<compile_context>
chip_gen: v7x
topology: tpu7x:2x2x1
jax: 0.10.0
libtpu: 0.0.40
codegen_flags: <defaults>
</compile_context>

<pallas_src>
import functools

import jax
import jax.numpy as jnp
from jax.experimental import pallas as pl
from jax.experimental.pallas import tpu as pltpu


# ------------------------------- kernel ------------------------------------ #

def _basic_block_kernel(*refs, stride, dilation, pad, Ho, Wo, cin, planes, has_ds):
    """Fused BasicBlock forward for one image (one grid step)."""
    if has_ds:
        x_ref, w1_ref, b1_ref, w2_ref, b2_ref, wd_ref, bd_ref, o_ref, ypad_ref = refs
    else:
        x_ref, w1_ref, b1_ref, w2_ref, b2_ref, o_ref, ypad_ref = refs
        wd_ref = bd_ref = None

    s, d = stride, dilation
    M = Ho * Wo

    # ---- conv1 (3x3, stride s, dilation d) + folded bn1 + ReLU --------------
    # x_ref: (s*s, Hph, Wph, cin) bf16, phase-decomposed padded input.
    acc = jnp.zeros((M, planes), jnp.float32)
    for i in range(3):
        for j in range(3):
            ri, cj = i * d, j * d
            p = (ri % s) * s + (cj % s)           # which stride-phase
            r0, c0 = ri // s, cj // s             # offset inside that phase
            tap = x_ref[p, r0:r0 + Ho, c0:c0 + Wo, :]          # (Ho, Wo, cin)
            acc = acc + jnp.dot(tap.reshape(M, cin), w1_ref[i * 3 + j],
                                preferred_element_type=jnp.float32)
    y = jnp.maximum(acc + b1_ref[...], 0.0)                     # (M, planes) f32

    # Stash conv1 output, zero-padded by 1, in VMEM for conv2.
    ypad_ref[...] = jnp.zeros_like(ypad_ref)
    ypad_ref[1:Ho + 1, 1:Wo + 1, :] = (
        y.reshape(Ho, Wo, planes).astype(ypad_ref.dtype))

    # ---- conv2 (3x3, stride 1, pad 1) + folded bn2 --------------------------
    acc2 = jnp.zeros((M, planes), jnp.float32)
    for i in range(3):
        for j in range(3):
            tap = ypad_ref[i:i + Ho, j:j + Wo, :]               # (Ho, Wo, planes)
            acc2 = acc2 + jnp.dot(tap.reshape(M, planes), w2_ref[i * 3 + j],
                                  preferred_element_type=jnp.float32)
    acc2 = acc2 + b2_ref[...]

    # ---- identity / downsample ----------------------------------------------
    if has_ds:
        # 1x1 conv, stride s, no padding -> reads x[::s, ::s] which is exactly
        # phase (pad%s, pad%s) of the padded input at offset pad//s.
        pd = (pad % s) * s + (pad % s)
        rd = pad // s
        xt = x_ref[pd, rd:rd + Ho, rd:rd + Wo, :]               # (Ho, Wo, cin)
        ident = (jnp.dot(xt.reshape(M, cin), wd_ref[0],
                         preferred_element_type=jnp.float32) + bd_ref[...])
    else:
        # stride == 1 and cin == planes: identity is the original (unpadded) x.
        ident = x_ref[0, pad:pad + Ho, pad:pad + Wo, :].reshape(M, cin)
        ident = ident.astype(jnp.float32)

    o_ref[...] = jnp.maximum(acc2 + ident, 0.0).astype(o_ref.dtype)


# ------------------------------- wrapper ------------------------------------ #

def basic_block_forward(x_nchw, params, *, stride=1, dilation=1):
    """BasicBlock forward.  x_nchw: (N, Cin, H, W) f32.  Returns NCHW f32."""
    N, cin, H, W = x_nchw.shape
    planes = params['w1'].shape[-1]
    has_ds = 'wd' in params
    if not has_ds:
        assert stride == 1 and cin == planes, "identity add requires matching shapes"

    s, d = stride, dilation
    pad = d                                    # conv1: padding == dilation
    Ho = (H + 2 * pad - 2 * d - 1) // s + 1
    Wo = (W + 2 * pad - 2 * d - 1) // s + 1

    # NHWC, zero-pad, then decompose into s*s stride-phases so every conv tap
    # inside the kernel is an unstrided shifted window.  Cast to bf16 for MXU.
    xh = jnp.transpose(x_nchw, (0, 2, 3, 1)).astype(jnp.float32)
    xp = jnp.pad(xh, ((0, 0), (pad, pad), (pad, pad), (0, 0)))
    Hp, Wp = H + 2 * pad, W + 2 * pad
    Hph, Wph = -(-Hp // s), -(-Wp // s)
    xp = jnp.pad(xp, ((0, 0), (0, Hph * s - Hp), (0, Wph * s - Wp), (0, 0)))
    xph = jnp.transpose(xp.reshape(N, Hph, s, Wph, s, cin), (2, 4, 0, 1, 3, 5))
    xph = xph.reshape(s * s, N, Hph, Wph, cin).astype(jnp.bfloat16)

    args = [xph, params['w1'], params['b1'], params['w2'], params['b2']]
    in_specs = [
        pl.BlockSpec((s * s, None, Hph, Wph, cin), lambda n: (0, n, 0, 0, 0)),
        pl.BlockSpec((9, cin, planes), lambda n: (0, 0, 0)),
        pl.BlockSpec((1, planes), lambda n: (0, 0)),
        pl.BlockSpec((9, planes, planes), lambda n: (0, 0, 0)),
        pl.BlockSpec((1, planes), lambda n: (0, 0)),
    ]
    if has_ds:
        args += [params['wd'], params['bd']]
        in_specs += [
            pl.BlockSpec((1, cin, planes), lambda n: (0, 0, 0)),
            pl.BlockSpec((1, planes), lambda n: (0, 0)),
        ]

    kernel = functools.partial(
        _basic_block_kernel, stride=s, dilation=d, pad=pad,
        Ho=Ho, Wo=Wo, cin=cin, planes=planes, has_ds=has_ds)

    out = pl.pallas_call(
        kernel,
        out_shape=jax.ShapeDtypeStruct((N, Ho * Wo, planes), jnp.float32),
        grid=(N,),
        in_specs=in_specs,
        out_specs=pl.BlockSpec((None, Ho * Wo, planes), lambda n: (n, 0, 0)),
        scratch_shapes=[pltpu.VMEM((Ho + 2, Wo + 2, planes), jnp.bfloat16)],
        compiler_params=pltpu.CompilerParams(
            dimension_semantics=("parallel",)),
    )(*args)

    return jnp.transpose(out.reshape(N, Ho, Wo, planes), (0, 3, 1, 2))


# --------------------------- parameter building ----------------------------- #

def _init_conv(key, kh, kw, ci, co):
    fan = kh * kw * ci
    return jax.random.normal(key, (kh, kw, ci, co), jnp.float32) * (2.0 / fan) ** 0.5


def _fold_bn(key, w_hwio, eps=1e-5):
    """Random eval-mode BN folded into the conv weight; returns (w_bf16, shift_f32)."""
    k1, k2, k3, k4 = jax.random.split(key, 4)
    co = w_hwio.shape[-1]
    gamma = jax.random.uniform(k1, (co,), jnp.float32, 0.5, 1.5)
    beta = jax.random.normal(k2, (co,), jnp.float32) * 0.1
    mean = jax.random.normal(k3, (co,), jnp.float32) * 0.1
    var = jax.random.uniform(k4, (co,), jnp.float32, 0.5, 1.5)
    scale = gamma / jnp.sqrt(var + eps)
    shift = beta - mean * scale
    kh, kw, ci, _ = w_hwio.shape
    w = (w_hwio * scale).reshape(kh * kw, ci, co).astype(jnp.bfloat16)
    return w, shift.reshape(1, co).astype(jnp.float32)


def build_basic_block_params(key, inplanes, planes, stride=1, dilation=1):
    k = jax.random.split(key, 6)
    w1, b1 = _fold_bn(k[1], _init_conv(k[0], 3, 3, inplanes, planes))
    w2, b2 = _fold_bn(k[3], _init_conv(k[2], 3, 3, planes, planes))
    params = {'w1': w1, 'b1': b1, 'w2': w2, 'b2': b2}
    if stride != 1 or inplanes != planes:     # downsample: 1x1 conv + BN
        wd, bd = _fold_bn(k[5], _init_conv(k[4], 1, 1, inplanes, planes))
        params['wd'], params['bd'] = wd, bd
    return params


# ---------------------------------- main ------------------------------------ #

if __name__ == "__main__":
    key = jax.random.PRNGKey(0)
    kx, kp1, kp2 = jax.random.split(key, 3)

    # Block 1: inplanes=planes=64, stride=1, dilation=2  -> no downsample
    # Block 2: 64 -> 128, stride=2, dilation=1           -> 1x1-conv downsample
    x = jax.random.normal(kx, (2, 64, 16, 16), jnp.float32)
    p1 = build_basic_block_params(kp1, 64, 64, stride=1, dilation=2)
    p2 = build_basic_block_params(kp2, 64, 128, stride=2, dilation=1)

    fwd = jax.jit(basic_block_forward, static_argnames=("stride", "dilation"))
    y1 = fwd(x, p1, stride=1, dilation=2)
    y2 = fwd(y1, p2, stride=2, dilation=1)
    y1, y2 = jax.block_until_ready((y1, y2))

    assert y1.shape == (2, 64, 16, 16), y1.shape
    assert y2.shape == (2, 128, 8, 8), y2.shape
    assert bool(jnp.all(jnp.isfinite(y1))) and bool(jnp.all(jnp.isfinite(y2)))
    assert bool(jnp.all(y1 >= 0.0)) and bool(jnp.all(y2 >= 0.0))   # final ReLU

    print("KERNEL_OK")
</pallas_src>

<mosaic_0001>
module attributes {stable_mosaic.version = 11 : i64} {
  func.func @_basic_block_kernel(%arg0: i32, %arg1: memref<1x1x20x20x64xbf16, #tpu.memory_space<vmem>>, %arg2: memref<9x64x64xbf16, #tpu.memory_space<vmem>>, %arg3: memref<1x64xf32, #tpu.memory_space<vmem>>, %arg4: memref<9x64x64xbf16, #tpu.memory_space<vmem>>, %arg5: memref<1x64xf32, #tpu.memory_space<vmem>>, %arg6: memref<1x256x64xf32, #tpu.memory_space<vmem>>, %arg7: memref<18x18x64xbf16, #tpu.memory_space<vmem>>) attributes {dimension_semantics = [#tpu.dimension_semantics<parallel>], iteration_bounds = array<i64: 2>, scalar_prefetch = 0 : i64, scratch_operands = 1 : i64, tpu.core_type = #tpu.core_type<tc>, window_params = [{transform_indices = @transform_0, window_bounds = array<i64: 1, 1, 20, 20, 64>}, {pipeline_mode = #tpu.pipeline_mode<synchronous>, transform_indices = @transform_1, window_bounds = array<i64: 9, 64, 64>}, {pipeline_mode = #tpu.pipeline_mode<synchronous>, transform_indices = @transform_2, window_bounds = array<i64: 1, 64>}, {pipeline_mode = #tpu.pipeline_mode<synchronous>, transform_indices = @transform_3, window_bounds = array<i64: 9, 64, 64>}, {pipeline_mode = #tpu.pipeline_mode<synchronous>, transform_indices = @transform_4, window_bounds = array<i64: 1, 64>}, {transform_indices = @transform_5, window_bounds = array<i64: 1, 256, 64>}]} {
    %cst = arith.constant 0.000000e+00 : f32
    %0 = vector.broadcast %cst : f32 to vector<256x64xf32>
    %c0 = arith.constant 0 : index
    %c0_0 = arith.constant 0 : index
    %c0_1 = arith.constant 0 : index
    %c0_2 = arith.constant 0 : index
    %c0_3 = arith.constant 0 : index
    %1 = vector.load %arg1[%c0, %c0_0, %c0_1, %c0_2, %c0_3] : memref<1x1x20x20x64xbf16, #tpu.memory_space<vmem>>, vector<1x1x16x16x64xbf16>
    %2 = vector.shape_cast %1 : vector<1x1x16x16x64xbf16> to vector<16x16x64xbf16>
    %3 = vector.shape_cast %2 : vector<16x16x64xbf16> to vector<256x64xbf16>
    %c0_4 = arith.constant 0 : index
    %c0_5 = arith.constant 0 : index
    %c0_6 = arith.constant 0 : index
    %4 = vector.load %arg2[%c0_4, %c0_5, %c0_6] : memref<9x64x64xbf16, #tpu.memory_space<vmem>>, vector<1x64x64xbf16>
    %5 = vector.shape_cast %4 : vector<1x64x64xbf16> to vector<64x64xbf16>
    %cst_7 = arith.constant dense<0.000000e+00> : vector<256x64xf32>
    %6 = tpu.matmul %3, %5, %cst_7 {dimension_numbers = #tpu.dot_dimension_numbers<[1], [0], [0], [1], [0, 0, 1, 1], [], []>} : vector<256x64xbf16>, vector<64x64xbf16>, vector<256x64xf32> -> vector<256x64xf32>
    %7 = arith.addf %0, %6 : vector<256x64xf32>
    %c0_8 = arith.constant 0 : index
    %c0_9 = arith.constant 0 : index
    %c0_10 = arith.constant 0 : index
    %c2 = arith.constant 2 : index
    %c0_11 = arith.constant 0 : index
    %8 = vector.load %arg1[%c0_8, %c0_9, %c0_10, %c2, %c0_11] : memref<1x1x20x20x64xbf16, #tpu.memory_space<vmem>>, vector<1x1x16x16x64xbf16>
    %9 = vector.shape_cast %8 : vector<1x1x16x16x64xbf16> to vector<16x16x64xbf16>
    %10 = vector.shape_cast %9 : vector<16x16x64xbf16> to vector<256x64xbf16>
    %c1 = arith.constant 1 : index
    %c0_12 = arith.constant 0 : index
    %c0_13 = arith.constant 0 : index
    %11 = vector.load %arg2[%c1, %c0_12, %c0_13] : memref<9x64x64xbf16, #tpu.memory_space<vmem>>, vector<1x64x64xbf16>
    %12 = vector.shape_cast %11 : vector<1x64x64xbf16> to vector<64x64xbf16>
    %cst_14 = arith.constant dense<0.000000e+00> : vector<256x64xf32>
    %13 = tpu.matmul %10, %12, %cst_14 {dimension_numbers = #tpu.dot_dimension_numbers<[1], [0], [0], [1], [0, 0, 1, 1], [], []>} : vector<256x64xbf16>, vector<64x64xbf16>, vector<256x64xf32> -> vector<256x64xf32>
    %14 = arith.addf %7, %13 : vector<256x64xf32>
    %c0_15 = arith.constant 0 : index
    %c0_16 = arith.constant 0 : index
    %c0_17 = arith.constant 0 : index
    %c4 = arith.constant 4 : index
    %c0_18 = arith.constant 0 : index
    %15 = vector.load %arg1[%c0_15, %c0_16, %c0_17, %c4, %c0_18] : memref<1x1x20x20x64xbf16, #tpu.memory_space<vmem>>, vector<1x1x16x16x64xbf16>
    %16 = vector.shape_cast %15 : vector<1x1x16x16x64xbf16> to vector<16x16x64xbf16>
    %17 = vector.shape_cast %16 : vector<16x16x64xbf16> to vector<256x64xbf16>
    %c2_19 = arith.constant 2 : index
    %c0_20 = arith.constant 0 : index
    %c0_21 = arith.constant 0 : index
    %18 = vector.load %arg2[%c2_19, %c0_20, %c0_21] : memref<9x64x64xbf16, #tpu.memory_space<vmem>>, vector<1x64x64xbf16>
    %19 = vector.shape_cast %18 : vector<1x64x64xbf16> to vector<64x64xbf16>
    %cst_22 = arith.constant dense<0.000000e+00> : vector<256x64xf32>
    %20 = tpu.matmul %17, %19, %cst_22 {dimension_numbers = #tpu.dot_dimension_numbers<[1], [0], [0], [1], [0, 0, 1, 1], [], []>} : vector<256x64xbf16>, vector<64x64xbf16>, vector<256x64xf32> -> vector<256x64xf32>
    %21 = arith.addf %14, %20 : vector<256x64xf32>
    %c0_23 = arith.constant 0 : index
    %c0_24 = arith.constant 0 : index
    %c2_25 = arith.constant 2 : index
    %c0_26 = arith.constant 0 : index
    %c0_27 = arith.constant 0 : index
    %22 = vector.load %arg1[%c0_23, %c0_24, %c2_25, %c0_26, %c0_27] : memref<1x1x20x20x64xbf16, #tpu.memory_space<vmem>>, vector<1x1x16x16x64xbf16>
    %23 = vector.shape_cast %22 : vector<1x1x16x16x64xbf16> to vector<16x16x64xbf16>
    %24 = vector.shape_cast %23 : vector<16x16x64xbf16> to vector<256x64xbf16>
    %c3 = arith.constant 3 : index
    %c0_28 = arith.constant 0 : index
    %c0_29 = arith.constant 0 : index
    %25 = vector.load %arg2[%c3, %c0_28, %c0_29] : memref<9x64x64xbf16, #tpu.memory_space<vmem>>, vector<1x64x64xbf16>
    %26 = vector.shape_cast %25 : vector<1x64x64xbf16> to vector<64x64xbf16>
    %cst_30 = arith.constant dense<0.000000e+00> : vector<256x64xf32>
    %27 = tpu.matmul %24, %26, %cst_30 {dimension_numbers = #tpu.dot_dimension_numbers<[1], [0], [0], [1], [0, 0, 1, 1], [], []>} : vector<256x64xbf16>, vector<64x64xbf16>, vector<256x64xf32> -> vector<256x64xf32>
    %28 = arith.addf %21, %27 : vector<256x64xf32>
    %c0_31 = arith.constant 0 : index
    %c0_32 = arith.constant 0 : index
    %c2_33 = arith.constant 2 : index
    %c2_34 = arith.constant 2 : index
    %c0_35 = arith.constant 0 : index
    %29 = vector.load %arg1[%c0_31, %c0_32, %c2_33, %c2_34, %c0_35] : memref<1x1x20x20x64xbf16, #tpu.memory_space<vmem>>, vector<1x1x16x16x64xbf16>
    %30 = vector.shape_cast %29 : vector<1x1x16x16x64xbf16> to vector<16x16x64xbf16>
    %31 = vector.shape_cast %30 : vector<16x16x64xbf16> to vector<256x64xbf16>
    %c4_36 = arith.constant 4 : index
    %c0_37 = arith.constant 0 : index
    %c0_38 = arith.constant 0 : index
    %32 = vector.load %arg2[%c4_36, %c0_37, %c0_38] : memref<9x64x64xbf16, #tpu.memory_space<vmem>>, vector<1x64x64xbf16>
    %33 = vector.shape_cast %32 : vector<1x64x64xbf16> to vector<64x64xbf16>
    %cst_39 = arith.constant dense<0.000000e+00> : vector<256x64xf32>
    %34 = tpu.matmul %31, %33, %cst_39 {dimension_numbers = #tpu.dot_dimension_numbers<[1], [0], [0], [1], [0, 0, 1, 1], [], []>} : vector<256x64xbf16>, vector<64x64xbf16>, vector<256x64xf32> -> vector<256x64xf32>
    %35 = arith.addf %28, %34 : vector<256x64xf32>
    %c0_40 = arith.constant 0 : index
    %c0_41 = arith.constant 0 : index
    %c2_42 = arith.constant 2 : index
    %c4_43 = arith.constant 4 : index
    %c0_44 = arith.constant 0 : index
    %36 = vector.load %arg1[%c0_40, %c0_41, %c2_42, %c4_43, %c0_44] : memref<1x1x20x20x64xbf16, #tpu.memory_space<vmem>>, vector<1x1x16x16x64xbf16>
    %37 = vector.shape_cast %36 : vector<1x1x16x16x64xbf16> to vector<16x16x64xbf16>
    %38 = vector.shape_cast %37 : vector<16x16x64xbf16> to vector<256x64xbf16>
    %c5 = arith.constant 5 : index
    %c0_45 = arith.constant 0 : index
    %c0_46 = arith.constant 0 : index
    %39 = vector.load %arg2[%c5, %c0_45, %c0_46] : memref<9x64x64xbf16, #tpu.memory_space<vmem>>, vector<1x64x64xbf16>
    %40 = vector.shape_cast %39 : vector<1x64x64xbf16> to vector<64x64xbf16>
    %cst_47 = arith.constant dense<0.000000e+00> : vector<256x64xf32>
    %41 = tpu.matmul %38, %40, %cst_47 {dimension_numbers = #tpu.dot_dimension_numbers<[1], [0], [0], [1], [0, 0, 1, 1], [], []>} : vector<256x64xbf16>, vector<64x64xbf16>, vector<256x64xf32> -> vector<256x64xf32>
    %42 = arith.addf %35, %41 : vector<256x64xf32>
    %c0_48 = arith.constant 0 : index
    %c0_49 = arith.constant 0 : index
    %c4_50 = arith.constant 4 : index
    %c0_51 = arith.constant 0 : index
    %c0_52 = arith.constant 0 : index
    %43 = vector.load %arg1[%c0_48, %c0_49, %c4_50, %c0_51, %c0_52] : memref<1x1x20x20x64xbf16, #tpu.memory_space<vmem>>, vector<1x1x16x16x64xbf16>
    %44 = vector.shape_cast %43 : vector<1x1x16x16x64xbf16> to vector<16x16x64xbf16>
    %45 = vector.shape_cast %44 : vector<16x16x64xbf16> to vector<256x64xbf16>
    %c6 = arith.constant 6 : index
    %c0_53 = arith.constant 0 : index
    %c0_54 = arith.constant 0 : index
    %46 = vector.load %arg2[%c6, %c0_53, %c0_54] : memref<9x64x64xbf16, #tpu.memory_space<vmem>>, vector<1x64x64xbf16>
    %47 = vector.shape_cast %46 : vector<1x64x64xbf16> to vector<64x64xbf16>
    %cst_55 = arith.constant dense<0.000000e+00> : vector<256x64xf32>
    %48 = tpu.matmul %45, %47, %cst_55 {dimension_numbers = #tpu.dot_dimension_numbers<[1], [0], [0], [1], [0, 0, 1, 1], [], []>} : vector<256x64xbf16>, vector<64x64xbf16>, vector<256x64xf32> -> vector<256x64xf32>
    %49 = arith.addf %42, %48 : vector<256x64xf32>
    %c0_56 = arith.constant 0 : index
    %c0_57 = arith.constant 0 : index
    %c4_58 = arith.constant 4 : index
    %c2_59 = arith.constant 2 : index
    %c0_60 = arith.constant 0 : index
    %50 = vector.load %arg1[%c0_56, %c0_57, %c4_58, %c2_59, %c0_60] : memref<1x1x20x20x64xbf16, #tpu.memory_space<vmem>>, vector<1x1x16x16x64xbf16>
    %51 = vector.shape_cast %50 : vector<1x1x16x16x64xbf16> to vector<16x16x64xbf16>
    %52 = vector.shape_cast %51 : vector<16x16x64xbf16> to vector<256x64xbf16>
    %c7 = arith.constant 7 : index
    %c0_61 = arith.constant 0 : index
    %c0_62 = arith.constant 0 : index
    %53 = vector.load %arg2[%c7, %c0_61, %c0_62] : memref<9x64x64xbf16, #tpu.memory_space<vmem>>, vector<1x64x64xbf16>
    %54 = vector.shape_cast %53 : vector<1x64x64xbf16> to vector<64x64xbf16>
    %cst_63 = arith.constant dense<0.000000e+00> : vector<256x64xf32>
    %55 = tpu.matmul %52, %54, %cst_63 {dimension_numbers = #tpu.dot_dimension_numbers<[1], [0], [0], [1], [0, 0, 1, 1], [], []>} : vector<256x64xbf16>, vector<64x64xbf16>, vector<256x64xf32> -> vector<256x64xf32>
    %56 = arith.addf %49, %55 : vector<256x64xf32>
    %c0_64 = arith.constant 0 : index
    %c0_65 = arith.constant 0 : index
    %c4_66 = arith.constant 4 : index
    %c4_67 = arith.constant 4 : index
    %c0_68 = arith.constant 0 : index
    %57 = vector.load %arg1[%c0_64, %c0_65, %c4_66, %c4_67, %c0_68] : memref<1x1x20x20x64xbf16, #tpu.memory_space<vmem>>, vector<1x1x16x16x64xbf16>
    %58 = vector.shape_cast %57 : vector<1x1x16x16x64xbf16> to vector<16x16x64xbf16>
    %59 = vector.shape_cast %58 : vector<16x16x64xbf16> to vector<256x64xbf16>
    %c8 = arith.constant 8 : index
    %c0_69 = arith.constant 0 : index
    %c0_70 = arith.constant 0 : index
    %60 = vector.load %arg2[%c8, %c0_69, %c0_70] : memref<9x64x64xbf16, #tpu.memory_space<vmem>>, vector<1x64x64xbf16>
    %61 = vector.shape_cast %60 : vector<1x64x64xbf16> to vector<64x64xbf16>
    %cst_71 = arith.constant dense<0.000000e+00> : vector<256x64xf32>
    %62 = tpu.matmul %59, %61, %cst_71 {dimension_numbers = #tpu.dot_dimension_numbers<[1], [0], [0], [1], [0, 0, 1, 1], [], []>} : vector<256x64xbf16>, vector<64x64xbf16>, vector<256x64xf32> -> vector<256x64xf32>
    %63 = arith.addf %56, %62 : vector<256x64xf32>
    %c0_72 = arith.constant 0 : index
    %c0_73 = arith.constant 0 : index
    %64 = vector.load %arg3[%c0_72, %c0_73] : memref<1x64xf32, #tpu.memory_space<vmem>>, vector<1x64xf32>
    %65 = vector.broadcast %64 : vector<1x64xf32> to vector<256x64xf32>
    %66 = arith.addf %63, %65 : vector<256x64xf32>
    %cst_74 = arith.constant 0.000000e+00 : f32
    %67 = vector.broadcast %cst_74 : f32 to vector<256x64xf32>
    %68 = arith.maximumf %66, %67 : vector<256x64xf32>
    %cst_75 = arith.constant 0.000000e+00 : bf16
    %69 = vector.broadcast %cst_75 : bf16 to vector<18x18x64xbf16>
    %c0_76 = arith.constant 0 : index
    %c0_77 = arith.constant 0 : index
    %c0_78 = arith.constant 0 : index
    %70 = vector.load %arg7[%c0_76, %c0_77, %c0_78] : memref<18x18x64xbf16, #tpu.memory_space<vmem>>, vector<18x18x64xbf16>
    tpu.vector_store %arg7[%c0_76, %c0_77, %c0_78], %69 {strides = array<i32>} : memref<18x18x64xbf16, #tpu.memory_space<vmem>>, vector<18x18x64xbf16>,
    %71 = vector.shape_cast %68 : vector<256x64xf32> to vector<16x16x64xf32>
    %72 = arith.truncf %71 : vector<16x16x64xf32> to vector<16x16x64xbf16>
    %c1_79 = arith.constant 1 : index
    %c1_80 = arith.constant 1 : index
    %c0_81 = arith.constant 0 : index
    %73 = vector.load %arg7[%c1_79, %c1_80, %c0_81] : memref<18x18x64xbf16, #tpu.memory_space<vmem>>, vector<16x16x64xbf16>
    tpu.vector_store %arg7[%c1_79, %c1_80, %c0_81], %72 {strides = array<i32>} : memref<18x18x64xbf16, #tpu.memory_space<vmem>>, vector<16x16x64xbf16>,
    %cst_82 = arith.constant 0.000000e+00 : f32
    %74 = vector.broadcast %cst_82 : f32 to vector<256x64xf32>
    %c0_83 = arith.constant 0 : index
    %c0_84 = arith.constant 0 : index
    %c0_85 = arith.constant 0 : index
    %75 = vector.load %arg7[%c0_83, %c0_84, %c0_85] : memref<18x18x64xbf16, #tpu.memory_space<vmem>>, vector<16x16x64xbf16>
    %76 = vector.shape_cast %75 : vector<16x16x64xbf16> to vector<256x64xbf16>
    %c0_86 = arith.constant 0 : index
    %c0_87 = arith.constant 0 : index
    %c0_88 = arith.constant 0 : index
    %77 = vector.load %arg4[%c0_86, %c0_87, %c0_88] : memref<9x64x64xbf16, #tpu.memory_space<vmem>>, vector<1x64x64xbf16>
    %78 = vector.shape_cast %77 : vector<1x64x64xbf16> to vector<64x64xbf16>
    %cst_89 = arith.constant dense<0.000000e+00> : vector<256x64xf32>
    %79 = tpu.matmul %76, %78, %cst_89 {dimension_numbers = #tpu.dot_dimension_numbers<[1], [0], [0], [1], [0, 0, 1, 1], [], []>} : vector<256x64xbf16>, vector<64x64xbf16>, vector<256x64xf32> -> vector<256x64xf32>
    %80 = arith.addf %74, %79 : vector<256x64xf32>
    %c0_90 = arith.constant 0 : index
    %c1_91 = arith.constant 1 : index
    %c0_92 = arith.constant 0 : index
    %81 = vector.load %arg7[%c0_90, %c1_91, %c0_92] : memref<18x18x64xbf16, #tpu.memory_space<vmem>>, vector<16x16x64xbf16>
    %82 = vector.shape_cast %81 : vector<16x16x64xbf16> to vector<256x64xbf16>
    %c1_93 = arith.constant 1 : index
    %c0_94 = arith.constant 0 : index
    %c0_95 = arith.constant 0 : index
    %83 = vector.load %arg4[%c1_93, %c0_94, %c0_95] : memref<9x64x64xbf16, #tpu.memory_space<vmem>>, vector<1x64x64xbf16>
    %84 = vector.shape_cast %83 : vector<1x64x64xbf16> to vector<64x64xbf16>
    %cst_96 = arith.constant dense<0.000000e+00> : vector<256x64xf32>
    %85 = tpu.matmul %82, %84, %cst_96 {dimension_numbers = #tpu.dot_dimension_numbers<[1], [0], [0], [1], [0, 0, 1, 1], [], []>} : vector<256x64xbf16>, vector<64x64xbf16>, vector<256x64xf32> -> vector<256x64xf32>
    %86 = arith.addf %80, %85 : vector<256x64xf32>
    %c0_97 = arith.constant 0 : index
    %c2_98 = arith.constant 2 : index
    %c0_99 = arith.constant 0 : index
    %87 = vector.load %arg7[%c0_97, %c2_98, %c0_99] : memref<18x18x64xbf16, #tpu.memory_space<vmem>>, vector<16x16x64xbf16>
    %88 = vector.shape_cast %87 : vector<16x16x64xbf16> to vector<256x64xbf16>
    %c2_100 = arith.constant 2 : index
    %c0_101 = arith.constant 0 : index
    %c0_102 = arith.constant 0 : index
    %89 = vector.load %arg4[%c2_100, %c0_101, %c0_102] : memref<9x64x64xbf16, #tpu.memory_space<vmem>>, vector<1x64x64xbf16>
    %90 = vector.shape_cast %89 : vector<1x64x64xbf16> to vector<64x64xbf16>
    %cst_103 = arith.constant dense<0.000000e+00> : vector<256x64xf32>
    %91 = tpu.matmul %88, %90, %cst_103 {dimension_numbers = #tpu.dot_dimension_numbers<[1], [0], [0], [1], [0, 0, 1, 1], [], []>} : vector<256x64xbf16>, vector<64x64xbf16>, vector<256x64xf32> -> vector<256x64xf32>
    %92 = arith.addf %86, %91 : vector<256x64xf32>
    %c1_104 = arith.constant 1 : index
    %c0_105 = arith.constant 0 : index
    %c0_106 = arith.constant 0 : index
    %93 = vector.load %arg7[%c1_104, %c0_105, %c0_106] : memref<18x18x64xbf16, #tpu.memory_space<vmem>>, vector<16x16x64xbf16>
    %94 = vector.shape_cast %93 : vector<16x16x64xbf16> to vector<256x64xbf16>
    %c3_107 = arith.constant 3 : index
    %c0_108 = arith.constant 0 : index
    %c0_109 = arith.constant 0 : index
    %95 = vector.load %arg4[%c3_107, %c0_108, %c0_109] : memref<9x64x64xbf16, #tpu.memory_space<vmem>>, vector<1x64x64xbf16>
    %96 = vector.shape_cast %95 : vector<1x64x64xbf16> to vector<64x64xbf16>
    %cst_110 = arith.constant dense<0.000000e+00> : vector<256x64xf32>
    %97 = tpu.matmul %94, %96, %cst_110 {dimension_numbers = #tpu.dot_dimension_numbers<[1], [0], [0], [1], [0, 0, 1, 1], [], []>} : vector<256x64xbf16>, vector<64x64xbf16>, vector<256x64xf32> -> vector<256x64xf32>
    %98 = arith.addf %92, %97 : vector<256x64xf32>
    %c1_111 = arith.constant 1 : index
    %c1_112 = arith.constant 1 : index
    %c0_113 = arith.constant 0 : index
    %99 = vector.load %arg7[%c1_111, %c1_112, %c0_113] : memref<18x18x64xbf16, #tpu.memory_space<vmem>>, vector<16x16x64xbf16>
    %100 = vector.shape_cast %99 : vector<16x16x64xbf16> to vector<256x64xbf16>
    %c4_114 = arith.constant 4 : index
    %c0_115 = arith.constant 0 : index
    %c0_116 = arith.constant 0 : index
    %101 = vector.load %arg4[%c4_114, %c0_115, %c0_116] : memref<9x64x64xbf16, #tpu.memory_space<vmem>>, vector<1x64x64xbf16>
    %102 = vector.shape_cast %101 : vector<1x64x64xbf16> to vector<64x64xbf16>
    %cst_117 = arith.constant dense<0.000000e+00> : vector<256x64xf32>
    %103 = tpu.matmul %100, %102, %cst_117 {dimension_numbers = #tpu.dot_dimension_numbers<[1], [0], [0], [1], [0, 0, 1, 1], [], []>} : vector<256x64xbf16>, vector<64x64xbf16>, vector<256x64xf32> -> vector<256x64xf32>
    %104 = arith.addf %98, %103 : vector<256x64xf32>
    %c1_118 = arith.constant 1 : index
    %c2_119 = arith.constant 2 : index
    %c0_120 = arith.constant 0 : index
    %105 = vector.load %arg7[%c1_118, %c2_119, %c0_120] : memref<18x18x64xbf16, #tpu.memory_space<vmem>>, vector<16x16x64xbf16>
    %106 = vector.shape_cast %105 : vector<16x16x64xbf16> to vector<256x64xbf16>
    %c5_121 = arith.constant 5 : index
    %c0_122 = arith.constant 0 : index
    %c0_123 = arith.constant 0 : index
    %107 = vector.load %arg4[%c5_121, %c0_122, %c0_123] : memref<9x64x64xbf16, #tpu.memory_space<vmem>>, vector<1x64x64xbf16>
    %108 = vector.shape_cast %107 : vector<1x64x64xbf16> to vector<64x64xbf16>
    %cst_124 = arith.constant dense<0.000000e+00> : vector<256x64xf32>
    %109 = tpu.matmul %106, %108, %cst_124 {dimension_numbers = #tpu.dot_dimension_numbers<[1], [0], [0], [1], [0, 0, 1, 1], [], []>} : vector<256x64xbf16>, vector<64x64xbf16>, vector<256x64xf32> -> vector<256x64xf32>
    %110 = arith.addf %104, %109 : vector<256x64xf32>
    %c2_125 = arith.constant 2 : index
    %c0_126 = arith.constant 0 : index
    %c0_127 = arith.constant 0 : index
    %111 = vector.load %arg7[%c2_125, %c0_126, %c0_127] : memref<18x18x64xbf16, #tpu.memory_space<vmem>>, vector<16x16x64xbf16>
    %112 = vector.shape_cast %111 : vector<16x16x64xbf16> to vector<256x64xbf16>
    %c6_128 = arith.constant 6 : index
    %c0_129 = arith.constant 0 : index
    %c0_130 = arith.constant 0 : index
    %113 = vector.load %arg4[%c6_128, %c0_129, %c0_130] : memref<9x64x64xbf16, #tpu.memory_space<vmem>>, vector<1x64x64xbf16>
    %114 = vector.shape_cast %113 : vector<1x64x64xbf16> to vector<64x64xbf16>
    %cst_131 = arith.constant dense<0.000000e+00> : vector<256x64xf32>
    %115 = tpu.matmul %112, %114, %cst_131 {dimension_numbers = #tpu.dot_dimension_numbers<[1], [0], [0], [1], [0, 0, 1, 1], [], []>} : vector<256x64xbf16>, vector<64x64xbf16>, vector<256x64xf32> -> vector<256x64xf32>
    %116 = arith.addf %110, %115 : vector<256x64xf32>
    %c2_132 = arith.constant 2 : index
    %c1_133 = arith.constant 1 : index
    %c0_134 = arith.constant 0 : index
    %117 = vector.load %arg7[%c2_132, %c1_133, %c0_134] : memref<18x18x64xbf16, #tpu.memory_space<vmem>>, vector<16x16x64xbf16>
    %118 = vector.shape_cast %117 : vector<16x16x64xbf16> to vector<256x64xbf16>
    %c7_135 = arith.constant 7 : index
    %c0_136 = arith.constant 0 : index
    %c0_137 = arith.constant 0 : index
    %119 = vector.load %arg4[%c7_135, %c0_136, %c0_137] : memref<9x64x64xbf16, #tpu.memory_space<vmem>>, vector<1x64x64xbf16>
    %120 = vector.shape_cast %119 : vector<1x64x64xbf16> to vector<64x64xbf16>
    %cst_138 = arith.constant dense<0.000000e+00> : vector<256x64xf32>
    %121 = tpu.matmul %118, %120, %cst_138 {dimension_numbers = #tpu.dot_dimension_numbers<[1], [0], [0], [1], [0, 0, 1, 1], [], []>} : vector<256x64xbf16>, vector<64x64xbf16>, vector<256x64xf32> -> vector<256x64xf32>
    %122 = arith.addf %116, %121 : vector<256x64xf32>
    %c2_139 = arith.constant 2 : index
    %c2_140 = arith.constant 2 : index
    %c0_141 = arith.constant 0 : index
    %123 = vector.load %arg7[%c2_139, %c2_140, %c0_141] : memref<18x18x64xbf16, #tpu.memory_space<vmem>>, vector<16x16x64xbf16>
    %124 = vector.shape_cast %123 : vector<16x16x64xbf16> to vector<256x64xbf16>
    %c8_142 = arith.constant 8 : index
    %c0_143 = arith.constant 0 : index
    %c0_144 = arith.constant 0 : index
    %125 = vector.load %arg4[%c8_142, %c0_143, %c0_144] : memref<9x64x64xbf16, #tpu.memory_space<vmem>>, vector<1x64x64xbf16>
    %126 = vector.shape_cast %125 : vector<1x64x64xbf16> to vector<64x64xbf16>
    %cst_145 = arith.constant dense<0.000000e+00> : vector<256x64xf32>
    %127 = tpu.matmul %124, %126, %cst_145 {dimension_numbers = #tpu.dot_dimension_numbers<[1], [0], [0], [1], [0, 0, 1, 1], [], []>} : vector<256x64xbf16>, vector<64x64xbf16>, vector<256x64xf32> -> vector<256x64xf32>
    %128 = arith.addf %122, %127 : vector<256x64xf32>
    %c0_146 = arith.constant 0 : index
    %c0_147 = arith.constant 0 : index
    %129 = vector.load %arg5[%c0_146, %c0_147] : memref<1x64xf32, #tpu.memory_space<vmem>>, vector<1x64xf32>
    %130 = vector.broadcast %129 : vector<1x64xf32> to vector<256x64xf32>
    %131 = arith.addf %128, %130 : vector<256x64xf32>
    %c0_148 = arith.constant 0 : index
    %c0_149 = arith.constant 0 : index
    %c2_150 = arith.constant 2 : index
    %c2_151 = arith.constant 2 : index
    %c0_152 = arith.constant 0 : index
    %132 = vector.load %arg1[%c0_148, %c0_149, %c2_150, %c2_151, %c0_152] : memref<1x1x20x20x64xbf16, #tpu.memory_space<vmem>>, vector<1x1x16x16x64xbf16>
    %133 = vector.shape_cast %132 : vector<1x1x16x16x64xbf16> to vector<16x16x64xbf16>
    %134 = vector.shape_cast %133 : vector<16x16x64xbf16> to vector<256x64xbf16>
    %135 = arith.extf %134 : vector<256x64xbf16> to vector<256x64xf32>
    %136 = arith.addf %131, %135 : vector<256x64xf32>
    %cst_153 = arith.constant 0.000000e+00 : f32
    %137 = vector.broadcast %cst_153 : f32 to vector<256x64xf32>
    %138 = arith.maximumf %136, %137 : vector<256x64xf32>
    %c0_154 = arith.constant 0 : index
    %c0_155 = arith.constant 0 : index
    %c0_156 = arith.constant 0 : index
    %139 = vector.load %arg6[%c0_154, %c0_155, %c0_156] : memref<1x256x64xf32, #tpu.memory_space<vmem>>, vector<1x256x64xf32>
    %140 = vector.shape_cast %139 : vector<1x256x64xf32> to vector<256x64xf32>
    %141 = vector.shape_cast %138 : vector<256x64xf32> to vector<1x256x64xf32>
    tpu.vector_store %arg6[%c0_154, %c0_155, %c0_156], %141 {strides = array<i32>} : memref<1x256x64xf32, #tpu.memory_space<vmem>>, vector<1x256x64xf32>,
    return
  }
  func.func @transform_0(%arg0: i32) -> (i32, i32, i32, i32, i32) {
    %c0_i32 = arith.constant 0 : i32
    %c0_i32_0 = arith.constant 0 : i32
    %c0_i32_1 = arith.constant 0 : i32
    %c0_i32_2 = arith.constant 0 : i32
    %c0_i32_3 = arith.constant 0 : i32
    return %c0_i32, %arg0, %c0_i32_0, %c0_i32_1, %c0_i32_2 : i32, i32, i32, i32, i32
  }
  func.func @transform_1(%arg0: i32) -> (i32, i32, i32) {
    %c0_i32 = arith.constant 0 : i32
    %c0_i32_0 = arith.constant 0 : i32
    %c0_i32_1 = arith.constant 0 : i32
    %c0_i32_2 = arith.constant 0 : i32
    return %c0_i32, %c0_i32_0, %c0_i32_1 : i32, i32, i32
  }
  func.func @transform_2(%arg0: i32) -> (i32, i32) {
    %c0_i32 = arith.constant 0 : i32
    %c0_i32_0 = arith.constant 0 : i32
    %c0_i32_1 = arith.constant 0 : i32
    return %c0_i32, %c0_i32_0 : i32, i32
  }
  func.func @transform_3(%arg0: i32) -> (i32, i32, i32) {
    %c0_i32 = arith.constant 0 : i32
    %c0_i32_0 = arith.constant 0 : i32
    %c0_i32_1 = arith.constant 0 : i32
    %c0_i32_2 = arith.constant 0 : i32
    return %c0_i32, %c0_i32_0, %c0_i32_1 : i32, i32, i32
  }
  func.func @transform_4(%arg0: i32) -> (i32, i32) {
    %c0_i32 = arith.constant 0 : i32
    %c0_i32_0 = arith.constant 0 : i32
    %c0_i32_1 = arith.constant 0 : i32
    return %c0_i32, %c0_i32_0 : i32, i32
  }
  func.func @transform_5(%arg0: i32) -> (i32, i32, i32) {
    %c0_i32 = arith.constant 0 : i32
    %c0_i32_0 = arith.constant 0 : i32
    %c0_i32_1 = arith.constant 0 : i32
    return %arg0, %c0_i32, %c0_i32_0 : i32, i32, i32
  }
}

</mosaic_0001>

<bundles_post_ra>
// kernel: basic_block_forward.1
= control target key start
LH: loop header
LB: loop body
LE: loop exit
PB: predicated region body
PF: predicated region fallthrough
CT: control target
= control target key end

     0   :  { %10 = vsyncpa [#allocation4], 0  ;;  %s16948_s0 = inlined_call_operand.vmem [shape: bf16[1,2,20,20,64], index: 0, kind: input, shape index: {}]   ;;  %s16949_s1 = inlined_call_operand.vmem [shape: bf16[9,64,64], index: 1, kind: input, shape index: {}]   ;;  %s16950_s2 = inlined_call_operand.vmem [shape: f32[1,64], index: 2, kind: input, shape index: {}]   ;;  %s16951_s3 = inlined_call_operand.vmem [shape: bf16[9,64,64], index: 3, kind: input, shape index: {}]   ;;  %s16952_s4 = inlined_call_operand.vmem [shape: f32[1,64], index: 4, kind: input, shape index: {}]   ;;  %s16953_s5 = inlined_call_operand.hbm [shape: f32[2,256,64], index: 5, kind: output, shape index: {}]  }
   0x1   :  { %12 = vsyncpa [#allocation4 + $0x1], 0  ;;  %s13540_s18 = smov 0   ;;  %s13542_s19 = smov 0  }
   0x2   :  { %s13544_s20 = smov 0   ;;  %s13546_s21 = smov 0  }
   0x3 LB: > { %s13561_s22 = sadd.s32 4294967295, %s13504_s21   ;;  %s10330_s23 = sadd.s32 4294967294, %s13504_s21   ;;  %s13504_s21 = sphi %s13546_s21, %s17225_s21   ;;  %s13500_s20 = sphi %s13544_s20, %s17224_s20   ;;  %s13496_s19 = sphi %s13542_s19, %s17223_s19   ;;  %s13492_s18 = sphi %s13540_s18, %s17222_s18  }
   0x4   : > { %s13565_s24 = sadd.s32 1, %s13504_s21   ;;  %s135_s25 = sadd.s32 1, %s13500_s20 }
   0x5   : > { %s132_s26 = ssub.s32 %s13504_s21, %s13565_s24  ;;  %p145_p0 = scmp.ne.s32.totalorder %s13500_s20, %s13496_s19 }
   0x6   : > { %p133_p1 = scmp.eq.s32.totalorder %s132_s26, 0  ;;  %p146_p2 = scmp.eq.s32.totalorder %s13561_s22, 1 }
   0x7   : > { %p151_p3 = scmp.ne.s32.totalorder %s13496_s19, %s13492_s18  ;;  %p152_p4 = scmp.eq.s32.totalorder %s10330_s23, 1 }
   0x8   : > { %s13576_s27 = scalar_select %p133_p1, %s13500_s20, %s135_s25  }
   0x9   : > { %p13578_p5 = por %p146_p2, %p145_p0  ;;  %p13582_p6 = por %p152_p4, %p151_p3 }
   0xa   : > { %p10333_p7 = scmp.ge.s32.totalorder %s13504_s21, 1  ;;  %p190_p8 = scmp.lt.s32.totalorder %s13504_s21, 3 }
   0xc   : > { %p191_p9 = pnand %p10333_p7, %p190_p8 }
   0xe   : > { %194 = sbr.rel (%p191_p9) target bundleno = 1662 (0x67e), region = 40 }
  0x15   : > { %v13251_v0 = vld [vmem:[%s16949_s1 + $0x20] sm:$0xff]   ;;  %p218_p10 = scmp.lt.s32.totalorder %s13561_s22, 1  ;;  %v13252_v1 = vld [vmem:[%s16949_s1 + $0x28] sm:$0xff]   ;;  %vm344_vm0 = vcmask 1042432   ;;  %vm345_vm1 = vcmask 1046532   ;;  %v13253_v2 = vld [vmem:[%s16949_s1 + $0x30] sm:$0xff]  }
  0x16   : > { %11976 = vmatprep.subr.bf16.mxu0 %v13251_v0  ;;  %vm13604_vm2 = vmor %vm344_vm0, %vm345_vm1  ;;  %v13254_v7 = vld [vmem:[%s16949_s1 + $0x38] sm:$0xff]   ;;  %vm540_vm3 = vcmask 523264   ;;  %v13255_v21 = vld [vmem:[%s16949_s1] sm:$0xff]   ;;  %vm1111_vm4 = vcmask 1041408   ;;  %vm1112_vm5 = vcmask 1045508   ;;  %vm4449_vm7 = vcmask 519168  }
  0x17   : > { %s219_s9 = scalar_select %p218_p10, %s13561_s22, 1  ;;  %11977 = vmatpush3.bf16.msra.mxu0 %v13251_v0  ;;  %v13256_v49 = vld [vmem:[%s16949_s1 + $0x8] sm:$0xff]   ;;  %v13257_v61 = vld [vmem:[%s16949_s1 + $0x10] sm:$0xff]   ;;  %vm13866_vm6 = vmor %vm1111_vm4, %vm1112_vm5  ;;  %vm4452_vm8 = vcmask 516096   ;;  %vm5098_vm9 = vsmask.f32 3328 }
  0x18   : > { %11978 = vmatprep.subr.bf16.mxu0 %v13252_v1  ;;  %vm5099_vm10 = vsmask.f32 7440  ;;  %vm4926_vm12 = vsmask.f32 7938  ;;  %vm4601_vm13 = vsmask.f32 256 }
  0x19   : > { %s13208_s12 = smul.u32 240, %s219_s9  ;;  %vm14829_vm11 = vmor %vm5098_vm9, %vm5099_vm10  ;;  %vm4602_vm14 = vsmask.f32 4368  ;;  %s215_s7 = sand.u32 1, %s13496_s19  }
  0x1a   : > { %vm14856_vm15 = vmand %vm4449_vm7, %vm4926_vm12  ;;  %s10334_s10 = sshll.u32 %s215_s7, 8  ;;  %s13507_s23 = smov [#allocation3]  }
  0x1b   : > { %s13602_s15 = scalar_lea.vmem %s16948_s0, %s13208_s12  ;;  %11979 = vmatpush3.bf16.msra.mxu0 %v13252_v1  ;;  %vm14863_vm0 = vmor %vm4601_vm13, %vm4602_vm14  ;;  %s16720_s11 = scalar_lea.vmem [#allocation3], %s10334_s10 }
  0x1c   : > { %v13609_v4 = vld [vmem:[%s13602_s15 + $0x4] sm:$0xf]  ;;  %v264_v5 = vld [vmem:[%s13602_s15] sm:$0xe]  ;;  %v265_v6 = vld [vmem:[%s13602_s15 + $0x8] sm:$0x1]  ;;  %11980 = vmatprep.subr.bf16.mxu0 %v13253_v2 }
  0x1d   : > { %v10336_v8 = vrot.slane %v264_v5, 9  ;;  %v349_v9 = vrot.slane %v13609_v4, 5  ;;  %v352_v10 = vrot.slane %v265_v6, 5  ;;  %v13618_v11 = vld [vmem:[%s13602_s15 + $0x10] sm:$0xf]  ;;  %vm14869_vm1 = vmand %vm4452_vm8, %vm4601_vm13  ;;  %s10268_s12 = sshll.u32 %s16720_s11, 4  ;;  %s16897_s12 = int_to_ptr.vmem [resolvable:$true] %s10268_s12 }
  0x1e   : > { %v266_v12 = vld [vmem:[%s13602_s15 + $0xc] sm:$0xe]  ;;  %v267_v13 = vld [vmem:[%s13602_s15 + $0x14] sm:$0x1]  ;;  %v356_v14 = vrot.slane %v13618_v11, 5  ;;  %s13442_s17 = scalar_lea.vmem %s16897_s12, 4096 }
  0x1f   : > { %v350_v15 = vsel %vm13604_vm2, %v10336_v8, %v349_v9  ;;  %v351_v16 = vrot.slane %v349_v9, 4  ;;  %v10337_v17 = vrot.slane %v266_v12, 9  ;;  %v359_v18 = vrot.slane %v267_v13, 5  ;;  %v13626_v19 = vld [vmem:[%s13602_s15 + $0x1c] sm:$0xf]  ;;  %11981 = vmatpush3.bf16.msra.mxu0 %v13253_v2  ;;  %p13443_p11 = scmp.ne.s32.totalorder %s16897_s12, %s13442_s17  ;;  %s13446_s25 = sshll.u32 %s13507_s23, 4  ;;  %s13447_s25 = int_to_ptr.vmem [resolvable:$false] %s13446_s25 }
  0x20   : > { %v358_v20 = vrot.slane %v356_v14, 4  ;;  %v268_v22 = vld [vmem:[%s13602_s15 + $0x18] sm:$0xe]  ;;  %v269_v23 = vld [vmem:[%s13602_s15 + $0x20] sm:$0x1]  ;;  %11982 = vmatprep.subr.bf16.mxu0 %v13254_v7  ;;  %v363_v27 = vrot.slane %v13626_v19, 5  ;;  %p13449_p0 = scmp.lt.s32.totalorder %s16897_s12, %s13447_s25 }
  0x21   : > { %v353_v24 = vsel %vm13604_vm2, %v351_v16, %v352_v10  ;;  %v357_v25 = vsel %vm13604_vm2, %v10337_v17, %v356_v14  ;;  %v10338_v26 = vrot.slane %v268_v22, 9  ;;  %v13639_v28 = vld [vmem:[%s13602_s15 + $0x28] sm:$0xf]  ;;  %v270_v29 = vld [vmem:[%s13602_s15 + $0x24] sm:$0xe]  ;;  %v366_v32 = vrot.slane %v269_v23, 5  ;;  %p13444_p12 = pnand %p13443_p11, %p13578_p5 }
  0x22   : > { %v10360_v30 = vcombine.low %v350_v15, %v353_v24  ;;  %v360_v31 = vsel %vm13604_vm2, %v358_v20, %v359_v18  ;;  %v271_v33 = vld [vmem:[%s13602_s15 + $0x2c] sm:$0x1]  ;;  %v13646_v34 = vld [vmem:[%s13602_s15 + $0x34] sm:$0xf]  ;;  %v365_v37 = vrot.slane %v363_v27, 4  ;;  %v370_v38 = vrot.slane %v13639_v28, 5 }
  0x23   : > { %v10361_v35 = vcombine.low %v357_v25, %v360_v31  ;;  %v364_v36 = vsel %vm13604_vm2, %v10338_v26, %v363_v27  ;;  %v272_v39 = vld [vmem:[%s13602_s15 + $0x30] sm:$0xe]  ;;  %v273_v40 = vld [vmem:[%s13602_s15 + $0x38] sm:$0x1]  ;;  %11983 = vmatpush3.bf16.msra.mxu0 %v13254_v7  ;;  %v10339_v41 = vrot.slane %v270_v29, 9  ;;  %v373_v42 = vrot.slane %v271_v33, 5  ;;  %p13445_p13 = pneg %p13444_p12 }
  0x24   : > { %11984 = vmatprep.mubr.msk.bf16.mxu0 %vm540_vm3, %v10360_v30  ;;  %v377_v43 = vrot.slane %v13646_v34, 5  ;;  %12016 = vmatprep.subr.bf16.mxu0 %v13255_v21  ;;  %v367_v44 = vsel %vm13604_vm2, %v365_v37, %v366_v32  ;;  %v372_v45 = vrot.slane %v370_v38, 4  ;;  %v10340_v46 = vrot.slane %v272_v39, 9  ;;  %v13658_v48 = vld [vmem:[%s13602_s15 + $0x40] sm:$0xf]  ;;  %v13258_v12 = vld [vmem:[%s16949_s1 + $0x18] sm:$0xff]  }
  0x25   : > { %v380_v47 = vrot.slane %v273_v40, 5  ;;  %v10362_v50 = vcombine.low %v364_v36, %v367_v44  ;;  %v13664_v52 = vld [vmem:[%s13602_s15 + $0x4c] sm:$0xf]  ;;  %v371_v53 = vsel %vm13604_vm2, %v10339_v41, %v370_v38  ;;  %v384_v55 = vrot.slane %v13658_v48, 5  ;;  %v274_v58 = vld [vmem:[%s13602_s15 + $0x3c] sm:$0xe] }
  0x26   : > { %v379_v51 = vrot.slane %v377_v43, 4  ;;  %11985 = vmatmul.mubr.msk.bf16.vlgmr.msra.gmra.mrb[0].mxu0 %vm540_vm3, %v10361_v35  ;;  %v374_v54 = vsel %vm13604_vm2, %v372_v45, %v373_v42  ;;  %v378_v56 = vsel %vm13604_vm2, %v10340_v46, %v377_v43  ;;  %v275_v59 = vld [vmem:[%s13602_s15 + $0x44] sm:$0x1]  ;;  %v391_v60 = vrot.slane %v13664_v52, 5  ;;  %v276_v62 = vld [vmem:[%s13602_s15 + $0x48] sm:$0xe] }
  0x27   : > { %12017 = vmatpush3.bf16.msra.mxu0 %v13255_v21  ;;  %11988 = vmatprep.mubr.msk.bf16.mxu0 %vm540_vm3, %v10362_v50  ;;  %v277_v63 = vld [vmem:[%s13602_s15 + $0x50] sm:$0x1]  ;;  %v10363_v0 = vcombine.low %v371_v53, %v374_v54  ;;  %v10341_v2 = vrot.slane %v274_v58, 9  ;;  %v386_v5 = vrot.slane %v384_v55, 4  ;;  %v387_v6 = vrot.slane %v275_v59, 5  ;;  %v13711_v23 = vld [vmem:[%s16949_s1 + $0x40] sm:$0xff]  }
  0x28   : > { %v381_v57 = vsel %vm13604_vm2, %v379_v51, %v380_v47  ;;  %12018 = vmatprep.subr.bf16.mxu0 %v13256_v49  ;;  %v10342_v7 = vrot.slane %v276_v62, 9  ;;  %v393_v8 = vrot.slane %v391_v60, 4  ;;  %v394_v9 = vrot.slane %v277_v63, 5  ;;  %v13686_v10 = vld [vmem:[%s13602_s15 + $0x58] sm:$0xf]  ;;  %s13448_s26 = scalar_lea.vmem %s13447_s25, 8192 }
  0x29   : > { %v10364_v1 = vcombine.low %v378_v56, %v381_v57  ;;  %v13692_v13 = vld [vmem:[%s13602_s15 + $0x64] sm:$0xf]  ;;  %v385_v14 = vsel %vm13604_vm2, %v10341_v2, %v384_v55  ;;  %v388_v15 = vsel %vm13604_vm2, %v386_v5, %v387_v6  ;;  %v278_v16 = vld [vmem:[%s13602_s15 + $0x54] sm:$0xe]  ;;  %v398_v17 = vrot.slane %v13686_v10, 5  ;;  %p13450_p1 = scmp.lt.s32.totalorder %s13448_s26, %s13442_s17 }
  0x2a   : > { %v392_v18 = vsel %vm13604_vm2, %v10342_v7, %v391_v60  ;;  %v395_v20 = vsel %vm13604_vm2, %v393_v8, %v394_v9  ;;  %v279_v21 = vld [vmem:[%s13602_s15 + $0x5c] sm:$0x1]  ;;  %v405_v22 = vrot.slane %v13692_v13, 5  ;;  %v280_v24 = vld [vmem:[%s13602_s15 + $0x60] sm:$0xe]  ;;  %v10365_v26 = vcombine.low %v385_v14, %v388_v15 }
  0x2b   : > { %12019 = vmatpush3.bf16.msra.mxu0 %v13256_v49  ;;  %v281_v25 = vld [vmem:[%s13602_s15 + $0x68] sm:$0x1]  ;;  %v10343_v27 = vrot.slane %v278_v16, 9  ;;  %v10366_v29 = vcombine.low %v392_v18, %v395_v20  ;;  %v400_v30 = vrot.slane %v398_v17, 4  ;;  %v401_v31 = vrot.slane %v279_v21, 5  ;;  %p13451_p2 = por %p13450_p1, %p13449_p0 }
  0x2c   : > { %12020 = vmatprep.subr.bf16.mxu0 %v13257_v61  ;;  %v10344_v32 = vrot.slane %v280_v24, 9  ;;  %v407_v33 = vrot.slane %v405_v22, 4  ;;  %v408_v35 = vrot.slane %v281_v25, 5  ;;  %v13716_v36 = vld [vmem:[%s13602_s15 + $0x70] sm:$0xf] }
  0x2d   : > { %v13720_v37 = vld [vmem:[%s13602_s15 + $0x7c] sm:$0xf]  ;;  %v399_v38 = vsel %vm13604_vm2, %v10343_v27, %v398_v17  ;;  %v402_v39 = vsel %vm13604_vm2, %v400_v30, %v401_v31  ;;  %v282_v40 = vld [vmem:[%s13602_s15 + $0x6c] sm:$0xe]  ;;  %v412_v41 = vrot.slane %v13716_v36, 5  ;;  %p13452_p3 = pnand %p13451_p2, %p13445_p13 }
  0x2e   : > { %11989 = vmatmul.mubr.msk.bf16.gmra.mrb[4].mxu0 %vm540_vm3, %v10363_v0  ;;  %v406_v42 = vsel %vm13604_vm2, %v10344_v32, %v405_v22  ;;  %v409_v43 = vsel %vm13604_vm2, %v407_v33, %v408_v35  ;;  %v283_v44 = vld [vmem:[%s13602_s15 + $0x74] sm:$0x1]  ;;  %v419_v45 = vrot.slane %v13720_v37, 5  ;;  %v284_v46 = vld [vmem:[%s13602_s15 + $0x78] sm:$0xe]  ;;  %v10367_v49 = vcombine.low %v399_v38, %v402_v39 }
  0x2f   : > { %11992 = vmatprep.mubr.msk.bf16.mxu0 %vm540_vm3, %v10364_v1  ;;  %12021 = vmatpush3.bf16.msra.mxu0 %v13257_v61  ;;  %v285_v47 = vld [vmem:[%s13602_s15 + $0x80] sm:$0x1]  ;;  %v10345_v50 = vrot.slane %v282_v40, 9  ;;  %v10368_v51 = vcombine.low %v406_v42, %v409_v43  ;;  %v414_v53 = vrot.slane %v412_v41, 4  ;;  %v415_v54 = vrot.slane %v283_v44, 5 }
  0x30   : > { %12022 = vmatprep.subr.bf16.mxu0 %v13258_v12  ;;  %v10346_v55 = vrot.slane %v284_v46, 9  ;;  %v421_v56 = vrot.slane %v419_v45, 4  ;;  %v422_v57 = vrot.slane %v285_v47, 5  ;;  %v13739_v58 = vld [vmem:[%s13602_s15 + $0x88] sm:$0xf] }
  0x31   : > { %v13742_v59 = vld [vmem:[%s13602_s15 + $0x94] sm:$0xf]  ;;  %v413_v60 = vsel %vm13604_vm2, %v10345_v50, %v412_v41  ;;  %v416_v61 = vsel %vm13604_vm2, %v414_v53, %v415_v54  ;;  %v426_v62 = vrot.slane %v13739_v58, 5  ;;  %v286_v1 = vld [vmem:[%s13602_s15 + $0x84] sm:$0xe] }
  0x32   : > { %v420_v63 = vsel %vm13604_vm2, %v10346_v55, %v419_v45  ;;  %v423_v0 = vsel %vm13604_vm2, %v421_v56, %v422_v57  ;;  %v287_v2 = vld [vmem:[%s13602_s15 + $0x8c] sm:$0x1]  ;;  %v433_v5 = vrot.slane %v13742_v59, 5  ;;  %v288_v6 = vld [vmem:[%s13602_s15 + $0x90] sm:$0xe]  ;;  %v10369_v8 = vcombine.low %v413_v60, %v416_v61 }
  0x33   : > { %12023 = vmatpush3.bf16.msra.mxu0 %v13258_v12  ;;  %v289_v7 = vld [vmem:[%s13602_s15 + $0x98] sm:$0x1]  ;;  %v10370_v9 = vcombine.low %v420_v63, %v423_v0  ;;  %v10347_v12 = vrot.slane %v286_v1, 9  ;;  %v428_v14 = vrot.slane %v426_v62, 4  ;;  %v429_v15 = vrot.slane %v287_v2, 5 }
  0x34   : > { %12056 = vmatprep.subr.bf16.mxu0 %v13711_v23  ;;  %v10348_v16 = vrot.slane %v288_v6, 9  ;;  %v435_v17 = vrot.slane %v433_v5, 4  ;;  %v436_v18 = vrot.slane %v289_v7, 5  ;;  %v13761_v20 = vld [vmem:[%s13602_s15 + $0xa0] sm:$0xf] }
  0x35   : > { %v13764_v21 = vld [vmem:[%s13602_s15 + $0xac] sm:$0xf]  ;;  %v427_v22 = vsel %vm13604_vm2, %v10347_v12, %v426_v62  ;;  %v430_v24 = vsel %vm13604_vm2, %v428_v14, %v429_v15  ;;  %v290_v25 = vld [vmem:[%s13602_s15 + $0x9c] sm:$0xe]  ;;  %v440_v27 = vrot.slane %v13761_v20, 5  ;;  %v13271_v12 = vld [vmem:[%s16949_s1 + $0x50] sm:$0xff]  }
  0x36   : > { %11993 = vmatmul.mubr.msk.bf16.gmra.mrb[8].mxu0 %vm540_vm3, %v10365_v26  ;;  %v291_v26 = vld [vmem:[%s13602_s15 + $0xa4] sm:$0x1]  ;;  %v437_v30 = vsel %vm13604_vm2, %v435_v17, %v436_v18  ;;  %v447_v31 = vrot.slane %v13764_v21, 5  ;;  %v292_v32 = vld [vmem:[%s13602_s15 + $0xa8] sm:$0xe]  ;;  %v10371_v35 = vcombine.low %v427_v22, %v430_v24  ;;  %v10349_v39 = vrot.slane %v290_v25, 9 }
  0x37   : > { %11996 = vmatprep.mubr.msk.bf16.mxu0 %vm540_vm3, %v10366_v29  ;;  %v434_v29 = vsel %vm13604_vm2, %v10348_v16, %v433_v5  ;;  %v293_v33 = vld [vmem:[%s13602_s15 + $0xb0] sm:$0x1]  ;;  %v442_v40 = vrot.slane %v440_v27, 4  ;;  %v443_v41 = vrot.slane %v291_v26, 5  ;;  %v10350_v42 = vrot.slane %v292_v32, 9  ;;  %v13276_v17 = vld [vmem:[%s16949_s1 + $0x58] sm:$0xff]  }
  0x38   : > { %v10372_v38 = vcombine.low %v434_v29, %v437_v30  ;;  %v449_v43 = vrot.slane %v447_v31, 4  ;;  %v450_v44 = vrot.slane %v293_v33, 5  ;;  %v13783_v45 = vld [vmem:[%s13602_s15 + $0xb8] sm:$0xf]  ;;  %v441_v46 = vsel %vm13604_vm2, %v10349_v39, %v440_v27  ;;  %v294_v53 = vld [vmem:[%s13602_s15 + $0xb4] sm:$0xe] }
  0x39   : > { %v444_v47 = vsel %vm13604_vm2, %v442_v40, %v443_v41  ;;  %v448_v50 = vsel %vm13604_vm2, %v10350_v42, %v447_v31  ;;  %v295_v54 = vld [vmem:[%s13602_s15 + $0xbc] sm:$0x1]  ;;  %v10351_v57 = vrot.slane %v294_v53, 9  ;;  %v224_v0 = vld [vmem:[%s13602_s15] sm:$0xf]  ;;  %v1116_v27 = vrot.slane %v13609_v4, 6 }
  0x3a   : > { %v10373_v55 = vcombine.low %v441_v46, %v444_v47  ;;  %v457_v61 = vrot.slane %v295_v54, 5  ;;  %v10396_v2 = vcombine.low %v224_v0, %v13609_v4  ;;  %v226_v5 = vld [vmem:[%s13602_s15 + $0xc] sm:$0xf]  ;;  %v228_v6 = vld [vmem:[%s13602_s15 + $0x18] sm:$0xf]  ;;  %v13833_v22 = vld [vmem:[%s16949_s1 + $0x60] sm:$0xff]  }
  0x3b   : > { %v10397_v7 = vcombine.low %v226_v5, %v13618_v11  ;;  %v230_v14 = vld [vmem:[%s13602_s15 + $0x24] sm:$0xf]  ;;  %v232_v15 = vld [vmem:[%s13602_s15 + $0x30] sm:$0xf]  ;;  %v236_v24 = vld [vmem:[%s13602_s15 + $0x48] sm:$0xf] }
  0x3c   : > { %v10399_v16 = vcombine.low %v230_v14, %v13639_v28  ;;  %v10400_v18 = vcombine.low %v232_v15, %v13646_v34  ;;  %v10402_v26 = vcombine.low %v236_v24, %v13664_v52  ;;  %v238_v29 = vld [vmem:[%s13602_s15 + $0x54] sm:$0xf]  ;;  %v240_v30 = vld [vmem:[%s13602_s15 + $0x60] sm:$0xf]  ;;  %v242_v33 = vld [vmem:[%s13602_s15 + $0x6c] sm:$0xf] }
  0x3d   : > { %v10403_v31 = vcombine.low %v238_v29, %v13686_v10  ;;  %v10404_v32 = vcombine.low %v240_v30, %v13692_v13  ;;  %v244_v4 = vld [vmem:[%s13602_s15 + $0x78] sm:$0xf]  ;;  %v246_v39 = vld [vmem:[%s13602_s15 + $0x84] sm:$0xf]  ;;  %v248_v40 = vld [vmem:[%s13602_s15 + $0x90] sm:$0xf] }
  0x3e   : > { %11997 = vmatmul.mubr.msk.bf16.gmra.mrb[12].mxu0 %vm540_vm3, %v10367_v49  ;;  %v454_v49 = vrot.slane %v13783_v45, 5  ;;  %v1047_v41 = vld [vmem:[%s13602_s15] sm:$0xc]  ;;  %v10407_v42 = vcombine.low %v246_v39, %v13739_v58  ;;  %v250_v46 = vld [vmem:[%s13602_s15 + $0x9c] sm:$0xf]  ;;  %v1123_v47 = vrot.slane %v13618_v11, 6 }
  0x3f   : > { %12000 = vmatprep.mubr.msk.bf16.mxu0 %vm540_vm3, %v10368_v51  ;;  %v451_v51 = vsel %vm13604_vm2, %v449_v43, %v450_v44  ;;  %v1048_v43 = vld [vmem:[%s13602_s15 + $0x8] sm:$0x3]  ;;  %v10408_v44 = vcombine.low %v248_v40, %v13742_v59  ;;  %v1118_v53 = vrot.slane %v1116_v27, 4  ;;  %v1052_v0 = vld [vmem:[%s13602_s15 + $0x20] sm:$0x3]  ;;  %v1151_v40 = vrot.slane %v13658_v48, 6 }
  0x40   : > { %v10374_v56 = vcombine.low %v448_v50, %v451_v51  ;;  %v456_v60 = vrot.slane %v454_v49, 4  ;;  %v455_v62 = vsel %vm13604_vm2, %v10351_v57, %v454_v49  ;;  %v252_v49 = vld [vmem:[%s13602_s15 + $0xa8] sm:$0xf]  ;;  %v10432_v50 = vrot.slane %v1047_v41, 10  ;;  %v254_v57 = vld [vmem:[%s13602_s15 + $0xb4] sm:$0xf] }
  0x41   : > { %v1119_v54 = vrot.slane %v1048_v43, 6  ;;  %v1125_v11 = vrot.slane %v1123_v47, 4  ;;  %v10411_v5 = vcombine.low %v254_v57, %v13783_v45  ;;  %v1054_v24 = vld [vmem:[%s13602_s15 + $0x2c] sm:$0x3]  ;;  %v1057_v43 = vld [vmem:[%s13602_s15 + $0x3c] sm:$0xc] }
  0x42   : > { %v458_v63 = vsel %vm13604_vm2, %v456_v60, %v457_v61  ;;  %v1049_v60 = vld [vmem:[%s13602_s15 + $0xc] sm:$0xc]  ;;  %v1050_v61 = vld [vmem:[%s13602_s15 + $0x14] sm:$0x3]  ;;  %v13335_v51 = vld [vmem:[%s16951_s3 + $0x20] sm:$0xff]  }
  0x43   : > { %v10375_v1 = vcombine.low %v455_v62, %v458_v63  ;;  %v1130_v62 = vrot.slane %v13626_v19, 6  ;;  %v1051_v63 = vld [vmem:[%s13602_s15 + $0x18] sm:$0xc]  ;;  %12336 = vmatprep.subr.bf16.mxu1 %v13335_v51 }
  0x44   : > { %12337 = vmatpush3.bf16.msra.mxu1 %v13335_v51 }
  0x46   : > { %12001 = vmatmul.mubr.msk.bf16.gmra.mrb[16].mxu0 %vm540_vm3, %v10369_v8  ;;  %v13266_v8 = vld [vmem:[%s16949_s1 + $0x48] sm:$0xff]  }
  0x47   : > { %12004 = vmatprep.mubr.msk.bf16.mxu0 %vm540_vm3, %v10370_v9  ;;  %v10398_v9 = vcombine.low %v228_v6, %v13626_v19  ;;  %v10434_v19 = vrot.slane %v1051_v63, 10 }
  0x4e   : > { %12005 = vmatmul.mubr.msk.bf16.gmra.mrb[20].mxu0 %vm540_vm3, %v10371_v35  ;;  %v10405_v35 = vcombine.low %v242_v33, %v13716_v36  ;;  %v1140_v33 = vrot.slane %v1054_v24, 6 }
  0x4f   : > { %12008 = vmatprep.mubr.msk.bf16.mxu0 %vm540_vm3, %v10372_v38  ;;  %v10406_v38 = vcombine.low %v244_v4, %v13720_v37 }
  0x56   : > { %12009 = vmatmul.mubr.msk.bf16.gmra.mrb[24].mxu0 %vm540_vm3, %v10373_v55  ;;  %v10409_v55 = vcombine.low %v250_v46, %v13761_v20  ;;  %v13281_v46 = vld [vmem:[%s16949_s1 + $0x70] sm:$0xff]  }
  0x57   : > { %12012 = vmatprep.mubr.msk.bf16.mxu0 %vm540_vm3, %v10374_v56  ;;  %v10410_v56 = vcombine.low %v252_v49, %v13764_v21  ;;  %v1060_v49 = vld [vmem:[%s13602_s15 + $0x50] sm:$0x3] }
  0x5e   : > { %12013 = vmatmul.mubr.msk.bf16.gmra.mrb[28].mxu0 %vm540_vm3, %v10375_v1  ;;  %v1117_v1 = vsel %vm13866_vm6, %v10432_v50, %v1116_v27  ;;  %v1056_v27 = vld [vmem:[%s13602_s15 + $0x38] sm:$0x3] }
  0x5f   : > { %12024 = vmatprep.mubr.msk.bf16.mxu0 %vm540_vm3, %v10396_v2  ;;  %v1120_v2 = vsel %vm13866_vm6, %v1118_v53, %v1119_v54  ;;  %v1153_v54 = vrot.slane %v1151_v40, 4 }
  0x60   : > { %v10456_v6 = vcombine.low %v1117_v1, %v1120_v2  ;;  %v1061_v1 = vld [vmem:[%s13602_s15 + $0x54] sm:$0xc]  ;;  %v1062_v2 = vld [vmem:[%s13602_s15 + $0x5c] sm:$0x3] }
  0x66   : > { %12025 = vmatmul.mubr.msk.bf16.vlgmr.msra.gmra.mrb[0].mxu0 %vm540_vm3, %v10397_v7  ;;  %v10433_v7 = vrot.slane %v1049_v60, 10 }
  0x67   : > { %12057 = vmatpush3.bf16.msra.mxu0 %v13711_v23  ;;  %12028 = vmatprep.mubr.msk.bf16.mxu0 %vm540_vm3, %v10398_v9  ;;  %v234_v23 = vld [vmem:[%s13602_s15 + $0x3c] sm:$0xf]  ;;  %v1132_v9 = vrot.slane %v1130_v62, 4 }
  0x68   : > { %12058 = vmatprep.subr.bf16.mxu0 %v13266_v8  ;;  %v10401_v25 = vcombine.low %v234_v23, %v13658_v48  ;;  %v1124_v14 = vsel %vm13866_vm6, %v10433_v7, %v1123_v47  ;;  %v1053_v23 = vld [vmem:[%s13602_s15 + $0x24] sm:$0xc]  ;;  %v1059_v47 = vld [vmem:[%s13602_s15 + $0x48] sm:$0xc]  ;;  %v10437_v48 = vrot.slane %v1057_v43, 10 }
  0x69   : > { %v1063_v7 = vld [vmem:[%s13602_s15 + $0x60] sm:$0xc]  ;;  %v1069_v43 = vld [vmem:[%s13602_s15 + $0x84] sm:$0xc] }
  0x6a   : > { %v1152_v60 = vsel %vm13866_vm6, %v10437_v48, %v1151_v40  ;;  %v1193_v40 = vrot.slane %v13739_v58, 6 }
  0x6b   : > { %12059 = vmatpush3.bf16.msra.mxu0 %v13266_v8  ;;  %v1126_v8 = vrot.slane %v1050_v61, 6 }
  0x6c   : > { %12060 = vmatprep.subr.bf16.mxu0 %v13271_v12  ;;  %v1195_v48 = vrot.slane %v1193_v40, 4 }
  0x6d   : > { %v1127_v15 = vsel %vm13866_vm6, %v1125_v11, %v1126_v8  ;;  %v1161_v11 = vrot.slane %v1060_v49, 6  ;;  %v1064_v8 = vld [vmem:[%s13602_s15 + $0x68] sm:$0x3] }
  0x6e   : > { %12029 = vmatmul.mubr.msk.bf16.gmra.mrb[4].mxu0 %vm540_vm3, %v10399_v16  ;;  %v1137_v16 = vrot.slane %v13639_v28, 6  ;;  %v10457_v29 = vcombine.low %v1124_v14, %v1127_v15  ;;  %v1168_v14 = vrot.slane %v1062_v2, 6  ;;  %v10440_v15 = vrot.slane %v1063_v7, 10 }
  0x6f   : > { %12032 = vmatprep.mubr.msk.bf16.mxu0 %vm540_vm3, %v10400_v18  ;;  %12061 = vmatpush3.bf16.msra.mxu0 %v13271_v12  ;;  %v1133_v12 = vrot.slane %v1052_v0, 6 }
  0x70   : > { %12062 = vmatprep.subr.bf16.mxu0 %v13276_v17 }
  0x71   : > { %v1134_v18 = vsel %vm13866_vm6, %v1132_v9, %v1133_v12  ;;  %v10439_v9 = vrot.slane %v1061_v1, 10  ;;  %v1076_v1 = vld [vmem:[%s13602_s15 + $0xb0] sm:$0x3] }
  0x73   : > { %12063 = vmatpush3.bf16.msra.mxu0 %v13276_v17  ;;  %v1131_v17 = vsel %vm13866_vm6, %v10434_v19, %v1130_v62  ;;  %v1165_v62 = vrot.slane %v13686_v10, 6 }
  0x74   : > { %12096 = vmatprep.subr.bf16.mxu0 %v13833_v22  ;;  %v10458_v30 = vcombine.low %v1131_v17, %v1134_v18 }
  0x75   : > { %v1167_v12 = vrot.slane %v1165_v62, 4  ;;  %v1166_v17 = vsel %vm13866_vm6, %v10439_v9, %v1165_v62  ;;  %v1074_v62 = vld [vmem:[%s13602_s15 + $0xa4] sm:$0x3]  ;;  %v1217_v9 = vrot.slane %v1076_v1, 6 }
  0x76   : > { %12033 = vmatmul.mubr.msk.bf16.gmra.mrb[8].mxu0 %vm540_vm3, %v10401_v25  ;;  %v1144_v25 = vrot.slane %v13646_v34, 6 }
  0x77   : > { %12036 = vmatprep.mubr.msk.bf16.mxu0 %vm540_vm3, %v10402_v26  ;;  %v1055_v26 = vld [vmem:[%s13602_s15 + $0x30] sm:$0xc]  ;;  %v1169_v18 = vsel %vm13866_vm6, %v1167_v12, %v1168_v14  ;;  %v1221_v14 = vrot.slane %v13783_v45, 6 }
  0x78   : > { %v10436_v28 = vrot.slane %v1055_v26, 10  ;;  %v1146_v4 = vrot.slane %v1144_v25, 4  ;;  %v1065_v26 = vld [vmem:[%s13602_s15 + $0x6c] sm:$0xc] }
  0x7a   : > { %v1145_v41 = vsel %vm13866_vm6, %v10436_v28, %v1144_v25  ;;  %v10441_v28 = vrot.slane %v1065_v26, 10 }
  0x7e   : > { %12037 = vmatmul.mubr.msk.bf16.gmra.mrb[12].mxu0 %vm540_vm3, %v10403_v31  ;;  %v10435_v31 = vrot.slane %v1053_v23, 10  ;;  %v1179_v23 = vrot.slane %v13716_v36, 6 }
  0x7f   : > { %12040 = vmatprep.mubr.msk.bf16.mxu0 %vm540_vm3, %v10404_v32  ;;  %v1139_v32 = vrot.slane %v1137_v16, 4 }
  0x80   : > { %v1138_v34 = vsel %vm13866_vm6, %v10435_v31, %v1137_v16  ;;  %v1175_v16 = vrot.slane %v1064_v8, 6  ;;  %v1068_v31 = vld [vmem:[%s13602_s15 + $0x80] sm:$0x3] }
  0x81   : > { %v1141_v39 = vsel %vm13866_vm6, %v1139_v32, %v1140_v33  ;;  %v10463_v32 = vcombine.low %v1166_v17, %v1169_v18  ;;  %v1078_v17 = vld [vmem:[%s13602_s15 + $0xbc] sm:$0x3] }
  0x82   : > { %v10459_v50 = vcombine.low %v1138_v34, %v1141_v39  ;;  %v1189_v34 = vrot.slane %v1068_v31, 6  ;;  %v1224_v26 = vrot.slane %v1078_v17, 6  ;;  %v13284_v31 = vld [vmem:[%s13602_s15 + $0x24] sm:$0xff]  }
  0x86   : > { %12041 = vmatmul.mubr.msk.bf16.gmra.mrb[16].mxu0 %vm540_vm3, %v10405_v35  ;;  %v1147_v35 = vrot.slane %v1056_v27, 6  ;;  %v1066_v27 = vld [vmem:[%s13602_s15 + $0x74] sm:$0x3] }
  0x87   : > { %12044 = vmatprep.mubr.msk.bf16.mxu0 %vm540_vm3, %v10406_v38  ;;  %v13280_v38 = vld [vmem:[%s16949_s1 + $0x68] sm:$0xff]   ;;  %v1182_v36 = vrot.slane %v1066_v27, 6 }
  0x8e   : > { %12045 = vmatmul.mubr.msk.bf16.gmra.mrb[20].mxu0 %vm540_vm3, %v10407_v42  ;;  %v1148_v42 = vsel %vm13866_vm6, %v1146_v4, %v1147_v35  ;;  %v1181_v4 = vrot.slane %v1179_v23, 4 }
  0x8f   : > { %12048 = vmatprep.mubr.msk.bf16.mxu0 %vm540_vm3, %v10408_v44  ;;  %v1058_v44 = vld [vmem:[%s13602_s15 + $0x44] sm:$0x3]  ;;  %v10460_v53 = vcombine.low %v1145_v41, %v1148_v42 }
  0x90   : > { %v1183_v39 = vsel %vm13866_vm6, %v1181_v4, %v1182_v36  ;;  %v13287_v4 = vld [vmem:[%s13602_s15 + $0x3c] sm:$0xff]   ;;  %v13288_v36 = vld [vmem:[%s13602_s15 + $0x48] sm:$0xff]  }
  0x96   : > { %12049 = vmatmul.mubr.msk.bf16.gmra.mrb[24].mxu0 %vm540_vm3, %v10409_v55  ;;  %v1154_v55 = vrot.slane %v1058_v44, 6  ;;  %v1070_v44 = vld [vmem:[%s13602_s15 + $0x8c] sm:$0x3] }
  0x97   : > { %12052 = vmatprep.mubr.msk.bf16.mxu0 %vm540_vm3, %v10410_v56  ;;  %v10438_v56 = vrot.slane %v1059_v47, 10  ;;  %v1072_v47 = vld [vmem:[%s13602_s15 + $0x98] sm:$0x3]  ;;  %v1196_v58 = vrot.slane %v1070_v44, 6  ;;  %v14058_v44 = vld [vmem:[%s13602_s15 + $0x1c] sm:$0xf] }
  0x98   : > { %v1155_v61 = vsel %vm13866_vm6, %v1153_v54, %v1154_v55 }
  0x99   : > { %v10461_v10 = vcombine.low %v1152_v60, %v1155_v61  ;;  %v1073_v61 = vld [vmem:[%s13602_s15 + $0x9c] sm:$0xc] }
  0x9a   : > { %v10445_v7 = vrot.slane %v1073_v61, 10  ;;  %v10574_v61 = vld [vmem:[%s13602_s15 + $0x30] sm:$0xe] }
  0x9e   : > { %12053 = vmatmul.mubr.msk.bf16.gmra.mrb[28].mxu0 %vm540_vm3, %v10411_v5  ;;  %v1172_v5 = vrot.slane %v13692_v13, 6 }
  0x9f   : > { %12064 = vmatprep.mubr.msk.bf16.mxu0 %vm540_vm3, %v10456_v6  ;;  %v13944_v6 = vld [vmem:[%s16949_s1 + $0x80] sm:$0xff]  }
  0xa0   : > { %v1174_v13 = vrot.slane %v1172_v5, 4  ;;  %v1173_v24 = vsel %vm13866_vm6, %v10440_v15, %v1172_v5 }
  0xa2   : > { %v1176_v25 = vsel %vm13866_vm6, %v1174_v13, %v1175_v16  ;;  %v1077_v16 = vld [vmem:[%s13602_s15 + $0xb4] sm:$0xc] }
  0xa3   : > { %v10464_v33 = vcombine.low %v1173_v24, %v1176_v25  ;;  %v10447_v24 = vrot.slane %v1077_v16, 10  ;;  %v1223_v25 = vrot.slane %v1221_v14, 4  ;;  %v10579_v16 = vld [vmem:[%s13602_s15 + $0x44] sm:$0x1] }
  0xa5   : > { %v1222_v45 = vsel %vm13866_vm6, %v10447_v24, %v1221_v14  ;;  %v1225_v27 = vsel %vm13866_vm6, %v1223_v25, %v1224_v26 }
  0xa6   : > { %12065 = vmatmul.mubr.msk.bf16.vlgmr.msra.gmra.mrb[0].mxu0 %vm540_vm3, %v10457_v29  ;;  %v1186_v29 = vrot.slane %v13720_v37, 6  ;;  %v1180_v37 = vsel %vm13866_vm6, %v10441_v28, %v1179_v23  ;;  %v13295_v28 = vld [vmem:[%s16949_s1 + $0x90] sm:$0xff]  }
  0xa7   : > { %12097 = vmatpush3.bf16.msra.mxu0 %v13833_v22  ;;  %12068 = vmatprep.mubr.msk.bf16.mxu0 %vm540_vm3, %v10458_v30  ;;  %v1158_v22 = vrot.slane %v13664_v52, 6  ;;  %v13282_v52 = vld [vmem:[%s16949_s1 + $0x78] sm:$0xff]   ;;  %v10465_v49 = vcombine.low %v1180_v37, %v1183_v39  ;;  %v13292_v37 = vld [vmem:[%s13602_s15 + $0x6c] sm:$0xff]  }
  0xa8   : > { %12098 = vmatprep.subr.bf16.mxu0 %v13280_v38  ;;  %v1067_v30 = vld [vmem:[%s13602_s15 + $0x78] sm:$0xc] }
  0xa9   : > { %v1160_v57 = vrot.slane %v1158_v22, 4  ;;  %v1159_v63 = vsel %vm13866_vm6, %v10438_v56, %v1158_v22  ;;  %v10442_v35 = vrot.slane %v1067_v30, 10  ;;  %v1200_v22 = vrot.slane %v13742_v59, 6  ;;  %v13283_v30 = vld [vmem:[%s13602_s15 + $0x18] sm:$0xff]  }
  0xaa   : > { %v1203_v56 = vrot.slane %v1072_v47, 6  ;;  %v13293_v39 = vld [vmem:[%s13602_s15 + $0x78] sm:$0xff]   ;;  %v10570_v47 = vld [vmem:[%s13602_s15 + $0x20] sm:$0x1] }
  0xab   : > { %12099 = vmatpush3.bf16.msra.mxu0 %v13280_v38  ;;  %v1162_v0 = vsel %vm13866_vm6, %v1160_v57, %v1161_v11  ;;  %v1188_v38 = vrot.slane %v1186_v29, 4  ;;  %v1187_v41 = vsel %vm13866_vm6, %v10442_v35, %v1186_v29  ;;  %v1202_v55 = vrot.slane %v1200_v22, 4  ;;  %v13300_v35 = vld [vmem:[%s16949_s1 + $0x98] sm:$0xff]  }
  0xac   : > { %12100 = vmatprep.subr.bf16.mxu0 %v13281_v46  ;;  %v10462_v19 = vcombine.low %v1159_v63, %v1162_v0  ;;  %v1197_v57 = vsel %vm13866_vm6, %v1195_v48, %v1196_v58  ;;  %v1207_v11 = vrot.slane %v13761_v20, 6  ;;  %v1214_v63 = vrot.slane %v13764_v21, 6  ;;  %v1075_v0 = vld [vmem:[%s13602_s15 + $0xa8] sm:$0xc] }
  0xad   : > { %v1190_v42 = vsel %vm13866_vm6, %v1188_v38, %v1189_v34  ;;  %v1204_v60 = vsel %vm13866_vm6, %v1202_v55, %v1203_v56  ;;  %v10446_v20 = vrot.slane %v1075_v0, 10  ;;  %v10471_v29 = vcombine.low %v1222_v45, %v1225_v27  ;;  %v13289_v38 = vld [vmem:[%s13602_s15 + $0x54] sm:$0xff]   ;;  %v13291_v34 = vld [vmem:[%s13602_s15 + $0x60] sm:$0xff]  }
  0xae   : > { %12069 = vmatmul.mubr.msk.bf16.gmra.mrb[4].mxu0 %vm540_vm3, %v10459_v50  ;;  %v10466_v50 = vcombine.low %v1187_v41, %v1190_v42  ;;  %v1209_v8 = vrot.slane %v1207_v11, 4  ;;  %v1208_v12 = vsel %vm13866_vm6, %v10445_v7, %v1207_v11  ;;  %v13296_v41 = vld [vmem:[%s13602_s15 + $0x90] sm:$0xff]   ;;  %v13297_v42 = vld [vmem:[%s13602_s15 + $0x9c] sm:$0xff]   ;;  %v2036_v58 = vrot.slane %v10570_v47, 5  ;;  %v10571_v11 = vld [vmem:[%s13602_s15 + $0x24] sm:$0xe] }
  0xaf   : > { %12072 = vmatprep.mubr.msk.bf16.mxu0 %vm540_vm3, %v10460_v53  ;;  %12101 = vmatpush3.bf16.msra.mxu0 %v13281_v46  ;;  %v1071_v46 = vld [vmem:[%s13602_s15 + $0x90] sm:$0xc]  ;;  %v10443_v53 = vrot.slane %v1069_v43, 10  ;;  %v1215_v15 = vsel %vm13866_vm6, %v10446_v20, %v1214_v63  ;;  %v13298_v43 = vld [vmem:[%s13602_s15 + $0xa8] sm:$0xff]   ;;  %v14071_v55 = vld [vmem:[%s13602_s15 + $0x34] sm:$0xf] }
  0xb0   : > { %12102 = vmatprep.subr.bf16.mxu0 %v13282_v52  ;;  %v10444_v54 = vrot.slane %v1071_v46, 10  ;;  %v10568_v46 = vld [vmem:[%s13602_s15 + $0x18] sm:$0xe]  ;;  %v10617_v1 = vrot.slane %v10571_v11, 9  ;;  %v10618_v7 = vrot.slane %v10574_v61, 9  ;;  %v2057_v27 = vrot.slane %v10579_v16, 5 }
  0xb1   : > { %v1194_v59 = vsel %vm13866_vm6, %v10443_v53, %v1193_v40  ;;  %v13294_v40 = vld [vmem:[%s13602_s15 + $0x84] sm:$0xff]   ;;  %v10616_v53 = vrot.slane %v10568_v46, 9  ;;  %v14087_v20 = vld [vmem:[%s13602_s15 + $0x40] sm:$0xf]  ;;  %v14172_v16 = vld [vmem:[%s13602_s15 + $0x94] sm:$0xf] }
  0xb2   : > { %v10467_v2 = vcombine.low %v1194_v59, %v1197_v57 }
  0xb3   : > { %12103 = vmatpush3.bf16.msra.mxu0 %v13282_v52  ;;  %v1201_v52 = vsel %vm13866_vm6, %v10444_v54, %v1200_v22  ;;  %v2033_v22 = vrot.slane %v14058_v44, 5  ;;  %v14068_v54 = vld [vmem:[%s13602_s15 + $0x28] sm:$0xf] }
  0xb4   : > { %12136 = vmatprep.subr.bf16.mxu0 %v13944_v6  ;;  %v10468_v5 = vcombine.low %v1201_v52, %v1204_v60  ;;  %v2040_v56 = vrot.slane %v14068_v54, 5  ;;  %v10573_v52 = vld [vmem:[%s13602_s15 + $0x2c] sm:$0x1]  ;;  %v2047_v60 = vrot.slane %v14071_v55, 5 }
  0xb5   : > { %v2035_v48 = vrot.slane %v2033_v22, 4  ;;  %v2034_v59 = vsel %vm13604_vm2, %v10616_v53, %v2033_v22 }
  0xb6   : > { %12073 = vmatmul.mubr.msk.bf16.gmra.mrb[8].mxu0 %vm540_vm3, %v10461_v10  ;;  %v1210_v10 = vrot.slane %v1074_v62, 6  ;;  %v10576_v62 = vld [vmem:[%s13602_s15 + $0x38] sm:$0x1]  ;;  %v2048_v14 = vsel %vm13604_vm2, %v10618_v7, %v2047_v60 }
  0xb7   : > { %12076 = vmatprep.mubr.msk.bf16.mxu0 %vm540_vm3, %v10462_v19  ;;  %v1216_v19 = vrot.slane %v1214_v63, 4  ;;  %v2037_v57 = vsel %vm13604_vm2, %v2035_v48, %v2036_v58  ;;  %v13302_v63 = vld [vmem:[%s13602_s15 + $0xcc] sm:$0xff]  }
  0xb8   : > { %v1211_v21 = vsel %vm13866_vm6, %v1209_v8, %v1210_v10  ;;  %v10640_v0 = vcombine.low %v2034_v59, %v2037_v57  ;;  %v2049_v8 = vrot.slane %v2047_v60, 4  ;;  %v2050_v10 = vrot.slane %v10576_v62, 5  ;;  %v14138_v58 = vld [vmem:[%s13602_s15 + $0x70] sm:$0xf]  ;;  %v14144_v59 = vld [vmem:[%s13602_s15 + $0x7c] sm:$0xf] }
  0xb9   : > { %v1218_v13 = vsel %vm13866_vm6, %v1216_v19, %v1217_v9  ;;  %v10469_v18 = vcombine.low %v1208_v12, %v1211_v21  ;;  %v14090_v19 = vld [vmem:[%s13602_s15 + $0x4c] sm:$0xf]  ;;  %v2041_v9 = vsel %vm13604_vm2, %v10617_v1, %v2040_v56  ;;  %v2054_v21 = vrot.slane %v14087_v20, 5  ;;  %v14163_v1 = vld [vmem:[%s16949_s1 + $0xc0] sm:$0xff]  }
  0xba   : > { %v10470_v23 = vcombine.low %v1215_v15, %v1218_v13  ;;  %v2051_v15 = vsel %vm13604_vm2, %v2049_v8, %v2050_v10  ;;  %v10577_v13 = vld [vmem:[%s13602_s15 + $0x3c] sm:$0xe]  ;;  %v2061_v17 = vrot.slane %v14090_v19, 5  ;;  %v10589_v62 = vld [vmem:[%s13602_s15 + $0x6c] sm:$0xe] }
  0xbb   : > { %v10642_v25 = vcombine.low %v2048_v14, %v2051_v15  ;;  %v10619_v26 = vrot.slane %v10577_v13, 9  ;;  %v2056_v45 = vrot.slane %v2054_v21, 4  ;;  %v10623_v10 = vrot.slane %v10589_v62, 9  ;;  %v14168_v13 = vld [vmem:[%s13602_s15 + $0x88] sm:$0xf] }
  0xbe   : > { %12077 = vmatmul.mubr.msk.bf16.gmra.mrb[12].mxu0 %vm540_vm3, %v10463_v32  ;;  %v13286_v32 = vld [vmem:[%s13602_s15 + $0x30] sm:$0xff]  }
  0xbf   : > { %12080 = vmatprep.mubr.msk.bf16.mxu0 %vm540_vm3, %v10464_v33  ;;  %v13290_v33 = vld [vmem:[%s16949_s1 + $0x88] sm:$0xff]  }
  0xc6   : > { %12081 = vmatmul.mubr.msk.bf16.gmra.mrb[16].mxu0 %vm540_vm3, %v10465_v49  ;;  %v13299_v49 = vld [vmem:[%s13602_s15 + $0xb4] sm:$0xff]  }
  0xc7   : > { %12084 = vmatprep.mubr.msk.bf16.mxu0 %vm540_vm3, %v10466_v50  ;;  %v13301_v50 = vld [vmem:[%s13602_s15 + $0xc0] sm:$0xff]  }
  0xce   : > { %12085 = vmatmul.mubr.msk.bf16.gmra.mrb[20].mxu0 %vm540_vm3, %v10467_v2  ;;  %v2042_v2 = vrot.slane %v2040_v56, 4  ;;  %v13306_v56 = vld [vmem:[%s16949_s1 + $0xb8] sm:$0xff]  }
  0xcf   : > { %12088 = vmatprep.mubr.msk.bf16.mxu0 %vm540_vm3, %v10468_v5  ;;  %v2043_v5 = vrot.slane %v10573_v52, 5  ;;  %v2082_v52 = vrot.slane %v14138_v58, 5 }
  0xd1   : > { %v2044_v12 = vsel %vm13604_vm2, %v2042_v2, %v2043_v5  ;;  %v10592_v2 = vld [vmem:[%s13602_s15 + $0x78] sm:$0xe]  ;;  %v10594_v5 = vld [vmem:[%s13602_s15 + $0x80] sm:$0x1] }
  0xd2   : > { %v10641_v24 = vcombine.low %v2041_v9, %v2044_v12  ;;  %v2084_v9 = vrot.slane %v2082_v52, 4  ;;  %v2092_v15 = vrot.slane %v10594_v5, 5 }
  0xd6   : > { %12089 = vmatmul.mubr.msk.bf16.gmra.mrb[24].mxu0 %vm540_vm3, %v10469_v18  ;;  %v10580_v18 = vld [vmem:[%s13602_s15 + $0x48] sm:$0xe] }
  0xd7   : > { %12092 = vmatprep.mubr.msk.bf16.mxu0 %vm540_vm3, %v10470_v23  ;;  %v10582_v23 = vld [vmem:[%s13602_s15 + $0x50] sm:$0x1] }
  0xde   : > { %12093 = vmatmul.mubr.msk.bf16.gmra.mrb[28].mxu0 %vm540_vm3, %v10471_v29  ;;  %v10620_v29 = vrot.slane %v10580_v18, 9 }
  0xdf   : > { %12104 = vmatprep.mubr.msk.bf16.mxu0 %vm540_vm3, %v13283_v30  ;;  %v2063_v30 = vrot.slane %v2061_v17, 4 }
  0xe6   : > { %12105 = vmatmul.mubr.msk.bf16.vlgmr.msra.gmra.mrb[0].mxu0 %vm540_vm3, %v13284_v31  ;;  %v2064_v31 = vrot.slane %v10582_v23, 5  ;;  %v2096_v23 = vrot.slane %v14168_v13, 5 }
  0xe7   : > { %12137 = vmatpush3.bf16.msra.mxu0 %v13944_v6  ;;  %12108 = vmatprep.mubr.msk.bf16.mxu0 %vm540_vm3, %v13286_v32  ;;  %v14040_v6 = vld [vmem:[%s16949_s1 + $0xa0] sm:$0xff]   ;;  %v14109_v32 = vld [vmem:[%s13602_s15 + $0x58] sm:$0xf] }
  0xe8   : > { %12138 = vmatprep.subr.bf16.mxu0 %v13290_v33 }
  0xeb   : > { %12139 = vmatpush3.bf16.msra.mxu0 %v13290_v33  ;;  %v13304_v33 = vld [vmem:[%s16949_s1 + $0xa8] sm:$0xff]  }
  0xec   : > { %12140 = vmatprep.subr.bf16.mxu0 %v13295_v28 }
  0xee   : > { %12109 = vmatmul.mubr.msk.bf16.gmra.mrb[4].mxu0 %vm540_vm3, %v13287_v4  ;;  %v2055_v4 = vsel %vm13604_vm2, %v10619_v26, %v2054_v21  ;;  %v10624_v21 = vrot.slane %v10592_v2, 9  ;;  %v10595_v26 = vld [vmem:[%s13602_s15 + $0x84] sm:$0xe] }
  0xef   : > { %12112 = vmatprep.mubr.msk.bf16.mxu0 %vm540_vm3, %v13288_v36  ;;  %12141 = vmatpush3.bf16.msra.mxu0 %v13295_v28  ;;  %v14115_v28 = vld [vmem:[%s13602_s15 + $0x64] sm:$0xf]  ;;  %v2058_v36 = vsel %vm13604_vm2, %v2056_v45, %v2057_v27  ;;  %v10597_v45 = vld [vmem:[%s13602_s15 + $0x8c] sm:$0x1]  ;;  %v2103_v27 = vrot.slane %v14172_v16, 5 }
  0xf0   : > { %12142 = vmatprep.subr.bf16.mxu0 %v13300_v35 }
  0xf3   : > { %12143 = vmatpush3.bf16.msra.mxu0 %v13300_v35  ;;  %v2068_v35 = vrot.slane %v14109_v32, 5 }
  0xf4   : > { %12176 = vmatprep.subr.bf16.mxu0 %v14040_v6 }
  0xf5   : > { %v2070_v47 = vrot.slane %v2068_v35, 4 }
  0xf6   : > { %12113 = vmatmul.mubr.msk.bf16.gmra.mrb[8].mxu0 %vm540_vm3, %v13289_v38  ;;  %v2062_v38 = vsel %vm13604_vm2, %v10620_v29, %v2061_v17  ;;  %v2083_v17 = vsel %vm13604_vm2, %v10623_v10, %v2082_v52  ;;  %v10598_v29 = vld [vmem:[%s13602_s15 + $0x90] sm:$0xe] }
  0xf7   : > { %12116 = vmatprep.mubr.msk.bf16.mxu0 %vm540_vm3, %v13291_v34  ;;  %v2065_v34 = vsel %vm13604_vm2, %v2063_v30, %v2064_v31  ;;  %v10600_v30 = vld [vmem:[%s13602_s15 + $0x98] sm:$0x1] }
  0xf8   : > { %v10644_v22 = vcombine.low %v2062_v38, %v2065_v34  ;;  %v10626_v38 = vrot.slane %v10598_v29, 9  ;;  %v2105_v34 = vrot.slane %v2103_v27, 4  ;;  %v14235_v29 = vld [vmem:[%s13602_s15 + $0xd0] sm:$0xf] }
  0xfe   : > { %12117 = vmatmul.mubr.msk.bf16.gmra.mrb[12].mxu0 %vm540_vm3, %v13292_v37  ;;  %v10583_v37 = vld [vmem:[%s13602_s15 + $0x54] sm:$0xe] }
  0xff   : > { %12120 = vmatprep.mubr.msk.bf16.mxu0 %vm540_vm3, %v13293_v39  ;;  %v10585_v39 = vld [vmem:[%s13602_s15 + $0x5c] sm:$0x1]  ;;  %v10621_v46 = vrot.slane %v10583_v37, 9  ;;  %v2106_v37 = vrot.slane %v10600_v30, 5 }
 0x101   : > { %v2069_v57 = vsel %vm13604_vm2, %v10621_v46, %v2068_v35  ;;  %v2099_v35 = vrot.slane %v10597_v45, 5  ;;  %v10601_v46 = vld [vmem:[%s13602_s15 + $0x9c] sm:$0xe] }
 0x106   : > { %12121 = vmatmul.mubr.msk.bf16.gmra.mrb[16].mxu0 %vm540_vm3, %v13294_v40  ;;  %v13305_v40 = vld [vmem:[%s16949_s1 + $0xb0] sm:$0xff]  }
 0x107   : > { %12124 = vmatprep.mubr.msk.bf16.mxu0 %vm540_vm3, %v13296_v41  ;;  %v10586_v41 = vld [vmem:[%s13602_s15 + $0x60] sm:$0xe] }
 0x10e   : > { %12125 = vmatmul.mubr.msk.bf16.gmra.mrb[20].mxu0 %vm540_vm3, %v13297_v42  ;;  %v10588_v42 = vld [vmem:[%s13602_s15 + $0x68] sm:$0x1] }
 0x10f   : > { %12128 = vmatprep.mubr.msk.bf16.mxu0 %vm540_vm3, %v13298_v43  ;;  %v10643_v43 = vcombine.low %v2055_v4, %v2058_v36  ;;  %v2078_v48 = vrot.slane %v10588_v42, 5  ;;  %v10625_v4 = vrot.slane %v10595_v26, 9  ;;  %v2098_v36 = vrot.slane %v2096_v23, 4 }
 0x116   : > { %12129 = vmatmul.mubr.msk.bf16.gmra.mrb[24].mxu0 %vm540_vm3, %v13299_v49  ;;  %v2071_v49 = vrot.slane %v10585_v39, 5  ;;  %v14191_v39 = vld [vmem:[%s13602_s15 + $0xa0] sm:$0xf] }
 0x117   : > { %12132 = vmatprep.mubr.msk.bf16.mxu0 %vm540_vm3, %v13301_v50  ;;  %v10622_v50 = vrot.slane %v10586_v41, 9  ;;  %v2100_v41 = vsel %vm13604_vm2, %v2098_v36, %v2099_v35  ;;  %v2110_v42 = vrot.slane %v14191_v39, 5  ;;  %v10613_v35 = vld [vmem:[%s13602_s15 + $0xcc] sm:$0xe] }
 0x118   : > { %v2072_v11 = vsel %vm13604_vm2, %v2070_v47, %v2071_v49  ;;  %v10603_v47 = vld [vmem:[%s13602_s15 + $0xa4] sm:$0x1] }
 0x119   : > { %v10645_v7 = vcombine.low %v2069_v57, %v2072_v11  ;;  %v10627_v57 = vrot.slane %v10601_v46, 9  ;;  %v2112_v11 = vrot.slane %v2110_v42, 4  ;;  %v2113_v52 = vrot.slane %v10603_v47, 5 }
 0x11b   : > { %v2111_v2 = vsel %vm13604_vm2, %v10627_v57, %v2110_v42  ;;  %v2114_v5 = vsel %vm13604_vm2, %v2112_v11, %v2113_v52  ;;  %v10678_v11 = vld [vmem:[%s13602_s15 + $0x24] sm:$0xc]  ;;  %v10679_v52 = vld [vmem:[%s13602_s15 + $0x2c] sm:$0x3] }
 0x11e   : > { %12133 = vmatmul.mubr.msk.bf16.gmra.mrb[28].mxu0 %vm540_vm3, %v13302_v63  ;;  %v10591_v63 = vld [vmem:[%s13602_s15 + $0x74] sm:$0x1] }
 0x11f   : > { %12144 = vmatprep.mubr.msk.bf16.mxu0 %vm540_vm3, %v10640_v0  ;;  %v2089_v0 = vrot.slane %v14144_v59, 5  ;;  %v2085_v12 = vrot.slane %v10591_v63, 5  ;;  %v14213_v63 = vld [vmem:[%s13602_s15 + $0xb8] sm:$0xf] }
 0x121   : > { %v2091_v14 = vrot.slane %v2089_v0, 4  ;;  %v2086_v18 = vsel %vm13604_vm2, %v2084_v9, %v2085_v12  ;;  %v10607_v9 = vld [vmem:[%s13602_s15 + $0xb4] sm:$0xe]  ;;  %v10609_v12 = vld [vmem:[%s13602_s15 + $0xbc] sm:$0x1] }
 0x122   : > { %v10647_v31 = vcombine.low %v2083_v17, %v2086_v18  ;;  %v10651_v17 = vcombine.low %v2111_v2, %v2114_v5 }
 0x126   : > { %12145 = vmatmul.mubr.msk.bf16.vlgmr.msra.gmra.mrb[0].mxu0 %vm540_vm3, %v10641_v24  ;;  %v2090_v24 = vsel %vm13604_vm2, %v10624_v21, %v2089_v0  ;;  %v14216_v0 = vld [vmem:[%s13602_s15 + $0xc4] sm:$0xf] }
 0x127   : > { %12177 = vmatpush3.bf16.msra.mxu0 %v14040_v6  ;;  %12148 = vmatprep.mubr.msk.bf16.mxu0 %vm540_vm3, %v10642_v25  ;;  %v2075_v6 = vrot.slane %v14115_v28, 5  ;;  %v2093_v25 = vsel %vm13604_vm2, %v2091_v14, %v2092_v15  ;;  %v2131_v21 = vrot.slane %v14216_v0, 5  ;;  %v10610_v14 = vld [vmem:[%s13602_s15 + $0xc0] sm:$0xe]  ;;  %v10612_v15 = vld [vmem:[%s13602_s15 + $0xc8] sm:$0x1] }
 0x128   : > { %12178 = vmatprep.subr.bf16.mxu0 %v13304_v33  ;;  %v10630_v26 = vrot.slane %v10610_v14, 9  ;;  %v2552_v14 = vrot.slane %v14087_v20, 6 }
 0x129   : > { %v2077_v53 = vrot.slane %v2075_v6, 4  ;;  %v2076_v60 = vsel %vm13604_vm2, %v10622_v50, %v2075_v6  ;;  %v14194_v6 = vld [vmem:[%s13602_s15 + $0xac] sm:$0xf]  ;;  %v10604_v50 = vld [vmem:[%s13602_s15 + $0xa8] sm:$0xe]  ;;  %v2133_v45 = vrot.slane %v2131_v21, 4 }
 0x12a   : > { %v2117_v49 = vrot.slane %v14194_v6, 5 }
 0x12b   : > { %12179 = vmatpush3.bf16.msra.mxu0 %v13304_v33  ;;  %v2079_v61 = vsel %vm13604_vm2, %v2077_v53, %v2078_v48  ;;  %v10648_v33 = vcombine.low %v2090_v24, %v2093_v25  ;;  %v10606_v53 = vld [vmem:[%s13602_s15 + $0xb0] sm:$0x1]  ;;  %v2127_v25 = vrot.slane %v10609_v12, 5 }
 0x12c   : > { %12180 = vmatprep.subr.bf16.mxu0 %v13305_v40  ;;  %v10646_v8 = vcombine.low %v2076_v60, %v2079_v61  ;;  %v10628_v60 = vrot.slane %v10604_v50, 9  ;;  %v2119_v61 = vrot.slane %v2117_v49, 4  ;;  %v2120_v62 = vrot.slane %v10606_v53, 5 }
 0x12e   : > { %12149 = vmatmul.mubr.msk.bf16.gmra.mrb[4].mxu0 %vm540_vm3, %v10643_v43  ;;  %v2104_v43 = vsel %vm13604_vm2, %v10626_v38, %v2103_v27  ;;  %v2121_v10 = vsel %vm13604_vm2, %v2119_v61, %v2120_v62  ;;  %v2134_v27 = vrot.slane %v10612_v15, 5  ;;  %v10615_v38 = vld [vmem:[%s13602_s15 + $0xd4] sm:$0x1]  ;;  %v10680_v61 = vld [vmem:[%s13602_s15 + $0x30] sm:$0xc] }
 0x12f   : > { %12152 = vmatprep.mubr.msk.bf16.mxu0 %vm540_vm3, %v10644_v22  ;;  %12181 = vmatpush3.bf16.msra.mxu0 %v13305_v40  ;;  %v2097_v40 = vsel %vm13604_vm2, %v10625_v4, %v2096_v23  ;;  %v2107_v22 = vsel %vm13604_vm2, %v2105_v34, %v2106_v37  ;;  %v10629_v23 = vrot.slane %v10607_v9, 9  ;;  %v2132_v4 = vsel %vm13604_vm2, %v10630_v26, %v2131_v21  ;;  %v10676_v37 = vld [vmem:[%s13602_s15 + $0x18] sm:$0xc]  ;;  %v10681_v62 = vld [vmem:[%s13602_s15 + $0x38] sm:$0x3] }
 0x130   : > { %12182 = vmatprep.subr.bf16.mxu0 %v13306_v56  ;;  %v10649_v48 = vcombine.low %v2097_v40, %v2100_v41  ;;  %v2135_v36 = vsel %vm13604_vm2, %v2133_v45, %v2134_v27  ;;  %v2531_v34 = vrot.slane %v14058_v44, 6  ;;  %v10677_v40 = vld [vmem:[%s13602_s15 + $0x20] sm:$0x3]  ;;  %v2141_v46 = vrot.slane %v10615_v38, 5  ;;  %v10685_v26 = vld [vmem:[%s13602_s15 + $0x50] sm:$0x3] }
 0x131   : > { %v10654_v42 = vcombine.low %v2132_v4, %v2135_v36  ;;  %v10708_v47 = vrot.slane %v10676_v37, 10  ;;  %v2534_v50 = vrot.slane %v10677_v40, 6  ;;  %v2548_v12 = vrot.slane %v10681_v62, 6  ;;  %v10690_v62 = vld [vmem:[%s13602_s15 + $0x6c] sm:$0xc] }
 0x132   : > { %v2562_v36 = vrot.slane %v10685_v26, 6  ;;  %v10695_v26 = vld [vmem:[%s13602_s15 + $0x8c] sm:$0x3] }
 0x133   : > { %12183 = vmatpush3.bf16.msra.mxu0 %v13306_v56  ;;  %v10650_v56 = vcombine.low %v2104_v43, %v2107_v22  ;;  %v10631_v43 = vrot.slane %v10613_v35, 9  ;;  %v13308_v35 = vld [vmem:[%s16949_s1 + $0xc8] sm:$0xff]  }
 0x134   : > { %12216 = vmatprep.subr.bf16.mxu0 %v14163_v1 }
 0x136   : > { %12153 = vmatmul.mubr.msk.bf16.gmra.mrb[8].mxu0 %vm540_vm3, %v10645_v7  ;;  %v2124_v7 = vrot.slane %v14213_v63, 5 }
 0x137   : > { %12156 = vmatprep.mubr.msk.bf16.mxu0 %vm540_vm3, %v10646_v8  ;;  %v2118_v8 = vsel %vm13604_vm2, %v10628_v60, %v2117_v49  ;;  %v2533_v49 = vrot.slane %v2531_v34, 4  ;;  %v2545_v60 = vrot.slane %v14071_v55, 6 }
 0x138   : > { %v10652_v18 = vcombine.low %v2118_v8, %v2121_v10  ;;  %v2126_v24 = vrot.slane %v2124_v7, 4  ;;  %v2125_v30 = vsel %vm13604_vm2, %v10629_v23, %v2124_v7  ;;  %v10709_v7 = vrot.slane %v10678_v11, 10  ;;  %v10683_v23 = vld [vmem:[%s13602_s15 + $0x44] sm:$0x3] }
 0x139   : > { %v2535_v57 = vsel %vm13866_vm6, %v2533_v49, %v2534_v50  ;;  %v10710_v10 = vrot.slane %v10680_v61, 10  ;;  %v2547_v9 = vrot.slane %v2545_v60, 4 }
 0x13b   : > { %v2546_v15 = vsel %vm13866_vm6, %v10710_v10, %v2545_v60 }
 0x13e   : > { %12157 = vmatmul.mubr.msk.bf16.gmra.mrb[12].mxu0 %vm540_vm3, %v10647_v31  ;;  %v2128_v31 = vsel %vm13604_vm2, %v2126_v24, %v2127_v25  ;;  %v2559_v24 = vrot.slane %v14090_v19, 6  ;;  %v10684_v25 = vld [vmem:[%s13602_s15 + $0x48] sm:$0xc] }
 0x13f   : > { %12160 = vmatprep.mubr.msk.bf16.mxu0 %vm540_vm3, %v10648_v33  ;;  %v2138_v33 = vrot.slane %v14235_v29, 5  ;;  %v10653_v41 = vcombine.low %v2125_v30, %v2128_v31  ;;  %v2554_v31 = vrot.slane %v2552_v14, 4  ;;  %v10712_v20 = vrot.slane %v10684_v25, 10  ;;  %v10694_v25 = vld [vmem:[%s13602_s15 + $0x84] sm:$0xc] }
 0x140   : > { %v2561_v4 = vrot.slane %v2559_v24, 4 }
 0x141   : > { %v2140_v22 = vrot.slane %v2138_v33, 4  ;;  %v2139_v44 = vsel %vm13604_vm2, %v10631_v43, %v2138_v33  ;;  %v2555_v33 = vrot.slane %v10683_v23, 6  ;;  %v2560_v37 = vsel %vm13866_vm6, %v10712_v20, %v2559_v24  ;;  %v13309_v43 = vld [vmem:[%s16949_s1 + $0xd0] sm:$0xff]  }
 0x142   : > { %v2563_v40 = vsel %vm13866_vm6, %v2561_v4, %v2562_v36  ;;  %v10717_v20 = vrot.slane %v10694_v25, 10 }
 0x143   : > { %v2142_v53 = vsel %vm13604_vm2, %v2140_v22, %v2141_v46  ;;  %v2556_v38 = vsel %vm13866_vm6, %v2554_v31, %v2555_v33  ;;  %v10688_v22 = vld [vmem:[%s13602_s15 + $0x60] sm:$0xc]  ;;  %v10689_v46 = vld [vmem:[%s13602_s15 + $0x68] sm:$0x3]  ;;  %v10736_v49 = vcombine.low %v2560_v37, %v2563_v40 }
 0x144   : > { %v10655_v2 = vcombine.low %v2139_v44, %v2142_v53  ;;  %v10714_v53 = vrot.slane %v10688_v22, 10  ;;  %v10701_v22 = vld [vmem:[%s13602_s15 + $0xb0] sm:$0x3] }
 0x146   : > { %12161 = vmatmul.mubr.msk.bf16.gmra.mrb[16].mxu0 %vm540_vm3, %v10649_v48  ;;  %v2538_v48 = vrot.slane %v14068_v54, 6  ;;  %v2541_v54 = vrot.slane %v10679_v52, 6  ;;  %v2580_v52 = vrot.slane %v14138_v58, 6 }
 0x147   : > { %12164 = vmatprep.mubr.msk.bf16.mxu0 %vm540_vm3, %v10650_v56  ;;  %v2532_v56 = vsel %vm13866_vm6, %v10708_v47, %v2531_v34  ;;  %v2566_v34 = vrot.slane %v14109_v32, 6 }
 0x148   : > { %v10732_v5 = vcombine.low %v2532_v56, %v2535_v57  ;;  %v2540_v8 = vrot.slane %v2538_v48, 4  ;;  %v2539_v55 = vsel %vm13866_vm6, %v10709_v7, %v2538_v48  ;;  %v2576_v56 = vrot.slane %v10689_v46, 6  ;;  %v14328_v7 = vld [vmem:[%s16949_s1 + $0xe0] sm:$0xff]  }
 0x149   : > { %v2568_v50 = vrot.slane %v2566_v34, 4 }
 0x14a   : > { %v2542_v21 = vsel %vm13866_vm6, %v2540_v8, %v2541_v54  ;;  %v10692_v8 = vld [vmem:[%s13602_s15 + $0x78] sm:$0xc]  ;;  %v10693_v54 = vld [vmem:[%s13602_s15 + $0x80] sm:$0x3] }
 0x14b   : > { %v10733_v45 = vcombine.low %v2539_v55, %v2542_v21  ;;  %v10716_v21 = vrot.slane %v10692_v8, 10 }
 0x14e   : > { %12165 = vmatmul.mubr.msk.bf16.gmra.mrb[20].mxu0 %vm540_vm3, %v10651_v17  ;;  %v2549_v17 = vsel %vm13866_vm6, %v2547_v9, %v2548_v12  ;;  %v10715_v9 = vrot.slane %v10690_v62, 10  ;;  %v2582_v12 = vrot.slane %v2580_v52, 4  ;;  %v10705_v62 = vld [vmem:[%s13602_s15 + $0xc8] sm:$0x3] }
 0x14f   : > { %12168 = vmatprep.mubr.msk.bf16.mxu0 %vm540_vm3, %v10652_v18  ;;  %v10682_v18 = vld [vmem:[%s13602_s15 + $0x3c] sm:$0xc]  ;;  %v10734_v27 = vcombine.low %v2546_v15, %v2549_v17 }
 0x150   : > { %v10711_v30 = vrot.slane %v10682_v18, 10  ;;  %v2581_v15 = vsel %vm13866_vm6, %v10715_v9, %v2580_v52  ;;  %v2594_v18 = vrot.slane %v14168_v13, 6  ;;  %v2597_v13 = vrot.slane %v10695_v26, 6  ;;  %v10703_v52 = vld [vmem:[%s13602_s15 + $0xbc] sm:$0x3] }
 0x151   : > { %v2632_v9 = vrot.slane %v10705_v62, 6 }
 0x152   : > { %v2553_v19 = vsel %vm13866_vm6, %v10711_v30, %v2552_v14  ;;  %v2590_v14 = vrot.slane %v10693_v54, 6  ;;  %v10697_v30 = vld [vmem:[%s13602_s15 + $0x98] sm:$0x3]  ;;  %v2596_v4 = vrot.slane %v2594_v18, 4 }
 0x153   : > { %v10735_v47 = vcombine.low %v2553_v19, %v2556_v38  ;;  %v2604_v19 = vrot.slane %v10697_v30, 6  ;;  %v13312_v30 = vld [vmem:[%s13602_s15 + $0x3c] sm:$0xff]  }
 0x154   : > { %v2598_v38 = vsel %vm13866_vm6, %v2596_v4, %v2597_v13  ;;  %v13315_v4 = vld [vmem:[%s13602_s15 + $0x54] sm:$0xff]   ;;  %v13316_v13 = vld [vmem:[%s13602_s15 + $0x60] sm:$0xff]  }
 0x156   : > { %12169 = vmatmul.mubr.msk.bf16.gmra.mrb[24].mxu0 %vm540_vm3, %v10653_v41  ;;  %v10686_v41 = vld [vmem:[%s13602_s15 + $0x54] sm:$0xc] }
 0x157   : > { %12172 = vmatprep.mubr.msk.bf16.mxu0 %vm540_vm3, %v10654_v42  ;;  %v10687_v42 = vld [vmem:[%s13602_s15 + $0x5c] sm:$0x3]  ;;  %v10713_v32 = vrot.slane %v10686_v41, 10  ;;  %v10698_v41 = vld [vmem:[%s13602_s15 + $0x9c] sm:$0xc] }
 0x158   : > { %v2569_v44 = vrot.slane %v10687_v42, 6  ;;  %v10699_v42 = vld [vmem:[%s13602_s15 + $0xa4] sm:$0x3] }
 0x159   : > { %v2567_v57 = vsel %vm13866_vm6, %v10713_v32, %v2566_v34  ;;  %v2608_v34 = vrot.slane %v14191_v39, 6  ;;  %v2611_v39 = vrot.slane %v10699_v42, 6  ;;  %v14442_v42 = vld [vmem:[%s13602_s15 + $0x34] sm:$0xf] }
 0x15a   : > { %v2570_v11 = vsel %vm13866_vm6, %v2568_v50, %v2569_v44 }
 0x15b   : > { %v10737_v58 = vcombine.low %v2567_v57, %v2570_v11  ;;  %v2610_v32 = vrot.slane %v2608_v34, 4  ;;  %v10702_v11 = vld [vmem:[%s13602_s15 + $0xb4] sm:$0xc] }
 0x15c   : > { %v10721_v8 = vrot.slane %v10702_v11, 10  ;;  %v10850_v11 = vld [vmem:[%s13602_s15 + $0x48] sm:$0xe] }
 0x15e   : > { %12173 = vmatmul.mubr.msk.bf16.gmra.mrb[28].mxu0 %vm540_vm3, %v10655_v2  ;;  %v10691_v2 = vld [vmem:[%s13602_s15 + $0x74] sm:$0x3] }
 0x15f   : > { %12184 = vmatprep.mubr.msk.bf16.mxu0 %vm540_vm3, %v10732_v5  ;;  %v2587_v5 = vrot.slane %v14144_v59, 6  ;;  %v2583_v55 = vrot.slane %v10691_v2, 6 }
 0x161   : > { %v2589_v59 = vrot.slane %v2587_v5, 4  ;;  %v2584_v17 = vsel %vm13866_vm6, %v2582_v12, %v2583_v55  ;;  %v2588_v23 = vsel %vm13866_vm6, %v10716_v21, %v2587_v5  ;;  %v2636_v55 = vrot.slane %v14235_v29, 6 }
 0x162   : > { %v10739_v31 = vcombine.low %v2581_v15, %v2584_v17  ;;  %v10707_v15 = vld [vmem:[%s13602_s15 + $0xd4] sm:$0x3] }
 0x163   : > { %v2591_v24 = vsel %vm13866_vm6, %v2589_v59, %v2590_v14  ;;  %v10706_v14 = vld [vmem:[%s13602_s15 + $0xcc] sm:$0xc]  ;;  %v2639_v25 = vrot.slane %v10707_v15, 6 }
 0x164   : > { %v10740_v33 = vcombine.low %v2588_v23, %v2591_v24  ;;  %v10723_v23 = vrot.slane %v10706_v14, 10  ;;  %v2638_v24 = vrot.slane %v2636_v55, 4  ;;  %v10855_v14 = vld [vmem:[%s13602_s15 + $0x5c] sm:$0x1] }
 0x166   : > { %12185 = vmatmul.mubr.msk.bf16.vlgmr.msra.gmra.mrb[0].mxu0 %vm540_vm3, %v10733_v45  ;;  %v2601_v45 = vrot.slane %v14172_v16, 6  ;;  %v2595_v16 = vsel %vm13866_vm6, %v10717_v20, %v2594_v18  ;;  %v2637_v29 = vsel %vm13866_vm6, %v10723_v23, %v2636_v55  ;;  %v2640_v26 = vsel %vm13866_vm6, %v2638_v24, %v2639_v25  ;;  %v13323_v20 = vld [vmem:[%s16949_s1 + $0xf0] sm:$0xff]  }
 0x167   : > { %12217 = vmatpush3.bf16.msra.mxu0 %v14163_v1  ;;  %12188 = vmatprep.mubr.msk.bf16.mxu0 %vm540_vm3, %v10734_v27  ;;  %v2573_v1 = vrot.slane %v14115_v28, 6  ;;  %v13310_v28 = vld [vmem:[%s16949_s1 + $0xd8] sm:$0xff]   ;;  %v10696_v27 = vld [vmem:[%s13602_s15 + $0x90] sm:$0xc]  ;;  %v10741_v46 = vcombine.low %v2595_v16, %v2598_v38  ;;  %v13320_v16 = vld [vmem:[%s13602_s15 + $0x84] sm:$0xff]  }
 0x168   : > { %12218 = vmatprep.subr.bf16.mxu0 %v13308_v35  ;;  %v10718_v36 = vrot.slane %v10696_v27, 10  ;;  %v13311_v27 = vld [vmem:[%s13602_s15 + $0x30] sm:$0xff]  }
 0x169   : > { %v2575_v48 = vrot.slane %v2573_v1, 4  ;;  %v2574_v60 = vsel %vm13866_vm6, %v10714_v53, %v2573_v1  ;;  %v2615_v1 = vrot.slane %v14194_v6, 6  ;;  %v2618_v53 = vrot.slane %v10701_v22, 6  ;;  %v13321_v38 = vld [vmem:[%s13602_s15 + $0x90] sm:$0xff]   ;;  %v10846_v22 = vld [vmem:[%s13602_s15 + $0x38] sm:$0x1] }
 0x16a   : > { %v2602_v37 = vsel %vm13866_vm6, %v10718_v36, %v2601_v45  ;;  %v13328_v36 = vld [vmem:[%s16949_s1 + $0xf8] sm:$0xff]  }
 0x16b   : > { %12219 = vmatpush3.bf16.msra.mxu0 %v13308_v35  ;;  %v2577_v61 = vsel %vm13866_vm6, %v2575_v48, %v2576_v56  ;;  %v2603_v35 = vrot.slane %v2601_v45, 4  ;;  %v2617_v44 = vrot.slane %v2615_v1, 4  ;;  %v2612_v48 = vsel %vm13866_vm6, %v2610_v32, %v2611_v39 }
 0x16c   : > { %12220 = vmatprep.subr.bf16.mxu0 %v13309_v43  ;;  %v10738_v10 = vcombine.low %v2574_v60, %v2577_v61  ;;  %v2622_v56 = vrot.slane %v14213_v63, 6  ;;  %v2629_v60 = vrot.slane %v14216_v0, 6  ;;  %v10704_v61 = vld [vmem:[%s13602_s15 + $0xc0] sm:$0xc]  ;;  %v10747_v45 = vcombine.low %v2637_v29, %v2640_v26 }
 0x16d   : > { %v2605_v40 = vsel %vm13866_vm6, %v2603_v35, %v2604_v19  ;;  %v2619_v57 = vsel %vm13866_vm6, %v2617_v44, %v2618_v53  ;;  %v10722_v63 = vrot.slane %v10704_v61, 10  ;;  %v13317_v35 = vld [vmem:[%s13602_s15 + $0x6c] sm:$0xff]   ;;  %v13319_v19 = vld [vmem:[%s13602_s15 + $0x78] sm:$0xff]   ;;  %v3451_v39 = vrot.slane %v10846_v22, 5 }
 0x16e   : > { %12189 = vmatmul.mubr.msk.bf16.gmra.mrb[4].mxu0 %vm540_vm3, %v10735_v47  ;;  %v10742_v47 = vcombine.low %v2602_v37, %v2605_v40  ;;  %v2624_v54 = vrot.slane %v2622_v56, 4  ;;  %v2623_v12 = vsel %vm13866_vm6, %v10721_v8, %v2622_v56  ;;  %v13324_v37 = vld [vmem:[%s13602_s15 + $0xa8] sm:$0xff]   ;;  %v13325_v40 = vld [vmem:[%s13602_s15 + $0xb4] sm:$0xff]   ;;  %v10847_v56 = vld [vmem:[%s13602_s15 + $0x3c] sm:$0xe]  ;;  %v10894_v8 = vrot.slane %v10850_v11, 9 }
 0x16f   : > { %12192 = vmatprep.mubr.msk.bf16.mxu0 %vm540_vm3, %v10736_v49  ;;  %12221 = vmatpush3.bf16.msra.mxu0 %v13309_v43  ;;  %v10700_v43 = vld [vmem:[%s13602_s15 + $0xa8] sm:$0xc]  ;;  %v10719_v49 = vrot.slane %v10698_v41, 10  ;;  %v2630_v21 = vsel %vm13866_vm6, %v10722_v63, %v2629_v60  ;;  %v13326_v41 = vld [vmem:[%s13602_s15 + $0xc0] sm:$0xff]   ;;  %v14455_v44 = vld [vmem:[%s13602_s15 + $0x4c] sm:$0xf] }
 0x170   : > { %12222 = vmatprep.subr.bf16.mxu0 %v13310_v28  ;;  %v10720_v50 = vrot.slane %v10700_v43, 10  ;;  %v10844_v43 = vld [vmem:[%s13602_s15 + $0x30] sm:$0xe]  ;;  %v10893_v62 = vrot.slane %v10847_v56, 9  ;;  %v14471_v63 = vld [vmem:[%s13602_s15 + $0x58] sm:$0xf] }
 0x171   : > { %v2609_v6 = vsel %vm13866_vm6, %v10719_v49, %v2608_v34  ;;  %v13322_v34 = vld [vmem:[%s13602_s15 + $0x9c] sm:$0xff]   ;;  %v10892_v49 = vrot.slane %v10844_v43, 9  ;;  %v3472_v26 = vrot.slane %v10855_v14, 5 }
 0x172   : > { %v10743_v2 = vcombine.low %v2609_v6, %v2612_v48 }
 0x173   : > { %12223 = vmatpush3.bf16.msra.mxu0 %v13310_v28  ;;  %v2616_v28 = vsel %vm13866_vm6, %v10720_v50, %v2615_v1  ;;  %v3448_v1 = vrot.slane %v14442_v42, 5  ;;  %v14452_v50 = vld [vmem:[%s13602_s15 + $0x40] sm:$0xf] }
 0x174   : > { %12256 = vmatprep.subr.bf16.mxu0 %v14328_v7  ;;  %v10744_v5 = vcombine.low %v2616_v28, %v2619_v57  ;;  %v3455_v53 = vrot.slane %v14452_v50, 5  ;;  %v10849_v28 = vld [vmem:[%s13602_s15 + $0x44] sm:$0x1]  ;;  %v3462_v57 = vrot.slane %v14455_v44, 5 }
 0x175   : > { %v3450_v32 = vrot.slane %v3448_v1, 4  ;;  %v3449_v6 = vsel %vm13604_vm2, %v10892_v49, %v3448_v1 }
 0x176   : > { %12193 = vmatmul.mubr.msk.bf16.gmra.mrb[8].mxu0 %vm540_vm3, %v10737_v58  ;;  %v2625_v58 = vrot.slane %v10703_v52, 6  ;;  %v10852_v52 = vld [vmem:[%s13602_s15 + $0x50] sm:$0x1]  ;;  %v3463_v55 = vsel %vm13604_vm2, %v10894_v8, %v3462_v57 }
 0x177   : > { %12196 = vmatprep.mubr.msk.bf16.mxu0 %vm540_vm3, %v10738_v10  ;;  %v2631_v10 = vrot.slane %v2629_v60, 4  ;;  %v3452_v48 = vsel %vm13604_vm2, %v3450_v32, %v3451_v39  ;;  %v13330_v60 = vld [vmem:[%s13602_s15 + $0xe4] sm:$0xff]  }
 0x178   : > { %v2626_v0 = vsel %vm13866_vm6, %v2624_v54, %v2625_v58  ;;  %v10916_v61 = vcombine.low %v3449_v6, %v3452_v48  ;;  %v3464_v54 = vrot.slane %v3462_v57, 4  ;;  %v3465_v58 = vrot.slane %v10852_v52, 5  ;;  %v14522_v39 = vld [vmem:[%s13602_s15 + $0x88] sm:$0xf]  ;;  %v14528_v6 = vld [vmem:[%s13602_s15 + $0x94] sm:$0xf] }
 0x179   : > { %v2633_v59 = vsel %vm13866_vm6, %v2631_v10, %v2632_v9  ;;  %v10745_v17 = vcombine.low %v2623_v12, %v2626_v0  ;;  %v14474_v10 = vld [vmem:[%s13602_s15 + $0x64] sm:$0xf]  ;;  %v3456_v9 = vsel %vm13604_vm2, %v10893_v62, %v3455_v53  ;;  %v3469_v0 = vrot.slane %v14471_v63, 5  ;;  %v10868_v62 = vld [vmem:[%s13602_s15 + $0x90] sm:$0xe] }
 0x17a   : > { %v10746_v18 = vcombine.low %v2630_v21, %v2633_v59  ;;  %v3466_v21 = vsel %vm13604_vm2, %v3464_v54, %v3465_v58  ;;  %v10853_v59 = vld [vmem:[%s13602_s15 + $0x54] sm:$0xe]  ;;  %v3476_v15 = vrot.slane %v14474_v10, 5  ;;  %v10865_v52 = vld [vmem:[%s13602_s15 + $0x84] sm:$0xe] }
 0x17b   : > { %v10918_v24 = vcombine.low %v3463_v55, %v3466_v21  ;;  %v10895_v25 = vrot.slane %v10853_v59, 9  ;;  %v3471_v29 = vrot.slane %v3469_v0, 4  ;;  %v10899_v54 = vrot.slane %v10865_v52, 9  ;;  %v14547_v21 = vld [vmem:[%s13602_s15 + $0xa0] sm:$0xf] }
 0x17c   : > { %v14550_v59 = vld [vmem:[%s13602_s15 + $0xac] sm:$0xf]  ;;  %v14591_v52 = vld [vmem:[%s13602_s15 + $0xd0] sm:$0xf] }
 0x17e   : > { %12197 = vmatmul.mubr.msk.bf16.gmra.mrb[12].mxu0 %vm540_vm3, %v10739_v31  ;;  %v13314_v31 = vld [vmem:[%s13602_s15 + $0x48] sm:$0xff]  }
 0x17f   : > { %12200 = vmatprep.mubr.msk.bf16.mxu0 %vm540_vm3, %v10740_v33  ;;  %v13318_v33 = vld [vmem:[%s16949_s1 + $0xe8] sm:$0xff]  }
 0x186   : > { %12201 = vmatmul.mubr.msk.bf16.gmra.mrb[16].mxu0 %vm540_vm3, %v10741_v46  ;;  %v13327_v46 = vld [vmem:[%s13602_s15 + $0xcc] sm:$0xff]  }
 0x187   : > { %12204 = vmatprep.mubr.msk.bf16.mxu0 %vm540_vm3, %v10742_v47  ;;  %v13329_v47 = vld [vmem:[%s13602_s15 + $0xd8] sm:$0xff]  }
 0x18e   : > { %12205 = vmatmul.mubr.msk.bf16.gmra.mrb[20].mxu0 %vm540_vm3, %v10743_v2  ;;  %v3457_v2 = vrot.slane %v3455_v53, 4  ;;  %v13334_v53 = vld [vmem:[%s16949_s1 + $0x118] sm:$0xff]  }
 0x18f   : > { %12208 = vmatprep.mubr.msk.bf16.mxu0 %vm540_vm3, %v10744_v5  ;;  %v3458_v5 = vrot.slane %v10849_v28, 5  ;;  %v3497_v28 = vrot.slane %v14522_v39, 5 }
 0x191   : > { %v3459_v12 = vsel %vm13604_vm2, %v3457_v2, %v3458_v5  ;;  %v10870_v2 = vld [vmem:[%s13602_s15 + $0x98] sm:$0x1]  ;;  %v3499_v58 = vrot.slane %v3497_v28, 4  ;;  %v3498_v14 = vsel %vm13604_vm2, %v10899_v54, %v3497_v28  ;;  %v10883_v54 = vld [vmem:[%s13602_s15 + $0xcc] sm:$0xe] }
 0x192   : > { %v10917_v23 = vcombine.low %v3456_v9, %v3459_v12  ;;  %v10900_v12 = vrot.slane %v10868_v62, 9  ;;  %v3507_v55 = vrot.slane %v10870_v2, 5  ;;  %v3539_v2 = vrot.slane %v14591_v52, 5 }
 0x196   : > { %12209 = vmatmul.mubr.msk.bf16.gmra.mrb[24].mxu0 %vm540_vm3, %v10745_v17  ;;  %v10856_v17 = vld [vmem:[%s13602_s15 + $0x60] sm:$0xe] }
 0x197   : > { %12212 = vmatprep.mubr.msk.bf16.mxu0 %vm540_vm3, %v10746_v18  ;;  %v10858_v18 = vld [vmem:[%s13602_s15 + $0x68] sm:$0x1] }
 0x19e   : > { %12213 = vmatmul.mubr.msk.bf16.gmra.mrb[28].mxu0 %vm540_vm3, %v10747_v45  ;;  %v10896_v45 = vrot.slane %v10856_v17, 9  ;;  %v3511_v17 = vrot.slane %v14547_v21, 5 }
 0x19f   : > { %12224 = vmatprep.mubr.msk.bf16.mxu0 %vm540_vm3, %v13311_v27  ;;  %v3478_v27 = vrot.slane %v3476_v15, 4 }
 0x1a6   : > { %12225 = vmatmul.mubr.msk.bf16.vlgmr.msra.gmra.mrb[0].mxu0 %vm540_vm3, %v13312_v30  ;;  %v3479_v30 = vrot.slane %v10858_v18, 5 }
 0x1a7   : > { %12257 = vmatpush3.bf16.msra.mxu0 %v14328_v7  ;;  %12228 = vmatprep.mubr.msk.bf16.mxu0 %vm540_vm3, %v13314_v31  ;;  %v14424_v7 = vld [vmem:[%s16949_s1 + $0x100] sm:$0xff]   ;;  %v14493_v31 = vld [vmem:[%s13602_s15 + $0x70] sm:$0xf] }
 0x1a8   : > { %12258 = vmatprep.subr.bf16.mxu0 %v13318_v33 }
 0x1ab   : > { %12259 = vmatpush3.bf16.msra.mxu0 %v13318_v33  ;;  %v13332_v33 = vld [vmem:[%s16949_s1 + $0x108] sm:$0xff]  }
 0x1ac   : > { %12260 = vmatprep.subr.bf16.mxu0 %v13323_v20 }
 0x1ae   : > { %12229 = vmatmul.mubr.msk.bf16.gmra.mrb[4].mxu0 %vm540_vm3, %v13315_v4  ;;  %v3470_v4 = vsel %vm13604_vm2, %v10895_v25, %v3469_v0  ;;  %v10873_v25 = vld [vmem:[%s13602_s15 + $0xa4] sm:$0x1] }
 0x1af   : > { %12232 = vmatprep.mubr.msk.bf16.mxu0 %vm540_vm3, %v13316_v13  ;;  %12261 = vmatpush3.bf16.msra.mxu0 %v13323_v20  ;;  %v14499_v20 = vld [vmem:[%s13602_s15 + $0x7c] sm:$0xf]  ;;  %v3473_v13 = vsel %vm13604_vm2, %v3471_v29, %v3472_v26  ;;  %v3518_v29 = vrot.slane %v14550_v59, 5  ;;  %v10874_v26 = vld [vmem:[%s13602_s15 + $0xa8] sm:$0xe] }
 0x1b0   : > { %12262 = vmatprep.subr.bf16.mxu0 %v13328_v36 }
 0x1b3   : > { %12263 = vmatpush3.bf16.msra.mxu0 %v13328_v36  ;;  %v3483_v36 = vrot.slane %v14493_v31, 5 }
 0x1b4   : > { %12296 = vmatprep.subr.bf16.mxu0 %v14424_v7 }
 0x1b5   : > { %v3485_v22 = vrot.slane %v3483_v36, 4 }
 0x1b6   : > { %12233 = vmatmul.mubr.msk.bf16.gmra.mrb[8].mxu0 %vm540_vm3, %v13317_v35  ;;  %v3477_v35 = vsel %vm13604_vm2, %v10896_v45, %v3476_v15  ;;  %v10876_v45 = vld [vmem:[%s13602_s15 + $0xb0] sm:$0x1] }
 0x1b7   : > { %12236 = vmatprep.mubr.msk.bf16.mxu0 %vm540_vm3, %v13319_v19  ;;  %v3480_v19 = vsel %vm13604_vm2, %v3478_v27, %v3479_v30 }
 0x1b8   : > { %v10920_v1 = vcombine.low %v3477_v35, %v3480_v19  ;;  %v3520_v35 = vrot.slane %v3518_v29, 4  ;;  %v3521_v19 = vrot.slane %v10876_v45, 5 }
 0x1be   : > { %12237 = vmatmul.mubr.msk.bf16.gmra.mrb[12].mxu0 %vm540_vm3, %v13320_v16  ;;  %v10859_v16 = vld [vmem:[%s13602_s15 + $0x6c] sm:$0xe] }
 0x1bf   : > { %12240 = vmatprep.mubr.msk.bf16.mxu0 %vm540_vm3, %v13321_v38  ;;  %v10861_v38 = vld [vmem:[%s13602_s15 + $0x74] sm:$0x1]  ;;  %v10897_v43 = vrot.slane %v10859_v16, 9  ;;  %v14569_v16 = vld [vmem:[%s13602_s15 + $0xb8] sm:$0xf] }
 0x1c1   : > { %v3484_v48 = vsel %vm13604_vm2, %v10897_v43, %v3483_v36  ;;  %v10902_v36 = vrot.slane %v10874_v26, 9  ;;  %v10879_v43 = vld [vmem:[%s13602_s15 + $0xbc] sm:$0x1] }
 0x1c6   : > { %12241 = vmatmul.mubr.msk.bf16.gmra.mrb[16].mxu0 %vm540_vm3, %v13322_v34  ;;  %v13333_v34 = vld [vmem:[%s16949_s1 + $0x110] sm:$0xff]  }
 0x1c7   : > { %12244 = vmatprep.mubr.msk.bf16.mxu0 %vm540_vm3, %v13324_v37  ;;  %v10862_v37 = vld [vmem:[%s13602_s15 + $0x78] sm:$0xe] }
 0x1ce   : > { %12245 = vmatmul.mubr.msk.bf16.gmra.mrb[20].mxu0 %vm540_vm3, %v13325_v40  ;;  %v10864_v40 = vld [vmem:[%s13602_s15 + $0x80] sm:$0x1] }
 0x1cf   : > { %12248 = vmatprep.mubr.msk.bf16.mxu0 %vm540_vm3, %v13326_v41  ;;  %v10919_v41 = vcombine.low %v3470_v4, %v3473_v13  ;;  %v3493_v32 = vrot.slane %v10864_v40, 5  ;;  %v3513_v4 = vrot.slane %v3511_v17, 4  ;;  %v3514_v13 = vrot.slane %v10873_v25, 5 }
 0x1d0   : > { %v3519_v40 = vsel %vm13604_vm2, %v10902_v36, %v3518_v29  ;;  %v14613_v29 = vld [vmem:[%s13602_s15 + $0xe8] sm:$0xf]  ;;  %v3946_v36 = vrot.slane %v14442_v42, 6 }
 0x1d6   : > { %12249 = vmatmul.mubr.msk.bf16.gmra.mrb[24].mxu0 %vm540_vm3, %v13327_v46  ;;  %v3486_v46 = vrot.slane %v10861_v38, 5  ;;  %v14572_v38 = vld [vmem:[%s13602_s15 + $0xc4] sm:$0xf] }
 0x1d7   : > { %12252 = vmatprep.mubr.msk.bf16.mxu0 %vm540_vm3, %v13329_v47  ;;  %v10898_v47 = vrot.slane %v10862_v37, 9  ;;  %v3525_v37 = vrot.slane %v14569_v16, 5 }
 0x1d8   : > { %v3487_v56 = vsel %vm13604_vm2, %v3485_v22, %v3486_v46  ;;  %v3532_v22 = vrot.slane %v14572_v38, 5  ;;  %v10880_v46 = vld [vmem:[%s13602_s15 + $0xc0] sm:$0xe] }
 0x1d9   : > { %v10921_v5 = vcombine.low %v3484_v48, %v3487_v56  ;;  %v3527_v48 = vrot.slane %v3525_v37, 4  ;;  %v3528_v56 = vrot.slane %v10879_v43, 5  ;;  %v10904_v28 = vrot.slane %v10880_v46, 9 }
 0x1da   : > { %v3948_v43 = vrot.slane %v3946_v36, 4 }
 0x1db   : > { %v3529_v62 = vsel %vm13604_vm2, %v3527_v48, %v3528_v56  ;;  %v10955_v48 = vld [vmem:[%s13602_s15 + $0x44] sm:$0x3]  ;;  %v3960_v56 = vrot.slane %v14455_v44, 6 }
 0x1de   : > { %12253 = vmatmul.mubr.msk.bf16.gmra.mrb[28].mxu0 %vm540_vm3, %v13330_v60  ;;  %v10867_v60 = vld [vmem:[%s13602_s15 + $0x8c] sm:$0x1] }
 0x1df   : > { %12264 = vmatprep.mubr.msk.bf16.mxu0 %vm540_vm3, %v10916_v61  ;;  %v3504_v61 = vrot.slane %v14528_v6, 5  ;;  %v3500_v9 = vrot.slane %v10867_v60, 5  ;;  %v14594_v60 = vld [vmem:[%s13602_s15 + $0xdc] sm:$0xf] }
 0x1e1   : > { %v3506_v0 = vrot.slane %v3504_v61, 4  ;;  %v3501_v15 = vsel %vm13604_vm2, %v3499_v58, %v3500_v9  ;;  %v3505_v18 = vsel %vm13604_vm2, %v10900_v12, %v3504_v61  ;;  %v10885_v58 = vld [vmem:[%s13602_s15 + $0xd4] sm:$0x1]  ;;  %v3546_v9 = vrot.slane %v14594_v60, 5  ;;  %v10886_v12 = vld [vmem:[%s13602_s15 + $0xd8] sm:$0xe] }
 0x1e2   : > { %v10923_v27 = vcombine.low %v3498_v14, %v3501_v15  ;;  %v10905_v15 = vrot.slane %v10883_v54, 9 }
 0x1e4   : > { %v3540_v26 = vsel %vm13604_vm2, %v10905_v15, %v3539_v2  ;;  %v3974_v15 = vrot.slane %v14474_v10, 6 }
 0x1e6   : > { %12265 = vmatmul.mubr.msk.bf16.vlgmr.msra.gmra.mrb[0].mxu0 %vm540_vm3, %v10917_v23  ;;  %v3508_v23 = vsel %vm13604_vm2, %v3506_v0, %v3507_v55  ;;  %v10888_v0 = vld [vmem:[%s13602_s15 + $0xe0] sm:$0x1] }
 0x1e7   : > { %12297 = vmatpush3.bf16.msra.mxu0 %v14424_v7  ;;  %12268 = vmatprep.mubr.msk.bf16.mxu0 %vm540_vm3, %v10918_v24  ;;  %v3490_v7 = vrot.slane %v14499_v20, 5  ;;  %v10871_v24 = vld [vmem:[%s13602_s15 + $0x9c] sm:$0xe]  ;;  %v10924_v30 = vcombine.low %v3505_v18, %v3508_v23  ;;  %v3542_v18 = vrot.slane %v10885_v58, 5  ;;  %v10906_v23 = vrot.slane %v10886_v12, 9 }
 0x1e8   : > { %12298 = vmatprep.subr.bf16.mxu0 %v13332_v33  ;;  %v3549_v25 = vrot.slane %v10888_v0, 5 }
 0x1e9   : > { %v3492_v49 = vrot.slane %v3490_v7, 4  ;;  %v3491_v57 = vsel %vm13604_vm2, %v10898_v47, %v3490_v7  ;;  %v10882_v47 = vld [vmem:[%s13602_s15 + $0xc8] sm:$0x1] }
 0x1eb   : > { %12299 = vmatpush3.bf16.msra.mxu0 %v13332_v33  ;;  %v3494_v11 = vsel %vm13604_vm2, %v3492_v49, %v3493_v32  ;;  %v10901_v33 = vrot.slane %v10871_v24, 9  ;;  %v3548_v24 = vrot.slane %v3546_v9, 4 }
 0x1ec   : > { %12300 = vmatprep.subr.bf16.mxu0 %v13333_v34  ;;  %v10922_v8 = vcombine.low %v3491_v57, %v3494_v11  ;;  %v3534_v57 = vrot.slane %v3532_v22, 4  ;;  %v3535_v11 = vrot.slane %v10882_v47, 5  ;;  %v3953_v47 = vrot.slane %v14452_v50, 6 }
 0x1ed   : > { %v3512_v7 = vsel %vm13604_vm2, %v10901_v33, %v3511_v17  ;;  %v3541_v17 = vrot.slane %v3539_v2, 4  ;;  %v3550_v33 = vsel %vm13604_vm2, %v3548_v24, %v3549_v25  ;;  %v3956_v50 = vrot.slane %v10955_v48, 6  ;;  %v10966_v48 = vld [vmem:[%s13602_s15 + $0x84] sm:$0xc] }
 0x1ee   : > { %12269 = vmatmul.mubr.msk.bf16.gmra.mrb[4].mxu0 %vm540_vm3, %v10919_v41  ;;  %v3522_v41 = vsel %vm13604_vm2, %v3520_v35, %v3521_v19  ;;  %v10952_v35 = vld [vmem:[%s13602_s15 + $0x30] sm:$0xc]  ;;  %v10953_v19 = vld [vmem:[%s13602_s15 + $0x38] sm:$0x3]  ;;  %v3955_v2 = vrot.slane %v3953_v47, 4 }
 0x1ef   : > { %12272 = vmatprep.mubr.msk.bf16.mxu0 %vm540_vm3, %v10920_v1  ;;  %12301 = vmatpush3.bf16.msra.mxu0 %v13333_v34  ;;  %v3515_v34 = vsel %vm13604_vm2, %v3513_v4, %v3514_v13  ;;  %v10877_v1 = vld [vmem:[%s13602_s15 + $0xb4] sm:$0xe]  ;;  %v10926_v32 = vcombine.low %v3519_v40, %v3522_v41  ;;  %v3543_v45 = vsel %vm13604_vm2, %v3541_v17, %v3542_v18  ;;  %v10889_v4 = vld [vmem:[%s13602_s15 + $0xe4] sm:$0xe]  ;;  %v10891_v13 = vld [vmem:[%s13602_s15 + $0xec] sm:$0x1] }
 0x1f0   : > { %12302 = vmatprep.subr.bf16.mxu0 %v13334_v53  ;;  %v10925_v49 = vcombine.low %v3512_v7, %v3515_v34  ;;  %v10929_v7 = vcombine.low %v3540_v26, %v3543_v45  ;;  %v3556_v41 = vrot.slane %v10891_v13, 5  ;;  %v3957_v58 = vsel %vm13866_vm6, %v3955_v2, %v3956_v50  ;;  %v10960_v17 = vld [vmem:[%s13602_s15 + $0x60] sm:$0xc]  ;;  %v10961_v18 = vld [vmem:[%s13602_s15 + $0x68] sm:$0x3] }
 0x1f1   : > { %v10988_v45 = vrot.slane %v10960_v17, 10  ;;  %v10991_v2 = vrot.slane %v10966_v48, 10  ;;  %v10973_v17 = vld [vmem:[%s13602_s15 + $0xb0] sm:$0x3] }
 0x1f3   : > { %12303 = vmatpush3.bf16.msra.mxu0 %v13334_v53  ;;  %v10903_v53 = vrot.slane %v10877_v1, 9  ;;  %v10984_v1 = vrot.slane %v10952_v35, 10  ;;  %v3975_v13 = vsel %vm13866_vm6, %v10988_v45, %v3974_v15  ;;  %v10962_v35 = vld [vmem:[%s13602_s15 + $0x6c] sm:$0xc]  ;;  %v4019_v45 = vrot.slane %v10973_v17, 6  ;;  %v13337_v17 = vld [vmem:[%s16951_s3 + $0x30] sm:$0xff]  }
 0x1f5   : > { %v3526_v61 = vsel %vm13604_vm2, %v10903_v53, %v3525_v37  ;;  %v10907_v37 = vrot.slane %v10889_v4, 9  ;;  %v10954_v53 = vld [vmem:[%s13602_s15 + $0x3c] sm:$0xc]  ;;  %v3981_v4 = vrot.slane %v14493_v31, 6 }
 0x1f6   : > { %12273 = vmatmul.mubr.msk.bf16.gmra.mrb[8].mxu0 %vm540_vm3, %v10921_v5  ;;  %v3533_v5 = vsel %vm13604_vm2, %v10904_v28, %v3532_v22  ;;  %v10927_v55 = vcombine.low %v3526_v61, %v3529_v62  ;;  %v3949_v22 = vrot.slane %v10953_v19, 6  ;;  %v10956_v28 = vld [vmem:[%s13602_s15 + $0x48] sm:$0xc]  ;;  %v10985_v62 = vrot.slane %v10954_v53, 10  ;;  %v10963_v19 = vld [vmem:[%s13602_s15 + $0x74] sm:$0x3] }
 0x1f7   : > { %12276 = vmatprep.mubr.msk.bf16.mxu0 %vm540_vm3, %v10922_v8  ;;  %v3536_v8 = vsel %vm13604_vm2, %v3534_v57, %v3535_v11  ;;  %v10957_v57 = vld [vmem:[%s13602_s15 + $0x50] sm:$0x3]  ;;  %v3984_v31 = vrot.slane %v10963_v19, 6  ;;  %v10977_v19 = vld [vmem:[%s13602_s15 + $0xc8] sm:$0x3] }
 0x1f8   : > { %v10928_v14 = vcombine.low %v3533_v5, %v3536_v8  ;;  %v10986_v5 = vrot.slane %v10956_v28, 10  ;;  %v3962_v8 = vrot.slane %v3960_v56, 4  ;;  %v3963_v54 = vrot.slane %v10957_v57, 6  ;;  %v10968_v57 = vld [vmem:[%s13602_s15 + $0x90] sm:$0xc] }
 0x1f9   : > { %v3954_v44 = vsel %vm13866_vm6, %v10985_v62, %v3953_v47  ;;  %v4002_v28 = vrot.slane %v14528_v6, 6 }
 0x1fa   : > { %v3961_v12 = vsel %vm13866_vm6, %v10986_v5, %v3960_v56  ;;  %v3964_v0 = vsel %vm13866_vm6, %v3962_v8, %v3963_v54  ;;  %v10967_v56 = vld [vmem:[%s13602_s15 + $0x8c] sm:$0x3]  ;;  %v10992_v5 = vrot.slane %v10968_v57, 10 }
 0x1fb   : > { %v11010_v24 = vcombine.low %v3961_v12, %v3964_v0  ;;  %v4004_v8 = vrot.slane %v4002_v28, 4  ;;  %v10970_v0 = vld [vmem:[%s13602_s15 + $0x9c] sm:$0xc] }
 0x1fe   : > { %12277 = vmatmul.mubr.msk.bf16.gmra.mrb[12].mxu0 %vm540_vm3, %v10923_v27  ;;  %v3553_v27 = vrot.slane %v14613_v29, 5 }
 0x1ff   : > { %12280 = vmatprep.mubr.msk.bf16.mxu0 %vm540_vm3, %v10924_v30  ;;  %v3547_v30 = vsel %vm13604_vm2, %v10906_v23, %v3546_v9  ;;  %v3967_v9 = vrot.slane %v14471_v63, 6  ;;  %v11009_v23 = vcombine.low %v3954_v44, %v3957_v58  ;;  %v4009_v58 = vrot.slane %v14547_v21, 6 }
 0x200   : > { %v10930_v34 = vcombine.low %v3547_v30, %v3550_v33  ;;  %v3555_v40 = vrot.slane %v3553_v27, 4  ;;  %v3554_v42 = vsel %vm13604_vm2, %v10907_v37, %v3553_v27  ;;  %v3976_v27 = vrot.slane %v3974_v15, 4  ;;  %v10965_v37 = vld [vmem:[%s13602_s15 + $0x80] sm:$0x3]  ;;  %v10972_v15 = vld [vmem:[%s13602_s15 + $0xa8] sm:$0xc] }
 0x201   : > { %v3969_v26 = vrot.slane %v3967_v9, 4  ;;  %v3977_v30 = vrot.slane %v10961_v18, 6 }
 0x202   : > { %v3557_v46 = vsel %vm13604_vm2, %v3555_v40, %v3556_v41 }
 0x203   : > { %v10931_v11 = vcombine.low %v3554_v42, %v3557_v46  ;;  %v3991_v46 = vrot.slane %v10965_v37, 6 }
 0x206   : > { %12281 = vmatmul.mubr.msk.bf16.gmra.mrb[16].mxu0 %vm540_vm3, %v10925_v49  ;;  %v3947_v49 = vsel %vm13866_vm6, %v10984_v1, %v3946_v36  ;;  %v3978_v36 = vsel %vm13866_vm6, %v3976_v27, %v3977_v30  ;;  %v10989_v1 = vrot.slane %v10962_v35, 10  ;;  %v4023_v30 = vrot.slane %v14569_v16, 6  ;;  %v10976_v35 = vld [vmem:[%s13602_s15 + $0xc0] sm:$0xc] }
 0x207   : > { %12284 = vmatprep.mubr.msk.bf16.mxu0 %vm540_vm3, %v10926_v32  ;;  %v3950_v32 = vsel %vm13866_vm6, %v3948_v43, %v3949_v22  ;;  %v11012_v41 = vcombine.low %v3975_v13, %v3978_v36  ;;  %v3983_v43 = vrot.slane %v3981_v4, 4  ;;  %v10975_v13 = vld [vmem:[%s13602_s15 + $0xbc] sm:$0x3]  ;;  %v4030_v36 = vrot.slane %v14572_v38, 6 }
 0x208   : > { %v11008_v61 = vcombine.low %v3947_v49, %v3950_v32  ;;  %v3995_v49 = vrot.slane %v14522_v39, 6  ;;  %v3998_v39 = vrot.slane %v10967_v56, 6  ;;  %v4026_v16 = vrot.slane %v10975_v13, 6 }
 0x209   : > { %v3985_v47 = vsel %vm13866_vm6, %v3983_v43, %v3984_v31  ;;  %v4033_v43 = vrot.slane %v10977_v19, 6 }
 0x20a   : > { %v3997_v50 = vrot.slane %v3995_v49, 4  ;;  %v3996_v6 = vsel %vm13866_vm6, %v10991_v2, %v3995_v49  ;;  %v4044_v49 = vrot.slane %v14594_v60, 6 }
 0x20c   : > { %v3999_v44 = vsel %vm13866_vm6, %v3997_v50, %v3998_v39  ;;  %v4051_v50 = vrot.slane %v14613_v29, 6 }
 0x20d   : > { %v11015_v18 = vcombine.low %v3996_v6, %v3999_v44 }
 0x20e   : > { %12285 = vmatmul.mubr.msk.bf16.gmra.mrb[20].mxu0 %vm540_vm3, %v10927_v55  ;;  %v10958_v55 = vld [vmem:[%s13602_s15 + $0x54] sm:$0xc] }
 0x20f   : > { %12288 = vmatprep.mubr.msk.bf16.mxu0 %vm540_vm3, %v10928_v14  ;;  %v10959_v14 = vld [vmem:[%s13602_s15 + $0x5c] sm:$0x3]  ;;  %v10987_v25 = vrot.slane %v10958_v55, 10  ;;  %v10971_v55 = vld [vmem:[%s13602_s15 + $0xa4] sm:$0x3] }
 0x210   : > { %v3970_v63 = vrot.slane %v10959_v14, 6  ;;  %v4016_v14 = vrot.slane %v14550_v59, 6  ;;  %v4012_v21 = vrot.slane %v10971_v55, 6 }
 0x211   : > { %v3968_v10 = vsel %vm13866_vm6, %v10987_v25, %v3967_v9  ;;  %v4003_v9 = vsel %vm13866_vm6, %v10992_v5, %v4002_v28  ;;  %v4011_v25 = vrot.slane %v4009_v58, 4 }
 0x212   : > { %v3971_v33 = vsel %vm13866_vm6, %v3969_v26, %v3970_v63  ;;  %v10994_v26 = vrot.slane %v10972_v15, 10  ;;  %v4018_v63 = vrot.slane %v4016_v14, 4  ;;  %v13336_v15 = vld [vmem:[%s16951_s3 + $0x28] sm:$0xff]  }
 0x213   : > { %v11011_v40 = vcombine.low %v3968_v10, %v3971_v33  ;;  %v4013_v27 = vsel %vm13866_vm6, %v4011_v25, %v4012_v21  ;;  %12338 = vmatprep.subr.bf16.mxu1 %v13336_v15 }
 0x214   : > { %v4017_v10 = vsel %vm13866_vm6, %v10994_v26, %v4016_v14  ;;  %v4020_v33 = vsel %vm13866_vm6, %v4018_v63, %v4019_v45  ;;  %v13506_v14 = vmov 0   ;;  %12339 = vmatpush3.bf16.msra.mxu1 %v13336_v15  ;;  %v13338_v63 = vld [vmem:[%s16951_s3 + $0x38] sm:$0xff]  }
 0x215   : > { %4457 = vst.msk [vmem:[#allocation2 + $0x18] sm:$0xf] %vm4449_vm7, %v13506_v14  ;;  %4450 = vst.msk [vmem:[#allocation2] sm:$0xf] %vm4449_vm7, %v13506_v14  ;;  %12340 = vmatprep.subr.bf16.mxu1 %v13337_v17 }
 0x216   : > { %12289 = vmatmul.mubr.msk.bf16.gmra.mrb[24].mxu0 %vm540_vm3, %v10929_v7  ;;  %v3988_v7 = vrot.slane %v14499_v20, 6  ;;  %v3982_v20 = vsel %vm13866_vm6, %v10989_v1, %v3981_v4  ;;  %v10974_v4 = vld [vmem:[%s13602_s15 + $0xb4] sm:$0xc]  ;;  %v4032_v1 = vrot.slane %v4030_v36, 4  ;;  %4451 = vst.msk [vmem:[#allocation2 + $0x4] sm:$0xf] %vm4449_vm7, %v13506_v14 }
 0x217   : > { %12292 = vmatprep.mubr.msk.bf16.mxu0 %vm540_vm3, %v10930_v34  ;;  %v10964_v34 = vld [vmem:[%s13602_s15 + $0x78] sm:$0xc]  ;;  %v10995_v37 = vrot.slane %v10974_v4, 10  ;;  %4454 = vst.msk [vmem:[#allocation2 + $0xc] sm:$0xf] %vm4449_vm7, %v13506_v14 }
 0x218   : > { %v10990_v22 = vrot.slane %v10964_v34, 10  ;;  %v3990_v42 = vrot.slane %v3988_v7, 4  ;;  %v11018_v34 = vcombine.low %v4017_v10, %v4020_v33  ;;  %4455 = vst.msk [vmem:[#allocation2 + $0x10] sm:$0xf] %vm4449_vm7, %v13506_v14  ;;  %4458 = vst.msk [vmem:[#allocation2 + $0x1c] sm:$0xf] %vm4449_vm7, %v13506_v14  ;;  %12341 = vmatpush3.bf16.msra.mxu1 %v13337_v17 }
 0x219   : > { %v4024_v38 = vsel %vm13866_vm6, %v10995_v37, %v4023_v30  ;;  %4460 = vst.msk [vmem:[#allocation2 + $0x24] sm:$0xf] %vm4449_vm7, %v13506_v14  ;;  %4461 = vst.msk [vmem:[#allocation2 + $0x28] sm:$0xf] %vm4449_vm7, %v13506_v14  ;;  %12342 = vmatprep.subr.bf16.mxu1 %v13338_v63 }
 0x21a   : > { %v3989_v32 = vsel %vm13866_vm6, %v10990_v22, %v3988_v7  ;;  %v3992_v53 = vsel %vm13866_vm6, %v3990_v42, %v3991_v46  ;;  %v4037_v22 = vrot.slane %v14591_v52, 6  ;;  %v4034_v46 = vsel %vm13866_vm6, %v4032_v1, %v4033_v43  ;;  %4463 = vst.msk [vmem:[#allocation2 + $0x30] sm:$0xf] %vm4449_vm7, %v13506_v14  ;;  %4464 = vst.msk [vmem:[#allocation2 + $0x34] sm:$0xf] %vm4449_vm7, %v13506_v14 }
 0x21b   : > { %v11014_v62 = vcombine.low %v3989_v32, %v3992_v53  ;;  %v10980_v32 = vld [vmem:[%s13602_s15 + $0xd8] sm:$0xc]  ;;  %v10981_v53 = vld [vmem:[%s13602_s15 + $0xe0] sm:$0x3]  ;;  %4466 = vst.msk [vmem:[#allocation2 + $0x3c] sm:$0xf] %vm4449_vm7, %v13506_v14 }
 0x21c   : > { %v4039_v57 = vrot.slane %v4037_v22, 4  ;;  %v10998_v52 = vrot.slane %v10980_v32, 10  ;;  %4467 = vst.msk [vmem:[#allocation2 + $0x40] sm:$0xf] %vm4449_vm7, %v13506_v14  ;;  %4469 = vst.msk [vmem:[#allocation2 + $0x48] sm:$0xf] %vm4449_vm7, %v13506_v14  ;;  %12343 = vmatpush3.bf16.msra.mxu1 %v13338_v63 }
 0x21d   : > { %4470 = vst.msk [vmem:[#allocation2 + $0x4c] sm:$0xf] %vm4449_vm7, %v13506_v14  ;;  %4472 = vst.msk [vmem:[#allocation2 + $0x54] sm:$0xf] %vm4449_vm7, %v13506_v14 }
 0x21e   : > { %12293 = vmatmul.mubr.msk.bf16.gmra.mrb[28].mxu0 %vm540_vm3, %v10931_v11  ;;  %v10969_v11 = vld [vmem:[%s13602_s15 + $0x98] sm:$0x3]  ;;  %v4045_v39 = vsel %vm13866_vm6, %v10998_v52, %v4044_v49  ;;  %4473 = vst.msk [vmem:[#allocation2 + $0x58] sm:$0xf] %vm4449_vm7, %v13506_v14  ;;  %4475 = vst.msk [vmem:[#allocation2 + $0x60] sm:$0xf] %vm4449_vm7, %v13506_v14 }
 0x21f   : > { %12304 = vmatprep.mubr.msk.bf16.mxu0 %vm540_vm3, %v11008_v61  ;;  %v11013_v61 = vcombine.low %v3982_v20, %v3985_v47  ;;  %v4005_v54 = vrot.slane %v10969_v11, 6  ;;  %v10978_v20 = vld [vmem:[%s13602_s15 + $0xcc] sm:$0xc]  ;;  %v10979_v47 = vld [vmem:[%s13602_s15 + $0xd4] sm:$0x3] }
 0x220   : > { %v10997_v28 = vrot.slane %v10978_v20, 10  ;;  %v4040_v11 = vrot.slane %v10979_v47, 6  ;;  %4476 = vst.msk [vmem:[#allocation2 + $0x64] sm:$0xf] %vm4449_vm7, %v13506_v14  ;;  %4478 = vst.msk [vmem:[#allocation2 + $0x6c] sm:$0xf] %vm4449_vm7, %v13506_v14 }
 0x221   : > { %v4006_v12 = vsel %vm13866_vm6, %v4004_v8, %v4005_v54  ;;  %v10982_v8 = vld [vmem:[%s13602_s15 + $0xe4] sm:$0xc]  ;;  %v10983_v54 = vld [vmem:[%s13602_s15 + $0xec] sm:$0x3]  ;;  %4479 = vst.msk [vmem:[#allocation2 + $0x70] sm:$0xf] %vm4449_vm7, %v13506_v14 }
 0x222   : > { %v4038_v2 = vsel %vm13866_vm6, %v10997_v28, %v4037_v22  ;;  %v4041_v60 = vsel %vm13866_vm6, %v4039_v57, %v4040_v11  ;;  %4481 = vst.msk [vmem:[#allocation2 + $0x78] sm:$0xf] %vm4449_vm7, %v13506_v14  ;;  %4482 = vst.msk [vmem:[#allocation2 + $0x7c] sm:$0xf] %vm4449_vm7, %v13506_v14 }
 0x223   : > { %v11021_v6 = vcombine.low %v4038_v2, %v4041_v60  ;;  %4484 = vst.msk [vmem:[#allocation2 + $0x84] sm:$0xf] %vm4449_vm7, %v13506_v14  ;;  %4485 = vst.msk [vmem:[#allocation2 + $0x88] sm:$0xf] %vm4449_vm7, %v13506_v14 }
 0x224   : > { %4487 = vst.msk [vmem:[#allocation2 + $0x90] sm:$0xf] %vm4449_vm7, %v13506_v14  ;;  %4488 = vst.msk [vmem:[#allocation2 + $0x94] sm:$0xf] %vm4449_vm7, %v13506_v14 }
 0x225   : > { %4490 = vst.msk [vmem:[#allocation2 + $0x9c] sm:$0xf] %vm4449_vm7, %v13506_v14  ;;  %4491 = vst.msk [vmem:[#allocation2 + $0xa0] sm:$0xf] %vm4449_vm7, %v13506_v14 }
 0x226   : > { %12305 = vmatmul.mubr.msk.bf16.vlgmr.msra.gmra.mrb[0].mxu0 %vm540_vm3, %v11009_v23  ;;  %v11016_v23 = vcombine.low %v4003_v9, %v4006_v12  ;;  %v4053_v9 = vrot.slane %v4051_v50, 4  ;;  %v4054_v12 = vrot.slane %v10983_v54, 6  ;;  %4493 = vst.msk [vmem:[#allocation2 + $0xa8] sm:$0xf] %vm4449_vm7, %v13506_v14  ;;  %4494 = vst.msk [vmem:[#allocation2 + $0xac] sm:$0xf] %vm4449_vm7, %v13506_v14 }
 0x227   : > { %12308 = vmatprep.mubr.msk.bf16.mxu0 %vm540_vm3, %v11010_v24  ;;  %v10993_v24 = vrot.slane %v10970_v0, 10  ;;  %4496 = vst.msk [vmem:[#allocation2 + $0xb4] sm:$0xf] %vm4449_vm7, %v13506_v14  ;;  %4497 = vst.msk [vmem:[#allocation2 + $0xb8] sm:$0xf] %vm4449_vm7, %v13506_v14 }
 0x228   : > { %v4055_v0 = vsel %vm13866_vm6, %v4053_v9, %v4054_v12  ;;  %4499 = vst.msk [vmem:[#allocation2 + $0xc0] sm:$0xf] %vm4449_vm7, %v13506_v14  ;;  %4500 = vst.msk [vmem:[#allocation2 + $0xc4] sm:$0xf] %vm4449_vm7, %v13506_v14 }
 0x229   : > { %v4010_v59 = vsel %vm13866_vm6, %v10993_v24, %v4009_v58  ;;  %v10999_v58 = vrot.slane %v10982_v8, 10  ;;  %4502 = vst.msk [vmem:[#allocation2 + $0xcc] sm:$0xf] %vm4449_vm7, %v13506_v14  ;;  %4503 = vst.msk [vmem:[#allocation2 + $0xd0] sm:$0xf] %vm4449_vm7, %v13506_v14 }
 0x22a   : > { %v11017_v7 = vcombine.low %v4010_v59, %v4013_v27  ;;  %4459 = vst.msk [vmem:[#allocation2 + $0x20] sm:$0x1] %vm4452_vm8, %v13506_v14  ;;  %4453 = vst.msk [vmem:[#allocation2 + $0x8] sm:$0x1] %vm4452_vm8, %v13506_v14 }
 0x22b   : > { %v4052_v29 = vsel %vm13866_vm6, %v10999_v58, %v4051_v50  ;;  %4456 = vst.msk [vmem:[#allocation2 + $0x14] sm:$0x1] %vm4452_vm8, %v13506_v14  ;;  %4462 = vst.msk [vmem:[#allocation2 + $0x2c] sm:$0x1] %vm4452_vm8, %v13506_v14 }
 0x22c   : > { %v11023_v55 = vcombine.low %v4052_v29, %v4055_v0  ;;  %4465 = vst.msk [vmem:[#allocation2 + $0x38] sm:$0x1] %vm4452_vm8, %v13506_v14  ;;  %4468 = vst.msk [vmem:[#allocation2 + $0x44] sm:$0x1] %vm4452_vm8, %v13506_v14 }
 0x22d   : > { %4471 = vst.msk [vmem:[#allocation2 + $0x50] sm:$0x1] %vm4452_vm8, %v13506_v14  ;;  %4474 = vst.msk [vmem:[#allocation2 + $0x5c] sm:$0x1] %vm4452_vm8, %v13506_v14 }
 0x22e   : > { %12309 = vmatmul.mubr.msk.bf16.gmra.mrb[4].mxu0 %vm540_vm3, %v11011_v40  ;;  %v4025_v40 = vrot.slane %v4023_v30, 4  ;;  %4477 = vst.msk [vmem:[#allocation2 + $0x68] sm:$0x1] %vm4452_vm8, %v13506_v14  ;;  %4480 = vst.msk [vmem:[#allocation2 + $0x74] sm:$0x1] %vm4452_vm8, %v13506_v14 }
 0x22f   : > { %12312 = vmatprep.mubr.msk.bf16.mxu0 %vm540_vm3, %v11012_v41  ;;  %v10996_v41 = vrot.slane %v10976_v35, 10  ;;  %4483 = vst.msk [vmem:[#allocation2 + $0x80] sm:$0x1] %vm4452_vm8, %v13506_v14  ;;  %4486 = vst.msk [vmem:[#allocation2 + $0x8c] sm:$0x1] %vm4452_vm8, %v13506_v14 }
 0x230   : > { %v4027_v31 = vsel %vm13866_vm6, %v4025_v40, %v4026_v16  ;;  %4489 = vst.msk [vmem:[#allocation2 + $0x98] sm:$0x1] %vm4452_vm8, %v13506_v14  ;;  %4492 = vst.msk [vmem:[#allocation2 + $0xa4] sm:$0x1] %vm4452_vm8, %v13506_v14  ;;  %v14841_v16 = vld [vmem:[%s16951_s3] sm:$0xff]  }
 0x231   : > { %v4031_v42 = vsel %vm13866_vm6, %v10996_v41, %v4030_v36  ;;  %v11019_v48 = vcombine.low %v4024_v38, %v4027_v31  ;;  %4495 = vst.msk [vmem:[#allocation2 + $0xb0] sm:$0x1] %vm4452_vm8, %v13506_v14  ;;  %4498 = vst.msk [vmem:[#allocation2 + $0xbc] sm:$0x1] %vm4452_vm8, %v13506_v14  ;;  %v5082_v30 = vld [vmem:[#allocation2 + $0x8] sm:$0x1]  ;;  %12376 = vmatprep.subr.bf16.mxu1 %v14841_v16 }
 0x232   : > { %v11020_v56 = vcombine.low %v4031_v42, %v4034_v46  ;;  %4501 = vst.msk [vmem:[#allocation2 + $0xc8] sm:$0x1] %vm4452_vm8, %v13506_v14  ;;  %4504 = vst.msk [vmem:[#allocation2 + $0xd4] sm:$0x1] %vm4452_vm8, %v13506_v14  ;;  %v5121_v13 = vshll.u32 %v5082_v30, 16 }
 0x233   : > { %v14847_v41 = vld [vmem:[%s16950_s2] ss:$0 sm:$0xff]  ;;  %v4928_v14 = vld [vmem:[#allocation2 + $0xc] sm:$0xf]  ;;  %v4934_v30 = vld [vmem:[#allocation2 + $0x14] sm:$0x1] }
 0x236   : > { %12313 = vmatmul.mubr.msk.bf16.gmra.mrb[8].mxu0 %vm540_vm3, %v11013_v61  ;;  %v4046_v61 = vrot.slane %v4044_v49, 4 }
 0x237   : > { %12316 = vmatprep.mubr.msk.bf16.mxu0 %vm540_vm3, %v11014_v62  ;;  %v4047_v62 = vrot.slane %v10981_v53, 6 }
 0x239   : > { %v4048_v5 = vsel %vm13866_vm6, %v4046_v61, %v4047_v62 }
 0x23a   : > { %v11022_v44 = vcombine.low %v4045_v39, %v4048_v5 }
 0x23e   : > { %12317 = vmatmul.mubr.msk.bf16.gmra.mrb[12].mxu0 %vm540_vm3, %v11015_v18  ;;  %v5042_v18 = vld [vmem:[#allocation2] sm:$0xf] }
 0x23f   : > { %12320 = vmatprep.mubr.msk.bf16.mxu0 %vm540_vm3, %v11016_v23  ;;  %v5043_v23 = vld [vmem:[#allocation2 + $0x4] sm:$0xf]  ;;  %v5102_v24 = vshrl.u32 %v5042_v18, 16  ;;  %v5105_v25 = vshll.u32 %v5042_v18, 16 }
 0x240   : > { %v5111_v21 = vshll.u32 %v5043_v23, 16  ;;  %v5115_v26 = vshrl.u32 %v5043_v23, 16 }
 0x241   : > { %v5104_v45 = vrot.slane %v5102_v24, 4  ;;  %v5107_v59 = vrot.slane %v5105_v25, 5 }
 0x242   : > { %v5113_v27 = vrot.slane %v5111_v21, 5  ;;  %v5117_v10 = vrot.slane %v5115_v26, 4  ;;  %v4941_v21 = vld [vmem:[#allocation2 + $0x20] sm:$0x1] }
 0x243   : > { %v5108_v33 = vor.u32 %v5107_v59, %v5104_v45 }
 0x244   : > { %v5118_v4 = vor.u32 %v5117_v10, %v5113_v27 }
 0x245   : > { %v5109_v36 = vrot.slane %v5108_v33, 4 }
 0x246   : > { %12321 = vmatmul.mubr.msk.bf16.gmra.mrb[16].mxu0 %vm540_vm3, %v11017_v7  ;;  %v5119_v19 = vrot.slane %v5118_v4, 4  ;;  %v5123_v7 = vrot.slane %v5121_v13, 5 }
 0x247   : > { %12324 = vmatprep.mubr.msk.bf16.mxu0 %vm540_vm3, %v11018_v34  ;;  %v5114_v34 = vsel %vm14829_vm11, %v5109_v36, %v5113_v27 }
 0x248   : > { %v5124_v37 = vsel %vm14829_vm11, %v5119_v19, %v5123_v7 }
 0x249   : > { %v11085_v40 = vcombine.low %v5114_v34, %v5124_v37 }
 0x24b   : > { %12344 = vmatprep.mubr.msk.bf16.mxu1 %vm540_vm3, %v11085_v40 }
 0x24e   : > { %12325 = vmatmul.mubr.msk.bf16.gmra.mrb[20].mxu0 %vm540_vm3, %v11019_v48 }
 0x24f   : > { %12328 = vmatprep.mubr.msk.bf16.mxu0 %vm540_vm3, %v11020_v56 }
 0x256   : > { %12329 = vmatmul.mubr.msk.bf16.gmra.mrb[24].mxu0 %vm540_vm3, %v11021_v6  ;;  %v4937_v6 = vld [vmem:[#allocation2 + $0x18] sm:$0xf] }
 0x257   : > { %12332 = vmatprep.mubr.msk.bf16.mxu0 %vm540_vm3, %v11022_v44 }
 0x25e   : > { %12333 = vmatmul.mubr.msk.bf16.gmra.mrb[28].mxu0 %vm540_vm3, %v11023_v55 }
 0x2f9   : > { %v12306_v1 = vpop.f32.mrb[0].mxu0 }
 0x2fa   : > { %v4387_v43 = vadd.f32 %v12306_v1, %v14847_v41  ;;  %v4219_v38 = vpop.f32.mrb[1].mxu0 }
 0x2fb   : > { %v4385_v31 = vadd.f32 %v14847_v41, %v4219_v38  ;;  %v12307_v22 = vpop.f32.mrb[2].mxu0 }
 0x2fc   : > { %v4419_v42 = vmax.f32 %v4387_v43, 0.0  ;;  %v4388_v46 = vadd.f32 %v12307_v22, %v14847_v41  ;;  %v4222_v20 = vpop.f32.mrb[3].mxu0 }
 0x2fd   : > { %v4417_v47 = vmax.f32 %v4385_v31, 0.0  ;;  %v4386_v49 = vadd.f32 %v14847_v41, %v4222_v20 }
 0x2fe   : > { %v11585_v32 = vpack.c.bf16 %v4419_v42, %v4419_v42  ;;  %v4420_v53 = vmax.f32 %v4388_v46, 0.0 }
 0x2ff   : > { %v11583_v48 = vpack.c.bf16 %v4417_v47, %v4417_v47  ;;  %v4418_v56 = vmax.f32 %v4386_v49, 0.0  ;;  %v4951_v47 = vld [vmem:[#allocation2 + $0x30] sm:$0xf] }
 0x300   : > { %v4622_v28 = vshrl.u32 %v11585_v32, 16  ;;  %v11586_v57 = vpack.c.bf16 %v4420_v53, %v4420_v53  ;;  %v4625_v11 = vshll.u32 %v11585_v32, 16 }
 0x301   : > { %v4605_v52 = vshrl.u32 %v11583_v48, 16  ;;  %v4608_v61 = vshll.u32 %v11583_v48, 16  ;;  %v11584_v62 = vpack.c.bf16 %v4418_v56, %v4418_v56  ;;  %v12310_v2 = vpop.f32.mrb[4].mxu0 }
 0x302   : > { %v4624_v60 = vrot.slane %v4622_v28, 7  ;;  %v4630_v50 = vshrl.u32 %v11586_v57, 16  ;;  %v4633_v39 = vshll.u32 %v11586_v57, 16  ;;  %v4391_v5 = vadd.f32 %v12310_v2, %v14847_v41  ;;  %v4235_v8 = vpop.f32.mrb[5].mxu0  ;;  %v4944_v57 = vld [vmem:[#allocation2 + $0x24] sm:$0xf] }
 0x303   : > { %v4607_v44 = vrot.slane %v4605_v52, 7  ;;  %v4613_v58 = vshrl.u32 %v11584_v62, 16  ;;  %v4616_v9 = vshll.u32 %v11584_v62, 16  ;;  %v4389_v12 = vadd.f32 %v14847_v41, %v4235_v8  ;;  %v12311_v29 = vpop.f32.mrb[6].mxu0 }
 0x304   : > { %v4627_v0 = vor.u32 %v4625_v11, %v4624_v60  ;;  %v4628_v55 = vrot.slane %v4624_v60, 4  ;;  %v4632_v15 = vrot.slane %v4630_v50, 7  ;;  %v4423_v17 = vmax.f32 %v4391_v5, 0.0  ;;  %v4238_v18 = vpop.f32.mrb[7].mxu0 }
 0x305   : > { %v4610_v23 = vor.u32 %v4608_v61, %v4607_v44  ;;  %v4611_v24 = vrot.slane %v4607_v44, 4  ;;  %v4615_v26 = vrot.slane %v4613_v58, 7  ;;  %v4421_v63 = vmax.f32 %v4389_v12, 0.0 }
 0x306   : > { %v4938_v45 = vsel %vm14856_vm15, %v4627_v0, %v4937_v6  ;;  %v4635_v59 = vor.u32 %v4633_v39, %v4632_v15  ;;  %v4637_v27 = vrot.slane %v4632_v15, 4  ;;  %v11589_v10 = vpack.c.bf16 %v4423_v17, %v4423_v17  ;;  %v4955_v15 = vld [vmem:[#allocation2 + $0x38] sm:$0x1]  ;;  %v4948_v17 = vld [vmem:[#allocation2 + $0x2c] sm:$0x1] }
 0x307   : > { %4939 = vst [vmem:[#allocation2 + $0x18] sm:$0xf] %v4938_v45  ;;  %v4929_v33 = vsel %vm14856_vm15, %v4610_v23, %v4928_v14  ;;  %v4618_v4 = vor.u32 %v4616_v9, %v4615_v26  ;;  %v4620_v13 = vrot.slane %v4615_v26, 4  ;;  %v11587_v36 = vpack.c.bf16 %v4421_v63, %v4421_v63 }
 0x308   : > { %4930 = vst [vmem:[#allocation2 + $0xc] sm:$0xf] %v4929_v33  ;;  %v4636_v19 = vsel %vm14863_vm0, %v4628_v55, %v4635_v59  ;;  %v4942_v7 = vsel %vm14869_vm1, %v4637_v27, %v4941_v21  ;;  %v4656_v34 = vshrl.u32 %v11589_v10, 16  ;;  %v4659_v1 = vshll.u32 %v11589_v10, 16  ;;  %v4965_v33 = vld [vmem:[#allocation2 + $0x48] sm:$0xf] }
 0x309   : > { %4940 = vst.msk [vmem:[#allocation2 + $0x1c] sm:$0xf] %vm4449_vm7, %v4636_v19  ;;  %4943 = vst [vmem:[#allocation2 + $0x20] sm:$0x1] %v4942_v7  ;;  %v4619_v37 = vsel %vm14863_vm0, %v4611_v24, %v4618_v4  ;;  %v4935_v40 = vsel %vm14869_vm1, %v4620_v13, %v4934_v30  ;;  %v4639_v43 = vshrl.u32 %v11587_v36, 16  ;;  %v12314_v38 = vpop.f32.mrb[8].mxu0  ;;  %v4392_v22 = vadd.f32 %v12311_v29, %v14847_v41 }
 0x30a   : > { %4931 = vst.msk [vmem:[#allocation2 + $0x10] sm:$0xf] %vm4449_vm7, %v4619_v37  ;;  %4936 = vst [vmem:[#allocation2 + $0x14] sm:$0x1] %v4935_v40  ;;  %v14887_v31 = vrot.slane %v4656_v34, 7  ;;  %v4390_v42 = vadd.f32 %v14847_v41, %v4238_v18  ;;  %v4395_v46 = vadd.f32 %v12314_v38, %v14847_v41  ;;  %v4251_v20 = vpop.f32.mrb[9].mxu0 }
 0x30b   : > { %v4641_v49 = vrot.slane %v4639_v43, 7  ;;  %v4642_v32 = vshll.u32 %v11587_v36, 16  ;;  %v4393_v53 = vadd.f32 %v14847_v41, %v4251_v20  ;;  %v12315_v48 = vpop.f32.mrb[10].mxu0  ;;  %v4424_v11 = vmax.f32 %v4392_v22, 0.0 }
 0x30c   : > { %v4661_v56 = vor.u32 %v4659_v1, %v14887_v31  ;;  %v4662_v28 = vrot.slane %v14887_v31, 4  ;;  %v4422_v52 = vmax.f32 %v4390_v42, 0.0  ;;  %v4254_v61 = vpop.f32.mrb[11].mxu0  ;;  %v4427_v60 = vmax.f32 %v4395_v46, 0.0  ;;  %v4958_v1 = vld [vmem:[#allocation2 + $0x3c] sm:$0xf] }
 0x30d   : > { %v4644_v62 = vor.u32 %v4642_v32, %v4641_v49  ;;  %v4645_v2 = vrot.slane %v4641_v49, 4  ;;  %v4425_v50 = vmax.f32 %v4393_v53, 0.0  ;;  %v11590_v5 = vpack.c.bf16 %v4424_v11, %v4424_v11 }
 0x30e   : > { %v4952_v39 = vsel %vm14856_vm15, %v4661_v56, %v4951_v47  ;;  %v11588_v8 = vpack.c.bf16 %v4422_v52, %v4422_v52  ;;  %v4396_v6 = vadd.f32 %v12315_v48, %v14847_v41  ;;  %v11593_v58 = vpack.c.bf16 %v4427_v60, %v4427_v60 }
 0x30f   : > { %4953 = vst [vmem:[#allocation2 + $0x30] sm:$0xf] %v4952_v39  ;;  %v4945_v44 = vsel %vm14856_vm15, %v4644_v62, %v4944_v57  ;;  %v11591_v9 = vpack.c.bf16 %v4425_v50, %v4425_v50  ;;  %v4394_v12 = vadd.f32 %v14847_v41, %v4254_v61  ;;  %v4664_v29 = vshrl.u32 %v11590_v5, 16  ;;  %v4969_v39 = vld [vmem:[#allocation2 + $0x50] sm:$0x1] }
 0x310   : > { %4946 = vst [vmem:[#allocation2 + $0x24] sm:$0xf] %v4945_v44  ;;  %v4667_v0 = vshll.u32 %v11590_v5, 16  ;;  %v4647_v55 = vshrl.u32 %v11588_v8, 16  ;;  %v4650_v14 = vshll.u32 %v11588_v8, 16  ;;  %v4690_v18 = vshrl.u32 %v11593_v58, 16 }
 0x311   : > { %v4693_v23 = vshll.u32 %v11593_v58, 16  ;;  %v4673_v24 = vshrl.u32 %v11591_v9, 16  ;;  %v4676_v21 = vshll.u32 %v11591_v9, 16  ;;  %v12318_v26 = vpop.f32.mrb[12].mxu0  ;;  %v4666_v63 = vrot.slane %v4664_v29, 7 }
 0x312   : > { %v4649_v45 = vrot.slane %v4647_v55, 7  ;;  %v4428_v59 = vmax.f32 %v4396_v6, 0.0  ;;  %v4426_v27 = vmax.f32 %v4394_v12, 0.0  ;;  %v4267_v30 = vpop.f32.mrb[13].mxu0  ;;  %v14901_v10 = vrot.slane %v4690_v18, 7 }
 0x313   : > { %v14903_v4 = vrot.slane %v4673_v24, 7  ;;  %v4399_v13 = vadd.f32 %v12318_v26, %v14847_v41  ;;  %v4397_v36 = vadd.f32 %v14847_v41, %v4267_v30  ;;  %v12319_v19 = vpop.f32.mrb[14].mxu0  ;;  %v4669_v7 = vor.u32 %v4667_v0, %v4666_v63  ;;  %v4962_v29 = vld [vmem:[#allocation2 + $0x44] sm:$0x1] }
 0x314   : > { %v4671_v34 = vrot.slane %v4666_v63, 4  ;;  %v4652_v37 = vor.u32 %v4650_v14, %v4649_v45  ;;  %v4654_v40 = vrot.slane %v4649_v45, 4  ;;  %v4270_v43 = vpop.f32.mrb[15].mxu0  ;;  %v4695_v38 = vor.u32 %v4693_v23, %v14901_v10 }
 0x315   : > { %v4696_v31 = vrot.slane %v14901_v10, 4  ;;  %v4678_v22 = vor.u32 %v4676_v21, %v14903_v4  ;;  %v4679_v42 = vrot.slane %v14903_v4, 4  ;;  %v4670_v46 = vsel %vm14863_vm0, %v4662_v28, %v4669_v7  ;;  %v4972_v7 = vld [vmem:[#allocation2 + $0x54] sm:$0xf] }
 0x316   : > { %v4956_v20 = vsel %vm14869_vm1, %v4671_v34, %v4955_v15  ;;  %v4653_v47 = vsel %vm14863_vm0, %v4645_v2, %v4652_v37  ;;  %v4949_v49 = vsel %vm14869_vm1, %v4654_v40, %v4948_v17  ;;  %4954 = vst.msk [vmem:[#allocation2 + $0x34] sm:$0xf] %vm4449_vm7, %v4670_v46  ;;  %v4966_v32 = vsel %vm14856_vm15, %v4695_v38, %v4965_v33 }
 0x317   : > { %4957 = vst [vmem:[#allocation2 + $0x38] sm:$0x1] %v4956_v20  ;;  %4947 = vst.msk [vmem:[#allocation2 + $0x28] sm:$0xf] %vm4449_vm7, %v4653_v47  ;;  %v4959_v53 = vsel %vm14856_vm15, %v4678_v22, %v4958_v1  ;;  %v11594_v48 = vpack.c.bf16 %v4428_v59, %v4428_v59  ;;  %v11592_v56 = vpack.c.bf16 %v4426_v27, %v4426_v27  ;;  %v4431_v28 = vmax.f32 %v4399_v13, 0.0 }
 0x318   : > { %4950 = vst [vmem:[#allocation2 + $0x2c] sm:$0x1] %v4949_v49  ;;  %4967 = vst [vmem:[#allocation2 + $0x48] sm:$0xf] %v4966_v32  ;;  %v4429_v57 = vmax.f32 %v4397_v36, 0.0  ;;  %v4400_v11 = vadd.f32 %v12319_v19, %v14847_v41  ;;  %v4398_v52 = vadd.f32 %v14847_v41, %v4270_v43 }
 0x319   : > { %4960 = vst [vmem:[#allocation2 + $0x3c] sm:$0xf] %v4959_v53  ;;  %v4698_v61 = vshrl.u32 %v11594_v48, 16  ;;  %v4701_v62 = vshll.u32 %v11594_v48, 16  ;;  %v4681_v2 = vshrl.u32 %v11592_v56, 16  ;;  %v4684_v60 = vshll.u32 %v11592_v56, 16 }
 0x31a   : > { %v12322_v50 = vpop.f32.mrb[16].mxu0  ;;  %v11597_v5 = vpack.c.bf16 %v4431_v28, %v4431_v28  ;;  %v11595_v8 = vpack.c.bf16 %v4429_v57, %v4429_v57  ;;  %v4432_v6 = vmax.f32 %v4400_v11, 0.0  ;;  %v4430_v44 = vmax.f32 %v4398_v52, 0.0  ;;  %v4979_v19 = vld [vmem:[#allocation2 + $0x60] sm:$0xf] }
 0x31b   : > { %v4283_v58 = vpop.f32.mrb[17].mxu0  ;;  %v4700_v9 = vrot.slane %v4698_v61, 7  ;;  %v4683_v12 = vrot.slane %v4681_v2, 7  ;;  %v4403_v0 = vadd.f32 %v12322_v50, %v14847_v41  ;;  %v5044_v43 = vld [vmem:[#allocation2 + $0xc] sm:$0xf] }
 0x31c   : > { %v4401_v55 = vadd.f32 %v14847_v41, %v4283_v58  ;;  %v12323_v14 = vpop.f32.mrb[18].mxu0  ;;  %v4724_v15 = vshrl.u32 %v11597_v5, 16  ;;  %v4727_v17 = vshll.u32 %v11597_v5, 16  ;;  %v4707_v18 = vshrl.u32 %v11595_v8, 16  ;;  %v4983_v49 = vld [vmem:[#allocation2 + $0x68] sm:$0x1] }
 0x31d   : > { %v4710_v23 = vshll.u32 %v11595_v8, 16  ;;  %v4286_v24 = vpop.f32.mrb[19].mxu0  ;;  %v4703_v21 = vor.u32 %v4701_v62, %v4700_v9  ;;  %v4705_v26 = vrot.slane %v4700_v9, 4  ;;  %v4686_v63 = vor.u32 %v4684_v60, %v4683_v12  ;;  %v4976_v32 = vld [vmem:[#allocation2 + $0x5c] sm:$0x1] }
 0x31e   : > { %v4688_v45 = vrot.slane %v4683_v12, 4  ;;  %v4726_v59 = vrot.slane %v4724_v15, 7  ;;  %v4709_v27 = vrot.slane %v4707_v18, 7  ;;  %v11598_v30 = vpack.c.bf16 %v4432_v6, %v4432_v6  ;;  %v5045_v60 = vld [vmem:[#allocation2 + $0x10] sm:$0xf] }
 0x31f   : > { %v11596_v10 = vpack.c.bf16 %v4430_v44, %v4430_v44  ;;  %v4704_v33 = vsel %vm14863_vm0, %v4696_v31, %v4703_v21  ;;  %v4970_v4 = vsel %vm14869_vm1, %v4705_v26, %v4969_v39  ;;  %v4687_v13 = vsel %vm14863_vm0, %v4679_v42, %v4686_v63  ;;  %v4993_v18 = vld [vmem:[#allocation2 + $0x78] sm:$0xf] }
 0x320   : > { %v4963_v36 = vsel %vm14869_vm1, %v4688_v45, %v4962_v29  ;;  %4968 = vst.msk [vmem:[#allocation2 + $0x4c] sm:$0xf] %vm4449_vm7, %v4704_v33  ;;  %4971 = vst [vmem:[#allocation2 + $0x50] sm:$0x1] %v4970_v4  ;;  %v4729_v34 = vor.u32 %v4727_v17, %v4726_v59  ;;  %v4730_v37 = vrot.slane %v4726_v59, 4  ;;  %v4712_v40 = vor.u32 %v4710_v23, %v4709_v27 }
 0x321   : > { %4961 = vst.msk [vmem:[#allocation2 + $0x40] sm:$0xf] %vm4449_vm7, %v4687_v13  ;;  %4964 = vst [vmem:[#allocation2 + $0x44] sm:$0x1] %v4963_v36  ;;  %v4713_v1 = vrot.slane %v4709_v27, 4  ;;  %v4732_v38 = vshrl.u32 %v11598_v30, 16  ;;  %v4404_v11 = vadd.f32 %v12323_v14, %v14847_v41  ;;  %v4402_v52 = vadd.f32 %v14847_v41, %v4286_v24 }
 0x322   : > { %v4735_v31 = vshll.u32 %v11598_v30, 16  ;;  %v4715_v22 = vshrl.u32 %v11596_v10, 16  ;;  %v4718_v42 = vshll.u32 %v11596_v10, 16  ;;  %v14939_v46 = vpop.f32.mrb[20].mxu0  ;;  %v4980_v20 = vsel %vm14856_vm15, %v4729_v34, %v4979_v19  ;;  %v4986_v23 = vld [vmem:[#allocation2 + $0x6c] sm:$0xf] }
 0x323   : > { %v4973_v47 = vsel %vm14856_vm15, %v4712_v40, %v4972_v7  ;;  %v4435_v53 = vmax.f32 %v4403_v0, 0.0  ;;  %v4433_v48 = vmax.f32 %v4401_v55, 0.0  ;;  %v14945_v56 = vpop.f32.mrb[21].mxu0  ;;  %4981 = vst [vmem:[#allocation2 + $0x60] sm:$0xf] %v4980_v20  ;;  %v4734_v28 = vrot.slane %v4732_v38, 7 }
 0x324   : > { %4974 = vst [vmem:[#allocation2 + $0x54] sm:$0xf] %v4973_v47  ;;  %v4717_v57 = vrot.slane %v4715_v22, 7  ;;  %v14949_v61 = vpop.f32.mrb[22].mxu0  ;;  %v5126_v50 = vshrl.u32 %v5044_v43, 16  ;;  %v5129_v39 = vshll.u32 %v5044_v43, 16 }
 0x325   : > { %v11601_v62 = vpack.c.bf16 %v4435_v53, %v4435_v53  ;;  %v11599_v2 = vpack.c.bf16 %v4433_v48, %v4433_v48  ;;  %v14951_v5 = vpop.f32.mrb[23].mxu0  ;;  %v4737_v8 = vor.u32 %v4735_v31, %v4734_v28  ;;  %v4739_v6 = vrot.slane %v4734_v28, 4  ;;  %v5083_v45 = vld [vmem:[#allocation2 + $0x14] sm:$0x1]  ;;  %v5046_v40 = vld [vmem:[#allocation2 + $0x18] sm:$0xf] }
 0x326   : > { %v4720_v44 = vor.u32 %v4718_v42, %v4717_v57  ;;  %v4722_v58 = vrot.slane %v4717_v57, 4  ;;  %v4436_v26 = vmax.f32 %v4404_v11, 0.0  ;;  %v4434_v63 = vmax.f32 %v4402_v52, 0.0  ;;  %v5047_v42 = vld [vmem:[#allocation2 + $0x1c] sm:$0xf] }
 0x327   : > { %v4758_v9 = vshrl.u32 %v11601_v62, 16  ;;  %v4761_v12 = vshll.u32 %v11601_v62, 16  ;;  %v4741_v29 = vshrl.u32 %v11599_v2, 16  ;;  %v4744_v0 = vshll.u32 %v11599_v2, 16  ;;  %v4997_v62 = vld [vmem:[#allocation2 + $0x80] sm:$0x1] }
 0x328   : > { %v4738_v55 = vsel %vm14863_vm0, %v4730_v37, %v4737_v8  ;;  %v4984_v14 = vsel %vm14869_vm1, %v4739_v6, %v4983_v49  ;;  %v4721_v15 = vsel %vm14863_vm0, %v4713_v1, %v4720_v44  ;;  %v4977_v17 = vsel %vm14869_vm1, %v4722_v58, %v4976_v32 }
 0x329   : > { %4982 = vst.msk [vmem:[#allocation2 + $0x64] sm:$0xf] %vm4449_vm7, %v4738_v55  ;;  %4985 = vst [vmem:[#allocation2 + $0x68] sm:$0x1] %v4984_v14  ;;  %v4760_v24 = vrot.slane %v4758_v9, 7  ;;  %v4743_v21 = vrot.slane %v4741_v29, 7  ;;  %v11602_v19 = vpack.c.bf16 %v4436_v26, %v4436_v26  ;;  %v11600_v7 = vpack.c.bf16 %v4434_v63, %v4434_v63 }
 0x32a   : > { %4975 = vst.msk [vmem:[#allocation2 + $0x58] sm:$0xf] %vm4449_vm7, %v4721_v15  ;;  %4978 = vst [vmem:[#allocation2 + $0x5c] sm:$0x1] %v4977_v17  ;;  %v5128_v59 = vrot.slane %v5126_v50, 4  ;;  %v5131_v27 = vrot.slane %v5129_v39, 5 }
 0x32b   : > { %v5135_v30 = vshll.u32 %v5045_v60, 16  ;;  %v5139_v10 = vshrl.u32 %v5045_v60, 16  ;;  %v14963_v33 = vpop.f32.mrb[24].mxu0  ;;  %v4763_v4 = vor.u32 %v4761_v12, %v4760_v24  ;;  %v4746_v13 = vor.u32 %v4744_v0, %v4743_v21  ;;  %v4990_v39 = vld [vmem:[#allocation2 + $0x74] sm:$0x1] }
 0x32c   : > { %v14965_v36 = vpop.f32.mrb[25].mxu0  ;;  %v5132_v34 = vor.u32 %v5131_v27, %v5128_v59  ;;  %v5145_v22 = vshll.u32 %v5083_v45, 16  ;;  %v4764_v47 = vrot.slane %v4760_v24, 4  ;;  %v4747_v49 = vrot.slane %v4743_v21, 4  ;;  %v5084_v55 = vld [vmem:[#allocation2 + $0x20] sm:$0x1] }
 0x32d   : > { %v5137_v37 = vrot.slane %v5135_v30, 5  ;;  %v14967_v1 = vpop.f32.mrb[26].mxu0  ;;  %v4994_v43 = vsel %vm14856_vm15, %v4763_v4, %v4993_v18  ;;  %v4987_v38 = vsel %vm14856_vm15, %v4746_v13, %v4986_v23  ;;  %v5141_v31 = vrot.slane %v5139_v10, 4  ;;  %v5048_v24 = vld [vmem:[#allocation2 + $0x24] sm:$0xf] }
 0x32e   : > { %v14973_v20 = vpop.f32.mrb[27].mxu0  ;;  %4995 = vst [vmem:[#allocation2 + $0x78] sm:$0xf] %v4994_v43  ;;  %4988 = vst [vmem:[#allocation2 + $0x6c] sm:$0xf] %v4987_v38  ;;  %v4766_v32 = vshrl.u32 %v11602_v19, 16  ;;  %v4406_v43 = vadd.f32 %v14847_v41, %v14951_v5 }
 0x32f   : > { %v4749_v53 = vshrl.u32 %v11600_v7, 16  ;;  %v4769_v48 = vshll.u32 %v11602_v19, 16  ;;  %v4752_v28 = vshll.u32 %v11600_v7, 16  ;;  %v5133_v57 = vrot.slane %v5132_v34, 4  ;;  %v13340_v19 = vld [vmem:[%s16951_s3 + $0x8] sm:$0xff]  }
 0x330   : > { %v5142_v11 = vor.u32 %v5141_v31, %v5137_v37  ;;  %v4768_v52 = vrot.slane %v4766_v32, 7  ;;  %v5147_v60 = vrot.slane %v5145_v22, 5  ;;  %v5150_v50 = vshrl.u32 %v5046_v40, 16  ;;  %v15008_v38 = vld [vmem:[#allocation2 + $0x28] sm:$0xf] }
 0x331   : > { %v4751_v2 = vrot.slane %v4749_v53, 7  ;;  %v5138_v8 = vsel %vm14829_vm11, %v5133_v57, %v5137_v37  ;;  %v5153_v44 = vshll.u32 %v5046_v40, 16  ;;  %v5159_v58 = vshll.u32 %v5047_v42, 16  ;;  %v14977_v14 = vpop.f32.mrb[28].mxu0 }
 0x332   : > { %v5143_v6 = vrot.slane %v5142_v11, 4  ;;  %v4771_v9 = vor.u32 %v4769_v48, %v4768_v52  ;;  %v4773_v12 = vrot.slane %v4768_v52, 4  ;;  %v5152_v17 = vrot.slane %v5150_v50, 4  ;;  %v14981_v21 = vpop.f32.mrb[29].mxu0 }
 0x333   : > { %v4754_v29 = vor.u32 %v4752_v28, %v4751_v2  ;;  %v4756_v0 = vrot.slane %v4751_v2, 4  ;;  %v5155_v18 = vrot.slane %v5153_v44, 5  ;;  %v5161_v23 = vrot.slane %v5159_v58, 5  ;;  %v14991_v27 = vpop.f32.mrb[30].mxu0 }
 0x334   : > { %v5148_v15 = vsel %vm14829_vm11, %v5143_v6, %v5147_v60  ;;  %v4772_v26 = vsel %vm14863_vm0, %v4764_v47, %v4771_v9  ;;  %v4998_v63 = vsel %vm14869_vm1, %v4773_v12, %v4997_v62  ;;  %v5163_v4 = vshrl.u32 %v5047_v42, 16  ;;  %v14998_v7 = vpop.f32.mrb[31].mxu0  ;;  %v5007_v9 = vld [vmem:[#allocation2 + $0x90] sm:$0xf]  ;;  %v5000_v12 = vld [vmem:[#allocation2 + $0x84] sm:$0xf] }
 0x335   : > { %v4755_v45 = vsel %vm14863_vm0, %v4747_v49, %v4754_v29  ;;  %v4991_v59 = vsel %vm14869_vm1, %v4756_v0, %v4990_v39  ;;  %4996 = vst.msk [vmem:[#allocation2 + $0x7c] sm:$0xf] %vm4449_vm7, %v4772_v26  ;;  %4999 = vst [vmem:[#allocation2 + $0x80] sm:$0x1] %v4998_v63  ;;  %v11086_v30 = vcombine.low %v5138_v8, %v5148_v15  ;;  %v5169_v13 = vshll.u32 %v5084_v55, 16  ;;  %v13342_v15 = vld [vmem:[%s16951_s3 + $0x18] sm:$0xff]  }
 0x336   : > { %4989 = vst.msk [vmem:[#allocation2 + $0x70] sm:$0xf] %vm4449_vm7, %v4755_v45  ;;  %4992 = vst [vmem:[#allocation2 + $0x74] sm:$0x1] %v4991_v59  ;;  %v5156_v10 = vor.u32 %v5155_v18, %v5152_v17  ;;  %v4407_v34 = vadd.f32 %v14939_v46, %v14847_v41  ;;  %v4405_v37 = vadd.f32 %v14847_v41, %v14945_v56  ;;  %v5165_v22 = vrot.slane %v5163_v4, 4  ;;  %v13341_v46 = vld [vmem:[%s16951_s3 + $0x10] sm:$0xff]  }
 0x337   : > { %v4408_v40 = vadd.f32 %v14949_v61, %v14847_v41  ;;  %12345 = vmatmul.mubr.msk.bf16.vlgmr.msra.gmra.mrb[0].mxu1 %vm540_vm3, %v11086_v30  ;;  %v5171_v42 = vrot.slane %v5169_v13, 5  ;;  %v5174_v47 = vshrl.u32 %v5048_v24, 16  ;;  %v4438_v32 = vmax.f32 %v4406_v43, 0.0  ;;  %v5004_v63 = vld [vmem:[#allocation2 + $0x8c] sm:$0x1] }
 0x338   : > { %v5157_v31 = vrot.slane %v5156_v10, 4  ;;  %12377 = vmatpush3.bf16.msra.mxu1 %v14841_v16  ;;  %v4439_v56 = vmax.f32 %v4407_v34, 0.0  ;;  %v4437_v49 = vmax.f32 %v4405_v37, 0.0  ;;  %v5166_v53 = vor.u32 %v5165_v22, %v5161_v23  ;;  %v15024_v4 = vld [vmem:[#allocation2 + $0x30] sm:$0xf] }
 0x339   : > { %v4440_v61 = vmax.f32 %v4408_v40, 0.0  ;;  %v5176_v48 = vrot.slane %v5174_v47, 4  ;;  %v5177_v28 = vshll.u32 %v5048_v24, 16  ;;  %12378 = vmatprep.subr.bf16.mxu1 %v13340_v19  ;;  %v11604_v62 = vpack.c.bf16 %v4438_v32, %v4438_v32  ;;  %v5011_v24 = vld [vmem:[#allocation2 + $0x98] sm:$0x1]  ;;  %v15030_v47 = vld [vmem:[%s16951_s3 + $0x40] sm:$0xff]  }
 0x33a   : > { %v5162_v5 = vsel %vm14829_vm11, %v5157_v31, %v5161_v23  ;;  %v11605_v57 = vpack.c.bf16 %v4439_v56, %v4439_v56  ;;  %v11603_v11 = vpack.c.bf16 %v4437_v49, %v4437_v49  ;;  %v5167_v2 = vrot.slane %v5166_v53, 4  ;;  %v15152_v54 = vld [vmem:[#allocation2 + $0x6c] sm:$0xf] }
 0x33b   : > { %v11606_v52 = vpack.c.bf16 %v4440_v61, %v4440_v61  ;;  %v5179_v60 = vrot.slane %v5177_v28, 5  ;;  %v5183_v50 = vshll.u32 %v15008_v38, 16  ;;  %v5187_v16 = vshrl.u32 %v15008_v38, 16 }
 0x33c   : > { %v4792_v39 = vshrl.u32 %v11605_v57, 16  ;;  %v4795_v8 = vshll.u32 %v11605_v57, 16  ;;  %v4775_v6 = vshrl.u32 %v11603_v11, 16  ;;  %v4778_v44 = vshll.u32 %v11603_v11, 16  ;;  %12379 = vmatpush3.bf16.msra.mxu1 %v13340_v19 }
 0x33d   : > { %v5172_v58 = vsel %vm14829_vm11, %v5167_v2, %v5171_v42  ;;  %v4800_v29 = vshrl.u32 %v11606_v52, 16  ;;  %v4803_v0 = vshll.u32 %v11606_v52, 16  ;;  %v4783_v55 = vshrl.u32 %v11604_v62, 16  ;;  %12380 = vmatprep.subr.bf16.mxu1 %v13341_v46  ;;  %v5085_v42 = vld [vmem:[#allocation2 + $0x2c] sm:$0x1] }
 0x33e   : > { %v11087_v17 = vcombine.low %v5162_v5, %v5172_v58  ;;  %v4794_v18 = vrot.slane %v4792_v39, 7  ;;  %v4777_v23 = vrot.slane %v4775_v6, 7  ;;  %v4786_v26 = vshll.u32 %v11604_v62, 16  ;;  %v5086_v5 = vld [vmem:[#allocation2 + $0x38] sm:$0x1] }
 0x33f   : > { %v4802_v45 = vrot.slane %v4800_v29, 7  ;;  %v4785_v59 = vrot.slane %v4783_v55, 7  ;;  %v5180_v30 = vor.u32 %v5179_v60, %v5176_v48  ;;  %v5185_v10 = vrot.slane %v5183_v50, 5  ;;  %v15057_v55 = vld [vmem:[#allocation2 + $0x3c] sm:$0xf] }
 0x340   : > { %12348 = vmatprep.mubr.msk.bf16.mxu1 %vm540_vm3, %v11087_v17  ;;  %v4797_v13 = vor.u32 %v4795_v8, %v4794_v18  ;;  %v4798_v19 = vrot.slane %v4794_v18, 4  ;;  %v4780_v34 = vor.u32 %v4778_v44, %v4777_v23  ;;  %v4781_v37 = vrot.slane %v4777_v23, 4  ;;  %12381 = vmatpush3.bf16.msra.mxu1 %v13341_v46  ;;  %v15036_v46 = vld [vmem:[#allocation2 + $0x34] sm:$0xf] }
 0x341   : > { %v4805_v40 = vor.u32 %v4803_v0, %v4802_v45  ;;  %v4807_v43 = vrot.slane %v4802_v45, 4  ;;  %v4788_v31 = vor.u32 %v4786_v26, %v4785_v59  ;;  %v4790_v22 = vrot.slane %v4785_v59, 4  ;;  %12382 = vmatprep.subr.bf16.mxu1 %v13342_v15 }
 0x342   : > { %v5008_v56 = vsel %vm14856_vm15, %v4797_v13, %v5007_v9  ;;  %v5001_v49 = vsel %vm14856_vm15, %v4780_v34, %v5000_v12  ;;  %v5181_v61 = vrot.slane %v5180_v30, 4  ;;  %v5189_v32 = vrot.slane %v5187_v16, 4 }
 0x343   : > { %5009 = vst [vmem:[#allocation2 + $0x90] sm:$0xf] %v5008_v56  ;;  %5002 = vst [vmem:[#allocation2 + $0x84] sm:$0xf] %v5001_v49  ;;  %v4806_v53 = vsel %vm14863_vm0, %v4798_v19, %v4805_v40  ;;  %v5012_v48 = vsel %vm14869_vm1, %v4807_v43, %v5011_v24  ;;  %v4789_v28 = vsel %vm14863_vm0, %v4781_v37, %v4788_v31  ;;  %v5193_v62 = vshll.u32 %v5085_v42, 16 }
 0x344   : > { %v5005_v57 = vsel %vm14869_vm1, %v4790_v22, %v5004_v63  ;;  %5010 = vst.msk [vmem:[#allocation2 + $0x94] sm:$0xf] %vm4449_vm7, %v4806_v53  ;;  %5013 = vst [vmem:[#allocation2 + $0x98] sm:$0x1] %v5012_v48  ;;  %v5186_v11 = vsel %vm14829_vm11, %v5181_v61, %v5185_v10  ;;  %v5190_v52 = vor.u32 %v5189_v32, %v5185_v10  ;;  %v5198_v2 = vshrl.u32 %v15024_v4, 16 }
 0x345   : > { %5003 = vst.msk [vmem:[#allocation2 + $0x88] sm:$0xf] %vm4449_vm7, %v4789_v28  ;;  %5006 = vst [vmem:[#allocation2 + $0x8c] sm:$0x1] %v5005_v57  ;;  %12383 = vmatpush3.bf16.msra.mxu1 %v13342_v15  ;;  %v5201_v60 = vshll.u32 %v15024_v4, 16  ;;  %v5207_v50 = vshll.u32 %v15036_v46, 16  ;;  %v4411_v58 = vadd.f32 %v14963_v33, %v14847_v41  ;;  %v4409_v18 = vadd.f32 %v14847_v41, %v14965_v36 }
 0x346   : > { %v5211_v16 = vshrl.u32 %v15036_v46, 16  ;;  %v5217_v39 = vshll.u32 %v5086_v5, 16  ;;  %12416 = vmatprep.subr.bf16.mxu1 %v15030_v47  ;;  %v5191_v8 = vrot.slane %v5190_v52, 4  ;;  %v5195_v6 = vrot.slane %v5193_v62, 5  ;;  %v15074_v5 = vld [vmem:[#allocation2 + $0x40] sm:$0xf] }
 0x347   : > { %v5200_v44 = vrot.slane %v5198_v2, 4  ;;  %v5203_v9 = vrot.slane %v5201_v60, 5  ;;  %v5209_v12 = vrot.slane %v5207_v50, 5  ;;  %v4443_v17 = vmax.f32 %v4411_v58, 0.0  ;;  %v5014_v53 = vld [vmem:[#allocation2 + $0x9c] sm:$0xf] }
 0x348   : > { %v5213_v29 = vrot.slane %v5211_v16, 4  ;;  %v5219_v0 = vrot.slane %v5217_v39, 5  ;;  %v5196_v15 = vsel %vm14829_vm11, %v5191_v8, %v5195_v6  ;;  %v4412_v23 = vadd.f32 %v14967_v1, %v14847_v41  ;;  %v5025_v60 = vld [vmem:[#allocation2 + $0xb0] sm:$0x1]  ;;  %v5018_v50 = vld [vmem:[#allocation2 + $0xa4] sm:$0x1] }
 0x349   : > { %v11088_v24 = vcombine.low %v5186_v11, %v5196_v15  ;;  %v5204_v26 = vor.u32 %v5203_v9, %v5200_v44  ;;  %v4410_v33 = vadd.f32 %v14847_v41, %v14973_v20  ;;  %v11609_v45 = vpack.c.bf16 %v4443_v17, %v4443_v17  ;;  %v5021_v20 = vld [vmem:[#allocation2 + $0xa8] sm:$0xf] }
 0x34a   : > { %v5214_v63 = vor.u32 %v5213_v29, %v5209_v12  ;;  %v4441_v59 = vmax.f32 %v4409_v18, 0.0  ;;  %v4444_v30 = vmax.f32 %v4412_v23, 0.0  ;;  %v5222_v10 = vshrl.u32 %v15057_v55, 16  ;;  %v15079_v58 = vld [vmem:[#allocation2 + $0x48] sm:$0xf] }
 0x34b   : > { %12349 = vmatmul.mubr.msk.bf16.gmra.mrb[4].mxu1 %vm540_vm3, %v11088_v24  ;;  %v5205_v13 = vrot.slane %v5204_v26, 4  ;;  %v4442_v34 = vmax.f32 %v4410_v33, 0.0  ;;  %v5225_v36 = vshll.u32 %v15057_v55, 16  ;;  %v4826_v37 = vshrl.u32 %v11609_v45, 16  ;;  %v15085_v26 = vld [vmem:[#allocation2 + $0x4c] sm:$0xf] }
 0x34c   : > { %v5215_v19 = vrot.slane %v5214_v63, 4  ;;  %v4829_v1 = vshll.u32 %v11609_v45, 16  ;;  %v11607_v40 = vpack.c.bf16 %v4441_v59, %v4441_v59  ;;  %v11610_v43 = vpack.c.bf16 %v4444_v30, %v4444_v30  ;;  %v15089_v30 = vld [vmem:[#allocation2 + $0x50] sm:$0x1] }
 0x34d   : > { %v5210_v31 = vsel %vm14829_vm11, %v5205_v13, %v5209_v12  ;;  %v11608_v22 = vpack.c.bf16 %v4442_v34, %v4442_v34  ;;  %v5224_v42 = vrot.slane %v5222_v10, 4  ;;  %v4828_v49 = vrot.slane %v4826_v37, 7 }
 0x34e   : > { %v5220_v41 = vsel %vm14829_vm11, %v5215_v19, %v5219_v0  ;;  %v4809_v61 = vshrl.u32 %v11607_v40, 16  ;;  %v4812_v32 = vshll.u32 %v11607_v40, 16  ;;  %v4834_v48 = vshrl.u32 %v11610_v43, 16  ;;  %v15083_v0 = vld [vmem:[#allocation2 + $0x44] sm:$0x1] }
 0x34f   : > { %v11089_v56 = vcombine.low %v5210_v31, %v5220_v41  ;;  %v4837_v28 = vshll.u32 %v11610_v43, 16  ;;  %v4817_v57 = vshrl.u32 %v11608_v22, 16  ;;  %v4820_v11 = vshll.u32 %v11608_v22, 16 }
 0x350   : > { %v4831_v52 = vor.u32 %v4829_v1, %v4828_v49  ;;  %v4832_v62 = vrot.slane %v4828_v49, 4  ;;  %v4811_v2 = vrot.slane %v4809_v61, 7  ;;  %v5227_v16 = vrot.slane %v5225_v36, 5  ;;  %v13412_v49 = vld [vmem:[%s16950_s2] ss:$0 sm:$0xff] }
 0x351   : > { %12352 = vmatprep.mubr.msk.bf16.mxu1 %vm540_vm3, %v11089_v56  ;;  %v4836_v39 = vrot.slane %v4834_v48, 7  ;;  %v4819_v8 = vrot.slane %v4817_v57, 7  ;;  %v5231_v6 = vshll.u32 %v15074_v5, 16  ;;  %v5235_v44 = vshrl.u32 %v15074_v5, 16  ;;  %v15113_v57 = vld [vmem:[#allocation2 + $0x54] sm:$0xf] }
 0x352   : > { %v5022_v9 = vsel %vm14856_vm15, %v4831_v52, %v5021_v20  ;;  %v4814_v12 = vor.u32 %v4812_v32, %v4811_v2  ;;  %v4815_v29 = vrot.slane %v4811_v2, 4  ;;  %v5228_v15 = vor.u32 %v5227_v16, %v5224_v42 }
 0x353   : > { %5023 = vst [vmem:[#allocation2 + $0xa8] sm:$0xf] %v5022_v9  ;;  %v4839_v17 = vor.u32 %v4837_v28, %v4836_v39  ;;  %v4841_v18 = vrot.slane %v4836_v39, 4  ;;  %v4822_v23 = vor.u32 %v4820_v11, %v4819_v8  ;;  %v4824_v24 = vrot.slane %v4819_v8, 4 }
 0x354   : > { %v5015_v63 = vsel %vm14856_vm15, %v4814_v12, %v5014_v53  ;;  %v5229_v33 = vrot.slane %v5228_v15, 4  ;;  %v5233_v45 = vrot.slane %v5231_v6, 5  ;;  %v5237_v59 = vrot.slane %v5235_v44, 4 }
 0x355   : > { %5016 = vst [vmem:[#allocation2 + $0x9c] sm:$0xf] %v5015_v63  ;;  %v4840_v10 = vsel %vm14863_vm0, %v4832_v62, %v4839_v17  ;;  %v5026_v13 = vsel %vm14869_vm1, %v4841_v18, %v5025_v60  ;;  %v4823_v19 = vsel %vm14863_vm0, %v4815_v29, %v4822_v23  ;;  %v5019_v34 = vsel %vm14869_vm1, %v4824_v24, %v5018_v50  ;;  %v5035_v24 = vld [vmem:[#allocation2 + $0xc0] sm:$0xf] }
 0x356   : > { %5024 = vst.msk [vmem:[#allocation2 + $0xac] sm:$0xf] %vm4449_vm7, %v4840_v10  ;;  %5027 = vst [vmem:[#allocation2 + $0xb0] sm:$0x1] %v5026_v13  ;;  %v5234_v36 = vsel %vm14829_vm11, %v5229_v33, %v5233_v45  ;;  %v5238_v37 = vor.u32 %v5237_v59, %v5233_v45  ;;  %v5241_v1 = vshll.u32 %v15083_v0, 16  ;;  %v5246_v40 = vshrl.u32 %v15079_v58, 16 }
 0x357   : > { %5017 = vst.msk [vmem:[#allocation2 + $0xa0] sm:$0xf] %vm4449_vm7, %v4823_v19  ;;  %5020 = vst [vmem:[#allocation2 + $0xa4] sm:$0x1] %v5019_v34  ;;  %v5249_v43 = vshll.u32 %v15079_v58, 16  ;;  %v5255_v31 = vshll.u32 %v15085_v26, 16  ;;  %v4415_v61 = vadd.f32 %v13412_v49, %v14977_v14  ;;  %v4413_v62 = vadd.f32 %v13412_v49, %v14981_v21 }
 0x358   : > { %v5259_v41 = vshrl.u32 %v15085_v26, 16  ;;  %v5265_v20 = vshll.u32 %v15089_v30, 16  ;;  %v5239_v22 = vrot.slane %v5238_v37, 4  ;;  %v5243_v42 = vrot.slane %v5241_v1, 5  ;;  %v15127_v33 = vld [vmem:[#allocation2 + $0x58] sm:$0xf] }
 0x359   : > { %v5248_v56 = vrot.slane %v5246_v40, 4  ;;  %v5251_v32 = vrot.slane %v5249_v43, 5  ;;  %v5257_v53 = vrot.slane %v5255_v31, 5  ;;  %v4447_v52 = vmax.f32 %v4415_v61, 0.0  ;;  %v5028_v34 = vld [vmem:[#allocation2 + $0xb4] sm:$0xf] }
 0x35a   : > { %v5261_v48 = vrot.slane %v5259_v41, 4  ;;  %v5267_v28 = vrot.slane %v5265_v20, 5  ;;  %v5244_v11 = vsel %vm14829_vm11, %v5239_v22, %v5243_v42  ;;  %v4416_v2 = vadd.f32 %v13412_v49, %v14991_v27  ;;  %v5039_v42 = vld [vmem:[#allocation2 + $0xc8] sm:$0x1] }
 0x35b   : > { %v11090_v60 = vcombine.low %v5234_v36, %v5244_v11  ;;  %v5252_v50 = vor.u32 %v5251_v32, %v5248_v56  ;;  %v4414_v39 = vadd.f32 %v13412_v49, %v14998_v7  ;;  %v11613_v14 = vpack.c.bf16 %v4447_v52, %v4447_v52  ;;  %v15134_v52 = vld [vmem:[#allocation2 + $0x60] sm:$0xf] }
 0x35c   : > { %v5262_v16 = vor.u32 %v5261_v48, %v5257_v53  ;;  %v4445_v8 = vmax.f32 %v4413_v62, 0.0  ;;  %v4448_v6 = vmax.f32 %v4416_v2, 0.0  ;;  %v5270_v44 = vshrl.u32 %v15113_v57, 16 }
 0x35d   : > { %12353 = vmatmul.mubr.msk.bf16.gmra.mrb[8].mxu1 %vm540_vm3, %v11090_v60  ;;  %v5253_v9 = vrot.slane %v5252_v50, 4  ;;  %v4446_v29 = vmax.f32 %v4414_v39, 0.0  ;;  %v5273_v15 = vshll.u32 %v15113_v57, 16  ;;  %v4860_v21 = vshrl.u32 %v11613_v14, 16  ;;  %v15138_v39 = vld [vmem:[#allocation2 + $0x64] sm:$0xf] }
 0x35e   : > { %v5263_v12 = vrot.slane %v5262_v16, 4  ;;  %v4863_v17 = vshll.u32 %v11613_v14, 16  ;;  %v11611_v27 = vpack.c.bf16 %v4445_v8, %v4445_v8  ;;  %v11614_v18 = vpack.c.bf16 %v4448_v6, %v4448_v6  ;;  %v15136_v16 = vld [vmem:[#allocation2 + $0x5c] sm:$0x1] }
 0x35f   : > { %v5258_v23 = vsel %vm14829_vm11, %v5253_v9, %v5257_v53  ;;  %v11612_v63 = vpack.c.bf16 %v4446_v29, %v4446_v29  ;;  %v5272_v45 = vrot.slane %v5270_v44, 4  ;;  %v4862_v10 = vrot.slane %v4860_v21, 7  ;;  %v15142_v9 = vld [vmem:[#allocation2 + $0x68] sm:$0x1] }
 0x360   : > { %v5268_v7 = vsel %vm14829_vm11, %v5263_v12, %v5267_v28  ;;  %v4843_v13 = vshrl.u32 %v11611_v27, 16  ;;  %v4846_v19 = vshll.u32 %v11611_v27, 16  ;;  %v4868_v36 = vshrl.u32 %v11614_v18, 16  ;;  %v5032_v28 = vld [vmem:[#allocation2 + $0xbc] sm:$0x1] }
 0x361   : > { %v11091_v59 = vcombine.low %v5258_v23, %v5268_v7  ;;  %v4871_v37 = vshll.u32 %v11614_v18, 16  ;;  %v4851_v1 = vshrl.u32 %v11612_v63, 16  ;;  %v4854_v40 = vshll.u32 %v11612_v63, 16 }
 0x362   : > { %v4865_v43 = vor.u32 %v4863_v17, %v4862_v10  ;;  %v4866_v31 = vrot.slane %v4862_v10, 4  ;;  %v4845_v41 = vrot.slane %v4843_v13, 7  ;;  %v5275_v20 = vrot.slane %v5273_v15, 5  ;;  %v15154_v17 = vld [vmem:[#allocation2 + $0x70] sm:$0xf] }
 0x363   : > { %12356 = vmatprep.mubr.msk.bf16.mxu1 %vm540_vm3, %v11091_v59  ;;  %v4870_v22 = vrot.slane %v4868_v36, 7  ;;  %v4853_v56 = vrot.slane %v4851_v1, 7  ;;  %v5279_v49 = vshll.u32 %v15127_v33, 16  ;;  %v5283_v61 = vshrl.u32 %v15127_v33, 16 }
 0x364   : > { %v5036_v32 = vsel %vm14856_vm15, %v4865_v43, %v5035_v24  ;;  %v4848_v53 = vor.u32 %v4846_v19, %v4845_v41  ;;  %v4849_v48 = vrot.slane %v4845_v41, 4  ;;  %v5276_v11 = vor.u32 %v5275_v20, %v5272_v45  ;;  %v15167_v19 = vld [vmem:[#allocation2 + $0x78] sm:$0xf] }
 0x365   : > { %5037 = vst [vmem:[#allocation2 + $0xc0] sm:$0xf] %v5036_v32  ;;  %v4873_v62 = vor.u32 %v4871_v37, %v4870_v22  ;;  %v4875_v2 = vrot.slane %v4870_v22, 4  ;;  %v4856_v60 = vor.u32 %v4854_v40, %v4853_v56  ;;  %v4858_v50 = vrot.slane %v4853_v56, 4  ;;  %v15169_v40 = vld [vmem:[#allocation2 + $0x74] sm:$0x1] }
 0x366   : > { %v5029_v14 = vsel %vm14856_vm15, %v4848_v53, %v5028_v34  ;;  %v5277_v8 = vrot.slane %v5276_v11, 4  ;;  %v5281_v6 = vrot.slane %v5279_v49, 5  ;;  %v5285_v44 = vrot.slane %v5283_v61, 4  ;;  %v15176_v61 = vld [vmem:[#allocation2 + $0x7c] sm:$0xf] }
 0x367   : > { %5030 = vst [vmem:[#allocation2 + $0xb4] sm:$0xf] %v5029_v14  ;;  %v4874_v12 = vsel %vm14863_vm0, %v4866_v31, %v4873_v62  ;;  %v5040_v29 = vsel %vm14869_vm1, %v4875_v2, %v5039_v42  ;;  %v4857_v15 = vsel %vm14863_vm0, %v4849_v48, %v4856_v60  ;;  %v5033_v21 = vsel %vm14869_vm1, %v4858_v50, %v5032_v28  ;;  %v15181_v60 = vld [vmem:[#allocation2 + $0x80] sm:$0x1] }
 0x368   : > { %5038 = vst.msk [vmem:[#allocation2 + $0xc4] sm:$0xf] %vm4449_vm7, %v4874_v12  ;;  %5041 = vst [vmem:[#allocation2 + $0xc8] sm:$0x1] %v5040_v29  ;;  %v5282_v27 = vsel %vm14829_vm11, %v5277_v8, %v5281_v6  ;;  %v5286_v18 = vor.u32 %v5285_v44, %v5281_v6  ;;  %v5289_v51 = vshll.u32 %v15136_v16, 16  ;;  %v5294_v23 = vshrl.u32 %v15134_v52, 16 }
 0x369   : > { %5031 = vst.msk [vmem:[#allocation2 + $0xb8] sm:$0xf] %vm4449_vm7, %v4857_v15  ;;  %5034 = vst [vmem:[#allocation2 + $0xbc] sm:$0x1] %v5033_v21  ;;  %v5297_v25 = vshll.u32 %v15134_v52, 16  ;;  %v5303_v7 = vshll.u32 %v15138_v39, 16 }
 0x36a   : > { %v5307_v24 = vshrl.u32 %v15138_v39, 16  ;;  %v5313_v63 = vshll.u32 %v15142_v9, 16  ;;  %v5287_v45 = vrot.slane %v5286_v18, 4  ;;  %v5291_v59 = vrot.slane %v5289_v51, 5  ;;  %v15185_v12 = vld [vmem:[#allocation2 + $0x84] sm:$0xf] }
 0x36b   : > { %v5296_v10 = vrot.slane %v5294_v23, 4  ;;  %v5318_v13 = vshrl.u32 %v15152_v54, 16  ;;  %v5299_v34 = vrot.slane %v5297_v25, 5  ;;  %v5305_v36 = vrot.slane %v5303_v7, 5  ;;  %v15191_v18 = vld [vmem:[#allocation2 + $0x88] sm:$0xf] }
 0x36c   : > { %v5309_v37 = vrot.slane %v5307_v24, 4  ;;  %v5315_v1 = vrot.slane %v5313_v63, 5  ;;  %v5292_v43 = vsel %vm14829_vm11, %v5287_v45, %v5291_v59  ;;  %v5321_v41 = vshll.u32 %v15152_v54, 16  ;;  %v15194_v24 = vld [vmem:[#allocation2 + $0x8c] sm:$0x1] }
 0x36d   : > { %v5320_v31 = vrot.slane %v5318_v13, 4  ;;  %v5327_v20 = vshll.u32 %v15154_v17, 16  ;;  %v11092_v22 = vcombine.low %v5282_v27, %v5292_v43  ;;  %v5300_v42 = vor.u32 %v5299_v34, %v5296_v10 }
 0x36e   : > { %v5310_v56 = vor.u32 %v5309_v37, %v5305_v36  ;;  %v5331_v49 = vshrl.u32 %v15154_v17, 16  ;;  %v5323_v32 = vrot.slane %v5321_v41, 5  ;;  %v5337_v48 = vshll.u32 %v15169_v40, 16 }
 0x36f   : > { %v5329_v53 = vrot.slane %v5327_v20, 5  ;;  %v5342_v28 = vshrl.u32 %v15167_v19, 16  ;;  %12357 = vmatmul.mubr.msk.bf16.gmra.mrb[12].mxu1 %vm540_vm3, %v11092_v22  ;;  %v5301_v11 = vrot.slane %v5300_v42, 4  ;;  %v5345_v50 = vshll.u32 %v15167_v19, 16  ;;  %v15207_v22 = vld [vmem:[#allocation2 + $0x94] sm:$0xf] }
 0x370   : > { %v5311_v62 = vrot.slane %v5310_v56, 4  ;;  %v5333_v2 = vrot.slane %v5331_v49, 4  ;;  %v5324_v14 = vor.u32 %v5323_v32, %v5320_v31  ;;  %v5339_v8 = vrot.slane %v5337_v48, 5 }
 0x371   : > { %v5344_v6 = vrot.slane %v5342_v28, 4  ;;  %v5351_v44 = vshll.u32 %v15176_v61, 16  ;;  %v5306_v29 = vsel %vm14829_vm11, %v5301_v11, %v5305_v36  ;;  %v5347_v27 = vrot.slane %v5345_v50, 5  ;;  %v15213_v11 = vld [vmem:[#allocation2 + $0x98] sm:$0x1] }
 0x372   : > { %v5316_v15 = vsel %vm14829_vm11, %v5311_v62, %v5315_v1  ;;  %v5334_v21 = vor.u32 %v5333_v2, %v5329_v53  ;;  %v5325_v23 = vrot.slane %v5324_v14, 4  ;;  %v5355_v7 = vshrl.u32 %v15176_v61, 16  ;;  %v15203_v1 = vld [vmem:[#allocation2 + $0x90] sm:$0xf] }
 0x373   : > { %v11093_v51 = vcombine.low %v5306_v29, %v5316_v15  ;;  %v5353_v25 = vrot.slane %v5351_v44, 5  ;;  %v5348_v45 = vor.u32 %v5347_v27, %v5344_v6  ;;  %v5361_v59 = vshll.u32 %v15181_v60, 16  ;;  %v15219_v6 = vld [vmem:[#allocation2 + $0x9c] sm:$0xf]  ;;  %v15222_v27 = vld [vmem:[#allocation2 + $0xa0] sm:$0xf] }
 0x374   : > { %v5335_v63 = vrot.slane %v5334_v21, 4  ;;  %v5366_v10 = vshrl.u32 %v15185_v12, 16  ;;  %v5330_v13 = vsel %vm14829_vm11, %v5325_v23, %v5329_v53  ;;  %v5357_v34 = vrot.slane %v5355_v7, 4 }
 0x375   : > { %12360 = vmatprep.mubr.msk.bf16.mxu1 %vm540_vm3, %v11093_v51  ;;  %v5369_v36 = vshll.u32 %v15185_v12, 16  ;;  %v5375_v37 = vshll.u32 %v15191_v18, 16  ;;  %v5349_v31 = vrot.slane %v5348_v45, 4  ;;  %v5363_v41 = vrot.slane %v5361_v59, 5 }
 0x376   : > { %v5340_v43 = vsel %vm14829_vm11, %v5335_v63, %v5339_v8  ;;  %v5368_v20 = vrot.slane %v5366_v10, 4  ;;  %v5358_v56 = vor.u32 %v5357_v34, %v5353_v25  ;;  %v5379_v48 = vshrl.u32 %v15191_v18, 16 }
 0x377   : > { %v11094_v42 = vcombine.low %v5330_v13, %v5340_v43  ;;  %v5371_v49 = vrot.slane %v5369_v36, 5  ;;  %v5377_v32 = vrot.slane %v5375_v37, 5  ;;  %v5354_v53 = vsel %vm14829_vm11, %v5349_v31, %v5353_v25  ;;  %v15229_v36 = vld [vmem:[#allocation2 + $0xa4] sm:$0x1] }
 0x378   : > { %v5385_v28 = vshll.u32 %v15194_v24, 16  ;;  %v5390_v62 = vshrl.u32 %v15203_v1, 16  ;;  %v5359_v2 = vrot.slane %v5358_v56, 4  ;;  %v5393_v14 = vshll.u32 %v15203_v1, 16  ;;  %v15235_v56 = vld [vmem:[#allocation2 + $0xa8] sm:$0xf] }
 0x379   : > { %12361 = vmatmul.mubr.msk.bf16.gmra.mrb[16].mxu1 %vm540_vm3, %v11094_v42  ;;  %v5372_v50 = vor.u32 %v5371_v49, %v5368_v20  ;;  %v5399_v8 = vshll.u32 %v15207_v22, 16  ;;  %v5381_v44 = vrot.slane %v5379_v48, 4  ;;  %v5403_v21 = vshrl.u32 %v15207_v22, 16 }
 0x37a   : > { %v5387_v29 = vrot.slane %v5385_v28, 5  ;;  %v5392_v15 = vrot.slane %v5390_v62, 4  ;;  %v5364_v51 = vsel %vm14829_vm11, %v5359_v2, %v5363_v41  ;;  %v5395_v25 = vrot.slane %v5393_v14, 5  ;;  %v15238_v28 = vld [vmem:[#allocation2 + $0xac] sm:$0xf] }
 0x37b   : > { %v5373_v23 = vrot.slane %v5372_v50, 4  ;;  %v5401_v7 = vrot.slane %v5399_v8, 5  ;;  %v11095_v63 = vcombine.low %v5354_v53, %v5364_v51  ;;  %v5382_v45 = vor.u32 %v5381_v44, %v5377_v32  ;;  %v15243_v8 = vld [vmem:[#allocation2 + $0xb0] sm:$0x1]  ;;  %v15245_v44 = vld [vmem:[#allocation2 + $0xb4] sm:$0xf] }
 0x37c   : > { %v5405_v59 = vrot.slane %v5403_v21, 4  ;;  %v5409_v10 = vshll.u32 %v15213_v11, 16  ;;  %v5396_v34 = vor.u32 %v5395_v25, %v5392_v15  ;;  %v5414_v37 = vshrl.u32 %v15219_v6, 16 }
 0x37d   : > { %v5378_v13 = vsel %vm14829_vm11, %v5373_v23, %v5377_v32  ;;  %v5417_v43 = vshll.u32 %v15219_v6, 16  ;;  %12364 = vmatprep.mubr.msk.bf16.mxu1 %vm540_vm3, %v11095_v63  ;;  %v5383_v31 = vrot.slane %v5382_v45, 4  ;;  %v5423_v42 = vshll.u32 %v15222_v27, 16  ;;  %v15253_v45 = vld [vmem:[#allocation2 + $0xb8] sm:$0xf] }
 0x37e   : > { %v5406_v41 = vor.u32 %v5405_v59, %v5401_v7  ;;  %v5411_v20 = vrot.slane %v5409_v10, 5  ;;  %v5397_v49 = vrot.slane %v5396_v34, 4  ;;  %v5416_v53 = vrot.slane %v5414_v37, 4 }
 0x37f   : > { %v5419_v48 = vrot.slane %v5417_v43, 5  ;;  %v5427_v32 = vshrl.u32 %v15222_v27, 16  ;;  %v5388_v62 = vsel %vm14829_vm11, %v5383_v31, %v5387_v29  ;;  %v5425_v50 = vrot.slane %v5423_v42, 5 }
 0x380   : > { %v5407_v2 = vrot.slane %v5406_v41, 4  ;;  %v5433_v14 = vshll.u32 %v15229_v36, 16  ;;  %v11096_v15 = vcombine.low %v5378_v13, %v5388_v62  ;;  %v5402_v23 = vsel %vm14829_vm11, %v5397_v49, %v5401_v7  ;;  %v15263_v62 = vld [vmem:[#allocation2 + $0xbc] sm:$0x1] }
 0x381   : > { %v5420_v21 = vor.u32 %v5419_v48, %v5416_v53  ;;  %v5429_v51 = vrot.slane %v5427_v32, 4  ;;  %v5438_v63 = vshrl.u32 %v15235_v56, 16  ;;  %v5441_v29 = vshll.u32 %v15235_v56, 16 }
 0x382   : > { %v5412_v25 = vsel %vm14829_vm11, %v5407_v2, %v5411_v20  ;;  %12365 = vmatmul.mubr.msk.bf16.gmra.mrb[20].mxu1 %vm540_vm3, %v11096_v15  ;;  %v5447_v13 = vshll.u32 %v15238_v28, 16  ;;  %v5435_v37 = vrot.slane %v5433_v14, 5  ;;  %v5451_v7 = vshrl.u32 %v15238_v28, 16 }
 0x383   : > { %v11097_v59 = vcombine.low %v5402_v23, %v5412_v25  ;;  %v5421_v10 = vrot.slane %v5420_v21, 4  ;;  %v5430_v34 = vor.u32 %v5429_v51, %v5425_v50  ;;  %v5440_v43 = vrot.slane %v5438_v63, 4 }
 0x384   : > { %v5443_v31 = vrot.slane %v5441_v29, 5  ;;  %v5449_v20 = vrot.slane %v5447_v13, 5  ;;  %v5457_v42 = vshll.u32 %v15243_v8, 16  ;;  %v5462_v49 = vshrl.u32 %v15245_v44, 16 }
 0x385   : > { %12368 = vmatprep.mubr.msk.bf16.mxu1 %vm540_vm3, %v11097_v59  ;;  %v5431_v41 = vrot.slane %v5430_v34, 4  ;;  %v5426_v53 = vsel %vm14829_vm11, %v5421_v10, %v5425_v50  ;;  %v5453_v32 = vrot.slane %v5451_v7, 4  ;;  %v5465_v2 = vshll.u32 %v15245_v44, 16 }
 0x386   : > { %v5444_v48 = vor.u32 %v5443_v31, %v5440_v43  ;;  %v5464_v15 = vrot.slane %v5462_v49, 4  ;;  %v5471_v21 = vshll.u32 %v15253_v45, 16  ;;  %v5475_v51 = vshrl.u32 %v15253_v45, 16 }
 0x387   : > { %v5436_v14 = vsel %vm14829_vm11, %v5431_v41, %v5435_v37  ;;  %v5454_v63 = vor.u32 %v5453_v32, %v5449_v20  ;;  %v5467_v29 = vrot.slane %v5465_v2, 5  ;;  %v5481_v10 = vshll.u32 %v15263_v62, 16 }
 0x388   : > { %v11098_v23 = vcombine.low %v5426_v53, %v5436_v14  ;;  %v5445_v25 = vrot.slane %v5444_v48, 4  ;;  %v5473_v59 = vrot.slane %v5471_v21, 5  ;;  %v5477_v50 = vrot.slane %v5475_v51, 4  ;;  %v6100_v21 = vld [vmem:[#allocation2 + $0x90] sm:$0xe] }
 0x389   : > { %v5455_v34 = vrot.slane %v5454_v63, 4  ;;  %v5459_v13 = vrot.slane %v5457_v42, 5  ;;  %v5468_v43 = vor.u32 %v5467_v29, %v5464_v15  ;;  %v5483_v48 = vrot.slane %v5481_v10, 5  ;;  %v13413_v63 = vld [vmem:[#allocation2] sm:$0xf] }
 0x38a   : > { %12369 = vmatmul.mubr.msk.bf16.gmra.mrb[24].mxu1 %vm540_vm3, %v11098_v23  ;;  %v5478_v31 = vor.u32 %v5477_v50, %v5473_v59  ;;  %v5450_v37 = vsel %vm14829_vm11, %v5445_v25, %v5449_v20  ;;  %v11128_v32 = vcombine.low %v15113_v57, %v15127_v33  ;;  %v11129_v2 = vcombine.low %v15134_v52, %v15138_v39  ;;  %v15295_v29 = vld [vmem:[#allocation2 + $0x4] sm:$0xf]  ;;  %v6101_v20 = vld [vmem:[#allocation2 + $0x9c] sm:$0xe] }
 0x38b   : > { %v5460_v7 = vsel %vm14829_vm11, %v5455_v34, %v5459_v13  ;;  %v5469_v41 = vrot.slane %v5468_v43, 4  ;;  %v11130_v14 = vcombine.low %v15152_v54, %v15154_v17  ;;  %v13415_v34 = vld [vmem:[#allocation2 + $0xc] sm:$0xf]  ;;  %v15304_v13 = vld [vmem:[#allocation2 + $0x10] sm:$0xf]  ;;  %v11126_v10 = vcombine.low %v15057_v55, %v15074_v5 }
 0x38c   : > { %v11099_v49 = vcombine.low %v5450_v37, %v5460_v7  ;;  %v5479_v53 = vrot.slane %v5478_v31, 4  ;;  %v11122_v43 = vcombine.low %v13415_v34, %v15304_v13  ;;  %v13344_v31 = vld [vmem:[%s16951_s3 + $0x48] sm:$0xff]   ;;  %v6095_v37 = vld [vmem:[#allocation2 + $0x54] sm:$0xe]  ;;  %v13417_v7 = vld [vmem:[#allocation2 + $0x18] sm:$0xf]  ;;  %v17044_v57 = vcombine.low %v15185_v12, %v15191_v18 }
 0x38d   : > { %v5474_v42 = vsel %vm14829_vm11, %v5469_v41, %v5473_v59  ;;  %v11121_v59 = vcombine.low %v13413_v63, %v15295_v29  ;;  %v15310_v41 = vld [vmem:[#allocation2 + $0x1c] sm:$0xf]  ;;  %v11164_v63 = vrot.slane %v6095_v37, 9  ;;  %v6190_v34 = vrot.slane %v15136_v16, 5  ;;  %v6098_v37 = vld [vmem:[#allocation2 + $0x78] sm:$0xe] }
 0x38e   : > { %12372 = vmatprep.mubr.msk.bf16.mxu1 %vm540_vm3, %v11099_v49  ;;  %v5484_v15 = vsel %vm14829_vm11, %v5479_v53, %v5483_v48  ;;  %v11123_v49 = vcombine.low %v13417_v7, %v15310_v41  ;;  %v6187_v53 = vrot.slane %v15127_v33, 5  ;;  %v6096_v48 = vld [vmem:[#allocation2 + $0x60] sm:$0xe]  ;;  %v11125_v7 = vcombine.low %v15024_v4, %v15036_v46  ;;  %v13420_v54 = vld [vmem:[#allocation2 + $0x8] sm:$0x1] }
 0x38f   : > { %v11100_v25 = vcombine.low %v5474_v42, %v5484_v15  ;;  %v6097_v42 = vld [vmem:[#allocation2 + $0x6c] sm:$0xe]  ;;  %v13419_v15 = vld [vmem:[#allocation2 + $0x24] sm:$0xf]  ;;  %v6201_v46 = vrot.slane %v15154_v17, 5  ;;  %v6197_v23 = vrot.slane %v15142_v9, 5  ;;  %v17045_v33 = vcombine.low %v15203_v1, %v15207_v22 }
 0x390   : > { %v11166_v4 = vrot.slane %v6097_v42, 9  ;;  %v11167_v9 = vrot.slane %v6098_v37, 9  ;;  %v6218_v37 = vrot.slane %v15194_v24, 5  ;;  %v15387_v24 = vld [vmem:[%s16951_s3 + $0x60] sm:$0xff]   ;;  %v6138_v52 = vrot.slane %v15295_v29, 5 }
 0x391   : > { %v6203_v42 = vrot.slane %v6201_v46, 4  ;;  %v6141_v17 = vrot.slane %v13420_v54, 5  ;;  %v6145_v1 = vrot.slane %v15304_v13, 5 }
 0x392   : > { %12373 = vmatmul.mubr.msk.bf16.gmra.mrb[28].mxu1 %vm540_vm3, %v11100_v25  ;;  %v11124_v25 = vcombine.low %v13419_v15, %v15008_v38  ;;  %v15329_v38 = vsel %vm13604_vm2, %v11164_v63, %v6187_v53  ;;  %v15345_v63 = vsel %vm13604_vm2, %v11166_v4, %v6201_v46  ;;  %v6215_v4 = vrot.slane %v15191_v18, 5 }
 0x393   : > { %12384 = vmatprep.mubr.msk.bf16.mxu1 %vm540_vm3, %v11121_v59  ;;  %v6189_v59 = vrot.slane %v6187_v53, 4  ;;  %v6099_v53 = vld [vmem:[#allocation2 + $0x84] sm:$0xe]  ;;  %v6232_v46 = vrot.slane %v15229_v36, 5  ;;  %v6147_v29 = vrot.slane %v6145_v1, 4 }
 0x394   : > { %v11168_v51 = vrot.slane %v6099_v53, 9  ;;  %v6222_v53 = vrot.slane %v15207_v22, 5  ;;  %v6152_v22 = vrot.slane %v15310_v41, 5  ;;  %v13423_v41 = vld [vmem:[#allocation2 + $0x28] sm:$0xf] }
 0x395   : > { %v15333_v16 = vsel %vm13604_vm2, %v6189_v59, %v6190_v34  ;;  %v6204_v59 = vrot.slane %v15169_v40, 5  ;;  %v6208_v34 = vrot.slane %v15176_v61, 5 }
 0x397   : > { %v15362_v40 = vsel %vm13604_vm2, %v6203_v42, %v6204_v59  ;;  %v6210_v15 = vrot.slane %v6208_v34, 4  ;;  %v15373_v42 = vsel %vm13604_vm2, %v11167_v9, %v6208_v34  ;;  %v6229_v59 = vrot.slane %v15222_v27, 5 }
 0x398   : > { %v6224_v9 = vrot.slane %v6222_v53, 4 }
 0x39a   : > { %12385 = vmatmul.mubr.msk.bf16.vlgmr.msra.gmra.mrb[0].mxu1 %vm540_vm3, %v11122_v43  ;;  %v13348_v43 = vld [vmem:[%s16951_s3 + $0x50] sm:$0xff]  }
 0x39b   : > { %12388 = vmatprep.mubr.msk.bf16.mxu1 %vm540_vm3, %v11123_v49  ;;  %12417 = vmatpush3.bf16.msra.mxu1 %v15030_v47  ;;  %v11165_v49 = vrot.slane %v6096_v48, 9  ;;  %v6194_v47 = vrot.slane %v15138_v39, 5  ;;  %v6088_v39 = vld [vmem:[#allocation2] sm:$0xe] }
 0x39c   : > { %12418 = vmatprep.subr.bf16.mxu1 %v13344_v31 }
 0x39d   : > { %v15340_v48 = vsel %vm13604_vm2, %v11165_v49, %v6194_v47  ;;  %v6196_v50 = vrot.slane %v6194_v47, 4  ;;  %v13353_v49 = vld [vmem:[%s16951_s3 + $0x58] sm:$0xff]  }
 0x39f   : > { %12419 = vmatpush3.bf16.msra.mxu1 %v13344_v31  ;;  %v15354_v47 = vsel %vm13604_vm2, %v6196_v50, %v6197_v23  ;;  %v6211_v31 = vrot.slane %v15181_v60, 5  ;;  %v11127_v23 = vcombine.low %v15079_v58, %v15085_v26  ;;  %v6217_v50 = vrot.slane %v6215_v4, 4 }
 0x3a0   : > { %12420 = vmatprep.subr.bf16.mxu1 %v13348_v43  ;;  %v15381_v58 = vsel %vm13604_vm2, %v11168_v51, %v6215_v4  ;;  %v6102_v51 = vld [vmem:[#allocation2 + $0xa8] sm:$0xe]  ;;  %v11170_v4 = vrot.slane %v6101_v20, 9  ;;  %v6243_v20 = vrot.slane %v15253_v45, 5 }
 0x3a2   : > { %12389 = vmatmul.mubr.msk.bf16.gmra.mrb[4].mxu1 %vm540_vm3, %v11124_v25  ;;  %v15377_v25 = vsel %vm13604_vm2, %v6210_v15, %v6211_v31  ;;  %v11169_v15 = vrot.slane %v6100_v21, 9  ;;  %v6225_v31 = vrot.slane %v15213_v11, 5  ;;  %v6103_v21 = vld [vmem:[#allocation2 + $0xb4] sm:$0xe]  ;;  %v15411_v34 = vsel %vm13604_vm2, %v11170_v4, %v6229_v59 }
 0x3a3   : > { %12392 = vmatprep.mubr.msk.bf16.mxu1 %vm540_vm3, %v11125_v7  ;;  %12421 = vmatpush3.bf16.msra.mxu1 %v13348_v43  ;;  %v15393_v43 = vsel %vm13604_vm2, %v6217_v50, %v6218_v37  ;;  %v6231_v7 = vrot.slane %v6229_v59, 4  ;;  %v6236_v50 = vrot.slane %v15238_v28, 5  ;;  %v11171_v11 = vrot.slane %v6102_v51, 9 }
 0x3a4   : > { %12422 = vmatprep.subr.bf16.mxu1 %v13353_v49  ;;  %v15401_v60 = vsel %vm13604_vm2, %v11169_v15, %v6222_v53  ;;  %v15407_v37 = vsel %vm13604_vm2, %v6224_v9, %v6225_v31  ;;  %v6239_v15 = vrot.slane %v15243_v8, 5  ;;  %v11172_v59 = vrot.slane %v6103_v21, 9  ;;  %v13422_v21 = vld [vmem:[#allocation2 + $0x20] sm:$0x1]  ;;  %v15693_v9 = vld [vmem:[#allocation2 + $0xac] sm:$0xf] }
 0x3a5   : > { %v15419_v53 = vsel %vm13604_vm2, %v6231_v7, %v6232_v46  ;;  %v6245_v31 = vrot.slane %v6243_v20, 4  ;;  %v6246_v51 = vrot.slane %v15263_v62, 5  ;;  %v15431_v4 = vsel %vm13604_vm2, %v11171_v11, %v6236_v50 }
 0x3a6   : > { %v15442_v62 = vsel %vm13604_vm2, %v11172_v59, %v6243_v20  ;;  %v6155_v11 = vrot.slane %v13422_v21, 5 }
 0x3a7   : > { %12423 = vmatpush3.bf16.msra.mxu1 %v13353_v49  ;;  %v6238_v49 = vrot.slane %v6236_v50, 4  ;;  %v15446_v55 = vsel %vm13604_vm2, %v6245_v31, %v6246_v51  ;;  %v6090_v50 = vld [vmem:[#allocation2 + $0x18] sm:$0xe] }
 0x3a8   : > { %12456 = vmatprep.subr.bf16.mxu1 %v15387_v24 }
 0x3a9   : > { %v15435_v46 = vsel %vm13604_vm2, %v6238_v49, %v6239_v15  ;;  %v6159_v49 = vrot.slane %v13423_v41, 5  ;;  %v11159_v15 = vrot.slane %v6090_v50, 9  ;;  %v6093_v50 = vld [vmem:[#allocation2 + $0x3c] sm:$0xe] }
 0x3aa   : > { %12393 = vmatmul.mubr.msk.bf16.gmra.mrb[8].mxu1 %vm540_vm3, %v11126_v10  ;;  %v11162_v41 = vrot.slane %v6093_v50, 9 }
 0x3ab   : > { %12396 = vmatprep.mubr.msk.bf16.mxu1 %vm540_vm3, %v11127_v23  ;;  %v17043_v23 = vcombine.low %v15167_v19, %v15176_v61  ;;  %v17046_v19 = vcombine.low %v15219_v6, %v15222_v27  ;;  %v17047_v61 = vcombine.low %v15235_v56, %v15238_v28  ;;  %v17048_v6 = vcombine.low %v15245_v44, %v15253_v45  ;;  %v6089_v27 = vld [vmem:[#allocation2 + $0xc] sm:$0xe]  ;;  %v13421_v28 = vld [vmem:[#allocation2 + $0x14] sm:$0x1] }
 0x3ac   : > { %v6154_v56 = vrot.slane %v6152_v22, 4  ;;  %v6148_v7 = vrot.slane %v13421_v28, 5  ;;  %v11158_v20 = vrot.slane %v6089_v27, 9  ;;  %v13424_v45 = vld [vmem:[#allocation2 + $0x34] sm:$0xf]  ;;  %v13359_v28 = vld [vmem:[%s16951_s3 + $0x78] sm:$0xff]  }
 0x3ad   : > { %v6166_v59 = vrot.slane %v13424_v45, 5 }
 0x3ae   : > { %v6149_v13 = vsel %vm13604_vm2, %v6147_v29, %v6148_v7  ;;  %v6156_v44 = vsel %vm13604_vm2, %v6154_v56, %v6155_v11  ;;  %v6146_v31 = vsel %vm13604_vm2, %v11158_v20, %v6145_v1  ;;  %v6180_v29 = vrot.slane %v15085_v26, 5  ;;  %v6094_v11 = vld [vmem:[#allocation2 + $0x48] sm:$0xe] }
 0x3af   : > { %v11182_v51 = vcombine.low %v6146_v31, %v6149_v13  ;;  %v6168_v54 = vrot.slane %v6166_v59, 4  ;;  %v6176_v26 = vrot.slane %v15083_v0, 5  ;;  %v6183_v20 = vrot.slane %v15089_v30, 5  ;;  %v15531_v13 = vld [vmem:[%s16951_s3 + $0x80] sm:$0xff]   ;;  %v15544_v31 = vld [vmem:[#allocation2 + $0x28] sm:$0xf] }
 0x3b0   : > { %v6182_v21 = vrot.slane %v6180_v29, 4 }
 0x3b2   : > { %12397 = vmatmul.mubr.msk.bf16.gmra.mrb[12].mxu1 %vm540_vm3, %v11128_v32  ;;  %v11157_v32 = vrot.slane %v6088_v39, 9  ;;  %v6091_v39 = vld [vmem:[#allocation2 + $0x24] sm:$0xe] }
 0x3b3   : > { %12400 = vmatprep.mubr.msk.bf16.mxu1 %vm540_vm3, %v11129_v2  ;;  %v6140_v2 = vrot.slane %v6138_v52, 4 }
 0x3b4   : > { %v6139_v12 = vsel %vm13604_vm2, %v11157_v32, %v6138_v52  ;;  %v6161_v52 = vrot.slane %v6159_v49, 4 }
 0x3b5   : > { %v6142_v18 = vsel %vm13604_vm2, %v6140_v2, %v6141_v17  ;;  %v13425_v17 = vld [vmem:[#allocation2 + $0x2c] sm:$0x1]  ;;  %v6092_v2 = vld [vmem:[#allocation2 + $0x30] sm:$0xe] }
 0x3b6   : > { %v6162_v32 = vrot.slane %v13425_v17, 5  ;;  %v17049_v17 = vcombine.low %v15329_v38, %v15333_v16  ;;  %v15569_v38 = vld [vmem:[#allocation2 + $0x50] sm:$0x1] }
 0x3b8   : > { %v6163_v1 = vsel %vm13604_vm2, %v6161_v52, %v6162_v32  ;;  %v15550_v52 = vld [vmem:[#allocation2 + $0x38] sm:$0x1]  ;;  %v15559_v32 = vld [vmem:[#allocation2 + $0x4c] sm:$0xf] }
 0x3ba   : > { %12401 = vmatmul.mubr.msk.bf16.gmra.mrb[16].mxu1 %vm540_vm3, %v11130_v14  ;;  %v11181_v14 = vcombine.low %v6139_v12, %v6142_v18  ;;  %v13358_v12 = vld [vmem:[%s16951_s3 + $0x70] sm:$0xff]   ;;  %v11160_v18 = vrot.slane %v6091_v39, 9  ;;  %v15552_v39 = vld [vmem:[#allocation2 + $0x40] sm:$0xf] }
 0x3bb   : > { %12404 = vmatprep.mubr.msk.bf16.mxu1 %vm540_vm3, %v17043_v23  ;;  %v6153_v23 = vsel %vm13604_vm2, %v11159_v15, %v6152_v22  ;;  %v6173_v22 = vrot.slane %v15074_v5, 5  ;;  %v11163_v15 = vrot.slane %v6094_v11, 9  ;;  %v7811_v11 = vrot.slane %v15559_v32, 5 }
 0x3bd   : > { %v6175_v7 = vrot.slane %v6173_v22, 4  ;;  %v6174_v0 = vsel %vm13604_vm2, %v11162_v41, %v6173_v22  ;;  %v6181_v30 = vsel %vm13604_vm2, %v11163_v15, %v6180_v29  ;;  %v15598_v41 = vld [vmem:[#allocation2 + $0x68] sm:$0x1] }
 0x3c2   : > { %12405 = vmatmul.mubr.msk.bf16.gmra.mrb[20].mxu1 %vm540_vm3, %v17044_v57  ;;  %v13357_v57 = vld [vmem:[%s16951_s3 + $0x68] sm:$0xff]  }
 0x3c3   : > { %12408 = vmatprep.mubr.msk.bf16.mxu1 %vm540_vm3, %v17045_v33  ;;  %v11183_v33 = vcombine.low %v6153_v23, %v6156_v44  ;;  %v6184_v44 = vsel %vm13604_vm2, %v6182_v21, %v6183_v20  ;;  %v7712_v23 = vld [vmem:[#allocation2 + $0x24] sm:$0xe]  ;;  %v7716_v20 = vld [vmem:[#allocation2 + $0x54] sm:$0xe] }
 0x3ca   : > { %12409 = vmatmul.mubr.msk.bf16.gmra.mrb[24].mxu1 %vm540_vm3, %v17046_v19  ;;  %v13426_v19 = vld [vmem:[#allocation2 + $0x38] sm:$0x1] }
 0x3cb   : > { %12412 = vmatprep.mubr.msk.bf16.mxu1 %vm540_vm3, %v17047_v61  ;;  %v6169_v61 = vrot.slane %v13426_v19, 5 }
 0x3d2   : > { %12413 = vmatmul.mubr.msk.bf16.gmra.mrb[28].mxu1 %vm540_vm3, %v17048_v6  ;;  %v6160_v6 = vsel %vm13604_vm2, %v11160_v18, %v6159_v49  ;;  %v6177_v49 = vsel %vm13604_vm2, %v6175_v7, %v6176_v26  ;;  %v15589_v7 = vld [vmem:[#allocation2 + $0x64] sm:$0xf] }
 0x3d3   : > { %12424 = vmatprep.mubr.msk.bf16.mxu1 %vm540_vm3, %v11181_v14  ;;  %v11161_v14 = vrot.slane %v6092_v2, 9  ;;  %v11184_v27 = vcombine.low %v6160_v6, %v6163_v1  ;;  %v11186_v45 = vcombine.low %v6174_v0, %v6177_v49  ;;  %v11307_v2 = vrot.slane %v7712_v23, 9  ;;  %v15677_v49 = vld [vmem:[#allocation2 + $0xa0] sm:$0xf] }
 0x3d4   : > { %v7800_v6 = vrot.slane %v15550_v52, 5  ;;  %v7813_v23 = vrot.slane %v7811_v11, 4 }
 0x3d5   : > { %v6167_v56 = vsel %vm13604_vm2, %v11161_v14, %v6166_v59  ;;  %v11187_v59 = vcombine.low %v6181_v30, %v6184_v44  ;;  %v7715_v14 = vld [vmem:[#allocation2 + $0x48] sm:$0xe]  ;;  %v15607_v30 = vld [vmem:[#allocation2 + $0x70] sm:$0xf] }
 0x3d6   : > { %v11310_v26 = vrot.slane %v7715_v14, 9 }
 0x3da   : > { %12425 = vmatmul.mubr.msk.bf16.vlgmr.msra.gmra.mrb[0].mxu1 %vm540_vm3, %v11182_v51  ;;  %v15546_v51 = vld [vmem:[#allocation2 + $0x34] sm:$0xf] }
 0x3db   : > { %12428 = vmatprep.mubr.msk.bf16.mxu1 %vm540_vm3, %v11183_v33  ;;  %12457 = vmatpush3.bf16.msra.mxu1 %v15387_v24  ;;  %v6170_v24 = vsel %vm13604_vm2, %v6168_v54, %v6169_v61  ;;  %v7713_v33 = vld [vmem:[#allocation2 + $0x30] sm:$0xe]  ;;  %v7790_v54 = vrot.slane %v15544_v31, 5  ;;  %v7797_v19 = vrot.slane %v15546_v51, 5  ;;  %v7714_v61 = vld [vmem:[#allocation2 + $0x3c] sm:$0xe] }
 0x3dc   : > { %12458 = vmatprep.subr.bf16.mxu1 %v13357_v57  ;;  %v11185_v5 = vcombine.low %v6167_v56, %v6170_v24  ;;  %v11308_v22 = vrot.slane %v7713_v33, 9  ;;  %v15567_v24 = vld [vmem:[#allocation2 + $0x44] sm:$0x1]  ;;  %v7814_v33 = vrot.slane %v15569_v38, 5 }
 0x3dd   : > { %v7792_v18 = vrot.slane %v7790_v54, 4  ;;  %v15573_v16 = vsel %vm13604_vm2, %v11307_v2, %v7790_v54  ;;  %v7799_v29 = vrot.slane %v7797_v19, 4  ;;  %v7807_v0 = vrot.slane %v15567_v24, 5 }
 0x3de   : > { %17051 = vst [vmem:[#allocation6_spill] sm:$0xff] %v15573_v16  ;;  %v15586_v56 = vsel %vm13604_vm2, %v11308_v22, %v7797_v19  ;;  %v11311_v2 = vrot.slane %v7716_v20, 9  ;;  %v15631_v14 = vsel %vm13604_vm2, %v7813_v23, %v7814_v33  ;;  %v7832_v33 = vrot.slane %v15607_v30, 5  ;;  %v9358_v16 = vld [vmem:[#allocation2 + $0x84] sm:$0xe] }
 0x3df   : > { %12459 = vmatpush3.bf16.msra.mxu1 %v13357_v57  ;;  %v15548_v57 = vld [vmem:[#allocation2 + $0x2c] sm:$0x1]  ;;  %17053 = vst [vmem:[#allocation8_spill] sm:$0xff] %v15586_v56  ;;  %v15595_v21 = vsel %vm13604_vm2, %v7799_v29, %v7800_v6  ;;  %17059 = vst [vmem:[#allocation13_spill] sm:$0xff] %v15631_v14  ;;  %v7723_v14 = vld [vmem:[#allocation2 + $0xa8] sm:$0xe] }
 0x3e0   : > { %12460 = vmatprep.subr.bf16.mxu1 %v13358_v12  ;;  %v7793_v1 = vrot.slane %v15548_v57, 5  ;;  %17054 = vst [vmem:[#allocation9_spill] sm:$0xff] %v15595_v21 }
 0x3e2   : > { %12429 = vmatmul.mubr.msk.bf16.gmra.mrb[4].mxu1 %vm540_vm3, %v11184_v27  ;;  %v15576_v27 = vld [vmem:[#allocation2 + $0x58] sm:$0xf] }
 0x3e3   : > { %12432 = vmatprep.mubr.msk.bf16.mxu1 %vm540_vm3, %v11185_v5  ;;  %12461 = vmatpush3.bf16.msra.mxu1 %v13358_v12  ;;  %v17050_v12 = vcombine.low %v15340_v48, %v15354_v47  ;;  %v15578_v48 = vld [vmem:[#allocation2 + $0x5c] sm:$0x1]  ;;  %v15582_v47 = vsel %vm13604_vm2, %v7792_v18, %v7793_v1  ;;  %v7804_v5 = vrot.slane %v15552_v39, 5  ;;  %v7818_v54 = vrot.slane %v15576_v27, 5 }
 0x3e4   : > { %12462 = vmatprep.subr.bf16.mxu1 %v13359_v28  ;;  %17052 = vst [vmem:[#allocation7_spill] sm:$0xff] %v15582_v47  ;;  %v7821_v19 = vrot.slane %v15578_v48, 5  ;;  %v17058_v18 = vcombine.low %v15345_v63, %v15362_v40  ;;  %v15625_v1 = vld [vmem:[#allocation2 + $0x7c] sm:$0xf]  ;;  %v15637_v63 = vld [vmem:[#allocation2 + $0x74] sm:$0x1] }
 0x3e5   : > { %v7806_v44 = vrot.slane %v7804_v5, 4  ;;  %v7820_v29 = vrot.slane %v7818_v54, 4  ;;  %v15639_v40 = vld [vmem:[#allocation2 + $0x80] sm:$0x1]  ;;  %v7835_v22 = vrot.slane %v15637_v63, 5 }
 0x3e6   : > { %v13379_v47 = vld [vmem:[#allocation2 + $0xc0] sm:$0xff]  }
 0x3e7   : > { %12463 = vmatpush3.bf16.msra.mxu1 %v13359_v28  ;;  %v11309_v28 = vrot.slane %v7714_v61, 9  ;;  %v7825_v61 = vrot.slane %v15589_v7, 5 }
 0x3e8   : > { %12496 = vmatprep.subr.bf16.mxu1 %v15531_v13 }
 0x3e9   : > { %v15604_v15 = vsel %vm13604_vm2, %v11309_v28, %v7804_v5  ;;  %v7719_v28 = vld [vmem:[#allocation2 + $0x78] sm:$0xe]  ;;  %v17060_v5 = vcombine.low %v15373_v42, %v15377_v25  ;;  %v7827_v20 = vrot.slane %v7825_v61, 4  ;;  %v15654_v42 = vsel %vm13604_vm2, %v7820_v29, %v7821_v19  ;;  %v7720_v29 = vld [vmem:[#allocation2 + $0x84] sm:$0xe] }
 0x3ea   : > { %12433 = vmatmul.mubr.msk.bf16.gmra.mrb[8].mxu1 %vm540_vm3, %v11186_v45  ;;  %17055 = vst [vmem:[#allocation10_spill] sm:$0xff] %v15604_v15  ;;  %v7717_v45 = vld [vmem:[#allocation2 + $0x60] sm:$0xe]  ;;  %17062 = vst [vmem:[#allocation15_spill] sm:$0xff] %v15654_v42  ;;  %v7839_v19 = vrot.slane %v15625_v1, 5 }
 0x3eb   : > { %12436 = vmatprep.mubr.msk.bf16.mxu1 %vm540_vm3, %v11187_v59  ;;  %v15611_v59 = vsel %vm13604_vm2, %v11310_v26, %v7811_v11  ;;  %v11312_v6 = vrot.slane %v7717_v45, 9  ;;  %v15645_v11 = vsel %vm13604_vm2, %v11311_v2, %v7818_v54  ;;  %v15650_v45 = vld [vmem:[#allocation2 + $0x94] sm:$0xf]  ;;  %v15661_v54 = vld [vmem:[#allocation2 + $0x8c] sm:$0x1] }
 0x3ec   : > { %17056 = vst [vmem:[#allocation11_spill] sm:$0xff] %v15611_v59  ;;  %17061 = vst [vmem:[#allocation14_spill] sm:$0xff] %v15645_v11  ;;  %v6991_v26 = vld [vmem:[#allocation2 + $0x98] sm:$0x1]  ;;  %v7721_v2 = vld [vmem:[#allocation2 + $0x90] sm:$0xe] }
 0x3ed   : > { %v15658_v25 = vsel %vm13604_vm2, %v11312_v6, %v7825_v61  ;;  %v7834_v6 = vrot.slane %v7832_v33, 4  ;;  %v15685_v61 = vld [vmem:[#allocation2 + $0xa4] sm:$0x1]  ;;  %v7849_v10 = vrot.slane %v15661_v54, 5  ;;  %v7853_v8 = vrot.slane %v15650_v45, 5 }
 0x3ee   : > { %17063 = vst [vmem:[#allocation16_spill] sm:$0xff] %v15658_v25  ;;  %v7722_v25 = vld [vmem:[#allocation2 + $0x9c] sm:$0xe]  ;;  %v7856_v11 = vrot.slane %v6991_v26, 5 }
 0x3ef   : > { %v7855_v42 = vrot.slane %v7853_v8, 4 }
 0x3f2   : > { %12437 = vmatmul.mubr.msk.bf16.gmra.mrb[12].mxu1 %vm540_vm3, %v17049_v17  ;;  %v15617_v17 = vsel %vm13604_vm2, %v7806_v44, %v7807_v0  ;;  %v7828_v44 = vrot.slane %v15598_v41, 5  ;;  %v15648_v0 = vld [vmem:[#allocation2 + $0x88] sm:$0xf] }
 0x3f3   : > { %12440 = vmatprep.mubr.msk.bf16.mxu1 %vm540_vm3, %v17050_v12  ;;  %17057 = vst [vmem:[#allocation12_spill] sm:$0xff] %v15617_v17  ;;  %v7718_v12 = vld [vmem:[#allocation2 + $0x6c] sm:$0xe]  ;;  %v7846_v50 = vrot.slane %v15648_v0, 5 }
 0x3f4   : > { %v11313_v23 = vrot.slane %v7718_v12, 9 }
 0x3f5   : > { %v7848_v36 = vrot.slane %v7846_v50, 4 }
 0x3f6   : > { %v15674_v12 = vsel %vm13604_vm2, %v11313_v23, %v7832_v33  ;;  %v15689_v23 = vsel %vm13604_vm2, %v7834_v6, %v7835_v22  ;;  %v11315_v33 = vrot.slane %v7720_v29, 9  ;;  %v17069_v22 = vcombine.low %v15381_v58, %v15393_v43  ;;  %v6997_v29 = vld [vmem:[#allocation2 + $0xb0] sm:$0x1] }
 0x3f7   : > { %17065 = vst [vmem:[#allocation18_spill] sm:$0xff] %v15674_v12  ;;  %17067 = vst [vmem:[#allocation20_spill] sm:$0xff] %v15689_v23  ;;  %v15719_v43 = vsel %vm13604_vm2, %v7848_v36, %v7849_v10  ;;  %v7724_v36 = vld [vmem:[#allocation2 + $0xb4] sm:$0xe]  ;;  %v7003_v10 = vld [vmem:[#allocation2 + $0xc8] sm:$0x1] }
 0x3f8   : > { %v15715_v58 = vsel %vm13604_vm2, %v11315_v33, %v7846_v50  ;;  %17072 = vst [vmem:[#allocation23_spill] sm:$0xff] %v15719_v43  ;;  %v11317_v50 = vrot.slane %v7722_v25, 9  ;;  %v7867_v33 = vrot.slane %v15693_v9, 5  ;;  %v11318_v6 = vrot.slane %v7723_v14, 9  ;;  %v13370_v23 = vld [vmem:[#allocation2 + $0x6c] sm:$0xff]  }
 0x3f9   : > { %17071 = vst [vmem:[#allocation22_spill] sm:$0xff] %v15715_v58  ;;  %v7870_v43 = vrot.slane %v6997_v29, 5  ;;  %v7090_v12 = vshrl.u32 %v15546_v51, 16 }
 0x3fa   : > { %12441 = vmatmul.mubr.msk.bf16.gmra.mrb[16].mxu1 %vm540_vm3, %v17058_v18  ;;  %v15667_v18 = vsel %vm13604_vm2, %v7827_v20, %v7828_v44  ;;  %v7841_v20 = vrot.slane %v7839_v19, 4  ;;  %v7842_v44 = vrot.slane %v15639_v40, 5 }
 0x3fb   : > { %12444 = vmatprep.mubr.msk.bf16.mxu1 %vm540_vm3, %v17060_v5  ;;  %17064 = vst [vmem:[#allocation17_spill] sm:$0xff] %v15667_v18  ;;  %v11314_v5 = vrot.slane %v7719_v28, 9  ;;  %v11316_v18 = vrot.slane %v7721_v2, 9  ;;  %v7000_v2 = vld [vmem:[#allocation2 + $0xbc] sm:$0x1] }
 0x3fd   : > { %v15681_v28 = vsel %vm13604_vm2, %v11314_v5, %v7839_v19  ;;  %v15699_v19 = vsel %vm13604_vm2, %v7841_v20, %v7842_v44  ;;  %v17070_v5 = vcombine.low %v15401_v60, %v15407_v37  ;;  %v15711_v20 = vld [vmem:[#allocation2 + $0xb8] sm:$0xf]  ;;  %v15723_v26 = vsel %vm13604_vm2, %v11316_v18, %v7853_v8  ;;  %v15726_v60 = vld [vmem:[#allocation2 + $0xc4] sm:$0xf] }
 0x3fe   : > { %17066 = vst [vmem:[#allocation19_spill] sm:$0xff] %v15681_v28  ;;  %17068 = vst [vmem:[#allocation21_spill] sm:$0xff] %v15699_v19  ;;  %v7860_v44 = vrot.slane %v15677_v49, 5  ;;  %v7869_v37 = vrot.slane %v7867_v33, 4  ;;  %v15749_v8 = vsel %vm13604_vm2, %v11318_v6, %v7867_v33  ;;  %v7881_v14 = vrot.slane %v15726_v60, 5 }
 0x3ff   : > { %17073 = vst [vmem:[#allocation24_spill] sm:$0xff] %v15723_v26  ;;  %17077 = vst [vmem:[#allocation28_spill] sm:$0xff] %v15749_v8  ;;  %v7877_v26 = vrot.slane %v7000_v2, 5  ;;  %v7884_v28 = vrot.slane %v7003_v10, 5  ;;  %v17079_v6 = vcombine.low %v15411_v34, %v15419_v53  ;;  %v17082_v2 = vcombine.low %v15431_v4, %v15435_v46  ;;  %v13361_v46 = vld [vmem:[#allocation2 + $0x18] sm:$0xff]   ;;  %v13363_v10 = vld [vmem:[#allocation2 + $0x24] sm:$0xff]  }
 0x400   : > { %v7862_v18 = vrot.slane %v7860_v44, 4  ;;  %v15740_v19 = vsel %vm13604_vm2, %v11317_v50, %v7860_v44  ;;  %v15756_v29 = vsel %vm13604_vm2, %v7869_v37, %v7870_v43  ;;  %v7883_v58 = vrot.slane %v7881_v14, 4  ;;  %v13366_v44 = vld [vmem:[#allocation2 + $0x48] sm:$0xff]  }
 0x401   : > { %17075 = vst [vmem:[#allocation26_spill] sm:$0xff] %v15740_v19  ;;  %17078 = vst [vmem:[#allocation29_spill] sm:$0xff] %v15756_v29  ;;  %v17085_v4 = vcombine.low %v15442_v62, %v15446_v55  ;;  %v13372_v62 = vld [vmem:[%s16951_s3 + $0x90] sm:$0xff]  }
 0x402   : > { %12445 = vmatmul.mubr.msk.bf16.gmra.mrb[20].mxu1 %vm540_vm3, %v17069_v22  ;;  %v7863_v22 = vrot.slane %v15685_v61, 5  ;;  %v15784_v53 = vsel %vm13604_vm2, %v7883_v58, %v7884_v28  ;;  %v6956_v28 = vld [vmem:[#allocation2 + $0xc] sm:$0xf]  ;;  %v15802_v55 = vld [vmem:[#allocation2 + $0x10] sm:$0xf] }
 0x403   : > { %12448 = vmatprep.mubr.msk.bf16.mxu1 %vm540_vm3, %v17070_v5  ;;  %v15732_v5 = vsel %vm13604_vm2, %v7855_v42, %v7856_v11  ;;  %v7874_v11 = vrot.slane %v15711_v20, 5  ;;  %v7725_v42 = vld [vmem:[#allocation2 + $0xc0] sm:$0xe]  ;;  %17084 = vst [vmem:[#allocation33_spill] sm:$0xff] %v15784_v53  ;;  %v7005_v58 = vshrl.u32 %v6956_v28, 16 }
 0x404   : > { %17074 = vst [vmem:[#allocation25_spill] sm:$0xff] %v15732_v5  ;;  %v15745_v25 = vsel %vm13604_vm2, %v7862_v18, %v7863_v22  ;;  %v11319_v5 = vrot.slane %v7724_v36, 9  ;;  %v11320_v22 = vrot.slane %v7725_v42, 9  ;;  %v13367_v36 = vld [vmem:[%s16951_s3 + $0x88] sm:$0xff]   ;;  %v7014_v42 = vshll.u32 %v15802_v55, 16  ;;  %v15818_v18 = vld [vmem:[%s16951_s3 + $0xa0] sm:$0xff]  }
 0x405   : > { %17076 = vst [vmem:[#allocation27_spill] sm:$0xff] %v15745_v25  ;;  %v7876_v50 = vrot.slane %v7874_v11, 4  ;;  %v15824_v53 = vld [vmem:[#allocation2 + $0x20] sm:$0x1]  ;;  %v6965_v19 = vld [vmem:[#allocation2 + $0x30] sm:$0xf] }
 0x406   : > { %v15766_v33 = vsel %vm13604_vm2, %v11319_v5, %v7874_v11  ;;  %v15780_v34 = vsel %vm13604_vm2, %v11320_v22, %v7881_v14  ;;  %v13360_v5 = vld [vmem:[#allocation2 + $0xc] sm:$0xff]   ;;  %v7008_v11 = vshll.u32 %v6956_v28, 16  ;;  %v7018_v14 = vshrl.u32 %v15802_v55, 16 }
 0x407   : > { %17080 = vst [vmem:[#allocation30_spill] sm:$0xff] %v15766_v33  ;;  %v15770_v43 = vsel %vm13604_vm2, %v7876_v50, %v7877_v26  ;;  %17083 = vst [vmem:[#allocation32_spill] sm:$0xff] %v15780_v34  ;;  %v6959_v50 = vld [vmem:[#allocation2 + $0x18] sm:$0xf]  ;;  %v13364_v22 = vld [vmem:[#allocation2 + $0x30] sm:$0xff]  }
 0x408   : > { %17081 = vst [vmem:[#allocation31_spill] sm:$0xff] %v15770_v43  ;;  %v7020_v28 = vrot.slane %v7018_v14, 4  ;;  %v13368_v33 = vld [vmem:[#allocation2 + $0x54] sm:$0xff]  }
 0x40a   : > { %12449 = vmatmul.mubr.msk.bf16.gmra.mrb[24].mxu1 %vm540_vm3, %v17079_v6  ;;  %v15809_v6 = vld [vmem:[#allocation2 + $0x1c] sm:$0xf] }
 0x40b   : > { %12452 = vmatprep.mubr.msk.bf16.mxu1 %vm540_vm3, %v17082_v2  ;;  %v13365_v2 = vld [vmem:[#allocation2 + $0x3c] sm:$0xff]   ;;  %v7038_v26 = vshll.u32 %v15809_v6, 16  ;;  %v7042_v37 = vshrl.u32 %v15809_v6, 16 }
 0x40d   : > { %v7044_v14 = vrot.slane %v7042_v37, 4  ;;  %v7048_v37 = vshll.u32 %v15824_v53, 16 }
 0x412   : > { %12453 = vmatmul.mubr.msk.bf16.gmra.mrb[28].mxu1 %vm540_vm3, %v17085_v4  ;;  %v7010_v4 = vrot.slane %v7008_v11, 5 }
 0x413   : > { %12464 = vmatprep.mubr.msk.bf16.mxu1 %vm540_vm3, %v13360_v5  ;;  %v7007_v5 = vrot.slane %v7005_v58, 4  ;;  %v15820_v58 = vld [vmem:[#allocation2 + $0x14] sm:$0x1] }
 0x414   : > { %v7024_v29 = vshll.u32 %v15820_v58, 16 }
 0x416   : > { %v7026_v8 = vrot.slane %v7024_v29, 5  ;;  %v7080_v29 = vshll.u32 %v6965_v19, 16 }
 0x41a   : > { %12465 = vmatmul.mubr.msk.bf16.vlgmr.msra.gmra.mrb[0].mxu1 %vm540_vm3, %v13361_v46  ;;  %v7029_v46 = vshrl.u32 %v6959_v50, 16 }
 0x41b   : > { %12468 = vmatprep.mubr.msk.bf16.mxu1 %vm540_vm3, %v13363_v10  ;;  %12497 = vmatpush3.bf16.msra.mxu1 %v15531_v13  ;;  %v13377_v13 = vld [vmem:[%s16951_s3 + $0x98] sm:$0xff]   ;;  %v7016_v10 = vrot.slane %v7014_v42, 5  ;;  %v15822_v42 = vrot.slane %v7038_v26, 5 }
 0x41c   : > { %12498 = vmatprep.subr.bf16.mxu1 %v13367_v36  ;;  %v7031_v11 = vrot.slane %v7029_v46, 4 }
 0x41d   : > { %v7045_v26 = vor.u32 %v7044_v14, %v15822_v42 }
 0x41f   : > { %12499 = vmatpush3.bf16.msra.mxu1 %v13367_v36  ;;  %v7032_v36 = vshll.u32 %v6959_v50, 16 }
 0x420   : > { %12500 = vmatprep.subr.bf16.mxu1 %v13372_v62 }
 0x421   : > { %v7034_v50 = vrot.slane %v7032_v36, 5 }
 0x422   : > { %12469 = vmatmul.mubr.msk.bf16.gmra.mrb[4].mxu1 %vm540_vm3, %v13364_v22  ;;  %v6962_v22 = vld [vmem:[#allocation2 + $0x24] sm:$0xf] }
 0x423   : > { %12472 = vmatprep.mubr.msk.bf16.mxu1 %vm540_vm3, %v13365_v2  ;;  %12501 = vmatpush3.bf16.msra.mxu1 %v13372_v62  ;;  %v7011_v2 = vor.u32 %v7010_v4, %v7007_v5  ;;  %v7021_v62 = vor.u32 %v7020_v28, %v7016_v10  ;;  %v7053_v34 = vshrl.u32 %v6962_v22, 16  ;;  %v7056_v43 = vshll.u32 %v6962_v22, 16 }
 0x424   : > { %12502 = vmatprep.subr.bf16.mxu1 %v13377_v13  ;;  %v7035_v46 = vor.u32 %v7034_v50, %v7031_v11  ;;  %v7062_v28 = vshll.u32 %v15544_v31, 16  ;;  %v7066_v22 = vshrl.u32 %v15544_v31, 16  ;;  %v7046_v11 = vrot.slane %v7045_v26, 4  ;;  %v6971_v26 = vld [vmem:[#allocation2 + $0x48] sm:$0xf] }
 0x425   : > { %v7022_v5 = vrot.slane %v7021_v62, 4  ;;  %v7055_v4 = vrot.slane %v7053_v34, 4  ;;  %v7058_v36 = vrot.slane %v7056_v43, 5  ;;  %v7072_v50 = vshll.u32 %v15548_v57, 16 }
 0x426   : > { %v7036_v25 = vrot.slane %v7035_v46, 4  ;;  %v15839_v43 = vrot.slane %v7062_v28, 5  ;;  %v7068_v14 = vrot.slane %v7066_v22, 4  ;;  %v7077_v31 = vshrl.u32 %v6965_v19, 16 }
 0x427   : > { %12503 = vmatpush3.bf16.msra.mxu1 %v13377_v13  ;;  %v7012_v13 = vrot.slane %v7011_v2, 4  ;;  %v13369_v2 = vld [vmem:[#allocation2 + $0x60] sm:$0xff]   ;;  %v7059_v34 = vor.u32 %v7058_v36, %v7055_v4  ;;  %v7086_v46 = vshll.u32 %v15546_v51, 16  ;;  %v7110_v19 = vshll.u32 %v15552_v39, 16 }
 0x428   : > { %12536 = vmatprep.subr.bf16.mxu1 %v15818_v18  ;;  %v7041_v57 = vsel %vm14829_vm11, %v7036_v25, %v15822_v42  ;;  %v7114_v51 = vshrl.u32 %v15552_v39, 16  ;;  %v7069_v4 = vor.u32 %v7068_v14, %v15839_v43  ;;  %v7134_v36 = vshll.u32 %v15559_v32, 16  ;;  %v6974_v42 = vld [vmem:[#allocation2 + $0x54] sm:$0xf]  ;;  %v13371_v14 = vld [vmem:[#allocation2 + $0x78] sm:$0xff]  }
 0x429   : > { %v7017_v62 = vsel %vm14829_vm11, %v7012_v13, %v7016_v10  ;;  %v6968_v10 = vld [vmem:[#allocation2 + $0x3c] sm:$0xf]  ;;  %v7138_v25 = vshrl.u32 %v15559_v32, 16  ;;  %v7079_v28 = vrot.slane %v7077_v31, 4  ;;  %v15859_v22 = vrot.slane %v7086_v46, 5 }
 0x42a   : > { %12473 = vmatmul.mubr.msk.bf16.gmra.mrb[8].mxu1 %vm540_vm3, %v13366_v44  ;;  %v7027_v44 = vsel %vm14829_vm11, %v7022_v5, %v7026_v8  ;;  %v15852_v5 = vrot.slane %v7072_v50, 5  ;;  %v7125_v50 = vshrl.u32 %v6971_v26, 16  ;;  %v7116_v39 = vrot.slane %v7114_v51, 4 }
 0x42b   : > { %12476 = vmatprep.mubr.msk.bf16.mxu1 %vm540_vm3, %v13368_v33  ;;  %v7050_v33 = vrot.slane %v7048_v37, 5  ;;  %v15844_v8 = vcombine.low %v7017_v62, %v7027_v44  ;;  %v7060_v37 = vrot.slane %v7059_v34, 4  ;;  %v7092_v44 = vrot.slane %v7090_v12, 4 }
 0x42c   : > { %v15861_v62 = vrot.slane %v7110_v19, 5  ;;  %v7149_v34 = vshrl.u32 %v6974_v42, 16  ;;  %v7152_v59 = vshll.u32 %v6974_v42, 16  ;;  %v15863_v17 = vrot.slane %v7134_v36, 5 }
 0x42d   : > { %v7051_v13 = vsel %vm14829_vm11, %v7046_v11, %v7050_v33  ;;  %v7101_v11 = vshrl.u32 %v6968_v10, 16  ;;  %v7104_v33 = vshll.u32 %v6968_v10, 16  ;;  %v7140_v15 = vrot.slane %v7138_v25, 4 }
 0x42e   : > { %v7158_v32 = vshll.u32 %v15576_v27, 16  ;;  %v7162_v31 = vshrl.u32 %v15576_v27, 16  ;;  %v7070_v46 = vrot.slane %v7069_v4, 4  ;;  %v7093_v10 = vor.u32 %v7092_v44, %v15859_v22  ;;  %v6977_v44 = vld [vmem:[#allocation2 + $0x60] sm:$0xf] }
 0x42f   : > { %v7103_v19 = vrot.slane %v7101_v11, 4  ;;  %v7106_v51 = vrot.slane %v7104_v33, 5  ;;  %v7127_v42 = vrot.slane %v7125_v50, 4  ;;  %v15871_v36 = vcombine.low %v7041_v57, %v7051_v13 }
 0x430   : > { %v7117_v25 = vor.u32 %v7116_v39, %v15861_v62  ;;  %v7151_v27 = vrot.slane %v7149_v34, 4  ;;  %v7154_v56 = vrot.slane %v7152_v59, 5  ;;  %v7065_v4 = vsel %vm14829_vm11, %v7060_v37, %v15839_v43 }
 0x431   : > { %v7075_v11 = vsel %vm14829_vm11, %v7070_v46, %v15852_v5  ;;  %v7094_v13 = vrot.slane %v7093_v10, 4  ;;  %v7120_v33 = vshll.u32 %v15567_v24, 16  ;;  %v7107_v59 = vor.u32 %v7106_v51, %v7103_v19  ;;  %v13375_v46 = vld [vmem:[#allocation2 + $0x9c] sm:$0xff]   ;;  %v6980_v51 = vld [vmem:[#allocation2 + $0x6c] sm:$0xf] }
 0x432   : > { %12477 = vmatmul.mubr.msk.bf16.gmra.mrb[12].mxu1 %vm540_vm3, %v13369_v2  ;;  %v7128_v2 = vshll.u32 %v6971_v26, 16  ;;  %v7096_v26 = vshll.u32 %v15550_v52, 16  ;;  %v7141_v52 = vor.u32 %v7140_v15, %v15863_v17  ;;  %v7144_v39 = vshll.u32 %v15569_v38, 16 }
 0x433   : > { %12480 = vmatprep.mubr.msk.bf16.mxu1 %vm540_vm3, %v13370_v23  ;;  %v7082_v23 = vrot.slane %v7080_v29, 5  ;;  %v13373_v29 = vld [vmem:[#allocation2 + $0x84] sm:$0xff]   ;;  %v7118_v43 = vrot.slane %v7117_v25, 4  ;;  %v7155_v37 = vor.u32 %v7154_v56, %v7151_v27  ;;  %v7173_v15 = vshrl.u32 %v6977_v44, 16 }
 0x434   : > { %v7130_v21 = vrot.slane %v7128_v2, 5  ;;  %v7098_v50 = vrot.slane %v7096_v26, 5  ;;  %v7176_v34 = vshll.u32 %v6977_v44, 16  ;;  %v7186_v5 = vshrl.u32 %v15589_v7, 16 }
 0x435   : > { %v7083_v12 = vor.u32 %v7082_v23, %v7079_v28  ;;  %v15878_v28 = vrot.slane %v7158_v32, 5  ;;  %v7164_v23 = vrot.slane %v7162_v31, 4  ;;  %v7142_v32 = vrot.slane %v7141_v52, 4 }
 0x436   : > { %v7131_v2 = vor.u32 %v7130_v21, %v7127_v42  ;;  %v7099_v38 = vsel %vm14829_vm11, %v7094_v13, %v7098_v50  ;;  %v7122_v56 = vrot.slane %v7120_v33, 5  ;;  %v7108_v21 = vrot.slane %v7107_v59, 4  ;;  %v15916_v13 = vld [vmem:[#allocation2 + $0x1c] sm:$0xf]  ;;  %v13376_v33 = vld [vmem:[#allocation2 + $0xa8] sm:$0xff]  }
 0x437   : > { %v7084_v57 = vrot.slane %v7083_v12, 4  ;;  %v7165_v31 = vor.u32 %v7164_v23, %v15878_v28  ;;  %v15888_v12 = vcombine.low %v7065_v4, %v7075_v11  ;;  %v7146_v26 = vrot.slane %v7144_v39, 5  ;;  %17086 = vst [vmem:[#allocation34_spill] sm:$0xff] %v15916_v13 }
 0x438   : > { %v7132_v10 = vrot.slane %v7131_v2, 4  ;;  %v7168_v19 = vshll.u32 %v15578_v48, 16  ;;  %v15900_v42 = vrot.slane %v7155_v37, 4  ;;  %v15904_v25 = vrot.slane %v7176_v34, 5  ;;  %v13378_v37 = vld [vmem:[#allocation2 + $0xb4] sm:$0xff]  }
 0x439   : > { %v7089_v24 = vsel %vm14829_vm11, %v7084_v57, %v15859_v22  ;;  %v15902_v22 = vrot.slane %v7173_v15, 4  ;;  %v7147_v27 = vsel %vm14829_vm11, %v7142_v32, %v7146_v26  ;;  %v15908_v4 = vrot.slane %v7165_v31, 4  ;;  %v9349_v32 = vld [vmem:[#allocation2 + $0x18] sm:$0xe]  ;;  %v15975_v34 = vld [vmem:[#allocation2 + $0x4c] sm:$0xf] }
 0x43a   : > { %12481 = vmatmul.mubr.msk.bf16.gmra.mrb[16].mxu1 %vm540_vm3, %v13371_v14  ;;  %v13374_v14 = vld [vmem:[#allocation2 + $0x90] sm:$0xff]   ;;  %v15912_v48 = vrot.slane %v7186_v5, 4  ;;  %v7197_v23 = vshrl.u32 %v6980_v51, 16  ;;  %v7200_v44 = vshll.u32 %v6980_v51, 16  ;;  %v7206_v11 = vshll.u32 %v15607_v30, 16  ;;  %17093 = vst [vmem:[#allocation41_spill] sm:$0xff] %v15975_v34 }
 0x43b   : > { %12484 = vmatprep.mubr.msk.bf16.mxu1 %vm540_vm3, %v13373_v29  ;;  %v7182_v29 = vshll.u32 %v15589_v7, 16  ;;  %v7123_v7 = vsel %vm14829_vm11, %v7118_v43, %v7122_v56  ;;  %v7210_v57 = vshrl.u32 %v15607_v30, 16  ;;  %v15918_v50 = vcombine.low %v7089_v24, %v7099_v38  ;;  %v15928_v43 = vld [vmem:[#allocation2 + $0x78] sm:$0xf]  ;;  %v9350_v38 = vld [vmem:[#allocation2 + $0x24] sm:$0xe] }
 0x43c   : > { %v7113_v59 = vsel %vm14829_vm11, %v7108_v21, %v15861_v62  ;;  %v7137_v2 = vsel %vm14829_vm11, %v7132_v10, %v15863_v17  ;;  %v15926_v39 = vrot.slane %v7168_v19, 5  ;;  %v15942_v17 = vld [vmem:[#allocation2 + $0x28] sm:$0xf]  ;;  %v9415_v24 = vrot.slane %v15916_v13, 5  ;;  %v15962_v19 = vld [vmem:[#allocation2 + $0x2c] sm:$0x1] }
 0x43d   : > { %v15910_v52 = vrot.slane %v7182_v29, 5  ;;  %v15930_v15 = vcombine.low %v7113_v59, %v7123_v7  ;;  %v15932_v30 = vcombine.low %v7137_v2, %v7147_v27  ;;  %17088 = vst [vmem:[#allocation36_spill] sm:$0xff] %v15942_v17  ;;  %v15954_v56 = vrot.slane %v7197_v23, 4  ;;  %17090 = vst [vmem:[#allocation38_spill] sm:$0xff] %v15962_v19  ;;  %v15965_v51 = vld [vmem:[#allocation2 + $0x38] sm:$0x1] }
 0x43e   : > { %v15956_v21 = vrot.slane %v7200_v44, 5  ;;  %v15958_v10 = vrot.slane %v7206_v11, 5  ;;  %v15960_v26 = vrot.slane %v7210_v57, 4  ;;  %17091 = vst [vmem:[#allocation39_spill] sm:$0xff] %v15965_v51  ;;  %v15967_v7 = vld [vmem:[#allocation2 + $0x40] sm:$0xf] }
 0x43f   : > { %17092 = vst [vmem:[#allocation40_spill] sm:$0xff] %v15967_v7  ;;  %v11453_v27 = vrot.slane %v9349_v32, 9  ;;  %v9417_v59 = vrot.slane %v9415_v24, 4  ;;  %v9422_v23 = vrot.slane %v15942_v17, 5  ;;  %v7230_v57 = vshll.u32 %v15625_v1, 16 }
 0x440   : > { %v11454_v5 = vrot.slane %v9350_v38, 9  ;;  %v9352_v44 = vld [vmem:[#allocation2 + $0x3c] sm:$0xe]  ;;  %v15990_v62 = vld [vmem:[#allocation2 + $0x44] sm:$0x1] }
 0x441   : > { %v15979_v32 = vsel %vm13604_vm2, %v11453_v27, %v9415_v24  ;;  %v9424_v29 = vrot.slane %v9422_v23, 4  ;;  %17096 = vst [vmem:[#allocation44_spill] sm:$0xff] %v15990_v62  ;;  %v9353_v17 = vld [vmem:[#allocation2 + $0x48] sm:$0xe]  ;;  %v16008_v13 = vld [vmem:[#allocation2 + $0x5c] sm:$0x1] }
 0x442   : > { %12485 = vmatmul.mubr.msk.bf16.gmra.mrb[20].mxu1 %vm540_vm3, %v13374_v14  ;;  %v15940_v14 = vld [vmem:[#allocation2 + $0x20] sm:$0x1]  ;;  %17094 = vst [vmem:[#allocation42_spill] sm:$0xff] %v15979_v32  ;;  %17101 = vst [vmem:[#allocation49_spill] sm:$0xff] %v16008_v13  ;;  %v9432_v32 = vrot.slane %v15965_v51, 5 }
 0x443   : > { %12488 = vmatprep.mubr.msk.bf16.mxu1 %vm540_vm3, %v13375_v46  ;;  %17087 = vst [vmem:[#allocation35_spill] sm:$0xff] %v15940_v14  ;;  %v15951_v46 = vld [vmem:[#allocation2 + $0x34] sm:$0xf]  ;;  %v9418_v2 = vrot.slane %v15940_v14, 5  ;;  %v15992_v14 = vld [vmem:[#allocation2 + $0x50] sm:$0x1] }
 0x444   : > { %17089 = vst [vmem:[#allocation37_spill] sm:$0xff] %v15951_v46  ;;  %17097 = vst [vmem:[#allocation45_spill] sm:$0xff] %v15992_v14  ;;  %v9429_v27 = vrot.slane %v15951_v46, 5  ;;  %v11456_v46 = vrot.slane %v9352_v44, 9 }
 0x445   : > { %v15983_v31 = vsel %vm13604_vm2, %v9417_v59, %v9418_v2  ;;  %v15997_v59 = vld [vmem:[#allocation2 + $0x58] sm:$0xf]  ;;  %v16001_v2 = vsel %vm13604_vm2, %v11454_v5, %v9422_v23  ;;  %v16013_v5 = vrot.slane %v7230_v57, 5  ;;  %v11457_v57 = vrot.slane %v9353_v17, 9 }
 0x446   : > { %17095 = vst [vmem:[#allocation43_spill] sm:$0xff] %v15983_v31  ;;  %17098 = vst [vmem:[#allocation46_spill] sm:$0xff] %v15997_v59  ;;  %v9431_v31 = vrot.slane %v9429_v27, 4  ;;  %v9450_v17 = vrot.slane %v15997_v59, 5  ;;  %v8621_v59 = vld [vmem:[#allocation2 + $0x80] sm:$0x1] }
 0x447   : > { %17099 = vst [vmem:[#allocation47_spill] sm:$0xff] %v16001_v2  ;;  %v9355_v2 = vld [vmem:[#allocation2 + $0x60] sm:$0xe] }
 0x448   : > { %v16024_v24 = vsel %vm13604_vm2, %v9431_v31, %v9432_v32 }
 0x449   : > { %17104 = vst [vmem:[#allocation52_spill] sm:$0xff] %v16024_v24  ;;  %v9356_v24 = vld [vmem:[#allocation2 + $0x6c] sm:$0xe] }
 0x44a   : > { %12489 = vmatmul.mubr.msk.bf16.gmra.mrb[24].mxu1 %vm540_vm3, %v13376_v33  ;;  %v9351_v33 = vld [vmem:[#allocation2 + $0x30] sm:$0xe] }
 0x44b   : > { %12492 = vmatprep.mubr.msk.bf16.mxu1 %vm540_vm3, %v13378_v37  ;;  %v9425_v37 = vrot.slane %v15962_v19, 5  ;;  %v11455_v38 = vrot.slane %v9351_v33, 9  ;;  %v9436_v19 = vrot.slane %v15967_v7, 5  ;;  %v9439_v33 = vrot.slane %v15990_v62, 5  ;;  %v16020_v7 = vld [vmem:[#allocation2 + $0x64] sm:$0xf] }
 0x44c   : > { %17103 = vst [vmem:[#allocation51_spill] sm:$0xff] %v16020_v7  ;;  %v9453_v62 = vrot.slane %v16008_v13, 5  ;;  %v11460_v13 = vrot.slane %v9356_v24, 9 }
 0x44d   : > { %v16005_v11 = vsel %vm13604_vm2, %v9424_v29, %v9425_v37  ;;  %v16017_v29 = vsel %vm13604_vm2, %v11455_v38, %v9429_v27  ;;  %v9438_v23 = vrot.slane %v9436_v19, 4  ;;  %v9354_v37 = vld [vmem:[#allocation2 + $0x54] sm:$0xe]  ;;  %v16028_v44 = vsel %vm13604_vm2, %v11456_v46, %v9436_v19  ;;  %v16032_v38 = vld [vmem:[#allocation2 + $0x68] sm:$0x1] }
 0x44e   : > { %17100 = vst [vmem:[#allocation48_spill] sm:$0xff] %v16005_v11  ;;  %17102 = vst [vmem:[#allocation50_spill] sm:$0xff] %v16017_v29  ;;  %v9443_v11 = vrot.slane %v15975_v34, 5  ;;  %v16034_v27 = vld [vmem:[#allocation2 + $0x70] sm:$0xf]  ;;  %v9446_v46 = vrot.slane %v15992_v14, 5 }
 0x44f   : > { %17105 = vst [vmem:[#allocation53_spill] sm:$0xff] %v16028_v44  ;;  %17106 = vst [vmem:[#allocation54_spill] sm:$0xff] %v16032_v38  ;;  %v16040_v31 = vsel %vm13604_vm2, %v9438_v23, %v9439_v33  ;;  %v16046_v19 = vld [vmem:[#allocation2 + $0x7c] sm:$0xf]  ;;  %v11458_v34 = vrot.slane %v9354_v37, 9  ;;  %v9452_v33 = vrot.slane %v9450_v17, 4 }
 0x450   : > { %17107 = vst [vmem:[#allocation55_spill] sm:$0xff] %v16034_v27  ;;  %17108 = vst [vmem:[#allocation56_spill] sm:$0xff] %v16040_v31  ;;  %v9445_v32 = vrot.slane %v9443_v11, 4  ;;  %v16051_v29 = vld [vmem:[#allocation2 + $0x74] sm:$0x1]  ;;  %v16055_v23 = vsel %vm13604_vm2, %v11457_v57, %v9443_v11  ;;  %v11459_v14 = vrot.slane %v9355_v2, 9 }
 0x451   : > { %17109 = vst [vmem:[#allocation57_spill] sm:$0xff] %v16046_v19  ;;  %17110 = vst [vmem:[#allocation58_spill] sm:$0xff] %v16051_v29  ;;  %v16064_v37 = vsel %vm13604_vm2, %v11458_v34, %v9450_v17  ;;  %v9464_v31 = vrot.slane %v16034_v27, 5  ;;  %v9357_v44 = vld [vmem:[#allocation2 + $0x78] sm:$0xe]  ;;  %v13381_v2 = vld [vmem:[%s16951_s3 + $0xa8] sm:$0xff]  }
 0x452   : > { %12493 = vmatmul.mubr.msk.bf16.gmra.mrb[28].mxu1 %vm540_vm3, %v13379_v47  ;;  %17111 = vst [vmem:[#allocation59_spill] sm:$0xff] %v16055_v23  ;;  %v16060_v51 = vsel %vm13604_vm2, %v9445_v32, %v9446_v46  ;;  %17113 = vst [vmem:[#allocation61_spill] sm:$0xff] %v16064_v37  ;;  %v9460_v47 = vrot.slane %v16032_v38, 5  ;;  %v16068_v11 = vld [vmem:[#allocation2 + $0x88] sm:$0xf]  ;;  %v16076_v46 = vsel %vm13604_vm2, %v9452_v33, %v9453_v62  ;;  %v11461_v33 = vrot.slane %v9357_v44, 9 }
 0x453   : > { %12504 = vmatprep.mubr.msk.bf16.mxu1 %vm540_vm3, %v15844_v8  ;;  %v9457_v8 = vrot.slane %v16020_v7, 5  ;;  %17112 = vst [vmem:[#allocation60_spill] sm:$0xff] %v16060_v51  ;;  %v16070_v57 = vld [vmem:[#allocation2 + $0x94] sm:$0xf]  ;;  %17115 = vst [vmem:[#allocation63_spill] sm:$0xff] %v16076_v46  ;;  %v9466_v27 = vrot.slane %v9464_v31, 4  ;;  %v16094_v24 = vsel %vm13604_vm2, %v11460_v13, %v9464_v31 }
 0x454   : > { %17114 = vst [vmem:[#allocation62_spill] sm:$0xff] %v16070_v57  ;;  %v8624_v34 = vld [vmem:[#allocation2 + $0x8c] sm:$0x1]  ;;  %v9467_v7 = vrot.slane %v16051_v29, 5  ;;  %17118 = vst [vmem:[#allocation66_spill] sm:$0xff] %v16094_v24  ;;  %v9474_v23 = vrot.slane %v8621_v59, 5 }
 0x455   : > { %v9459_v32 = vrot.slane %v9457_v8, 4  ;;  %v16082_v38 = vsel %vm13604_vm2, %v11459_v14, %v9457_v8  ;;  %v9471_v14 = vrot.slane %v16046_v19, 5  ;;  %v9359_v8 = vld [vmem:[#allocation2 + $0x90] sm:$0xe]  ;;  %v8627_v17 = vld [vmem:[#allocation2 + $0x98] sm:$0x1] }
 0x456   : > { %17116 = vst [vmem:[#allocation64_spill] sm:$0xff] %v16082_v38  ;;  %v8629_v46 = vld [vmem:[#allocation2 + $0xa0] sm:$0xf]  ;;  %v16101_v51 = vsel %vm13604_vm2, %v9466_v27, %v9467_v7  ;;  %v8632_v13 = vld [vmem:[#allocation2 + $0xac] sm:$0xf]  ;;  %v9481_v29 = vrot.slane %v8624_v34, 5 }
 0x457   : > { %v16090_v62 = vsel %vm13604_vm2, %v9459_v32, %v9460_v47  ;;  %17119 = vst [vmem:[#allocation67_spill] sm:$0xff] %v16101_v51  ;;  %v9478_v47 = vrot.slane %v16068_v11, 5  ;;  %v9473_v31 = vrot.slane %v9471_v14, 4  ;;  %v11462_v32 = vrot.slane %v9358_v16, 9  ;;  %v9360_v19 = vld [vmem:[#allocation2 + $0x9c] sm:$0xe] }
 0x458   : > { %17117 = vst [vmem:[#allocation65_spill] sm:$0xff] %v16090_v62  ;;  %v8630_v7 = vld [vmem:[#allocation2 + $0xa4] sm:$0x1]  ;;  %v16113_v59 = vsel %vm13604_vm2, %v11461_v33, %v9471_v14  ;;  %v9485_v37 = vrot.slane %v16070_v57, 5  ;;  %v13382_v16 = vld [vmem:[%s16951_s3 + $0xb0] sm:$0xff]   ;;  %v9488_v33 = vrot.slane %v8627_v17, 5 }
 0x459   : > { %v9480_v27 = vrot.slane %v9478_v47, 4  ;;  %v8633_v34 = vld [vmem:[#allocation2 + $0xb0] sm:$0x1]  ;;  %v9492_v14 = vrot.slane %v8629_v46, 5  ;;  %v8635_v44 = vld [vmem:[#allocation2 + $0xb8] sm:$0xf] }
 0x45a   : > { %12505 = vmatmul.mubr.msk.bf16.vlgmr.msra.gmra.mrb[0].mxu1 %vm540_vm3, %v15871_v36  ;;  %v11463_v36 = vrot.slane %v9359_v8, 9  ;;  %v9487_v24 = vrot.slane %v9485_v37, 4  ;;  %v11464_v62 = vrot.slane %v9360_v19, 9  ;;  %v9361_v38 = vld [vmem:[#allocation2 + $0xa8] sm:$0xe]  ;;  %v9499_v19 = vrot.slane %v8632_v13, 5 }
 0x45b   : > { %12508 = vmatprep.mubr.msk.bf16.mxu1 %vm540_vm3, %v15888_v12  ;;  %12537 = vmatpush3.bf16.msra.mxu1 %v15818_v18  ;;  %v16121_v12 = vsel %vm13604_vm2, %v9473_v31, %v9474_v23  ;;  %v16125_v18 = vsel %vm13604_vm2, %v11462_v32, %v9478_v47  ;;  %v16131_v51 = vsel %vm13604_vm2, %v9480_v27, %v9481_v29  ;;  %v7234_v23 = vshrl.u32 %v15625_v1, 16  ;;  %v9362_v17 = vld [vmem:[#allocation2 + $0xb4] sm:$0xe]  ;;  %v8636_v46 = vld [vmem:[#allocation2 + $0xbc] sm:$0x1] }
 0x45c   : > { %12538 = vmatprep.subr.bf16.mxu1 %v13381_v2  ;;  %17120 = vst [vmem:[#allocation68_spill] sm:$0xff] %v16125_v18  ;;  %17121 = vst [vmem:[#allocation69_spill] sm:$0xff] %v16131_v51  ;;  %v9494_v47 = vrot.slane %v9492_v14, 4  ;;  %v9495_v32 = vrot.slane %v8630_v7, 5  ;;  %v8638_v57 = vld [vmem:[#allocation2 + $0xc4] sm:$0xf]  ;;  %v16138_v8 = vsel %vm13604_vm2, %v11463_v36, %v9485_v37  ;;  %v16142_v29 = vsel %vm13604_vm2, %v9487_v24, %v9488_v33 }
 0x45d   : > { %17122 = vst [vmem:[#allocation70_spill] sm:$0xff] %v16142_v29  ;;  %v16146_v1 = vsel %vm13604_vm2, %v11464_v62, %v9492_v14  ;;  %v11465_v27 = vrot.slane %v9361_v38, 9  ;;  %v9506_v24 = vrot.slane %v8635_v44, 5  ;;  %v9363_v36 = vld [vmem:[#allocation2 + $0xc0] sm:$0xe]  ;;  %v9501_v13 = vrot.slane %v9499_v19, 4 }
 0x45e   : > { %v16155_v37 = vsel %vm13604_vm2, %v9494_v47, %v9495_v32  ;;  %v8639_v33 = vld [vmem:[#allocation2 + $0xc8] sm:$0x1]  ;;  %v9502_v14 = vrot.slane %v8633_v34, 5  ;;  %v11466_v31 = vrot.slane %v9362_v17, 9  ;;  %v7236_v51 = vrot.slane %v7234_v23, 4  ;;  %v17201_v35 = vld [vmem:[#allocation53_spill] sm:$0xff] }
 0x45f   : > { %12539 = vmatpush3.bf16.msra.mxu1 %v13381_v2  ;;  %v13383_v2 = vld [vmem:[%s16951_s3 + $0xb8] sm:$0xff]   ;;  %v11488_v62 = vcombine.low %v16146_v1, %v16155_v37  ;;  %v9508_v18 = vrot.slane %v9506_v24, 4  ;;  %v9509_v7 = vrot.slane %v8636_v46, 5  ;;  %v9513_v29 = vrot.slane %v8638_v57, 5  ;;  %v6986_v23 = vld [vmem:[#allocation2 + $0x84] sm:$0xf] }
 0x460   : > { %12540 = vmatprep.subr.bf16.mxu1 %v13382_v16  ;;  %v16165_v38 = vsel %vm13604_vm2, %v11465_v27, %v9499_v19  ;;  %v16169_v44 = vsel %vm13604_vm2, %v9501_v13, %v9502_v14  ;;  %v16173_v34 = vsel %vm13604_vm2, %v11466_v31, %v9506_v24  ;;  %v9516_v32 = vrot.slane %v8639_v33, 5  ;;  %v11514_v37 = vld [vmem:[%s13602_s15 + $0x18] sm:$0xe] }
 0x461   : > { %v11489_v57 = vcombine.low %v16165_v38, %v16169_v44  ;;  %v9515_v47 = vrot.slane %v9513_v29, 4  ;;  %v17123_v31 = vor.u32 %v15904_v25, %v15902_v22  ;;  %v7216_v46 = vshll.u32 %v15637_v63, 16  ;;  %v11519_v38 = vld [vmem:[%s13602_s15 + $0x2c] sm:$0x1] }
 0x462   : > { %12509 = vmatmul.mubr.msk.bf16.gmra.mrb[4].mxu1 %vm540_vm3, %v15918_v50  ;;  %v11467_v50 = vrot.slane %v9363_v36, 9  ;;  %v17124_v19 = vshrl.u32 %v15928_v43, 16  ;;  %v7254_v36 = vshll.u32 %v15648_v0, 16  ;;  %v7258_v13 = vshrl.u32 %v15648_v0, 16 }
 0x463   : > { %12512 = vmatprep.mubr.msk.bf16.mxu1 %vm540_vm3, %v15930_v15  ;;  %12541 = vmatpush3.bf16.msra.mxu1 %v13382_v16  ;;  %v16178_v15 = vld [vmem:[%s16951_s3 + $0xc0] sm:$0xff]   ;;  %v16184_v16 = vsel %vm13604_vm2, %v9508_v18, %v9509_v7  ;;  %v7180_v17 = vrot.slane %v17123_v31, 4  ;;  %v16202_v22 = vsel %vm13604_vm2, %v9515_v47, %v9516_v32  ;;  %v17125_v63 = vshll.u32 %v15928_v43, 16 }
 0x464   : > { %12542 = vmatprep.subr.bf16.mxu1 %v13383_v2  ;;  %v7223_v27 = vrot.slane %v17124_v19, 4  ;;  %v11490_v24 = vcombine.low %v16173_v34, %v16184_v16  ;;  %v16198_v18 = vsel %vm13604_vm2, %v11467_v50, %v9513_v29  ;;  %v7245_v7 = vshrl.u32 %v6986_v23, 16  ;;  %v11516_v34 = vld [vmem:[%s13602_s15 + $0x20] sm:$0x1] }
 0x465   : > { %v7226_v25 = vrot.slane %v17125_v63, 5  ;;  %v7248_v33 = vshll.u32 %v6986_v23, 16  ;;  %v11491_v14 = vcombine.low %v16198_v18, %v16202_v22  ;;  %v17126_v0 = vor.u32 %v15912_v48, %v15910_v52 }
 0x466   : > { %v17127_v29 = vor.u32 %v15956_v21, %v15954_v56  ;;  %v17128_v47 = vor.u32 %v15960_v26, %v15958_v10  ;;  %v7237_v43 = vor.u32 %v7236_v51, %v16013_v5  ;;  %v17130_v48 = vsel %vm14829_vm11, %v15900_v42, %v15878_v28 }
 0x467   : > { %12543 = vmatpush3.bf16.msra.mxu1 %v13383_v2  ;;  %v7190_v31 = vrot.slane %v17126_v0, 4  ;;  %v17129_v2 = vsel %vm14829_vm11, %v15908_v4, %v15926_v39  ;;  %v17131_v21 = vshll.u32 %v15598_v41, 16  ;;  %v7218_v26 = vrot.slane %v7216_v46, 5  ;;  %v6989_v0 = vld [vmem:[#allocation2 + $0x90] sm:$0xf] }
 0x468   : > { %v7204_v50 = vrot.slane %v17127_v29, 4  ;;  %v7214_v32 = vrot.slane %v17128_v47, 4  ;;  %12576 = vmatprep.subr.bf16.mxu1 %v16178_v15  ;;  %v11275_v56 = vcombine.low %v17130_v48, %v17129_v2  ;;  %v7240_v51 = vshll.u32 %v15639_v40, 16 }
 0x469   : > { %v7194_v23 = vrot.slane %v17131_v21, 5  ;;  %v16234_v19 = vrot.slane %v7254_v36, 5  ;;  %v7260_v63 = vrot.slane %v7258_v13, 4  ;;  %v7185_v28 = vsel %vm14829_vm11, %v7180_v17, %v15910_v52  ;;  %v6992_v17 = vld [vmem:[#allocation2 + $0x9c] sm:$0xf] }
 0x46a   : > { %12513 = vmatmul.mubr.msk.bf16.gmra.mrb[8].mxu1 %vm540_vm3, %v15932_v30  ;;  %v7227_v42 = vor.u32 %v7226_v25, %v7223_v27  ;;  %v7247_v4 = vrot.slane %v7245_v7, 4  ;;  %v7250_v41 = vrot.slane %v7248_v33, 5  ;;  %v7209_v40 = vsel %vm14829_vm11, %v7204_v50, %v15958_v10 }
 0x46b   : > { %12516 = vmatprep.mubr.msk.bf16.mxu1 %vm540_vm3, %v11275_v56  ;;  %v7195_v39 = vsel %vm14829_vm11, %v7190_v31, %v7194_v23  ;;  %v7219_v30 = vsel %vm14829_vm11, %v7214_v32, %v7218_v26  ;;  %v7238_v46 = vrot.slane %v7237_v43, 4  ;;  %v7269_v36 = vshrl.u32 %v6989_v0, 16 }
 0x46c   : > { %v7272_v13 = vshll.u32 %v6989_v0, 16  ;;  %v7278_v29 = vshll.u32 %v15650_v45, 16  ;;  %v7282_v52 = vshrl.u32 %v15650_v45, 16  ;;  %v7242_v27 = vrot.slane %v7240_v51, 5 }
 0x46d   : > { %v7261_v25 = vor.u32 %v7260_v63, %v16234_v19  ;;  %v7302_v7 = vshll.u32 %v15677_v49, 16  ;;  %v7306_v33 = vshrl.u32 %v15677_v49, 16  ;;  %v11276_v31 = vcombine.low %v7185_v28, %v7195_v39 }
 0x46e   : > { %v11277_v10 = vcombine.low %v7209_v40, %v7219_v30  ;;  %v7228_v50 = vrot.slane %v7227_v42, 4  ;;  %v7251_v47 = vor.u32 %v7250_v41, %v7247_v4  ;;  %v7243_v32 = vsel %vm14829_vm11, %v7238_v46, %v7242_v27  ;;  %v6995_v41 = vld [vmem:[#allocation2 + $0xa8] sm:$0xf]  ;;  %v13427_v27 = vld [vmem:[#allocation2 + $0x98] sm:$0x1] }
 0x46f   : > { %v7264_v43 = vshll.u32 %v15661_v54, 16  ;;  %v7293_v2 = vshrl.u32 %v6992_v17, 16  ;;  %v7296_v48 = vshll.u32 %v6992_v17, 16  ;;  %v7271_v45 = vrot.slane %v7269_v36, 4  ;;  %v6998_v36 = vld [vmem:[#allocation2 + $0xb4] sm:$0xf] }
 0x470   : > { %v7274_v56 = vrot.slane %v7272_v13, 5  ;;  %v16255_v21 = vrot.slane %v7278_v29, 5  ;;  %v7284_v23 = vrot.slane %v7282_v52, 4  ;;  %v7262_v26 = vrot.slane %v7261_v25, 4 }
 0x471   : > { %v16258_v49 = vrot.slane %v7302_v7, 5  ;;  %v7308_v51 = vrot.slane %v7306_v33, 4  ;;  %v7233_v63 = vsel %vm14829_vm11, %v7228_v50, %v16013_v5  ;;  %v7252_v54 = vrot.slane %v7251_v47, 4 }
 0x472   : > { %12517 = vmatmul.mubr.msk.bf16.gmra.mrb[12].mxu1 %vm540_vm3, %v11276_v31  ;;  %v11278_v0 = vcombine.low %v7233_v63, %v7243_v32  ;;  %v7266_v28 = vrot.slane %v7264_v43, 5  ;;  %v7295_v42 = vrot.slane %v7293_v2, 4  ;;  %v7298_v4 = vrot.slane %v7296_v48, 5 }
 0x473   : > { %12520 = vmatprep.mubr.msk.bf16.mxu1 %vm540_vm3, %v11277_v10  ;;  %v7275_v39 = vor.u32 %v7274_v56, %v7271_v45  ;;  %v7285_v40 = vor.u32 %v7284_v23, %v16255_v21  ;;  %v7326_v30 = vshll.u32 %v15693_v9, 16  ;;  %v7330_v46 = vshrl.u32 %v15693_v9, 16 }
 0x474   : > { %v7267_v13 = vsel %vm14829_vm11, %v7262_v26, %v7266_v28  ;;  %v7309_v29 = vor.u32 %v7308_v51, %v16258_v49  ;;  %v7350_v5 = vshll.u32 %v15711_v20, 16  ;;  %v7354_v52 = vshrl.u32 %v15711_v20, 16  ;;  %v7001_v28 = vld [vmem:[#allocation2 + $0xc0] sm:$0xf] }
 0x475   : > { %v7257_v17 = vsel %vm14829_vm11, %v7252_v54, %v16234_v19  ;;  %v7288_v25 = vshll.u32 %v13427_v27, 16  ;;  %v7317_v7 = vshrl.u32 %v6995_v41, 16  ;;  %v7320_v33 = vshll.u32 %v6995_v41, 16 }
 0x476   : > { %v7299_v31 = vor.u32 %v7298_v4, %v7295_v42  ;;  %v7312_v9 = vshll.u32 %v15685_v61, 16  ;;  %v7341_v10 = vshrl.u32 %v6998_v36, 16  ;;  %v7344_v50 = vshll.u32 %v6998_v36, 16  ;;  %v13428_v36 = vld [vmem:[#allocation2 + $0xb0] sm:$0x1] }
 0x477   : > { %v11279_v47 = vcombine.low %v7257_v17, %v7267_v13  ;;  %v7286_v32 = vrot.slane %v7285_v40, 4  ;;  %v7328_v43 = vrot.slane %v7326_v30, 5  ;;  %v7332_v2 = vrot.slane %v7330_v46, 4 }
 0x478   : > { %v7276_v20 = vrot.slane %v7275_v39, 4  ;;  %v7310_v48 = vrot.slane %v7309_v29, 4  ;;  %v7352_v45 = vrot.slane %v7350_v5, 5  ;;  %v7356_v56 = vrot.slane %v7354_v52, 4 }
 0x479   : > { %v7290_v19 = vrot.slane %v7288_v25, 5  ;;  %v7319_v23 = vrot.slane %v7317_v7, 4  ;;  %v7322_v26 = vrot.slane %v7320_v33, 5  ;;  %v7300_v51 = vrot.slane %v7299_v31, 4 }
 0x47a   : > { %12521 = vmatmul.mubr.msk.bf16.gmra.mrb[16].mxu1 %vm540_vm3, %v11278_v0  ;;  %v7314_v63 = vrot.slane %v7312_v9, 5  ;;  %v7343_v61 = vrot.slane %v7341_v10, 4  ;;  %v7346_v54 = vrot.slane %v7344_v50, 5  ;;  %v7333_v4 = vor.u32 %v7332_v2, %v7328_v43 }
 0x47b   : > { %12524 = vmatprep.mubr.msk.bf16.mxu1 %vm540_vm3, %v11279_v47  ;;  %v7291_v42 = vsel %vm14829_vm11, %v7286_v32, %v7290_v19  ;;  %v7374_v0 = vshll.u32 %v15726_v60, 16  ;;  %v7378_v41 = vshrl.u32 %v15726_v60, 16  ;;  %v7281_v39 = vsel %vm14829_vm11, %v7276_v20, %v16255_v21  ;;  %v13429_v60 = vld [vmem:[#allocation2 + $0xbc] sm:$0x1] }
 0x47c   : > { %v7315_v40 = vsel %vm14829_vm11, %v7310_v48, %v7314_v63  ;;  %v7357_v30 = vor.u32 %v7356_v56, %v7352_v45  ;;  %v7323_v46 = vor.u32 %v7322_v26, %v7319_v23  ;;  %v7336_v13 = vshll.u32 %v13428_v36, 16 }
 0x47d   : > { %v7365_v29 = vshrl.u32 %v7001_v28, 16  ;;  %v7368_v5 = vshll.u32 %v7001_v28, 16  ;;  %v11280_v52 = vcombine.low %v7281_v39, %v7291_v42  ;;  %v7305_v17 = vsel %vm14829_vm11, %v7300_v51, %v16258_v49  ;;  %v13430_v51 = vld [vmem:[#allocation2 + $0xc8] sm:$0x1] }
 0x47e   : > { %v7347_v27 = vor.u32 %v7346_v54, %v7343_v61  ;;  %v7360_v25 = vshll.u32 %v13429_v60, 16  ;;  %v11281_v7 = vcombine.low %v7305_v17, %v7315_v40  ;;  %v7334_v33 = vrot.slane %v7333_v4, 4 }
 0x47f   : > { %v7376_v21 = vrot.slane %v7374_v0, 5  ;;  %v7380_v31 = vrot.slane %v7378_v41, 4  ;;  %v7358_v9 = vrot.slane %v7357_v30, 4  ;;  %v7324_v10 = vrot.slane %v7323_v46, 4 }
 0x480   : > { %v7338_v50 = vrot.slane %v7336_v13, 5  ;;  %v7367_v47 = vrot.slane %v7365_v29, 4  ;;  %v7370_v32 = vrot.slane %v7368_v5, 5  ;;  %v7348_v2 = vrot.slane %v7347_v27, 4 }
 0x481   : > { %v7362_v20 = vrot.slane %v7360_v25, 5  ;;  %v7381_v48 = vor.u32 %v7380_v31, %v7376_v21  ;;  %v7776_v19 = vrot.slane %v15802_v55, 5  ;;  %v7329_v23 = vsel %vm14829_vm11, %v7324_v10, %v7328_v43  ;;  %v7710_v55 = vld [vmem:[#allocation2 + $0xc] sm:$0xe]  ;;  %v13387_v31 = vld [vmem:[%s16951_s3 + $0xd8] sm:$0xff]   ;;  %v17136_v10 = vld [vmem:[#allocation9_spill] sm:$0xff] }
 0x482   : > { %12525 = vmatmul.mubr.msk.bf16.gmra.mrb[20].mxu1 %vm540_vm3, %v11280_v52  ;;  %v7339_v49 = vsel %vm14829_vm11, %v7334_v33, %v7338_v50  ;;  %v7371_v26 = vor.u32 %v7370_v32, %v7367_v47  ;;  %v7384_v63 = vshll.u32 %v13430_v51, 16  ;;  %v7353_v54 = vsel %vm14829_vm11, %v7348_v2, %v7352_v45  ;;  %v13385_v25 = vld [vmem:[%s16951_s3 + $0xc8] sm:$0xff]   ;;  %v17133_v33 = vld [vmem:[#allocation7_spill] sm:$0xff]  ;;  %v17138_v47 = vld [vmem:[#allocation10_spill] sm:$0xff] }
 0x483   : > { %12528 = vmatprep.mubr.msk.bf16.mxu1 %vm540_vm3, %v11281_v7  ;;  %v7363_v56 = vsel %vm14829_vm11, %v7358_v9, %v7362_v20  ;;  %v11282_v61 = vcombine.low %v7329_v23, %v7339_v49  ;;  %v7382_v42 = vrot.slane %v7381_v48, 4  ;;  %v7778_v4 = vrot.slane %v7776_v19, 4  ;;  %v17132_v7 = vld [vmem:[#allocation6_spill] sm:$0xff]  ;;  %v17135_v9 = vld [vmem:[#allocation8_spill] sm:$0xff]  ;;  %v17141_v20 = vld [vmem:[#allocation11_spill] sm:$0xff] }
 0x484   : > { %v11283_v28 = vcombine.low %v7353_v54, %v7363_v56  ;;  %v7372_v0 = vrot.slane %v7371_v26, 4  ;;  %v7386_v41 = vrot.slane %v7384_v63, 5  ;;  %v7779_v39 = vrot.slane %v15820_v58, 5  ;;  %v7711_v58 = vld [vmem:[#allocation2 + $0x18] sm:$0xe]  ;;  %v17139_v32 = vld [vmem:[#allocation12_spill] sm:$0xff] }
 0x485   : > { %v7783_v40 = vrot.slane %v15809_v6, 5  ;;  %v11305_v30 = vrot.slane %v7710_v55, 9  ;;  %v7786_v6 = vrot.slane %v15824_v53, 5  ;;  %v11306_v52 = vrot.slane %v7711_v58, 9  ;;  %v13386_v53 = vld [vmem:[%s16951_s3 + $0xd0] sm:$0xff]   ;;  %v17144_v56 = vld [vmem:[#allocation14_spill] sm:$0xff] }
 0x486   : > { %v7387_v43 = vsel %vm14829_vm11, %v7382_v42, %v7386_v41  ;;  %v7780_v45 = vsel %vm13604_vm2, %v7778_v4, %v7779_v39  ;;  %v7377_v46 = vsel %vm14829_vm11, %v7372_v0, %v7376_v21  ;;  %v17134_v21 = vcombine.low %v17132_v7, %v17133_v33  ;;  %v17142_v49 = vld [vmem:[#allocation13_spill] sm:$0xff]  ;;  %v17147_v26 = vld [vmem:[#allocation16_spill] sm:$0xff]  ;;  %v17153_v42 = vld [vmem:[#allocation19_spill] sm:$0xff] }
 0x487   : > { %v11284_v36 = vcombine.low %v7377_v46, %v7387_v43  ;;  %v7777_v13 = vsel %vm13604_vm2, %v11305_v30, %v7776_v19  ;;  %v7785_v5 = vrot.slane %v7783_v40, 4  ;;  %v7784_v27 = vsel %vm13604_vm2, %v11306_v52, %v7783_v40  ;;  %v17145_v19 = vld [vmem:[#allocation15_spill] sm:$0xff]  ;;  %v17148_v51 = vld [vmem:[#allocation17_spill] sm:$0xff]  ;;  %v17151_v54 = vld [vmem:[#allocation20_spill] sm:$0xff] }
 0x488   : > { %v11329_v29 = vcombine.low %v7777_v13, %v7780_v45  ;;  %v17137_v50 = vcombine.low %v17135_v9, %v17136_v10  ;;  %v17140_v2 = vcombine.low %v17138_v47, %v17139_v32  ;;  %v17143_v48 = vcombine.low %v17141_v20, %v17142_v49  ;;  %v17154_v4 = vld [vmem:[#allocation21_spill] sm:$0xff]  ;;  %v17156_v41 = vld [vmem:[#allocation22_spill] sm:$0xff]  ;;  %v17157_v55 = vld [vmem:[#allocation23_spill] sm:$0xff] }
 0x489   : > { %v7787_v17 = vsel %vm13604_vm2, %v7785_v5, %v7786_v6  ;;  %v17146_v23 = vcombine.low %v17144_v56, %v17145_v19  ;;  %v17149_v63 = vcombine.low %v17147_v26, %v17148_v51  ;;  %v17155_v0 = vcombine.low %v17153_v42, %v17154_v4  ;;  %v17159_v43 = vld [vmem:[#allocation24_spill] sm:$0xff]  ;;  %v17160_v40 = vld [vmem:[#allocation25_spill] sm:$0xff]  ;;  %v17162_v45 = vld [vmem:[#allocation26_spill] sm:$0xff] }
 0x48a   : > { %12529 = vmatmul.mubr.msk.bf16.gmra.mrb[24].mxu1 %vm540_vm3, %v11282_v61  ;;  %v11330_v60 = vcombine.low %v7784_v27, %v7787_v17  ;;  %v17150_v61 = vld [vmem:[#allocation18_spill] sm:$0xff]  ;;  %v17158_v39 = vcombine.low %v17156_v41, %v17157_v55  ;;  %v17161_v30 = vcombine.low %v17159_v43, %v17160_v40  ;;  %v17163_v46 = vld [vmem:[#allocation27_spill] sm:$0xff]  ;;  %v17165_v13 = vld [vmem:[#allocation28_spill] sm:$0xff]  ;;  %v9987_v22 = vrot.slane %v11516_v34, 5 }
 0x48b   : > { %12532 = vmatprep.mubr.msk.bf16.mxu1 %vm540_vm3, %v11283_v28  ;;  %v17152_v28 = vcombine.low %v17150_v61, %v17151_v54  ;;  %v17168_v58 = vld [vmem:[#allocation30_spill] sm:$0xff]  ;;  %v17169_v6 = vld [vmem:[#allocation31_spill] sm:$0xff]  ;;  %v17171_v27 = vld [vmem:[#allocation32_spill] sm:$0xff] }
 0x48c   : > { %v17170_v52 = vcombine.low %v17168_v58, %v17169_v6  ;;  %v13388_v17 = vld [vmem:[#allocation2 + $0x18] sm:$0xff]   ;;  %v13389_v7 = vld [vmem:[#allocation2 + $0x24] sm:$0xff]  }
 0x48d   : > { %v13395_v33 = vld [vmem:[%s16951_s3 + $0xe8] sm:$0xff]   ;;  %v13405_v9 = vld [vmem:[%s16951_s3 + $0xf8] sm:$0xff]   ;;  %v13396_v32 = vld [vmem:[#allocation2 + $0x60] sm:$0xff]  }
 0x48e   : > { %v13393_v10 = vld [vmem:[#allocation2 + $0x48] sm:$0xff]   ;;  %v13394_v47 = vld [vmem:[#allocation2 + $0x54] sm:$0xff]   ;;  %v8598_v19 = vld [vmem:[#allocation2 + $0x24] sm:$0xf] }
 0x48f   : > { %v8595_v20 = vld [vmem:[#allocation2 + $0x18] sm:$0xf]  ;;  %v8671_v42 = vshll.u32 %v8598_v19, 16  ;;  %v17175_v41 = vld [vmem:[#allocation36_spill] sm:$0xff] }
 0x490   : > { %v17174_v49 = vld [vmem:[#allocation34_spill] sm:$0xff]  ;;  %v8644_v26 = vshrl.u32 %v8595_v20, 16  ;;  %v8647_v51 = vshll.u32 %v8595_v20, 16  ;;  %v8677_v55 = vshll.u32 %v17175_v41, 16 }
 0x491   : > { %v8657_v56 = vshrl.u32 %v17174_v49, 16  ;;  %v8673_v40 = vrot.slane %v8671_v42, 5 }
 0x492   : > { %12533 = vmatmul.mubr.msk.bf16.gmra.mrb[28].mxu1 %vm540_vm3, %v11284_v36  ;;  %v17164_v36 = vcombine.low %v17162_v45, %v17163_v46  ;;  %v8646_v4 = vrot.slane %v8644_v26, 4  ;;  %v8601_v45 = vld [vmem:[#allocation2 + $0x30] sm:$0xf]  ;;  %v13402_v46 = vld [vmem:[#allocation2 + $0x9c] sm:$0xff]   ;;  %v16421_v58 = vrot.slane %v8677_v55, 5 }
 0x493   : > { %12544 = vmatprep.mubr.msk.bf16.mxu1 %vm540_vm3, %v11329_v29  ;;  %v17166_v29 = vld [vmem:[#allocation29_spill] sm:$0xff]  ;;  %v8659_v54 = vrot.slane %v8657_v56, 4  ;;  %v8692_v6 = vshrl.u32 %v8601_v45, 16  ;;  %v17179_v26 = vld [vmem:[#allocation39_spill] sm:$0xff]  ;;  %v8607_v55 = vld [vmem:[#allocation2 + $0x48] sm:$0xf] }
 0x494   : > { %v17167_v5 = vcombine.low %v17165_v13, %v17166_v29  ;;  %v17176_v13 = vld [vmem:[#allocation35_spill] sm:$0xff]  ;;  %v13404_v56 = vld [vmem:[#allocation2 + $0xb4] sm:$0xff]  }
 0x495   : > { %v8663_v29 = vshll.u32 %v17176_v13, 16 }
 0x49a   : > { %12545 = vmatmul.mubr.msk.bf16.vlgmr.msra.gmra.mrb[0].mxu1 %vm540_vm3, %v11330_v60  ;;  %v17172_v60 = vld [vmem:[#allocation33_spill] sm:$0xff] }
 0x49b   : > { %12548 = vmatprep.mubr.msk.bf16.mxu1 %vm540_vm3, %v17134_v21  ;;  %12577 = vmatpush3.bf16.msra.mxu1 %v16178_v15  ;;  %v13390_v15 = vld [vmem:[%s16951_s3 + $0xe0] sm:$0xff]   ;;  %v13391_v21 = vld [vmem:[#allocation2 + $0x30] sm:$0xff]  }
 0x49c   : > { %12578 = vmatprep.subr.bf16.mxu1 %v13385_v25 }
 0x49f   : > { %12579 = vmatpush3.bf16.msra.mxu1 %v13385_v25  ;;  %v17173_v25 = vcombine.low %v17171_v27, %v17172_v60  ;;  %v8695_v60 = vshll.u32 %v8601_v45, 16  ;;  %v16448_v45 = vld [vmem:[#allocation2 + $0xd0] sm:$0xf] }
 0x4a0   : > { %12580 = vmatprep.subr.bf16.mxu1 %v13386_v53 }
 0x4a1   : > { %v8697_v20 = vrot.slane %v8695_v60, 5 }
 0x4a2   : > { %12549 = vmatmul.mubr.msk.bf16.gmra.mrb[4].mxu1 %vm540_vm3, %v17137_v50  ;;  %v16407_v50 = vld [vmem:[%s16951_s3 + $0x100] sm:$0xff]  }
 0x4a3   : > { %12552 = vmatprep.mubr.msk.bf16.mxu1 %vm540_vm3, %v17140_v2  ;;  %12581 = vmatpush3.bf16.msra.mxu1 %v13386_v53  ;;  %v13400_v53 = vld [vmem:[%s16951_s3 + $0xf0] sm:$0xff]  }
 0x4a4   : > { %12582 = vmatprep.subr.bf16.mxu1 %v13387_v31  ;;  %v13397_v2 = vld [vmem:[#allocation2 + $0x6c] sm:$0xff]  }
 0x4a7   : > { %12583 = vmatpush3.bf16.msra.mxu1 %v13387_v31  ;;  %v13392_v31 = vld [vmem:[#allocation2 + $0x3c] sm:$0xff]  }
 0x4a8   : > { %12616 = vmatprep.subr.bf16.mxu1 %v13390_v15 }
 0x4aa   : > { %12553 = vmatmul.mubr.msk.bf16.gmra.mrb[8].mxu1 %vm540_vm3, %v17143_v48  ;;  %v8653_v48 = vshll.u32 %v17174_v49, 16 }
 0x4ab   : > { %12556 = vmatprep.mubr.msk.bf16.mxu1 %vm540_vm3, %v17146_v23  ;;  %v13399_v23 = vld [vmem:[#allocation2 + $0x84] sm:$0xff]  }
 0x4ac   : > { %v8655_v61 = vrot.slane %v8653_v48, 5 }
 0x4b2   : > { %12557 = vmatmul.mubr.msk.bf16.gmra.mrb[12].mxu1 %vm540_vm3, %v17149_v63  ;;  %v13401_v63 = vld [vmem:[#allocation2 + $0x90] sm:$0xff]  }
 0x4b3   : > { %12560 = vmatprep.mubr.msk.bf16.mxu1 %vm540_vm3, %v17152_v28  ;;  %v8668_v28 = vshrl.u32 %v8598_v19, 16 }
 0x4b5   : > { %v8670_v43 = vrot.slane %v8668_v28, 4 }
 0x4ba   : > { %12561 = vmatmul.mubr.msk.bf16.gmra.mrb[16].mxu1 %vm540_vm3, %v17155_v0  ;;  %v8649_v0 = vrot.slane %v8647_v51, 5  ;;  %v8711_v51 = vshll.u32 %v17179_v26, 16 }
 0x4bb   : > { %12564 = vmatprep.mubr.msk.bf16.mxu1 %vm540_vm3, %v17158_v39  ;;  %v8660_v39 = vor.u32 %v8659_v54, %v8655_v61  ;;  %v13406_v54 = vld [vmem:[#allocation2 + $0xc0] sm:$0xff]  }
 0x4c2   : > { %12565 = vmatmul.mubr.msk.bf16.gmra.mrb[20].mxu1 %vm540_vm3, %v17161_v30  ;;  %v8681_v30 = vshrl.u32 %v17175_v41, 16 }
 0x4c3   : > { %12568 = vmatprep.mubr.msk.bf16.mxu1 %vm540_vm3, %v17164_v36  ;;  %v8650_v36 = vor.u32 %v8649_v0, %v8646_v4  ;;  %v17180_v4 = vld [vmem:[#allocation40_spill] sm:$0xff] }
 0x4c4   : > { %v8683_v27 = vrot.slane %v8681_v30, 4  ;;  %v8725_v0 = vshll.u32 %v17180_v4, 16  ;;  %v8729_v41 = vshrl.u32 %v17180_v4, 16 }
 0x4ca   : > { %12569 = vmatmul.mubr.msk.bf16.gmra.mrb[24].mxu1 %vm540_vm3, %v17167_v5  ;;  %v13403_v5 = vld [vmem:[#allocation2 + $0xa8] sm:$0xff]  }
 0x4cb   : > { %12572 = vmatprep.mubr.msk.bf16.mxu1 %vm540_vm3, %v17170_v52  ;;  %v8661_v52 = vrot.slane %v8660_v39, 4 }
 0x4d2   : > { %12573 = vmatmul.mubr.msk.bf16.gmra.mrb[28].mxu1 %vm540_vm3, %v17173_v25  ;;  %v17177_v25 = vld [vmem:[#allocation37_spill] sm:$0xff] }
 0x4d3   : > { %12584 = vmatprep.mubr.msk.bf16.mxu1 %vm540_vm3, %v13388_v17  ;;  %v8674_v17 = vor.u32 %v8673_v40, %v8670_v43  ;;  %v17181_v40 = vld [vmem:[#allocation41_spill] sm:$0xff] }
 0x4d4   : > { %v8749_v30 = vshll.u32 %v17181_v40, 16  ;;  %v8753_v13 = vshrl.u32 %v17181_v40, 16 }
 0x4da   : > { %12585 = vmatmul.mubr.msk.bf16.vlgmr.msra.gmra.mrb[0].mxu1 %vm540_vm3, %v13389_v7  ;;  %v8701_v7 = vshll.u32 %v17177_v25, 16 }
 0x4db   : > { %12588 = vmatprep.mubr.msk.bf16.mxu1 %vm540_vm3, %v13391_v21  ;;  %12617 = vmatpush3.bf16.msra.mxu1 %v13390_v15  ;;  %v13398_v15 = vld [vmem:[#allocation2 + $0x78] sm:$0xff]   ;;  %v8651_v21 = vrot.slane %v8650_v36, 4 }
 0x4dc   : > { %12618 = vmatprep.subr.bf16.mxu1 %v13395_v33  ;;  %v16433_v49 = vrot.slane %v8701_v7, 5 }
 0x4dd   : > { %v8656_v19 = vsel %vm14829_vm11, %v8651_v21, %v8655_v61  ;;  %v8731_v21 = vrot.slane %v8729_v41, 4  ;;  %v17183_v41 = vld [vmem:[#allocation44_spill] sm:$0xff] }
 0x4df   : > { %12619 = vmatpush3.bf16.msra.mxu1 %v13395_v33  ;;  %v8705_v33 = vshrl.u32 %v17177_v25, 16 }
 0x4e0   : > { %12620 = vmatprep.subr.bf16.mxu1 %v13400_v53 }
 0x4e1   : > { %v8707_v48 = vrot.slane %v8705_v33, 4  ;;  %v16459_v33 = vrot.slane %v8725_v0, 5 }
 0x4e2   : > { %12589 = vmatmul.mubr.msk.bf16.gmra.mrb[4].mxu1 %vm540_vm3, %v13392_v31  ;;  %v17178_v31 = vld [vmem:[#allocation38_spill] sm:$0xff] }
 0x4e3   : > { %12592 = vmatprep.mubr.msk.bf16.mxu1 %vm540_vm3, %v13393_v10  ;;  %12621 = vmatpush3.bf16.msra.mxu1 %v13400_v53  ;;  %v8665_v53 = vrot.slane %v8663_v29, 5  ;;  %v8694_v10 = vrot.slane %v8692_v6, 4  ;;  %v8708_v36 = vor.u32 %v8707_v48, %v16433_v49  ;;  %v9364_v29 = vld [vmem:[#allocation2 + $0xcc] sm:$0xe] }
 0x4e4   : > { %12622 = vmatprep.subr.bf16.mxu1 %v13405_v9  ;;  %v11468_v25 = vrot.slane %v9364_v29, 9 }
 0x4e5   : > { %v8698_v43 = vor.u32 %v8697_v20, %v8694_v10  ;;  %v8743_v10 = vshll.u32 %v8607_v55, 16  ;;  %v8709_v0 = vrot.slane %v8708_v36, 4 }
 0x4e7   : > { %12623 = vmatpush3.bf16.msra.mxu1 %v13405_v9  ;;  %v8687_v9 = vshll.u32 %v17178_v31, 16  ;;  %v13407_v31 = vld [vmem:[#allocation2 + $0xcc] sm:$0xff]   ;;  %v8699_v4 = vrot.slane %v8698_v43, 4  ;;  %v17184_v43 = vld [vmem:[#allocation51_spill] sm:$0xff] }
 0x4e8   : > { %12656 = vmatprep.subr.bf16.mxu1 %v16407_v50  ;;  %v8797_v36 = vshll.u32 %v17184_v43, 16 }
 0x4ea   : > { %12593 = vmatmul.mubr.msk.bf16.gmra.mrb[8].mxu1 %vm540_vm3, %v13394_v47  ;;  %v8604_v47 = vld [vmem:[#allocation2 + $0x3c] sm:$0xf] }
 0x4eb   : > { %12596 = vmatprep.mubr.msk.bf16.mxu1 %vm540_vm3, %v13396_v32  ;;  %v8666_v32 = vsel %vm14829_vm11, %v8661_v52, %v8665_v53  ;;  %v8719_v42 = vshll.u32 %v8604_v47, 16  ;;  %v8610_v52 = vld [vmem:[#allocation2 + $0x54] sm:$0xf] }
 0x4ec   : > { %v11417_v28 = vcombine.low %v8656_v19, %v8666_v32  ;;  %v8767_v20 = vshll.u32 %v8610_v52, 16 }
 0x4ed   : > { %v8721_v7 = vrot.slane %v8719_v42, 5 }
 0x4f2   : > { %12597 = vmatmul.mubr.msk.bf16.gmra.mrb[12].mxu1 %vm540_vm3, %v13397_v2  ;;  %v16430_v2 = vrot.slane %v8674_v17, 4  ;;  %v17182_v17 = vld [vmem:[#allocation46_spill] sm:$0xff] }
 0x4f3   : > { %12600 = vmatprep.mubr.msk.bf16.mxu1 %vm540_vm3, %v13398_v15  ;;  %v8684_v15 = vor.u32 %v8683_v27, %v16421_v58  ;;  %v8773_v27 = vshll.u32 %v17182_v17, 16  ;;  %v8777_v60 = vshrl.u32 %v17182_v17, 16  ;;  %v8801_v17 = vshrl.u32 %v17184_v43, 16 }
 0x4f4   : > { %v8680_v61 = vsel %vm14829_vm11, %v16430_v2, %v16421_v58  ;;  %v8755_v2 = vrot.slane %v8753_v13, 4  ;;  %v8745_v13 = vrot.slane %v8743_v10, 5 }
 0x4f5   : > { %v8685_v39 = vrot.slane %v8684_v15, 4  ;;  %v8764_v15 = vshrl.u32 %v8610_v52, 16  ;;  %v16471_v19 = vrot.slane %v8773_v27, 5  ;;  %v8779_v26 = vrot.slane %v8777_v60, 4  ;;  %v17185_v60 = vld [vmem:[#allocation45_spill] sm:$0xff] }
 0x4fa   : > { %12601 = vmatmul.mubr.msk.bf16.gmra.mrb[16].mxu1 %vm540_vm3, %v13399_v23  ;;  %v16437_v23 = vrot.slane %v8687_v9, 5  ;;  %v8740_v9 = vshrl.u32 %v8607_v55, 16  ;;  %v8735_v55 = vshll.u32 %v17183_v41, 16  ;;  %v17187_v41 = vld [vmem:[#allocation55_spill] sm:$0xff] }
 0x4fb   : > { %12604 = vmatprep.mubr.msk.bf16.mxu1 %vm540_vm3, %v13401_v63  ;;  %v8716_v63 = vshrl.u32 %v8604_v47, 16  ;;  %v16461_v47 = vrot.slane %v8749_v30, 5 }
 0x4fc   : > { %v8690_v42 = vsel %vm14829_vm11, %v8685_v39, %v16437_v23  ;;  %v8742_v30 = vrot.slane %v8740_v9, 4  ;;  %v8780_v23 = vor.u32 %v8779_v26, %v16471_v19  ;;  %v8616_v26 = vld [vmem:[#allocation2 + $0x6c] sm:$0xf] }
 0x4fd   : > { %v8718_v58 = vrot.slane %v8716_v63, 4  ;;  %v8613_v63 = vld [vmem:[#allocation2 + $0x60] sm:$0xf]  ;;  %v8756_v29 = vor.u32 %v8755_v2, %v16461_v47  ;;  %v11418_v27 = vcombine.low %v8680_v61, %v8690_v42  ;;  %v16496_v42 = vrot.slane %v8797_v36, 5 }
 0x4fe   : > { %v8788_v52 = vshrl.u32 %v8613_v63, 16  ;;  %v8791_v39 = vshll.u32 %v8613_v63, 16  ;;  %v8746_v10 = vor.u32 %v8745_v13, %v8742_v30  ;;  %v8781_v61 = vrot.slane %v8780_v23, 4 }
 0x4ff   : > { %v8722_v40 = vor.u32 %v8721_v7, %v8718_v58  ;;  %v8704_v58 = vsel %vm14829_vm11, %v8699_v4, %v16433_v49  ;;  %v8757_v2 = vrot.slane %v8756_v29, 4  ;;  %v13409_v49 = vld [vmem:[%s16951_s3 + $0x108] sm:$0xff]   ;;  %v8812_v13 = vshrl.u32 %v8616_v26, 16 }
 0x500   : > { %v8793_v63 = vrot.slane %v8791_v39, 5  ;;  %v8815_v29 = vshll.u32 %v8616_v26, 16 }
 0x501   : > { %v8723_v7 = vrot.slane %v8722_v40, 4  ;;  %v8825_v40 = vshrl.u32 %v17187_v41, 16 }
 0x502   : > { %12605 = vmatmul.mubr.msk.bf16.gmra.mrb[20].mxu1 %vm540_vm3, %v13402_v46  ;;  %v16450_v46 = vld [vmem:[#allocation2 + $0xd4] sm:$0x1] }
 0x503   : > { %12608 = vmatprep.mubr.msk.bf16.mxu1 %vm540_vm3, %v13403_v5  ;;  %v9520_v5 = vrot.slane %v16448_v45, 5  ;;  %v9523_v6 = vrot.slane %v16450_v46, 5 }
 0x505   : > { %v9522_v53 = vrot.slane %v9520_v5, 4  ;;  %v16465_v32 = vsel %vm13604_vm2, %v11468_v25, %v9520_v5  ;;  %v8766_v5 = vrot.slane %v8764_v15, 4  ;;  %v8759_v25 = vshll.u32 %v17185_v60, 16 }
 0x507   : > { %v16469_v48 = vsel %vm13604_vm2, %v9522_v53, %v9523_v6  ;;  %v8769_v6 = vrot.slane %v8767_v20, 5  ;;  %v8737_v53 = vrot.slane %v8735_v55, 5  ;;  %v8790_v20 = vrot.slane %v8788_v52, 4 }
 0x508   : > { %v8821_v55 = vshll.u32 %v17187_v41, 16  ;;  %v8747_v52 = vrot.slane %v8746_v10, 4 }
 0x509   : > { %v8770_v15 = vor.u32 %v8769_v6, %v8766_v5  ;;  %v8619_v5 = vld [vmem:[#allocation2 + $0x78] sm:$0xf] }
 0x50a   : > { %12609 = vmatmul.mubr.msk.bf16.gmra.mrb[24].mxu1 %vm540_vm3, %v13404_v56  ;;  %v8713_v56 = vrot.slane %v8711_v51, 5  ;;  %v8732_v51 = vor.u32 %v8731_v21, %v16459_v33  ;;  %v8836_v60 = vshrl.u32 %v8619_v5, 16 }
 0x50b   : > { %12612 = vmatprep.mubr.msk.bf16.mxu1 %vm540_vm3, %v13406_v54  ;;  %v11492_v54 = vcombine.low %v16465_v32, %v16469_v48  ;;  %v8771_v39 = vrot.slane %v8770_v15, 4  ;;  %v11521_v48 = vld [vmem:[%s13602_s15 + $0x34] sm:$0xf] }
 0x50c   : > { %v8733_v21 = vrot.slane %v8732_v51, 4  ;;  %v8728_v51 = vsel %vm14829_vm11, %v8723_v7, %v16459_v33  ;;  %v8794_v33 = vor.u32 %v8793_v63, %v8790_v20  ;;  %v8814_v7 = vrot.slane %v8812_v13, 4 }
 0x50d   : > { %v8776_v15 = vsel %vm14829_vm11, %v8771_v39, %v16471_v19 }
 0x50e   : > { %v8738_v6 = vsel %vm14829_vm11, %v8733_v21, %v8737_v53  ;;  %v8817_v21 = vrot.slane %v8815_v29, 5  ;;  %v17189_v53 = vld [vmem:[#allocation57_spill] sm:$0xff] }
 0x50f   : > { %v11420_v10 = vcombine.low %v8728_v51, %v8738_v6  ;;  %v8869_v6 = vshll.u32 %v16068_v11, 16 }
 0x510   : > { %v8818_v19 = vor.u32 %v8817_v21, %v8814_v7 }
 0x512   : > { %12613 = vmatmul.mubr.msk.bf16.gmra.mrb[28].mxu1 %vm540_vm3, %v13407_v31  ;;  %v17186_v31 = vld [vmem:[#allocation49_spill] sm:$0xff] }
 0x513   : > { %12624 = vmatprep.mubr.msk.bf16.mxu1 %vm540_vm3, %v11417_v28  ;;  %v8714_v28 = vsel %vm14829_vm11, %v8709_v0, %v8713_v56  ;;  %v8783_v9 = vshll.u32 %v17186_v31, 16  ;;  %v8803_v56 = vrot.slane %v8801_v17, 4  ;;  %v8761_v0 = vrot.slane %v8759_v25, 5  ;;  %v17188_v17 = vld [vmem:[#allocation54_spill] sm:$0xff] }
 0x514   : > { %v11419_v4 = vcombine.low %v8704_v58, %v8714_v28  ;;  %v16517_v58 = vrot.slane %v8821_v55, 5  ;;  %v8827_v28 = vrot.slane %v8825_v40, 4  ;;  %v8839_v25 = vshll.u32 %v8619_v5, 16  ;;  %v8625_v40 = vld [vmem:[#allocation2 + $0x90] sm:$0xf] }
 0x515   : > { %v8785_v30 = vrot.slane %v8783_v9, 5  ;;  %v8762_v23 = vsel %vm14829_vm11, %v8757_v2, %v8761_v0  ;;  %v8804_v36 = vor.u32 %v8803_v56, %v16496_v42  ;;  %v8845_v31 = vshll.u32 %v17189_v53, 16  ;;  %v8622_v56 = vld [vmem:[#allocation2 + $0x84] sm:$0xf] }
 0x516   : > { %v8849_v9 = vshrl.u32 %v17189_v53, 16  ;;  %v8752_v2 = vsel %vm14829_vm11, %v8747_v52, %v16461_v47  ;;  %v8828_v41 = vor.u32 %v8827_v28, %v16517_v58  ;;  %v8838_v55 = vrot.slane %v8836_v60, 4 }
 0x517   : > { %v8786_v43 = vsel %vm14829_vm11, %v8781_v61, %v8785_v30  ;;  %v11421_v20 = vcombine.low %v8752_v2, %v8762_v23  ;;  %v8795_v61 = vrot.slane %v8794_v33, 4  ;;  %v8805_v0 = vrot.slane %v8804_v36, 4 }
 0x518   : > { %v11422_v26 = vcombine.low %v8776_v15, %v8786_v43  ;;  %v8841_v47 = vrot.slane %v8839_v25, 5  ;;  %v16533_v30 = vrot.slane %v8845_v31, 5  ;;  %v8851_v13 = vrot.slane %v8849_v9, 4  ;;  %v17191_v43 = vld [vmem:[#allocation62_spill] sm:$0xff] }
 0x519   : > { %v8860_v29 = vshrl.u32 %v8622_v56, 16  ;;  %v8863_v5 = vshll.u32 %v8622_v56, 16  ;;  %v8873_v52 = vshrl.u32 %v16068_v11, 16  ;;  %v8884_v23 = vshrl.u32 %v8625_v40, 16 }
 0x51a   : > { %12625 = vmatmul.mubr.msk.bf16.vlgmr.msra.gmra.mrb[0].mxu1 %vm540_vm3, %v11418_v27  ;;  %v8807_v27 = vshll.u32 %v17188_v17, 16  ;;  %v8887_v39 = vshll.u32 %v8625_v40, 16  ;;  %v8893_v33 = vshll.u32 %v17191_v43, 16  ;;  %v8897_v36 = vshrl.u32 %v17191_v43, 16 }
 0x51b   : > { %12628 = vmatprep.mubr.msk.bf16.mxu1 %vm540_vm3, %v11419_v4  ;;  %12657 = vmatpush3.bf16.msra.mxu1 %v16407_v50  ;;  %v13410_v50 = vld [vmem:[%s16951_s3 + $0x110] sm:$0xff]   ;;  %v13411_v4 = vld [vmem:[%s16951_s3 + $0x118] sm:$0xff]   ;;  %v8800_v17 = vsel %vm14829_vm11, %v8795_v61, %v16496_v42  ;;  %v8829_v28 = vrot.slane %v8828_v41, 4  ;;  %v8842_v60 = vor.u32 %v8841_v47, %v8838_v55  ;;  %v8819_v25 = vrot.slane %v8818_v19, 4 }
 0x51c   : > { %12658 = vmatprep.subr.bf16.mxu1 %v13409_v49  ;;  %v8809_v63 = vrot.slane %v8807_v27, 5  ;;  %v8852_v11 = vor.u32 %v8851_v13, %v16533_v30  ;;  %v8862_v53 = vrot.slane %v8860_v29, 4  ;;  %v8865_v31 = vrot.slane %v8863_v5, 5  ;;  %v8628_v61 = vld [vmem:[#allocation2 + $0x9c] sm:$0xf] }
 0x51d   : > { %v16546_v9 = vrot.slane %v8869_v6, 5  ;;  %v8886_v2 = vrot.slane %v8884_v23, 4  ;;  %v8889_v15 = vrot.slane %v8887_v39, 5  ;;  %v16548_v42 = vrot.slane %v8893_v33, 5  ;;  %v13432_v5 = vld [vmem:[#allocation2 + $0x8c] sm:$0x1] }
 0x51e   : > { %v8810_v27 = vsel %vm14829_vm11, %v8805_v0, %v8809_v63  ;;  %v8843_v0 = vrot.slane %v8842_v60, 4  ;;  %v8824_v41 = vsel %vm14829_vm11, %v8819_v25, %v16517_v58  ;;  %v8853_v55 = vrot.slane %v8852_v11, 4  ;;  %v13433_v58 = vld [vmem:[#allocation2 + $0xa0] sm:$0xf]  ;;  %v8631_v39 = vld [vmem:[#allocation2 + $0xa8] sm:$0xf] }
 0x51f   : > { %12659 = vmatpush3.bf16.msra.mxu1 %v13409_v49  ;;  %v17190_v49 = vld [vmem:[#allocation58_spill] sm:$0xff]  ;;  %v11423_v63 = vcombine.low %v8800_v17, %v8810_v27  ;;  %v8908_v40 = vshrl.u32 %v8628_v61, 16  ;;  %v8911_v19 = vshll.u32 %v8628_v61, 16  ;;  %v8890_v13 = vor.u32 %v8889_v15, %v8886_v2  ;;  %v13435_v17 = vld [vmem:[#allocation2 + $0xac] sm:$0xf] }
 0x520   : > { %12660 = vmatprep.subr.bf16.mxu1 %v13410_v50  ;;  %v8831_v51 = vshll.u32 %v17190_v49, 16  ;;  %v8879_v6 = vshll.u32 %v13432_v5, 16  ;;  %v8921_v23 = vshrl.u32 %v13433_v58, 16  ;;  %v13434_v33 = vld [vmem:[#allocation2 + $0x98] sm:$0x1]  ;;  %v8941_v27 = vshll.u32 %v13435_v17, 16 }
 0x521   : > { %v8913_v11 = vrot.slane %v8911_v19, 5 }
 0x522   : > { %12629 = vmatmul.mubr.msk.bf16.gmra.mrb[4].mxu1 %vm540_vm3, %v11420_v10  ;;  %v8833_v7 = vrot.slane %v8831_v51, 5  ;;  %v8875_v10 = vrot.slane %v8873_v52, 4  ;;  %v8917_v52 = vshll.u32 %v13433_v58, 16  ;;  %v8923_v15 = vrot.slane %v8921_v23, 4  ;;  %v13438_v23 = vld [vmem:[#allocation2 + $0xc4] sm:$0xf] }
 0x523   : > { %12632 = vmatprep.mubr.msk.bf16.mxu1 %vm540_vm3, %v11421_v20  ;;  %12661 = vmatpush3.bf16.msra.mxu1 %v13410_v50  ;;  %v13431_v50 = vld [vmem:[#allocation2 + $0x80] sm:$0x1]  ;;  %v8899_v20 = vrot.slane %v8897_v36, 4  ;;  %v8903_v36 = vshll.u32 %v13434_v33, 16  ;;  %v16567_v61 = vrot.slane %v8941_v27, 5 }
 0x524   : > { %12662 = vmatprep.subr.bf16.mxu1 %v13411_v4  ;;  %v8855_v21 = vshll.u32 %v13431_v50, 16  ;;  %v8834_v56 = vsel %vm14829_vm11, %v8829_v28, %v8833_v7  ;;  %v8876_v47 = vor.u32 %v8875_v10, %v16546_v9  ;;  %v8945_v28 = vshrl.u32 %v13435_v17, 16 }
 0x525   : > { %v11424_v49 = vcombine.low %v8824_v41, %v8834_v56  ;;  %v8900_v29 = vor.u32 %v8899_v20, %v16548_v42  ;;  %v8910_v7 = vrot.slane %v8908_v40, 4  ;;  %v8891_v50 = vrot.slane %v8890_v13, 4  ;;  %v8634_v56 = vld [vmem:[#allocation2 + $0xb4] sm:$0xf] }
 0x526   : > { %v8857_v51 = vrot.slane %v8855_v21, 5  ;;  %v8877_v25 = vrot.slane %v8876_v47, 4  ;;  %v8932_v21 = vshrl.u32 %v8631_v39, 16  ;;  %v8881_v10 = vrot.slane %v8879_v6, 5  ;;  %v8637_v6 = vld [vmem:[#allocation2 + $0xc0] sm:$0xf] }
 0x527   : > { %12663 = vmatpush3.bf16.msra.mxu1 %v13411_v4  ;;  %v8866_v4 = vor.u32 %v8865_v31, %v8862_v53  ;;  %v8935_v53 = vshll.u32 %v8631_v39, 16  ;;  %v16564_v2 = vrot.slane %v8917_v52, 5  ;;  %v8905_v20 = vrot.slane %v8903_v36, 5 }
 0x528   : > { %v8858_v43 = vsel %vm14829_vm11, %v8853_v55, %v8857_v51  ;;  %v8882_v41 = vsel %vm14829_vm11, %v8877_v25, %v8881_v10  ;;  %v8914_v55 = vor.u32 %v8913_v11, %v8910_v7  ;;  %v8896_v40 = vsel %vm14829_vm11, %v8891_v50, %v16548_v42  ;;  %v8640_v11 = vld [vmem:[#allocation2 + $0xcc] sm:$0xf] }
 0x529   : > { %v8867_v60 = vrot.slane %v8866_v4, 4  ;;  %v13436_v4 = vld [vmem:[#allocation2 + $0xa4] sm:$0x1]  ;;  %v8937_v51 = vrot.slane %v8935_v53, 5  ;;  %v8924_v13 = vor.u32 %v8923_v15, %v16564_v2  ;;  %v8959_v52 = vshll.u32 %v8634_v56, 16 }
 0x52a   : > { %12633 = vmatmul.mubr.msk.bf16.gmra.mrb[8].mxu1 %vm540_vm3, %v11422_v26  ;;  %v8848_v26 = vsel %vm14829_vm11, %v8843_v0, %v16533_v30  ;;  %v8901_v30 = vrot.slane %v8900_v29, 4  ;;  %v8927_v47 = vshll.u32 %v13436_v4, 16  ;;  %v8956_v29 = vshrl.u32 %v8634_v56, 16 }
 0x52b   : > { %12636 = vmatprep.mubr.msk.bf16.mxu1 %vm540_vm3, %v11423_v63  ;;  %v11425_v31 = vcombine.low %v8848_v26, %v8858_v43  ;;  %v8947_v63 = vrot.slane %v8945_v28, 4  ;;  %v8872_v0 = vsel %vm14829_vm11, %v8867_v60, %v16546_v9  ;;  %v13437_v26 = vld [vmem:[#allocation2 + $0xb8] sm:$0xf]  ;;  %v8989_v39 = vshll.u32 %v13438_v23, 16  ;;  %v13439_v28 = vld [vmem:[#allocation2 + $0xb0] sm:$0x1] }
 0x52c   : > { %v8906_v19 = vsel %vm14829_vm11, %v8901_v30, %v8905_v20  ;;  %v8965_v9 = vshll.u32 %v13437_v26, 16  ;;  %v8969_v5 = vshrl.u32 %v13437_v26, 16  ;;  %v8993_v43 = vshrl.u32 %v13438_v23, 16  ;;  %v13440_v26 = vld [vmem:[#allocation2 + $0xbc] sm:$0x1] }
 0x52d   : > { %v8948_v58 = vor.u32 %v8947_v63, %v16567_v61  ;;  %v11426_v33 = vcombine.low %v8872_v0, %v8882_v41  ;;  %v11427_v42 = vcombine.low %v8896_v40, %v8906_v19  ;;  %v8915_v36 = vrot.slane %v8914_v55, 4 }
 0x52e   : > { %v8929_v17 = vrot.slane %v8927_v47, 5  ;;  %v8951_v60 = vshll.u32 %v13439_v28, 16  ;;  %v8980_v25 = vshrl.u32 %v8637_v6, 16  ;;  %v8983_v7 = vshll.u32 %v8637_v6, 16 }
 0x52f   : > { %v8925_v50 = vrot.slane %v8924_v13, 4  ;;  %v8958_v30 = vrot.slane %v8956_v29, 4  ;;  %v8971_v53 = vrot.slane %v8969_v5, 4  ;;  %v8961_v10 = vrot.slane %v8959_v52, 5 }
 0x530   : > { %v8991_v15 = vrot.slane %v8989_v39, 5  ;;  %v8995_v20 = vrot.slane %v8993_v43, 4  ;;  %v9004_v63 = vshrl.u32 %v8640_v11, 16  ;;  %v9007_v56 = vshll.u32 %v8640_v11, 16  ;;  %v13441_v43 = vld [vmem:[#allocation2 + $0xc8] sm:$0x1] }
 0x531   : > { %v9013_v0 = vshll.u32 %v16448_v45, 16  ;;  %v9017_v41 = vshrl.u32 %v16448_v45, 16  ;;  %v8953_v4 = vrot.slane %v8951_v60, 5  ;;  %v8982_v47 = vrot.slane %v8980_v25, 4 }
 0x532   : > { %12637 = vmatmul.mubr.msk.bf16.gmra.mrb[12].mxu1 %vm540_vm3, %v11424_v49  ;;  %v8934_v49 = vrot.slane %v8932_v21, 4  ;;  %v8967_v21 = vrot.slane %v8965_v9, 5  ;;  %v8985_v40 = vrot.slane %v8983_v7, 5  ;;  %v8920_v19 = vsel %vm14829_vm11, %v8915_v36, %v16564_v2 }
 0x533   : > { %12640 = vmatprep.mubr.msk.bf16.mxu1 %vm540_vm3, %v11425_v31  ;;  %v8949_v31 = vrot.slane %v8948_v58, 4  ;;  %v8962_v29 = vor.u32 %v8961_v10, %v8958_v30  ;;  %v8975_v9 = vshll.u32 %v13440_v26, 16  ;;  %v8996_v5 = vor.u32 %v8995_v20, %v8991_v15 }
 0x534   : > { %v8938_v27 = vor.u32 %v8937_v51, %v8934_v49  ;;  %v8930_v49 = vsel %vm14829_vm11, %v8925_v50, %v8929_v17  ;;  %v8972_v51 = vor.u32 %v8971_v53, %v8967_v21  ;;  %v9006_v45 = vrot.slane %v9004_v63, 4 }
 0x535   : > { %v8954_v13 = vsel %vm14829_vm11, %v8949_v31, %v8953_v4  ;;  %v9009_v6 = vrot.slane %v9007_v56, 5  ;;  %v9015_v58 = vrot.slane %v9013_v0, 5  ;;  %v9019_v52 = vrot.slane %v9017_v41, 4  ;;  %v17193_v4 = vld [vmem:[#allocation43_spill] sm:$0xff] }
 0x536   : > { %v8939_v55 = vrot.slane %v8938_v27, 4  ;;  %v11428_v23 = vcombine.low %v8920_v19, %v8930_v49  ;;  %v8986_v39 = vor.u32 %v8985_v40, %v8982_v47  ;;  %v8973_v36 = vrot.slane %v8972_v51, 4  ;;  %v17196_v40 = vld [vmem:[#allocation48_spill] sm:$0xff]  ;;  %v17198_v49 = vld [vmem:[#allocation50_spill] sm:$0xff] }
 0x537   : > { %v8977_v17 = vrot.slane %v8975_v9, 5  ;;  %v8997_v27 = vrot.slane %v8996_v5, 4  ;;  %v8963_v28 = vrot.slane %v8962_v29, 4  ;;  %v9010_v60 = vor.u32 %v9009_v6, %v9006_v45  ;;  %v17199_v51 = vld [vmem:[#allocation52_spill] sm:$0xff]  ;;  %v17204_v9 = vld [vmem:[#allocation59_spill] sm:$0xff]  ;;  %v17207_v6 = vld [vmem:[#allocation61_spill] sm:$0xff] }
 0x538   : > { %v8944_v2 = vsel %vm14829_vm11, %v8939_v55, %v16567_v61  ;;  %v9020_v25 = vor.u32 %v9019_v52, %v9015_v58  ;;  %v9023_v7 = vshll.u32 %v16450_v46, 16  ;;  %v8987_v11 = vrot.slane %v8986_v39, 4  ;;  %v17202_v29 = vld [vmem:[#allocation56_spill] sm:$0xff] }
 0x539   : > { %v8978_v61 = vsel %vm14829_vm11, %v8973_v36, %v8977_v17  ;;  %v8968_v53 = vsel %vm14829_vm11, %v8963_v28, %v8967_v21  ;;  %v9011_v31 = vrot.slane %v9010_v60, 4  ;;  %v17192_v21 = vld [vmem:[#allocation42_spill] sm:$0xff]  ;;  %v17203_v26 = vcombine.low %v17201_v35, %v17202_v29  ;;  %v17205_v5 = vld [vmem:[#allocation60_spill] sm:$0xff] }
 0x53a   : > { %12641 = vmatmul.mubr.msk.bf16.gmra.mrb[16].mxu1 %vm540_vm3, %v11426_v33  ;;  %v8999_v33 = vshll.u32 %v13441_v43, 16  ;;  %v9021_v10 = vrot.slane %v9020_v25, 4  ;;  %v9025_v20 = vrot.slane %v9023_v7, 5  ;;  %v11430_v63 = vcombine.low %v8968_v53, %v8978_v61  ;;  %v17213_v43 = vld [vmem:[#allocation66_spill] sm:$0xff]  ;;  %v17217_v17 = vld [vmem:[#allocation68_spill] sm:$0xff] }
 0x53b   : > { %12644 = vmatprep.mubr.msk.bf16.mxu1 %vm540_vm3, %v11427_v42  ;;  %v11429_v42 = vcombine.low %v8944_v2, %v8954_v13  ;;  %v8992_v56 = vsel %vm14829_vm11, %v8987_v11, %v8991_v15  ;;  %v9016_v46 = vsel %vm14829_vm11, %v9011_v31, %v9015_v58  ;;  %v17194_v47 = vcombine.low %v17192_v21, %v17193_v4  ;;  %v17195_v15 = vld [vmem:[#allocation47_spill] sm:$0xff]  ;;  %v17211_v2 = vld [vmem:[#allocation65_spill] sm:$0xff]  ;;  %v17220_v60 = vld [vmem:[#allocation70_spill] sm:$0xff] }
 0x53c   : > { %v9001_v50 = vrot.slane %v8999_v33, 5  ;;  %v9026_v41 = vsel %vm14829_vm11, %v9021_v10, %v9025_v20  ;;  %v17197_v19 = vcombine.low %v17195_v15, %v17196_v40  ;;  %v17200_v13 = vcombine.low %v17198_v49, %v17199_v51  ;;  %v17208_v58 = vld [vmem:[#allocation63_spill] sm:$0xff]  ;;  %v11523_v7 = vld [vmem:[%s13602_s15 + $0x3c] sm:$0xe] }
 0x53d   : > { %v11432_v55 = vcombine.low %v9016_v46, %v9026_v41  ;;  %v17206_v45 = vcombine.low %v17204_v9, %v17205_v5  ;;  %v17209_v52 = vcombine.low %v17207_v6, %v17208_v58  ;;  %v17214_v33 = vld [vmem:[#allocation67_spill] sm:$0xff]  ;;  %v17216_v36 = vcombine.low %v16113_v59, %v16121_v12  ;;  %v11518_v59 = vld [vmem:[%s13602_s15 + $0x28] sm:$0xf]  ;;  %v11515_v12 = vld [vmem:[%s13602_s15 + $0x1c] sm:$0xf] }
 0x53e   : > { %v9002_v30 = vsel %vm14829_vm11, %v8997_v27, %v9001_v50  ;;  %v17218_v27 = vld [vmem:[#allocation69_spill] sm:$0xff]  ;;  %v17221_v25 = vcombine.low %v16138_v8, %v17220_v60  ;;  %v11517_v8 = vld [vmem:[%s13602_s15 + $0x24] sm:$0xe]  ;;  %v9991_v1 = vrot.slane %v11518_v59, 5  ;;  %v16695_v11 = vld [vmem:[%s16952_s4] ss:$0 sm:$0xff] }
 0x53f   : > { %v11431_v0 = vcombine.low %v8992_v56, %v9002_v30  ;;  %v17219_v28 = vcombine.low %v17217_v17, %v17218_v27  ;;  %v11563_v44 = vrot.slane %v11517_v8, 9  ;;  %v11520_v30 = vld [vmem:[%s13602_s15 + $0x30] sm:$0xe]  ;;  %v9998_v10 = vrot.slane %v11521_v48, 5  ;;  %v11525_v20 = vld [vmem:[%s13602_s15 + $0x44] sm:$0x1] }
 0x540   : > { %v9993_v16 = vrot.slane %v9991_v1, 4  ;;  %v11522_v46 = vld [vmem:[%s13602_s15 + $0x38] sm:$0x1]  ;;  %v11564_v4 = vrot.slane %v11520_v30, 9  ;;  %v10008_v49 = vrot.slane %v11525_v20, 5 }
 0x541   : > { %v9992_v32 = vsel %vm13604_vm2, %v11563_v44, %v9991_v1  ;;  %v10000_v29 = vrot.slane %v9998_v10, 4  ;;  %v11530_v9 = vld [vmem:[%s13602_s15 + $0x58] sm:$0xf]  ;;  %v11527_v58 = vld [vmem:[%s13602_s15 + $0x4c] sm:$0xf] }
 0x542   : > { %12645 = vmatmul.mubr.msk.bf16.gmra.mrb[20].mxu1 %vm540_vm3, %v11428_v23  ;;  %v17210_v23 = vld [vmem:[#allocation64_spill] sm:$0xff]  ;;  %v10128_v53 = vunpack.c.l.bf16 %v9992_v32  ;;  %v11531_v59 = vld [vmem:[%s13602_s15 + $0x5c] sm:$0x1] }
 0x543   : > { %12648 = vmatprep.mubr.msk.bf16.mxu1 %vm540_vm3, %v11429_v42  ;;  %v17212_v39 = vcombine.low %v17210_v23, %v17211_v2  ;;  %v17215_v42 = vcombine.low %v17213_v43, %v17214_v33  ;;  %v9999_v2 = vsel %vm13604_vm2, %v11564_v4, %v9998_v10  ;;  %v11526_v17 = vld [vmem:[%s13602_s15 + $0x48] sm:$0xe]  ;;  %v11533_v10 = vld [vmem:[%s13602_s15 + $0x64] sm:$0xf]  ;;  %v11532_v4 = vld [vmem:[%s13602_s15 + $0x60] sm:$0xe] }
 0x544   : > { %v10130_v1 = vunpack.c.l.bf16 %v9999_v2 }
 0x54a   : > { %12649 = vmatmul.mubr.msk.bf16.gmra.mrb[24].mxu1 %vm540_vm3, %v11430_v63 }
 0x54b   : > { %12652 = vmatprep.mubr.msk.bf16.mxu1 %vm540_vm3, %v11431_v0  ;;  %v11565_v0 = vrot.slane %v11523_v7, 9 }
 0x552   : > { %12653 = vmatmul.mubr.msk.bf16.gmra.mrb[28].mxu1 %vm540_vm3, %v11432_v55 }
 0x553   : > { %12664 = vmatprep.mubr.msk.bf16.mxu1 %vm540_vm3, %v17194_v47 }
 0x55a   : > { %12665 = vmatmul.mubr.msk.bf16.vlgmr.msra.gmra.mrb[0].mxu1 %vm540_vm3, %v17197_v19 }
 0x55b   : > { %12668 = vmatprep.mubr.msk.bf16.mxu1 %vm540_vm3, %v17200_v13 }
 0x562   : > { %12669 = vmatmul.mubr.msk.bf16.gmra.mrb[4].mxu1 %vm540_vm3, %v17203_v26  ;;  %v10001_v26 = vrot.slane %v11522_v46, 5 }
 0x563   : > { %12672 = vmatprep.mubr.msk.bf16.mxu1 %vm540_vm3, %v17206_v45 }
 0x564   : > { %v10002_v60 = vsel %vm13604_vm2, %v10000_v29, %v10001_v26  ;;  %v11534_v26 = vld [vmem:[%s13602_s15 + $0x68] sm:$0x1] }
 0x56a   : > { %12673 = vmatmul.mubr.msk.bf16.gmra.mrb[8].mxu1 %vm540_vm3, %v17209_v52 }
 0x56b   : > { %12676 = vmatprep.mubr.msk.bf16.mxu1 %vm540_vm3, %v17212_v39  ;;  %v11529_v39 = vld [vmem:[%s13602_s15 + $0x54] sm:$0xe] }
 0x572   : > { %12677 = vmatmul.mubr.msk.bf16.gmra.mrb[12].mxu1 %vm540_vm3, %v17215_v42 }
 0x573   : > { %12680 = vmatprep.mubr.msk.bf16.mxu1 %vm540_vm3, %v17216_v36  ;;  %v10019_v36 = vrot.slane %v11530_v9, 5 }
 0x57a   : > { %12681 = vmatmul.mubr.msk.bf16.gmra.mrb[16].mxu1 %vm540_vm3, %v17219_v28 }
 0x57b   : > { %12684 = vmatprep.mubr.msk.bf16.mxu1 %vm540_vm3, %v17221_v25  ;;  %v10012_v25 = vrot.slane %v11527_v58, 5 }
 0x57d   : > { %v10014_v7 = vrot.slane %v10012_v25, 4 }
 0x582   : > { %12685 = vmatmul.mubr.msk.bf16.gmra.mrb[20].mxu1 %vm540_vm3, %v11488_v62  ;;  %v9984_v62 = vrot.slane %v11515_v12, 5 }
 0x583   : > { %12688 = vmatprep.mubr.msk.bf16.mxu1 %vm540_vm3, %v11489_v57  ;;  %v11562_v57 = vrot.slane %v11514_v37, 9  ;;  %v11567_v37 = vrot.slane %v11529_v39, 9 }
 0x584   : > { %v9986_v18 = vrot.slane %v9984_v62, 4 }
 0x586   : > { %v9988_v31 = vsel %vm13604_vm2, %v9986_v18, %v9987_v22  ;;  %v10131_v18 = vunpack.c.l.bf16 %v10002_v60  ;;  %v10021_v22 = vrot.slane %v10019_v36, 4 }
 0x587   : > { %v10127_v40 = vunpack.c.l.bf16 %v9988_v31  ;;  %v10020_v31 = vsel %vm13604_vm2, %v11567_v37, %v10019_v36  ;;  %v11541_v37 = vld [vmem:[%s13602_s15 + $0x84] sm:$0xe] }
 0x58a   : > { %12689 = vmatmul.mubr.msk.bf16.gmra.mrb[24].mxu1 %vm540_vm3, %v11490_v24  ;;  %v9994_v24 = vrot.slane %v11519_v38, 5 }
 0x58b   : > { %12692 = vmatprep.mubr.msk.bf16.mxu1 %vm540_vm3, %v11491_v14  ;;  %v11524_v14 = vld [vmem:[%s13602_s15 + $0x40] sm:$0xf] }
 0x58c   : > { %v9995_v50 = vsel %vm13604_vm2, %v9993_v16, %v9994_v24  ;;  %v10005_v61 = vrot.slane %v11524_v14, 5  ;;  %v10022_v14 = vrot.slane %v11531_v59, 5  ;;  %v11539_v59 = vld [vmem:[%s13602_s15 + $0x7c] sm:$0xf] }
 0x58d   : > { %v10129_v21 = vunpack.c.l.bf16 %v9995_v50 }
 0x58e   : > { %v10007_v19 = vrot.slane %v10005_v61, 4  ;;  %v10006_v6 = vsel %vm13604_vm2, %v11565_v0, %v10005_v61  ;;  %v11536_v61 = vld [vmem:[%s13602_s15 + $0x70] sm:$0xf]  ;;  %v11535_v0 = vld [vmem:[%s13602_s15 + $0x6c] sm:$0xe] }
 0x58f   : > { %v10132_v28 = vunpack.c.l.bf16 %v10006_v6  ;;  %v11569_v29 = vrot.slane %v11535_v0, 9  ;;  %v11568_v6 = vrot.slane %v11532_v4, 9 }
 0x590   : > { %v10009_v42 = vsel %vm13604_vm2, %v10007_v19, %v10008_v49  ;;  %v10026_v19 = vrot.slane %v11533_v10, 5  ;;  %v11537_v49 = vld [vmem:[%s13602_s15 + $0x74] sm:$0x1] }
 0x591   : > { %v10133_v34 = vunpack.c.l.bf16 %v10009_v42  ;;  %v10036_v39 = vrot.slane %v11537_v49, 5  ;;  %v11545_v49 = vld [vmem:[%s13602_s15 + $0x94] sm:$0xf] }
 0x592   : > { %12693 = vmatmul.mubr.msk.bf16.gmra.mrb[28].mxu1 %vm540_vm3, %v11492_v54  ;;  %v9985_v54 = vsel %vm13604_vm2, %v11562_v57, %v9984_v62  ;;  %v11528_v62 = vld [vmem:[%s13602_s15 + $0x50] sm:$0x1]  ;;  %v11566_v57 = vrot.slane %v11526_v17, 9  ;;  %v10028_v36 = vrot.slane %v10026_v19, 4  ;;  %v10029_v17 = vrot.slane %v11534_v26, 5 }
 0x593   : > { %v10126_v56 = vunpack.c.l.bf16 %v9985_v54  ;;  %v10015_v50 = vrot.slane %v11528_v62, 5 }
 0x62d   : > { %v12666_v63 = vpop.f32.mrb[0].mxu1 }
 0x62e   : > { %v9856_v41 = vadd.f32 %v12666_v63, %v16695_v11  ;;  %v9688_v55 = vpop.f32.mrb[1].mxu1 }
 0x62f   : > { %v9854_v47 = vadd.f32 %v16695_v11, %v9688_v55  ;;  %v12667_v15 = vpop.f32.mrb[2].mxu1  ;;  %v10023_v55 = vsel %vm13604_vm2, %v10021_v22, %v10022_v14  ;;  %v10040_v22 = vrot.slane %v11539_v59, 5  ;;  %v11543_v14 = vld [vmem:[%s13602_s15 + $0x8c] sm:$0x1] }
 0x630   : > { %v10160_v51 = vadd.f32 %v10128_v53, %v9856_v41  ;;  %v9857_v13 = vadd.f32 %v12667_v15, %v16695_v11  ;;  %v9691_v35 = vpop.f32.mrb[3].mxu1  ;;  %v10136_v15 = vunpack.c.l.bf16 %v10020_v31  ;;  %v10050_v0 = vrot.slane %v11543_v14, 5  ;;  %v11551_v14 = vld [vmem:[%s13602_s15 + $0xac] sm:$0xf] }
 0x631   : > { %v10158_v5 = vadd.f32 %v10126_v56, %v9854_v47  ;;  %v9855_v45 = vadd.f32 %v16695_v11, %v9691_v35  ;;  %v10013_v56 = vsel %vm13604_vm2, %v11566_v57, %v10012_v25  ;;  %v11538_v57 = vld [vmem:[%s13602_s15 + $0x78] sm:$0xe] }
 0x632   : > { %v10192_v52 = vmax.f32 %v10160_v51, 0.0  ;;  %v10161_v23 = vadd.f32 %v10129_v21, %v9857_v13  ;;  %v10033_v21 = vrot.slane %v11536_v61, 5  ;;  %v10134_v35 = vunpack.c.l.bf16 %v10013_v56 }
 0x633   : > { %v10190_v43 = vmax.f32 %v10158_v5, 0.0  ;;  %v10159_v33 = vadd.f32 %v10127_v40, %v9855_v45  ;;  %v10016_v40 = vsel %vm13604_vm2, %v10014_v7, %v10015_v50  ;;  %v10137_v45 = vunpack.c.l.bf16 %v10023_v55  ;;  %v11540_v50 = vld [vmem:[%s13602_s15 + $0x80] sm:$0x1] }
 0x634   : > { %10224 = vst.msk [vmem:[%s16720_s11 + $0x10] sm:$0xff] %vm540_vm3, %v10192_v52  ;;  %v10193_v27 = vmax.f32 %v10161_v23, 0.0  ;;  %v10135_v23 = vunpack.c.l.bf16 %v10016_v40  ;;  %v10035_v2 = vrot.slane %v10033_v21, 4  ;;  %v10034_v25 = vsel %vm13604_vm2, %v11569_v29, %v10033_v21  ;;  %v11547_v29 = vld [vmem:[%s13602_s15 + $0x9c] sm:$0xe] }
 0x635   : > { %10222 = vst.msk [vmem:[%s16720_s11] sm:$0xff] %vm540_vm3, %v10190_v43  ;;  %v10191_v12 = vmax.f32 %v10159_v33, 0.0  ;;  %v12670_v8 = vpop.f32.mrb[4].mxu1  ;;  %v11571_v7 = vrot.slane %v11541_v37, 9  ;;  %v11570_v31 = vrot.slane %v11538_v57, 9  ;;  %v10042_v21 = vrot.slane %v10040_v22, 4 }
 0x636   : > { %10225 = vst.msk [vmem:[%s16720_s11 + $0x18] sm:$0xff] %vm540_vm3, %v10193_v27  ;;  %v9860_v38 = vadd.f32 %v12670_v8, %v16695_v11  ;;  %v9704_v44 = vpop.f32.mrb[5].mxu1  ;;  %v11542_v27 = vld [vmem:[%s13602_s15 + $0x88] sm:$0xf]  ;;  %v10043_v4 = vrot.slane %v11540_v50, 5 }
 0x637   : > { %10223 = vst.msk [vmem:[%s16720_s11 + $0x8] sm:$0xff] %vm540_vm3, %v10191_v12  ;;  %v9858_v16 = vadd.f32 %v16695_v11, %v9704_v44  ;;  %v12671_v24 = vpop.f32.mrb[6].mxu1  ;;  %v10037_v44 = vsel %vm13604_vm2, %v10035_v2, %v10036_v39  ;;  %v10054_v2 = vrot.slane %v11545_v49, 5  ;;  %v11549_v39 = vld [vmem:[%s13602_s15 + $0xa4] sm:$0x1] }
 0x638   : > { %v10164_v32 = vadd.f32 %v10132_v28, %v9860_v38  ;;  %v9861_v48 = vadd.f32 %v12671_v24, %v16695_v11  ;;  %v9707_v54 = vpop.f32.mrb[7].mxu1  ;;  %v10140_v24 = vunpack.c.l.bf16 %v10034_v25  ;;  %v10064_v37 = vrot.slane %v11549_v39, 5  ;;  %v11557_v39 = vld [vmem:[%s13602_s15 + $0xc4] sm:$0xf] }
 0x639   : > { %v10162_v30 = vadd.f32 %v10130_v1, %v9858_v16  ;;  %v9859_v53 = vadd.f32 %v16695_v11, %v9707_v54  ;;  %v10027_v1 = vsel %vm13604_vm2, %v11568_v6, %v10026_v19  ;;  %v11544_v6 = vld [vmem:[%s13602_s15 + $0x90] sm:$0xe] }
 0x63a   : > { %v10196_v20 = vmax.f32 %v10164_v32, 0.0  ;;  %v10165_v63 = vadd.f32 %v10133_v34, %v9861_v48  ;;  %v10047_v34 = vrot.slane %v11542_v27, 5  ;;  %v10138_v54 = vunpack.c.l.bf16 %v10027_v1 }
 0x63b   : > { %v10194_v46 = vmax.f32 %v10162_v30, 0.0  ;;  %v10163_v41 = vadd.f32 %v10131_v18, %v9859_v53  ;;  %v10030_v18 = vsel %vm13604_vm2, %v10028_v36, %v10029_v17  ;;  %v10141_v53 = vunpack.c.l.bf16 %v10037_v44  ;;  %v11546_v17 = vld [vmem:[%s13602_s15 + $0x98] sm:$0x1] }
 0x63c   : > { %10228 = vst.msk [vmem:[%s16720_s11 + $0x30] sm:$0xff] %vm540_vm3, %v10196_v20  ;;  %v10197_v47 = vmax.f32 %v10165_v63, 0.0  ;;  %v10139_v63 = vunpack.c.l.bf16 %v10030_v18  ;;  %v10049_v56 = vrot.slane %v10047_v34, 4  ;;  %v10048_v19 = vsel %vm13604_vm2, %v11571_v7, %v10047_v34  ;;  %v11553_v7 = vld [vmem:[%s13602_s15 + $0xb4] sm:$0xe] }
 0x63d   : > { %10226 = vst.msk [vmem:[%s16720_s11 + $0x20] sm:$0xff] %vm540_vm3, %v10194_v46  ;;  %v10195_v51 = vmax.f32 %v10163_v41, 0.0  ;;  %v12674_v13 = vpop.f32.mrb[8].mxu1  ;;  %v11573_v36 = vrot.slane %v11547_v29, 9  ;;  %v11572_v25 = vrot.slane %v11544_v6, 9  ;;  %v10056_v34 = vrot.slane %v10054_v2, 4 }
 0x63e   : > { %10229 = vst.msk [vmem:[%s16720_s11 + $0x38] sm:$0xff] %vm540_vm3, %v10197_v47  ;;  %v9864_v9 = vadd.f32 %v12674_v13, %v16695_v11  ;;  %v9720_v5 = vpop.f32.mrb[9].mxu1  ;;  %v11548_v47 = vld [vmem:[%s13602_s15 + $0xa0] sm:$0xf]  ;;  %v10057_v57 = vrot.slane %v11546_v17, 5 }
 0x63f   : > { %10227 = vst.msk [vmem:[%s16720_s11 + $0x28] sm:$0xff] %vm540_vm3, %v10195_v51  ;;  %v9862_v58 = vadd.f32 %v16695_v11, %v9720_v5  ;;  %v12675_v52 = vpop.f32.mrb[10].mxu1  ;;  %v10051_v5 = vsel %vm13604_vm2, %v10049_v56, %v10050_v0  ;;  %v10068_v56 = vrot.slane %v11551_v14, 5  ;;  %v11555_v0 = vld [vmem:[%s13602_s15 + $0xbc] sm:$0x1] }
 0x640   : > { %v10168_v43 = vadd.f32 %v10136_v15, %v9864_v9  ;;  %v9865_v33 = vadd.f32 %v12675_v52, %v16695_v11  ;;  %v9723_v42 = vpop.f32.mrb[11].mxu1  ;;  %v10144_v52 = vunpack.c.l.bf16 %v10048_v19  ;;  %v10078_v29 = vrot.slane %v11555_v0, 5 }
 0x641   : > { %v10166_v28 = vadd.f32 %v10134_v35, %v9862_v58  ;;  %v9863_v60 = vadd.f32 %v16695_v11, %v9723_v42  ;;  %v10041_v35 = vsel %vm13604_vm2, %v11570_v31, %v10040_v22  ;;  %v11550_v31 = vld [vmem:[%s13602_s15 + $0xa8] sm:$0xe] }
 0x642   : > { %v10200_v12 = vmax.f32 %v10168_v43, 0.0  ;;  %v10169_v8 = vadd.f32 %v10137_v45, %v9865_v33  ;;  %v10061_v45 = vrot.slane %v11548_v47, 5  ;;  %v10142_v42 = vunpack.c.l.bf16 %v10041_v35 }
 0x643   : > { %v10198_v62 = vmax.f32 %v10166_v28, 0.0  ;;  %v10167_v38 = vadd.f32 %v10135_v23, %v9863_v60  ;;  %v10044_v23 = vsel %vm13604_vm2, %v10042_v21, %v10043_v4  ;;  %v10145_v60 = vunpack.c.l.bf16 %v10051_v5  ;;  %v11552_v4 = vld [vmem:[%s13602_s15 + $0xb0] sm:$0x1] }
 0x644   : > { %10232 = vst.msk [vmem:[%s16720_s11 + $0x50] sm:$0xff] %vm540_vm3, %v10200_v12  ;;  %v10201_v16 = vmax.f32 %v10169_v8, 0.0  ;;  %v10143_v8 = vunpack.c.l.bf16 %v10044_v23  ;;  %v10063_v1 = vrot.slane %v10061_v45, 4  ;;  %v10062_v22 = vsel %vm13604_vm2, %v11573_v36, %v10061_v45  ;;  %v11559_v36 = vld [vmem:[%s13602_s15 + $0xcc] sm:$0xe] }
 0x645   : > { %10230 = vst.msk [vmem:[%s16720_s11 + $0x40] sm:$0xff] %vm540_vm3, %v10198_v62  ;;  %v10199_v32 = vmax.f32 %v10167_v38, 0.0  ;;  %v12678_v48 = vpop.f32.mrb[12].mxu1  ;;  %v11575_v21 = vrot.slane %v11553_v7, 9  ;;  %v11574_v19 = vrot.slane %v11550_v31, 9  ;;  %v10070_v45 = vrot.slane %v10068_v56, 4 }
 0x646   : > { %10233 = vst.msk [vmem:[%s16720_s11 + $0x58] sm:$0xff] %vm540_vm3, %v10201_v16  ;;  %v9868_v61 = vadd.f32 %v12678_v48, %v16695_v11  ;;  %v9736_v30 = vpop.f32.mrb[13].mxu1  ;;  %v11554_v16 = vld [vmem:[%s13602_s15 + $0xb8] sm:$0xf]  ;;  %v10071_v6 = vrot.slane %v11552_v4, 5 }
 0x647   : > { %10231 = vst.msk [vmem:[%s16720_s11 + $0x48] sm:$0xff] %vm540_vm3, %v10199_v32  ;;  %v9866_v10 = vadd.f32 %v16695_v11, %v9736_v30  ;;  %v12679_v20 = vpop.f32.mrb[14].mxu1  ;;  %v10065_v30 = vsel %vm13604_vm2, %v10063_v1, %v10064_v37  ;;  %v10082_v1 = vrot.slane %v11557_v39, 5  ;;  %v11561_v37 = vld [vmem:[%s13602_s15 + $0xd4] sm:$0x1] }
 0x648   : > { %v10172_v46 = vadd.f32 %v10140_v24, %v9868_v61  ;;  %v9869_v41 = vadd.f32 %v12679_v20, %v16695_v11  ;;  %v9739_v55 = vpop.f32.mrb[15].mxu1  ;;  %v10148_v20 = vunpack.c.l.bf16 %v10062_v22  ;;  %v10092_v7 = vrot.slane %v11561_v37, 5 }
 0x649   : > { %v10170_v15 = vadd.f32 %v10138_v54, %v9866_v10  ;;  %v9867_v40 = vadd.f32 %v16695_v11, %v9739_v55  ;;  %v10055_v54 = vsel %vm13604_vm2, %v11572_v25, %v10054_v2  ;;  %v11556_v25 = vld [vmem:[%s13602_s15 + $0xc0] sm:$0xe] }
 0x64a   : > { %v10204_v51 = vmax.f32 %v10172_v46, 0.0  ;;  %v10173_v13 = vadd.f32 %v10141_v53, %v9869_v41  ;;  %v10075_v53 = vrot.slane %v11554_v16, 5  ;;  %v10146_v55 = vunpack.c.l.bf16 %v10055_v54 }
 0x64b   : > { %v10202_v26 = vmax.f32 %v10170_v15, 0.0  ;;  %v10171_v9 = vadd.f32 %v10139_v63, %v9867_v40  ;;  %v10058_v63 = vsel %vm13604_vm2, %v10056_v34, %v10057_v57  ;;  %v10149_v40 = vunpack.c.l.bf16 %v10065_v30  ;;  %v11558_v57 = vld [vmem:[%s13602_s15 + $0xc8] sm:$0x1] }
 0x64c   : > { %10236 = vst.msk [vmem:[%s16720_s11 + $0x70] sm:$0xff] %vm540_vm3, %v10204_v51  ;;  %v10205_v58 = vmax.f32 %v10173_v13, 0.0  ;;  %v10147_v13 = vunpack.c.l.bf16 %v10058_v63  ;;  %v10077_v35 = vrot.slane %v10075_v53, 4  ;;  %v10076_v2 = vsel %vm13604_vm2, %v11575_v21, %v10075_v53 }
 0x64d   : > { %10234 = vst.msk [vmem:[%s16720_s11 + $0x60] sm:$0xff] %vm540_vm3, %v10202_v26  ;;  %v10203_v43 = vmax.f32 %v10171_v9, 0.0  ;;  %v12682_v33 = vpop.f32.mrb[16].mxu1  ;;  %v11577_v34 = vrot.slane %v11559_v36, 9  ;;  %v11576_v22 = vrot.slane %v11556_v25, 9  ;;  %v10084_v53 = vrot.slane %v10082_v1, 4 }
 0x64e   : > { %10237 = vst.msk [vmem:[%s16720_s11 + $0x78] sm:$0xff] %vm540_vm3, %v10205_v58  ;;  %v9872_v27 = vadd.f32 %v12682_v33, %v16695_v11  ;;  %v9752_v28 = vpop.f32.mrb[17].mxu1  ;;  %v11560_v58 = vld [vmem:[%s13602_s15 + $0xd0] sm:$0xf]  ;;  %v10085_v31 = vrot.slane %v11558_v57, 5  ;;  %s11615_s15 = sshll.u32 %s13561_s22, 12 }
 0x64f   : > { %10235 = vst.msk [vmem:[%s16720_s11 + $0x68] sm:$0xff] %vm540_vm3, %v10203_v43  ;;  %v9870_v59 = vadd.f32 %v16695_v11, %v9752_v28  ;;  %v12683_v12 = vpop.f32.mrb[18].mxu1  ;;  %v10079_v28 = vsel %vm13604_vm2, %v10077_v35, %v10078_v29  ;;  %s16895_s16 = scalar_lea.hbm %s16953_s5, %s11615_s15  ;;  %s16907_s22 = scalar_lea.sflag [#allocation4], %s215_s7 }
 0x650   : > { %v10176_v62 = vadd.f32 %v10144_v52, %v9872_v27  ;;  %v9873_v38 = vadd.f32 %v12683_v12, %v16695_v11  ;;  %v9755_v44 = vpop.f32.mrb[19].mxu1  ;;  %v10152_v12 = vunpack.c.l.bf16 %v10076_v2 }
 0x651   : > { %v10174_v24 = vadd.f32 %v10142_v42, %v9870_v59  ;;  %v9871_v18 = vadd.f32 %v16695_v11, %v9755_v44  ;;  %v10069_v42 = vsel %vm13604_vm2, %v11574_v19, %v10068_v56 }
 0x652   : > { %v10208_v32 = vmax.f32 %v10176_v62, 0.0  ;;  %v10177_v48 = vadd.f32 %v10145_v60, %v9873_v38  ;;  %v10089_v60 = vrot.slane %v11560_v58, 5  ;;  %v10150_v44 = vunpack.c.l.bf16 %v10069_v42 }
 0x653   : > { %v10206_v50 = vmax.f32 %v10174_v24, 0.0  ;;  %v10175_v61 = vadd.f32 %v10143_v8, %v9871_v18  ;;  %v10072_v8 = vsel %vm13604_vm2, %v10070_v45, %v10071_v6  ;;  %v10153_v18 = vunpack.c.l.bf16 %v10079_v28 }
 0x654   : > { %10240 = vst.msk [vmem:[%s16720_s11 + $0x90] sm:$0xff] %vm540_vm3, %v10208_v32  ;;  %v10209_v10 = vmax.f32 %v10177_v48, 0.0  ;;  %v10151_v48 = vunpack.c.l.bf16 %v10072_v8  ;;  %v10091_v54 = vrot.slane %v10089_v60, 4  ;;  %v10090_v63 = vsel %vm13604_vm2, %v11577_v34, %v10089_v60 }
 0x655   : > { %10238 = vst.msk [vmem:[%s16720_s11 + $0x80] sm:$0xff] %vm540_vm3, %v10206_v50  ;;  %v10207_v46 = vmax.f32 %v10175_v61, 0.0  ;;  %v12686_v41 = vpop.f32.mrb[20].mxu1 }
 0x656   : > { %10241 = vst.msk [vmem:[%s16720_s11 + $0x98] sm:$0xff] %vm540_vm3, %v10209_v10  ;;  %v9876_v47 = vadd.f32 %v12686_v41, %v16695_v11  ;;  %v9768_v15 = vpop.f32.mrb[21].mxu1  ;;  %v10093_v21 = vsel %vm13604_vm2, %v10091_v54, %v10092_v7 }
 0x657   : > { %10239 = vst.msk [vmem:[%s16720_s11 + $0x88] sm:$0xff] %vm540_vm3, %v10207_v46  ;;  %v9874_v49 = vadd.f32 %v16695_v11, %v9768_v15  ;;  %v12687_v51 = vpop.f32.mrb[22].mxu1  ;;  %v10083_v46 = vsel %vm13604_vm2, %v11576_v22, %v10082_v1  ;;  %v10086_v15 = vsel %vm13604_vm2, %v10084_v53, %v10085_v31  ;;  %v10157_v35 = vunpack.c.l.bf16 %v10093_v21 }
 0x658   : > { %v10180_v26 = vadd.f32 %v10148_v20, %v9876_v47  ;;  %v9877_v9 = vadd.f32 %v12687_v51, %v16695_v11  ;;  %v9771_v5 = vpop.f32.mrb[23].mxu1  ;;  %v10156_v47 = vunpack.c.l.bf16 %v10090_v63 }
 0x659   : > { %v10178_v52 = vadd.f32 %v10146_v55, %v9874_v49  ;;  %v9875_v23 = vadd.f32 %v16695_v11, %v9771_v5  ;;  %v10154_v49 = vunpack.c.l.bf16 %v10083_v46 }
 0x65a   : > { %v10212_v43 = vmax.f32 %v10180_v26, 0.0  ;;  %v10181_v33 = vadd.f32 %v10149_v40, %v9877_v9  ;;  %v10155_v26 = vunpack.c.l.bf16 %v10086_v15 }
 0x65b   : > { %v10210_v17 = vmax.f32 %v10178_v52, 0.0  ;;  %v10179_v27 = vadd.f32 %v10147_v13, %v9875_v23 }
 0x65c   : > { %10244 = vst.msk [vmem:[%s16720_s11 + $0xb0] sm:$0xff] %vm540_vm3, %v10212_v43  ;;  %v10213_v59 = vmax.f32 %v10181_v33, 0.0 }
 0x65d   : > { %10242 = vst.msk [vmem:[%s16720_s11 + $0xa0] sm:$0xff] %vm540_vm3, %v10210_v17  ;;  %v10211_v62 = vmax.f32 %v10179_v27, 0.0  ;;  %v12690_v38 = vpop.f32.mrb[24].mxu1 }
 0x65e   : > { %10245 = vst.msk [vmem:[%s16720_s11 + $0xb8] sm:$0xff] %vm540_vm3, %v10213_v59  ;;  %v9880_v16 = vadd.f32 %v12690_v38, %v16695_v11  ;;  %v9784_v24 = vpop.f32.mrb[25].mxu1 }
 0x65f   : > { %10243 = vst.msk [vmem:[%s16720_s11 + $0xa8] sm:$0xff] %vm540_vm3, %v10211_v62  ;;  %v9878_v14 = vadd.f32 %v16695_v11, %v9784_v24  ;;  %v12691_v32 = vpop.f32.mrb[26].mxu1 }
 0x660   : > { %v10184_v50 = vadd.f32 %v10152_v12, %v9880_v16  ;;  %v9881_v61 = vadd.f32 %v12691_v32, %v16695_v11  ;;  %v9787_v30 = vpop.f32.mrb[27].mxu1 }
 0x661   : > { %v10182_v10 = vadd.f32 %v10150_v44, %v9878_v14  ;;  %v9879_v20 = vadd.f32 %v16695_v11, %v9787_v30 }
 0x662   : > { %v10216_v56 = vmax.f32 %v10184_v50, 0.0  ;;  %v10185_v0 = vadd.f32 %v10153_v18, %v9881_v61 }
 0x663   : > { %v10214_v41 = vmax.f32 %v10182_v10, 0.0  ;;  %v10183_v55 = vadd.f32 %v10151_v48, %v9879_v20 }
 0x664   : > { %10248 = vst.msk [vmem:[%s16720_s11 + $0xd0] sm:$0xff] %vm540_vm3, %v10216_v56  ;;  %v10217_v4 = vmax.f32 %v10185_v0, 0.0 }
 0x665   : > { %10246 = vst.msk [vmem:[%s16720_s11 + $0xc0] sm:$0xff] %vm540_vm3, %v10214_v41  ;;  %v10215_v40 = vmax.f32 %v10183_v55, 0.0  ;;  %v12694_v19 = vpop.f32.mrb[28].mxu1 }
 0x666   : > { %10249 = vst.msk [vmem:[%s16720_s11 + $0xd8] sm:$0xff] %vm540_vm3, %v10217_v4  ;;  %v9884_v51 = vadd.f32 %v12694_v19, %v16695_v11  ;;  %v9800_v13 = vpop.f32.mrb[29].mxu1 }
 0x667   : > { %10247 = vst.msk [vmem:[%s16720_s11 + $0xc8] sm:$0xff] %vm540_vm3, %v10215_v40  ;;  %v9882_v29 = vadd.f32 %v16695_v11, %v9800_v13  ;;  %v12695_v3 = vpop.f32.mrb[30].mxu1 }
 0x668   : > { %v10188_v9 = vadd.f32 %v10156_v47, %v9884_v51  ;;  %v9885_v5 = vadd.f32 %v12695_v3, %v16695_v11  ;;  %v9803_v45 = vpop.f32.mrb[31].mxu1 }
 0x669   : > { %v10186_v6 = vadd.f32 %v10154_v49, %v9882_v29  ;;  %v9883_v58 = vadd.f32 %v16695_v11, %v9803_v45 }
 0x66a   : > { %v10220_v52 = vmax.f32 %v10188_v9, 0.0  ;;  %v10189_v23 = vadd.f32 %v10157_v35, %v9885_v5 }
 0x66b   : > { %v10218_v2 = vmax.f32 %v10186_v6, 0.0  ;;  %v10187_v39 = vadd.f32 %v10155_v26, %v9883_v58 }
 0x66c   : > { %10252 = vst.msk [vmem:[%s16720_s11 + $0xf0] sm:$0xff] %vm540_vm3, %v10220_v52  ;;  %v10221_v43 = vmax.f32 %v10189_v23, 0.0 }
 0x66d   : > { %10250 = vst.msk [vmem:[%s16720_s11 + $0xe0] sm:$0xff] %vm540_vm3, %v10218_v2  ;;  %v10219_v11 = vmax.f32 %v10187_v39, 0.0 }
 0x66e   : > { %10253 = vst.msk [vmem:[%s16720_s11 + $0xf8] sm:$0xff] %vm540_vm3, %v10221_v43 }
 0x66f   : > { %10251 = vst.msk [vmem:[%s16720_s11 + $0xe8] sm:$0xff] %vm540_vm3, %v10219_v11 }
 0x670   : > { %13455 = shalt.err (!%p13452_p3)
}
 0x671   : > { %s13456_s30 = scalar_lea.hbm %s16895_s16, 4096  ;;  %s13460_s8 = scalar_lea.hbm %s16953_s5, 8192 }
 0x672   : > { %p13457_p4 = scmp.ne.s32.totalorder %s16895_s16, %s13456_s30  ;;  %p13461_p9 = scmp.lt.u32.totalorder %s16895_s16, %s16953_s5 }
 0x673   : > { %p13462_p10 = scmp.lt.u32.totalorder %s13460_s8, %s13456_s30  ;;  %p13464_p12 = scmp.lt.u32.totalorder %s13456_s30, %s16895_s16 }
 0x674   : > { %p13458_p7 = pnand %p13457_p4, %p13578_p5 }
 0x675   : > { %p13463_p11 = por %p13462_p10, %p13461_p9 }
 0x676   : > { %p13459_p8 = pneg %p13458_p7 }
 0x677   : > { %p13465_p13 = por %p13464_p12, %p13463_p11 }
 0x679   : > { %p13466_p0 = pnand %p13465_p13, %p13459_p8 }
 0x67b   : > { %13469 = shalt.err (!%p13466_p0)
}
 0x67c   : > { %s13508_s11 = smov 128   ;;  %s13509_s15 = smov 8  }
 0x67d   : > { %13209 = dma.vmem_to_hbm [thread:$0]  (%p13578_p5), %s16897_s12, 4096, %s16895_s16, %s16907_s22, %s13508_s11, %s13508_s11, %s13509_s15  }
 0x67e PF: > { %p13215_p1 = scmp.ge.s32.totalorder %s13504_s21, 2  ;;  %s10283_s13 = sand.u32 1, %s13492_s18  }
 0x67f   : > { %s10284_s14 = scalar_lea.sflag [#allocation4], %s10283_s13 }
 0x680   : > { %p13212_p2 = pnand %p13215_p1, %p13582_p6 }
 0x682   : > { %13487 = dma.done.wait (!%p13212_p2), %s10284_s14, 4096  }
 0x683   : > { %13489 = vsyncadd (!%p13212_p2), %s10284_s14, 4294963200  ;;  %p15_p3 = scmp.ge.s32.totalorder %s13565_s24, 4   ;;  %s17222_s18 = smov %s13496_s19 }
 0x684   : > { %s17223_s19 = smov %s13500_s20  ;;  %s17224_s20 = smov %s13576_s27 }
 0x685   : > { %s17225_s21 = smov %s13565_s24  ;;  %17 = sbr.rel (!%p15_p3) target bundleno = 3 (0x3), region = 95 }
 0x68c   :  { %10289 = vsyncpa [#allocation4], 1 }
 0x68d   :  { %10291 = vsyncpa [#allocation4 + $0x1], 1 }

</bundles_post_ra>
